<compile_context>
chip_gen: v6e
topology: v6e:2x2x1
jax: 0.10.0
libtpu: 0.0.40
codegen_flags: <defaults>
</compile_context>

<pallas_src>
import functools

import jax
import jax.numpy as jnp
from jax.experimental import pallas as pl
from jax.experimental.pallas import tpu as pltpu


# ----------------------- bilinear x2 upsample as matmuls -----------------------
# Matches torch.nn.Upsample(scale_factor=2, mode='bilinear') (align_corners=False).

def _upsample_coords(out_size, in_size):
    i = jnp.arange(out_size, dtype=jnp.float32)
    src = (i + 0.5) * (in_size / out_size) - 0.5
    src = jnp.maximum(src, 0.0)                     # PyTorch clamps negative coords to 0
    i0 = jnp.clip(jnp.floor(src).astype(jnp.int32), 0, in_size - 1)
    i1 = jnp.minimum(i0 + 1, in_size - 1)
    lam = src - i0.astype(jnp.float32)
    return i0, i1, lam


def _upsample_matrix(out_size, in_size):
    """U (out_size, in_size) with out = U @ in  (1-D linear interpolation)."""
    i0, i1, lam = _upsample_coords(out_size, in_size)
    cols = jnp.arange(in_size)[None, :]
    U = ((cols == i0[:, None]).astype(jnp.float32) * (1.0 - lam[:, None])
         + (cols == i1[:, None]).astype(jnp.float32) * lam[:, None])
    return U


def _upsample_kernel(x_ref, uh_ref, mw_ref, o_ref):
    # x_ref : (H, W*C)    bf16 channel-folded input for one batch element
    # uh_ref: (2H, H)     bf16 row-interpolation matrix
    # mw_ref: (W*C, 2W*C) bf16 = kron(UW^T, I_C) column-interpolation matrix
    # o_ref : (2H, 2W*C)  bf16 channel-folded upsampled output
    xh = jnp.dot(uh_ref[...], x_ref[...], preferred_element_type=jnp.float32)
    xu = jnp.dot(xh.astype(jnp.bfloat16), mw_ref[...],
                 preferred_element_type=jnp.float32)
    o_ref[...] = xu.astype(o_ref.dtype)


def bilinear_upsample_x2(x_nhwc):
    """x2 bilinear upsample (align_corners=False). NHWC in -> NHWC (bf16) out."""
    N, H, W, C = x_nhwc.shape
    Ho, Wo = 2 * H, 2 * W
    x2d = x_nhwc.reshape(N, H, W * C).astype(jnp.bfloat16)
    uh = _upsample_matrix(Ho, H).astype(jnp.bfloat16)
    mw = jnp.kron(_upsample_matrix(Wo, W).T,
                  jnp.eye(C, dtype=jnp.float32)).astype(jnp.bfloat16)
    out = pl.pallas_call(
        _upsample_kernel,
        out_shape=jax.ShapeDtypeStruct((N, Ho, Wo * C), jnp.bfloat16),
        grid=(N,),
        in_specs=[
            pl.BlockSpec((pl.Squeezed(), H, W * C), lambda n: (n, 0, 0)),
            pl.BlockSpec((Ho, H), lambda n: (0, 0)),
            pl.BlockSpec((W * C, Wo * C), lambda n: (0, 0)),
        ],
        out_specs=pl.BlockSpec((pl.Squeezed(), Ho, Wo * C), lambda n: (n, 0, 0)),
        compiler_params=pltpu.CompilerParams(dimension_semantics=("parallel",)),
    )(x2d, uh, mw)
    return out.reshape(N, Ho, Wo, C)        # free metadata reshape in HBM


# --------------- fused concat + pad + conv1 + ReLU + conv2 + ReLU ---------------

def _fused_conv_kernel(xu_ref, y_ref, w1_ref, b1_ref, w2_ref, b2_ref, o_ref,
                       xpad, ypad, hpad, *, Ho, Wo, Cin, Cmid, Cout):
    # xu_ref: (Ho, Wo, Cin) bf16  upsampled x  (first  Cin channels of the concat)
    # y_ref : (Ho, Wo, Cin) bf16  skip input   (second Cin channels of the concat)
    # w1_ref: (18*Cin, Cmid) bf16 conv1 weights, im2col-packed: [x-tap rows ; y-tap rows]
    # b1_ref: (1, Cmid) f32;  w2_ref: (9*Cmid, Cout) bf16;  b2_ref: (1, Cout) f32
    # o_ref : (Cout, Ho*Wo) f32   lane-dense, channel-major (NCHW-flat) output
    # xpad / ypad / hpad: (Ho+2, Wo+2, C) bf16 VMEM scratch for zero-padded images.

    # Zero the padded scratches each step (cheap; keeps borders correct even when the
    # batch grid axis is sharded across TensorCores).
    xpad[...] = jnp.zeros_like(xpad)
    ypad[...] = jnp.zeros_like(ypad)
    hpad[...] = jnp.zeros_like(hpad)
    xpad[1:1 + Ho, 1:1 + Wo, :] = xu_ref[...].astype(xpad.dtype)
    ypad[1:1 + Ho, 1:1 + Wo, :] = y_ref[...].astype(ypad.dtype)

    def im2col(pad_ref, c):
        # (Ho*Wo, 9*c); column order (kh, kw, channel) matches row-major HWIO reshape.
        cols = []
        for kh in range(3):
            for kw in range(3):
                cols.append(pad_ref[kh:kh + Ho, kw:kw + Wo, :].reshape(Ho * Wo, c))
        return jnp.concatenate(cols, axis=-1)

    # conv1 + ReLU: the channel concat is implicit in the weight packing, so
    # cat + conv1 is ONE (Ho*Wo, 18*Cin) x (18*Cin, Cmid) matmul.
    patch1 = jnp.concatenate([im2col(xpad, Cin), im2col(ypad, Cin)], axis=-1)
    h = jnp.dot(patch1, w1_ref[...], preferred_element_type=jnp.float32)
    h = jnp.maximum(h + b1_ref[...], 0.0)                       # (Ho*Wo, Cmid) f32
    hpad[1:1 + Ho, 1:1 + Wo, :] = h.reshape(Ho, Wo, Cmid).astype(hpad.dtype)

    # conv2 + ReLU (single im2col matmul), then lane-dense transposed store.
    o = jnp.dot(im2col(hpad, Cmid), w2_ref[...], preferred_element_type=jnp.float32)
    o = jnp.maximum(o + b2_ref[...], 0.0)                       # (Ho*Wo, Cout) f32
    o_ref[...] = o.T.astype(o_ref.dtype)                        # (Cout, Ho*Wo)


# ------------------------------- module wrapper -------------------------------

def init_params(key, in_channels, out_channels):
    """Synthetic init mirroring PyTorch Conv2d default U(-1/sqrt(fan_in), +...); HWIO layout."""
    k1, k2, k3, k4 = jax.random.split(key, 4)

    def conv_init(kw, kb, cin, cout):
        bound = 1.0 / float(jnp.sqrt(cin * 9.0))
        w = jax.random.uniform(kw, (3, 3, cin, cout), jnp.float32, -bound, bound)
        b = jax.random.uniform(kb, (cout,), jnp.float32, -bound, bound)
        return w, b

    w1, b1 = conv_init(k1, k2, 2 * in_channels, in_channels)    # conv1: 2*Cin -> Cin
    w2, b2 = conv_init(k3, k4, in_channels, out_channels)       # conv2: Cin -> Cout
    return (w1, b1, w2, b2)


def upsample_forward(params, x_nchw, y_nchw):
    """Inputs/outputs are NCHW to mirror the PyTorch module."""
    w1, b1, w2, b2 = params
    N, Cin, H, W = x_nchw.shape
    Ho, Wo = 2 * H, 2 * W
    Cmid = w1.shape[-1]
    Cout = w2.shape[-1]

    # --- Pallas kernel 1: bilinear x2 upsample (matmul form) ---
    x_nhwc = jnp.transpose(x_nchw, (0, 2, 3, 1))
    xu_nhwc = bilinear_upsample_x2(x_nhwc)                      # (N, Ho, Wo, Cin) bf16

    # --- Pallas kernel 2: concat + pad + conv1 + ReLU + conv2 + ReLU ---
    y_nhwc = jnp.transpose(y_nchw, (0, 2, 3, 1)).astype(jnp.bfloat16)
    w1x = w1[:, :, :Cin, :].reshape(9 * Cin, Cmid)              # x-channel taps
    w1y = w1[:, :, Cin:, :].reshape(9 * Cin, Cmid)              # y-channel taps
    w1p = jnp.concatenate([w1x, w1y], axis=0).astype(jnp.bfloat16)   # (18*Cin, Cmid)
    w2p = w2.reshape(9 * Cmid, Cout).astype(jnp.bfloat16)
    b1r = b1.reshape(1, Cmid).astype(jnp.float32)
    b2r = b2.reshape(1, Cout).astype(jnp.float32)

    kernel = functools.partial(_fused_conv_kernel, Ho=Ho, Wo=Wo,
                               Cin=Cin, Cmid=Cmid, Cout=Cout)
    out = pl.pallas_call(
        kernel,
        out_shape=jax.ShapeDtypeStruct((N, Cout, Ho * Wo), jnp.float32),
        grid=(N,),
        in_specs=[
            pl.BlockSpec((pl.Squeezed(), Ho, Wo, Cin), lambda n: (n, 0, 0, 0)),
            pl.BlockSpec((pl.Squeezed(), Ho, Wo, Cin), lambda n: (n, 0, 0, 0)),
            pl.BlockSpec((18 * Cin, Cmid), lambda n: (0, 0)),
            pl.BlockSpec((1, Cmid), lambda n: (0, 0)),
            pl.BlockSpec((9 * Cmid, Cout), lambda n: (0, 0)),
            pl.BlockSpec((1, Cout), lambda n: (0, 0)),
        ],
        out_specs=pl.BlockSpec((pl.Squeezed(), Cout, Ho * Wo), lambda n: (n, 0, 0)),
        scratch_shapes=[
            pltpu.VMEM((Ho + 2, Wo + 2, Cin), jnp.bfloat16),
            pltpu.VMEM((Ho + 2, Wo + 2, Cin), jnp.bfloat16),
            pltpu.VMEM((Ho + 2, Wo + 2, Cmid), jnp.bfloat16),
        ],
        compiler_params=pltpu.CompilerParams(dimension_semantics=("parallel",)),
    )(xu_nhwc, y_nhwc, w1p, b1r, w2p, b2r)

    # (N, Cout, Ho*Wo) is already channel-major: free reshape gives NCHW.
    return out.reshape(N, Cout, Ho, Wo)


if __name__ == "__main__":
    key = jax.random.PRNGKey(0)
    kx, ky, kp = jax.random.split(key, 3)

    N, Cin, Cout = 2, 4, 8
    H = W = 8  # x is pre-upsample; y is at the upsampled resolution (2H, 2W)

    x = jax.random.normal(kx, (N, Cin, H, W), jnp.float32)
    y = jax.random.normal(ky, (N, Cin, 2 * H, 2 * W), jnp.float32)
    params = init_params(kp, Cin, Cout)

    out = jax.jit(upsample_forward)(params, x, y)
    jax.block_until_ready(out)
    assert out.shape == (N, Cout, 2 * H, 2 * W), out.shape
    assert bool(jnp.all(out >= 0.0))  # ReLU output
    print("KERNEL_OK")
</pallas_src>

<mosaic_0001>
module attributes {stable_mosaic.version = 11 : i64} {
  func.func @_upsample_kernel(%arg0: i32, %arg1: memref<1x8x32xbf16, #tpu.memory_space<vmem>>, %arg2: memref<16x8xbf16, #tpu.memory_space<vmem>>, %arg3: memref<32x64xbf16, #tpu.memory_space<vmem>>, %arg4: memref<1x16x64xbf16, #tpu.memory_space<vmem>>) attributes {dimension_semantics = [#tpu.dimension_semantics<parallel>], iteration_bounds = array<i64: 2>, scalar_prefetch = 0 : i64, scratch_operands = 0 : i64, tpu.core_type = #tpu.core_type<tc>, window_params = [{transform_indices = @transform_0, window_bounds = array<i64: 1, 8, 32>}, {pipeline_mode = #tpu.pipeline_mode<synchronous>, transform_indices = @transform_1, window_bounds = array<i64: 16, 8>}, {pipeline_mode = #tpu.pipeline_mode<synchronous>, transform_indices = @transform_2, window_bounds = array<i64: 32, 64>}, {transform_indices = @transform_3, window_bounds = array<i64: 1, 16, 64>}]} {
    %c0 = arith.constant 0 : index
    %c0_0 = arith.constant 0 : index
    %0 = vector.load %arg2[%c0, %c0_0] : memref<16x8xbf16, #tpu.memory_space<vmem>>, vector<16x8xbf16>
    %c0_1 = arith.constant 0 : index
    %c0_2 = arith.constant 0 : index
    %c0_3 = arith.constant 0 : index
    %1 = vector.load %arg1[%c0_1, %c0_2, %c0_3] : memref<1x8x32xbf16, #tpu.memory_space<vmem>>, vector<1x8x32xbf16>
    %2 = vector.shape_cast %1 : vector<1x8x32xbf16> to vector<8x32xbf16>
    %cst = arith.constant dense<0.000000e+00> : vector<16x32xf32>
    %3 = tpu.matmul %0, %2, %cst {dimension_numbers = #tpu.dot_dimension_numbers<[1], [0], [0], [1], [0, 0, 1, 1], [], []>} : vector<16x8xbf16>, vector<8x32xbf16>, vector<16x32xf32> -> vector<16x32xf32>
    %4 = arith.truncf %3 : vector<16x32xf32> to vector<16x32xbf16>
    %c0_4 = arith.constant 0 : index
    %c0_5 = arith.constant 0 : index
    %5 = vector.load %arg3[%c0_4, %c0_5] : memref<32x64xbf16, #tpu.memory_space<vmem>>, vector<32x64xbf16>
    %cst_6 = arith.constant dense<0.000000e+00> : vector<16x64xf32>
    %6 = tpu.matmul %4, %5, %cst_6 {dimension_numbers = #tpu.dot_dimension_numbers<[1], [0], [0], [1], [0, 0, 1, 1], [], []>} : vector<16x32xbf16>, vector<32x64xbf16>, vector<16x64xf32> -> vector<16x64xf32>
    %7 = arith.truncf %6 : vector<16x64xf32> to vector<16x64xbf16>
    %c0_7 = arith.constant 0 : index
    %c0_8 = arith.constant 0 : index
    %c0_9 = arith.constant 0 : index
    %8 = vector.load %arg4[%c0_7, %c0_8, %c0_9] : memref<1x16x64xbf16, #tpu.memory_space<vmem>>, vector<1x16x64xbf16>
    %9 = vector.shape_cast %8 : vector<1x16x64xbf16> to vector<16x64xbf16>
    %10 = vector.shape_cast %7 : vector<16x64xbf16> to vector<1x16x64xbf16>
    tpu.vector_store %arg4[%c0_7, %c0_8, %c0_9], %10 {strides = array<i32>} : memref<1x16x64xbf16, #tpu.memory_space<vmem>>, vector<1x16x64xbf16>,
    return
  }
  func.func @transform_0(%arg0: i32) -> (i32, i32, i32) {
    %c0_i32 = arith.constant 0 : i32
    %c0_i32_0 = arith.constant 0 : i32
    %c0_i32_1 = arith.constant 0 : i32
    return %arg0, %c0_i32, %c0_i32_0 : i32, i32, i32
  }
  func.func @transform_1(%arg0: i32) -> (i32, i32) {
    %c0_i32 = arith.constant 0 : i32
    %c0_i32_0 = arith.constant 0 : i32
    %c0_i32_1 = arith.constant 0 : i32
    return %c0_i32, %c0_i32_0 : i32, i32
  }
  func.func @transform_2(%arg0: i32) -> (i32, i32) {
    %c0_i32 = arith.constant 0 : i32
    %c0_i32_0 = arith.constant 0 : i32
    %c0_i32_1 = arith.constant 0 : i32
    return %c0_i32, %c0_i32_0 : i32, i32
  }
  func.func @transform_3(%arg0: i32) -> (i32, i32, i32) {
    %c0_i32 = arith.constant 0 : i32
    %c0_i32_0 = arith.constant 0 : i32
    %c0_i32_1 = arith.constant 0 : i32
    return %arg0, %c0_i32, %c0_i32_0 : i32, i32, i32
  }
}

module attributes {stable_mosaic.version = 11 : i64} {
  func.func @_fused_conv_kernel(%arg0: i32, %arg1: memref<1x16x16x4xbf16, #tpu.memory_space<vmem>>, %arg2: memref<1x16x16x4xbf16, #tpu.memory_space<vmem>>, %arg3: memref<72x4xbf16, #tpu.memory_space<vmem>>, %arg4: memref<1x4xf32, #tpu.memory_space<vmem>>, %arg5: memref<36x8xbf16, #tpu.memory_space<vmem>>, %arg6: memref<1x8xf32, #tpu.memory_space<vmem>>, %arg7: memref<1x8x256xf32, #tpu.memory_space<vmem>>, %arg8: memref<18x18x4xbf16, #tpu.memory_space<vmem>>, %arg9: memref<18x18x4xbf16, #tpu.memory_space<vmem>>, %arg10: memref<18x18x4xbf16, #tpu.memory_space<vmem>>) attributes {dimension_semantics = [#tpu.dimension_semantics<parallel>], iteration_bounds = array<i64: 2>, scalar_prefetch = 0 : i64, scratch_operands = 3 : i64, tpu.core_type = #tpu.core_type<tc>, window_params = [{transform_indices = @transform_0, window_bounds = array<i64: 1, 16, 16, 4>}, {transform_indices = @transform_1, window_bounds = array<i64: 1, 16, 16, 4>}, {pipeline_mode = #tpu.pipeline_mode<synchronous>, transform_indices = @transform_2, window_bounds = array<i64: 72, 4>}, {pipeline_mode = #tpu.pipeline_mode<synchronous>, transform_indices = @transform_3, window_bounds = array<i64: 1, 4>}, {pipeline_mode = #tpu.pipeline_mode<synchronous>, transform_indices = @transform_4, window_bounds = array<i64: 36, 8>}, {pipeline_mode = #tpu.pipeline_mode<synchronous>, transform_indices = @transform_5, window_bounds = array<i64: 1, 8>}, {transform_indices = @transform_6, window_bounds = array<i64: 1, 8, 256>}]} {
    %cst = arith.constant 0.000000e+00 : bf16
    %0 = vector.broadcast %cst : bf16 to vector<18x18x4xbf16>
    %c0 = arith.constant 0 : index
    %c0_0 = arith.constant 0 : index
    %c0_1 = arith.constant 0 : index
    %1 = vector.load %arg8[%c0, %c0_0, %c0_1] : memref<18x18x4xbf16, #tpu.memory_space<vmem>>, vector<18x18x4xbf16>
    tpu.vector_store %arg8[%c0, %c0_0, %c0_1], %0 {strides = array<i32>} : memref<18x18x4xbf16, #tpu.memory_space<vmem>>, vector<18x18x4xbf16>,
    %cst_2 = arith.constant 0.000000e+00 : bf16
    %2 = vector.broadcast %cst_2 : bf16 to vector<18x18x4xbf16>
    %c0_3 = arith.constant 0 : index
    %c0_4 = arith.constant 0 : index
    %c0_5 = arith.constant 0 : index
    %3 = vector.load %arg9[%c0_3, %c0_4, %c0_5] : memref<18x18x4xbf16, #tpu.memory_space<vmem>>, vector<18x18x4xbf16>
    tpu.vector_store %arg9[%c0_3, %c0_4, %c0_5], %2 {strides = array<i32>} : memref<18x18x4xbf16, #tpu.memory_space<vmem>>, vector<18x18x4xbf16>,
    %cst_6 = arith.constant 0.000000e+00 : bf16
    %4 = vector.broadcast %cst_6 : bf16 to vector<18x18x4xbf16>
    %c0_7 = arith.constant 0 : index
    %c0_8 = arith.constant 0 : index
    %c0_9 = arith.constant 0 : index
    %5 = vector.load %arg10[%c0_7, %c0_8, %c0_9] : memref<18x18x4xbf16, #tpu.memory_space<vmem>>, vector<18x18x4xbf16>
    tpu.vector_store %arg10[%c0_7, %c0_8, %c0_9], %4 {strides = array<i32>} : memref<18x18x4xbf16, #tpu.memory_space<vmem>>, vector<18x18x4xbf16>,
    %c0_10 = arith.constant 0 : index
    %c0_11 = arith.constant 0 : index
    %c0_12 = arith.constant 0 : index
    %c0_13 = arith.constant 0 : index
    %6 = vector.load %arg1[%c0_10, %c0_11, %c0_12, %c0_13] : memref<1x16x16x4xbf16, #tpu.memory_space<vmem>>, vector<1x16x16x4xbf16>
    %7 = vector.shape_cast %6 : vector<1x16x16x4xbf16> to vector<16x16x4xbf16>
    %c1 = arith.constant 1 : index
    %c1_14 = arith.constant 1 : index
    %c0_15 = arith.constant 0 : index
    %8 = vector.load %arg8[%c1, %c1_14, %c0_15] : memref<18x18x4xbf16, #tpu.memory_space<vmem>>, vector<16x16x4xbf16>
    tpu.vector_store %arg8[%c1, %c1_14, %c0_15], %7 {strides = array<i32>} : memref<18x18x4xbf16, #tpu.memory_space<vmem>>, vector<16x16x4xbf16>,
    %c0_16 = arith.constant 0 : index
    %c0_17 = arith.constant 0 : index
    %c0_18 = arith.constant 0 : index
    %c0_19 = arith.constant 0 : index
    %9 = vector.load %arg2[%c0_16, %c0_17, %c0_18, %c0_19] : memref<1x16x16x4xbf16, #tpu.memory_space<vmem>>, vector<1x16x16x4xbf16>
    %10 = vector.shape_cast %9 : vector<1x16x16x4xbf16> to vector<16x16x4xbf16>
    %c1_20 = arith.constant 1 : index
    %c1_21 = arith.constant 1 : index
    %c0_22 = arith.constant 0 : index
    %11 = vector.load %arg9[%c1_20, %c1_21, %c0_22] : memref<18x18x4xbf16, #tpu.memory_space<vmem>>, vector<16x16x4xbf16>
    tpu.vector_store %arg9[%c1_20, %c1_21, %c0_22], %10 {strides = array<i32>} : memref<18x18x4xbf16, #tpu.memory_space<vmem>>, vector<16x16x4xbf16>,
    %c0_23 = arith.constant 0 : index
    %c0_24 = arith.constant 0 : index
    %c0_25 = arith.constant 0 : index
    %12 = vector.load %arg8[%c0_23, %c0_24, %c0_25] : memref<18x18x4xbf16, #tpu.memory_space<vmem>>, vector<16x16x4xbf16>
    %13 = vector.shape_cast %12 : vector<16x16x4xbf16> to vector<256x4xbf16>
    %c0_26 = arith.constant 0 : index
    %c1_27 = arith.constant 1 : index
    %c0_28 = arith.constant 0 : index
    %14 = vector.load %arg8[%c0_26, %c1_27, %c0_28] : memref<18x18x4xbf16, #tpu.memory_space<vmem>>, vector<16x16x4xbf16>
    %15 = vector.shape_cast %14 : vector<16x16x4xbf16> to vector<256x4xbf16>
    %c0_29 = arith.constant 0 : index
    %c2 = arith.constant 2 : index
    %c0_30 = arith.constant 0 : index
    %16 = vector.load %arg8[%c0_29, %c2, %c0_30] : memref<18x18x4xbf16, #tpu.memory_space<vmem>>, vector<16x16x4xbf16>
    %17 = vector.shape_cast %16 : vector<16x16x4xbf16> to vector<256x4xbf16>
    %c1_31 = arith.constant 1 : index
    %c0_32 = arith.constant 0 : index
    %c0_33 = arith.constant 0 : index
    %18 = vector.load %arg8[%c1_31, %c0_32, %c0_33] : memref<18x18x4xbf16, #tpu.memory_space<vmem>>, vector<16x16x4xbf16>
    %19 = vector.shape_cast %18 : vector<16x16x4xbf16> to vector<256x4xbf16>
    %c1_34 = arith.constant 1 : index
    %c1_35 = arith.constant 1 : index
    %c0_36 = arith.constant 0 : index
    %20 = vector.load %arg8[%c1_34, %c1_35, %c0_36] : memref<18x18x4xbf16, #tpu.memory_space<vmem>>, vector<16x16x4xbf16>
    %21 = vector.shape_cast %20 : vector<16x16x4xbf16> to vector<256x4xbf16>
    %c1_37 = arith.constant 1 : index
    %c2_38 = arith.constant 2 : index
    %c0_39 = arith.constant 0 : index
    %22 = vector.load %arg8[%c1_37, %c2_38, %c0_39] : memref<18x18x4xbf16, #tpu.memory_space<vmem>>, vector<16x16x4xbf16>
    %23 = vector.shape_cast %22 : vector<16x16x4xbf16> to vector<256x4xbf16>
    %c2_40 = arith.constant 2 : index
    %c0_41 = arith.constant 0 : index
    %c0_42 = arith.constant 0 : index
    %24 = vector.load %arg8[%c2_40, %c0_41, %c0_42] : memref<18x18x4xbf16, #tpu.memory_space<vmem>>, vector<16x16x4xbf16>
    %25 = vector.shape_cast %24 : vector<16x16x4xbf16> to vector<256x4xbf16>
    %c2_43 = arith.constant 2 : index
    %c1_44 = arith.constant 1 : index
    %c0_45 = arith.constant 0 : index
    %26 = vector.load %arg8[%c2_43, %c1_44, %c0_45] : memref<18x18x4xbf16, #tpu.memory_space<vmem>>, vector<16x16x4xbf16>
    %27 = vector.shape_cast %26 : vector<16x16x4xbf16> to vector<256x4xbf16>
    %c2_46 = arith.constant 2 : index
    %c2_47 = arith.constant 2 : index
    %c0_48 = arith.constant 0 : index
    %28 = vector.load %arg8[%c2_46, %c2_47, %c0_48] : memref<18x18x4xbf16, #tpu.memory_space<vmem>>, vector<16x16x4xbf16>
    %29 = vector.shape_cast %28 : vector<16x16x4xbf16> to vector<256x4xbf16>
    %30 = tpu.concatenate %13, %15, %17, %19, %21, %23, %25, %27, %29 in 1 : vector<256x4xbf16>, vector<256x4xbf16>, vector<256x4xbf16>, vector<256x4xbf16>, vector<256x4xbf16>, vector<256x4xbf16>, vector<256x4xbf16>, vector<256x4xbf16>, vector<256x4xbf16> -> vector<256x36xbf16>
    %c0_49 = arith.constant 0 : index
    %c0_50 = arith.constant 0 : index
    %c0_51 = arith.constant 0 : index
    %31 = vector.load %arg9[%c0_49, %c0_50, %c0_51] : memref<18x18x4xbf16, #tpu.memory_space<vmem>>, vector<16x16x4xbf16>
    %32 = vector.shape_cast %31 : vector<16x16x4xbf16> to vector<256x4xbf16>
    %c0_52 = arith.constant 0 : index
    %c1_53 = arith.constant 1 : index
    %c0_54 = arith.constant 0 : index
    %33 = vector.load %arg9[%c0_52, %c1_53, %c0_54] : memref<18x18x4xbf16, #tpu.memory_space<vmem>>, vector<16x16x4xbf16>
    %34 = vector.shape_cast %33 : vector<16x16x4xbf16> to vector<256x4xbf16>
    %c0_55 = arith.constant 0 : index
    %c2_56 = arith.constant 2 : index
    %c0_57 = arith.constant 0 : index
    %35 = vector.load %arg9[%c0_55, %c2_56, %c0_57] : memref<18x18x4xbf16, #tpu.memory_space<vmem>>, vector<16x16x4xbf16>
    %36 = vector.shape_cast %35 : vector<16x16x4xbf16> to vector<256x4xbf16>
    %c1_58 = arith.constant 1 : index
    %c0_59 = arith.constant 0 : index
    %c0_60 = arith.constant 0 : index
    %37 = vector.load %arg9[%c1_58, %c0_59, %c0_60] : memref<18x18x4xbf16, #tpu.memory_space<vmem>>, vector<16x16x4xbf16>
    %38 = vector.shape_cast %37 : vector<16x16x4xbf16> to vector<256x4xbf16>
    %c1_61 = arith.constant 1 : index
    %c1_62 = arith.constant 1 : index
    %c0_63 = arith.constant 0 : index
    %39 = vector.load %arg9[%c1_61, %c1_62, %c0_63] : memref<18x18x4xbf16, #tpu.memory_space<vmem>>, vector<16x16x4xbf16>
    %40 = vector.shape_cast %39 : vector<16x16x4xbf16> to vector<256x4xbf16>
    %c1_64 = arith.constant 1 : index
    %c2_65 = arith.constant 2 : index
    %c0_66 = arith.constant 0 : index
    %41 = vector.load %arg9[%c1_64, %c2_65, %c0_66] : memref<18x18x4xbf16, #tpu.memory_space<vmem>>, vector<16x16x4xbf16>
    %42 = vector.shape_cast %41 : vector<16x16x4xbf16> to vector<256x4xbf16>
    %c2_67 = arith.constant 2 : index
    %c0_68 = arith.constant 0 : index
    %c0_69 = arith.constant 0 : index
    %43 = vector.load %arg9[%c2_67, %c0_68, %c0_69] : memref<18x18x4xbf16, #tpu.memory_space<vmem>>, vector<16x16x4xbf16>
    %44 = vector.shape_cast %43 : vector<16x16x4xbf16> to vector<256x4xbf16>
    %c2_70 = arith.constant 2 : index
    %c1_71 = arith.constant 1 : index
    %c0_72 = arith.constant 0 : index
    %45 = vector.load %arg9[%c2_70, %c1_71, %c0_72] : memref<18x18x4xbf16, #tpu.memory_space<vmem>>, vector<16x16x4xbf16>
    %46 = vector.shape_cast %45 : vector<16x16x4xbf16> to vector<256x4xbf16>
    %c2_73 = arith.constant 2 : index
    %c2_74 = arith.constant 2 : index
    %c0_75 = arith.constant 0 : index
    %47 = vector.load %arg9[%c2_73, %c2_74, %c0_75] : memref<18x18x4xbf16, #tpu.memory_space<vmem>>, vector<16x16x4xbf16>
    %48 = vector.shape_cast %47 : vector<16x16x4xbf16> to vector<256x4xbf16>
    %49 = tpu.concatenate %32, %34, %36, %38, %40, %42, %44, %46, %48 in 1 : vector<256x4xbf16>, vector<256x4xbf16>, vector<256x4xbf16>, vector<256x4xbf16>, vector<256x4xbf16>, vector<256x4xbf16>, vector<256x4xbf16>, vector<256x4xbf16>, vector<256x4xbf16> -> vector<256x36xbf16>
    %50 = tpu.concatenate %30, %49 in 1 : vector<256x36xbf16>, vector<256x36xbf16> -> vector<256x72xbf16>
    %c0_76 = arith.constant 0 : index
    %c0_77 = arith.constant 0 : index
    %51 = vector.load %arg3[%c0_76, %c0_77] : memref<72x4xbf16, #tpu.memory_space<vmem>>, vector<72x4xbf16>
    %cst_78 = arith.constant dense<0.000000e+00> : vector<256x4xf32>
    %52 = tpu.matmul %50, %51, %cst_78 {dimension_numbers = #tpu.dot_dimension_numbers<[1], [0], [0], [1], [0, 0, 1, 1], [], []>} : vector<256x72xbf16>, vector<72x4xbf16>, vector<256x4xf32> -> vector<256x4xf32>
    %c0_79 = arith.constant 0 : index
    %c0_80 = arith.constant 0 : index
    %53 = vector.load %arg4[%c0_79, %c0_80] : memref<1x4xf32, #tpu.memory_space<vmem>>, vector<1x4xf32>
    %54 = vector.broadcast %53 : vector<1x4xf32> to vector<256x4xf32>
    %55 = arith.addf %52, %54 : vector<256x4xf32>
    %cst_81 = arith.constant 0.000000e+00 : f32
    %56 = vector.broadcast %cst_81 : f32 to vector<256x4xf32>
    %57 = arith.maximumf %55, %56 : vector<256x4xf32>
    %58 = vector.shape_cast %57 : vector<256x4xf32> to vector<16x16x4xf32>
    %59 = arith.truncf %58 : vector<16x16x4xf32> to vector<16x16x4xbf16>
    %c1_82 = arith.constant 1 : index
    %c1_83 = arith.constant 1 : index
    %c0_84 = arith.constant 0 : index
    %60 = vector.load %arg10[%c1_82, %c1_83, %c0_84] : memref<18x18x4xbf16, #tpu.memory_space<vmem>>, vector<16x16x4xbf16>
    tpu.vector_store %arg10[%c1_82, %c1_83, %c0_84], %59 {strides = array<i32>} : memref<18x18x4xbf16, #tpu.memory_space<vmem>>, vector<16x16x4xbf16>,
    %c0_85 = arith.constant 0 : index
    %c0_86 = arith.constant 0 : index
    %c0_87 = arith.constant 0 : index
    %61 = vector.load %arg10[%c0_85, %c0_86, %c0_87] : memref<18x18x4xbf16, #tpu.memory_space<vmem>>, vector<16x16x4xbf16>
    %62 = vector.shape_cast %61 : vector<16x16x4xbf16> to vector<256x4xbf16>
    %c0_88 = arith.constant 0 : index
    %c1_89 = arith.constant 1 : index
    %c0_90 = arith.constant 0 : index
    %63 = vector.load %arg10[%c0_88, %c1_89, %c0_90] : memref<18x18x4xbf16, #tpu.memory_space<vmem>>, vector<16x16x4xbf16>
    %64 = vector.shape_cast %63 : vector<16x16x4xbf16> to vector<256x4xbf16>
    %c0_91 = arith.constant 0 : index
    %c2_92 = arith.constant 2 : index
    %c0_93 = arith.constant 0 : index
    %65 = vector.load %arg10[%c0_91, %c2_92, %c0_93] : memref<18x18x4xbf16, #tpu.memory_space<vmem>>, vector<16x16x4xbf16>
    %66 = vector.shape_cast %65 : vector<16x16x4xbf16> to vector<256x4xbf16>
    %c1_94 = arith.constant 1 : index
    %c0_95 = arith.constant 0 : index
    %c0_96 = arith.constant 0 : index
    %67 = vector.load %arg10[%c1_94, %c0_95, %c0_96] : memref<18x18x4xbf16, #tpu.memory_space<vmem>>, vector<16x16x4xbf16>
    %68 = vector.shape_cast %67 : vector<16x16x4xbf16> to vector<256x4xbf16>
    %c1_97 = arith.constant 1 : index
    %c1_98 = arith.constant 1 : index
    %c0_99 = arith.constant 0 : index
    %69 = vector.load %arg10[%c1_97, %c1_98, %c0_99] : memref<18x18x4xbf16, #tpu.memory_space<vmem>>, vector<16x16x4xbf16>
    %70 = vector.shape_cast %69 : vector<16x16x4xbf16> to vector<256x4xbf16>
    %c1_100 = arith.constant 1 : index
    %c2_101 = arith.constant 2 : index
    %c0_102 = arith.constant 0 : index
    %71 = vector.load %arg10[%c1_100, %c2_101, %c0_102] : memref<18x18x4xbf16, #tpu.memory_space<vmem>>, vector<16x16x4xbf16>
    %72 = vector.shape_cast %71 : vector<16x16x4xbf16> to vector<256x4xbf16>
    %c2_103 = arith.constant 2 : index
    %c0_104 = arith.constant 0 : index
    %c0_105 = arith.constant 0 : index
    %73 = vector.load %arg10[%c2_103, %c0_104, %c0_105] : memref<18x18x4xbf16, #tpu.memory_space<vmem>>, vector<16x16x4xbf16>
    %74 = vector.shape_cast %73 : vector<16x16x4xbf16> to vector<256x4xbf16>
    %c2_106 = arith.constant 2 : index
    %c1_107 = arith.constant 1 : index
    %c0_108 = arith.constant 0 : index
    %75 = vector.load %arg10[%c2_106, %c1_107, %c0_108] : memref<18x18x4xbf16, #tpu.memory_space<vmem>>, vector<16x16x4xbf16>
    %76 = vector.shape_cast %75 : vector<16x16x4xbf16> to vector<256x4xbf16>
    %c2_109 = arith.constant 2 : index
    %c2_110 = arith.constant 2 : index
    %c0_111 = arith.constant 0 : index
    %77 = vector.load %arg10[%c2_109, %c2_110, %c0_111] : memref<18x18x4xbf16, #tpu.memory_space<vmem>>, vector<16x16x4xbf16>
    %78 = vector.shape_cast %77 : vector<16x16x4xbf16> to vector<256x4xbf16>
    %79 = tpu.concatenate %62, %64, %66, %68, %70, %72, %74, %76, %78 in 1 : vector<256x4xbf16>, vector<256x4xbf16>, vector<256x4xbf16>, vector<256x4xbf16>, vector<256x4xbf16>, vector<256x4xbf16>, vector<256x4xbf16>, vector<256x4xbf16>, vector<256x4xbf16> -> vector<256x36xbf16>
    %c0_112 = arith.constant 0 : index
    %c0_113 = arith.constant 0 : index
    %80 = vector.load %arg5[%c0_112, %c0_113] : memref<36x8xbf16, #tpu.memory_space<vmem>>, vector<36x8xbf16>
    %cst_114 = arith.constant dense<0.000000e+00> : vector<256x8xf32>
    %81 = tpu.matmul %79, %80, %cst_114 {dimension_numbers = #tpu.dot_dimension_numbers<[1], [0], [0], [1], [0, 0, 1, 1], [], []>} : vector<256x36xbf16>, vector<36x8xbf16>, vector<256x8xf32> -> vector<256x8xf32>
    %c0_115 = arith.constant 0 : index
    %c0_116 = arith.constant 0 : index
    %82 = vector.load %arg6[%c0_115, %c0_116] : memref<1x8xf32, #tpu.memory_space<vmem>>, vector<1x8xf32>
    %83 = vector.broadcast %82 : vector<1x8xf32> to vector<256x8xf32>
    %84 = arith.addf %81, %83 : vector<256x8xf32>
    %cst_117 = arith.constant 0.000000e+00 : f32
    %85 = vector.broadcast %cst_117 : f32 to vector<256x8xf32>
    %86 = arith.maximumf %84, %85 : vector<256x8xf32>
    %87 = tpu.transpose %86, [1, 0] : vector<256x8xf32> -> vector<8x256xf32>
    %c0_118 = arith.constant 0 : index
    %c0_119 = arith.constant 0 : index
    %c0_120 = arith.constant 0 : index
    %88 = vector.load %arg7[%c0_118, %c0_119, %c0_120] : memref<1x8x256xf32, #tpu.memory_space<vmem>>, vector<1x8x256xf32>
    %89 = vector.shape_cast %88 : vector<1x8x256xf32> to vector<8x256xf32>
    %90 = vector.shape_cast %87 : vector<8x256xf32> to vector<1x8x256xf32>
    tpu.vector_store %arg7[%c0_118, %c0_119, %c0_120], %90 {strides = array<i32>} : memref<1x8x256xf32, #tpu.memory_space<vmem>>, vector<1x8x256xf32>,
    return
  }
  func.func @transform_0(%arg0: i32) -> (i32, i32, i32, i32) {
    %c0_i32 = arith.constant 0 : i32
    %c0_i32_0 = arith.constant 0 : i32
    %c0_i32_1 = arith.constant 0 : i32
    %c0_i32_2 = arith.constant 0 : i32
    return %arg0, %c0_i32, %c0_i32_0, %c0_i32_1 : i32, i32, i32, i32
  }
  func.func @transform_1(%arg0: i32) -> (i32, i32, i32, i32) {
    %c0_i32 = arith.constant 0 : i32
    %c0_i32_0 = arith.constant 0 : i32
    %c0_i32_1 = arith.constant 0 : i32
    %c0_i32_2 = arith.constant 0 : i32
    return %arg0, %c0_i32, %c0_i32_0, %c0_i32_1 : i32, i32, i32, i32
  }
  func.func @transform_2(%arg0: i32) -> (i32, i32) {
    %c0_i32 = arith.constant 0 : i32
    %c0_i32_0 = arith.constant 0 : i32
    %c0_i32_1 = arith.constant 0 : i32
    return %c0_i32, %c0_i32_0 : i32, i32
  }
  func.func @transform_3(%arg0: i32) -> (i32, i32) {
    %c0_i32 = arith.constant 0 : i32
    %c0_i32_0 = arith.constant 0 : i32
    %c0_i32_1 = arith.constant 0 : i32
    return %c0_i32, %c0_i32_0 : i32, i32
  }
  func.func @transform_4(%arg0: i32) -> (i32, i32) {
    %c0_i32 = arith.constant 0 : i32
    %c0_i32_0 = arith.constant 0 : i32
    %c0_i32_1 = arith.constant 0 : i32
    return %c0_i32, %c0_i32_0 : i32, i32
  }
  func.func @transform_5(%arg0: i32) -> (i32, i32) {
    %c0_i32 = arith.constant 0 : i32
    %c0_i32_0 = arith.constant 0 : i32
    %c0_i32_1 = arith.constant 0 : i32
    return %c0_i32, %c0_i32_0 : i32, i32
  }
  func.func @transform_6(%arg0: i32) -> (i32, i32, i32) {
    %c0_i32 = arith.constant 0 : i32
    %c0_i32_0 = arith.constant 0 : i32
    %c0_i32_1 = arith.constant 0 : i32
    return %arg0, %c0_i32, %c0_i32_0 : i32, i32, i32
  }
}

</mosaic_0001>

<bundles_post_ra>
// kernel: upsample_forward.2
= control target key start
LH: loop header
LB: loop body
LE: loop exit
PB: predicated region body
PF: predicated region fallthrough
CT: control target
= control target key end

     0   :  { %s436_s12 = smov 0   ;;  %s462_s0 = inlined_call_operand.vmem [shape: bf16[2,8,32], index: 0, kind: input, shape index: {}]   ;;  %s463_s1 = inlined_call_operand.vmem [shape: bf16[16,8], index: 1, kind: input, shape index: {}]   ;;  %s464_s2 = inlined_call_operand.vmem [shape: bf16[32,64], index: 2, kind: input, shape index: {}]   ;;  %s465_s3 = inlined_call_operand.vmem [shape: bf16[2,16,64], index: 3, kind: output, shape index: {}]  }
   0x1 LB: > { %s354_s13 = sadd.s32 4294967295, %s412_s12   ;;  %p358_p0 = scmp.ge.s32.totalorder %s412_s12, 1  ;;  %s412_s12 = sphi %s436_s12, %s13_s12  }
   0x2   : > { %p136_p1 = scmp.lt.s32.totalorder %s412_s12, 3 }
   0x4   : > { %p137_p2 = pnand %p358_p0, %p136_p1 }
   0x5   : > { %p159_p3 = scmp.lt.s32.totalorder (!%p137_p2), %s354_s13, 1 }
   0x6   : > { %140 = sbr.rel (%p137_p2) target bundleno = 418 (0x1a2), region = 32 }
   0xb   : > { %v414_v0 = vmov 0.0   ;;  %vm415_vm0 = vmmov 0   ;;  %s467_s13 = smov (!%p159_p3, %s354_s13), 1  ;;  %vm181_vm1 = vcmask 1043456   ;;  %v403_v3 = vld [vmem:[%s463_s1] sm:$0xff]   ;;  %vm177_vm2 = vcmask 64512  }
   0xc   : > { %379 = vmatprep.subr.bf16.mxu0 %v414_v0  ;;  %381 = vmatprep.mubr.msk.bf16.mxu0 %vm415_vm0, %v414_v0  ;;  %s359_s14 = sshll.u32 %s467_s13, 2  ;;  %v404_v4 = vld [vmem:[%s464_s2 + $0x8] sm:$0xff]   ;;  %v405_v5 = vld [vmem:[%s464_s2] sm:$0xff]   ;;  %vm243_vm3 = vcmask 261120   ;;  %s371_s24 = sshll.u32 %s467_s13, 3  ;;  %vm296_vm4 = vcmask 519168  }
   0xd   : > { %385 = vmatprep.subr.bf16.mxu1 %v414_v0  ;;  %389 = vmatprep.mubr.msk.bf16.mxu1 %vm415_vm0, %v414_v0  ;;  %s162_s17 = scalar_lea.vmem %s462_s0, %s359_s14  ;;  %s167_s27 = scalar_lea.vmem %s465_s3, %s371_s24 }
   0xe   : > { %v171_v1 = vld [vmem:[%s162_s17] sm:$0xf]  ;;  %386 = vmatpush3.bf16.msra.mxu1 %v404_v4 }
   0xf   : > { %v183_v2 = vsel %vm181_vm1, %v171_v1, 0  ;;  %387 = vmatprep.subr.bf16.mxu1 %v414_v0 }
  0x10   : > { %380 = vmatpush3.bf16.msra.mxu0 %v183_v2 }
  0x12   : > { %388 = vmatpush3.bf16.msra.mxu1 %v405_v5 }
  0x13   : > { %382 = vmatmul.mubr.msk.bf16.vlgmr.msra.gmra.mxu0 %vm177_vm2, %v403_v3 }
  0xd3   : > { %v219_v6 = vpop.f32.mrf.mxu0 }
  0xd5   : > { %v383_v7 = vpop.f32.mrf.mxu0 }
  0xd7   : > { %v222_v8 = vpop.f32.mrf.mxu0 }
  0xd8   : > { %v226_v9 = vpack.c.bf16 %v222_v8, %v219_v6 }
  0xd9   : > { %v384_v10 = vpop.f32.mrf.mxu0 }
  0xda   : > { %390 = vmatmul.mubr.msk.bf16.vlgmr.msra.gmra.mxu1 %vm243_vm3, %v226_v9 }
 0x19a   : > { %v281_v11 = vpop.f32.mrf.mxu1 }
 0x19b   : > { %v372_v12 = vpack.c.bf16 %v281_v11, %v281_v11 }
 0x19c   : > { %v391_v13 = vpop.f32.mrf.mxu1 }
 0x19d   : > { %297 = vst.msk [vmem:[%s167_s27] sm:$0xf] %vm296_vm4, %v372_v12 }
 0x19e   : > { %v284_v14 = vpop.f32.mrf.mxu1 }
 0x19f   : > { %v373_v15 = vpack.c.bf16 %v284_v14, %v284_v14 }
 0x1a0   : > { %v392_v16 = vpop.f32.mrf.mxu1 }
 0x1a1   : > { %298 = vst.msk [vmem:[%s167_s27 + $0x4] sm:$0xf] %vm296_vm4, %v373_v15 }
 0x1a2 PF: > { %s13_s12 = sadd.s32 1, %s412_s12  }
 0x1a3   : > { %p10_p4 = scmp.ge.s32.totalorder %s13_s12, 4  }
 0x1a5   :  { %12 = sbr.rel (!%p10_p4) target bundleno = 1 (0x1), region = 62 }

// kernel: upsample_forward.3
= control target key start
LH: loop header
LB: loop body
LE: loop exit
PB: predicated region body
PF: predicated region fallthrough
CT: control target
= control target key end

     0   :  { %s12260_s21 = smov 0   ;;  %s17727_s0 = inlined_call_operand.vmem [shape: bf16[2,16,16,4], index: 0, kind: input, shape index: {}]   ;;  %s17728_s1 = inlined_call_operand.vmem [shape: bf16[2,16,16,4], index: 1, kind: input, shape index: {}]   ;;  %s17729_s2 = inlined_call_operand.vmem [shape: bf16[72,4], index: 2, kind: input, shape index: {}]   ;;  %s17730_s3 = inlined_call_operand.vmem [shape: f32[1,4], index: 3, kind: input, shape index: {}]   ;;  %s17731_s4 = inlined_call_operand.vmem [shape: bf16[36,8], index: 4, kind: input, shape index: {}]   ;;  %s17732_s5 = inlined_call_operand.vmem [shape: f32[1,8], index: 5, kind: input, shape index: {}]   ;;  %s17733_s6 = inlined_call_operand.vmem [shape: f32[2,8,256], index: 6, kind: output, shape index: {}]  }
   0x1 LB: > { %s11160_s22 = sadd.s32 4294967295, %s12213_s21   ;;  %p11164_p0 = scmp.ge.s32.totalorder %s12213_s21, 1  ;;  %s12213_s21 = sphi %s12260_s21, %s16_s21  }
   0x2   : > { %p222_p1 = scmp.lt.s32.totalorder %s12213_s21, 3 }
   0x4   : > { %p223_p2 = pnand %p11164_p0, %p222_p1 }
   0x6   : > { %226 = sbr.rel (%p223_p2) target bundleno = 1862 (0x746), region = 44 }
   0xb   : > { %vm273_vm0 = vcmask 27648   ;;  %vm276_vm1 = vcmask 24576   ;;  %v12215_v0 = vmov 0   ;;  %p257_p3 = scmp.lt.s32.totalorder %s11160_s22, 1  ;;  %vm1874_vm2 = vcmask 1042432   ;;  %s12216_s27 = smov 8  }
   0xc   : > { %274 = vst.msk [vmem:[#allocation2] sm:$0xf] %vm273_vm0, %v12215_v0  ;;  %275 = vst.msk [vmem:[#allocation2 + $0x4] sm:$0xf] %vm273_vm0, %v12215_v0  ;;  %vm1423_vm3 = vsmask.f32 3328 }
   0xd   : > { %277 = vst.msk [vmem:[#allocation2 + $0x8] sm:$0x1] %vm276_vm1, %v12215_v0  ;;  %280 = vst.msk [vmem:[#allocation2 + $0x14] sm:$0x1] %vm276_vm1, %v12215_v0  ;;  %vm1875_vm4 = vcmask 1046532   ;;  %s18052_s22 = smov (!%p257_p3, %s11160_s22), 1 }
   0xe   : > { %278 = vst.msk [vmem:[#allocation2 + $0xc] sm:$0xf] %vm273_vm0, %v12215_v0  ;;  %279 = vst.msk [vmem:[#allocation2 + $0x10] sm:$0xf] %vm273_vm0, %v12215_v0  ;;  %vm1424_vm5 = vsmask.f32 7440 }
   0xf   : > { %281 = vst.msk [vmem:[#allocation2 + $0x18] sm:$0xf] %vm273_vm0, %v12215_v0  ;;  %282 = vst.msk [vmem:[#allocation2 + $0x1c] sm:$0xf] %vm273_vm0, %v12215_v0  ;;  %s11823_s23 = sshll.u32 %s18052_s22, 7  ;;  %v17753_v1 = vmov 0 }
  0x10   : > { %283 = vst.msk [vmem:[#allocation2 + $0x20] sm:$0x1] %vm276_vm1, %v12215_v0  ;;  %286 = vst.msk [vmem:[#allocation2 + $0x2c] sm:$0x1] %vm276_vm1, %v12215_v0  ;;  %s12604_s26 = scalar_lea.vmem %s17727_s0, %s11823_s23  ;;  %vm469_vm6 = vsmask.f32 256  ;;  %s13689_s10 = scalar_lea.vmem %s17728_s1, %s11823_s23 }
  0x11   : > { %284 = vst.msk [vmem:[#allocation2 + $0x24] sm:$0xf] %vm273_vm0, %v12215_v0  ;;  %285 = vst.msk [vmem:[#allocation2 + $0x28] sm:$0xf] %vm273_vm0, %v12215_v0  ;;  %v437_v2 = vld [vmem:[%s12604_s26] sm:$0xf] }
  0x12   : > { %287 = vst.msk [vmem:[#allocation2 + $0x30] sm:$0xf] %vm273_vm0, %v12215_v0  ;;  %288 = vst.msk [vmem:[#allocation2 + $0x34] sm:$0xf] %vm273_vm0, %v12215_v0  ;;  %vm470_vm8 = vsmask.f32 4368 }
  0x13   : > { %289 = vst.msk [vmem:[#allocation2 + $0x38] sm:$0x1] %vm276_vm1, %v12215_v0  ;;  %292 = vst.msk [vmem:[#allocation2 + $0x44] sm:$0x1] %vm276_vm1, %v12215_v0  ;;  %vm794_vm9 = vsmask.f32 7938 }
  0x14   : > { %290 = vst.msk [vmem:[#allocation2 + $0x3c] sm:$0xf] %vm273_vm0, %v12215_v0  ;;  %291 = vst.msk [vmem:[#allocation2 + $0x40] sm:$0xf] %vm273_vm0, %v12215_v0  ;;  %v1376_v3 = vld [vmem:[#allocation2 + $0x4] sm:$0xf] }
  0x15   : > { %293 = vst.msk [vmem:[#allocation2 + $0x48] sm:$0xf] %vm273_vm0, %v12215_v0  ;;  %294 = vst.msk [vmem:[#allocation2 + $0x4c] sm:$0xf] %vm273_vm0, %v12215_v0  ;;  %v1407_v4 = vld [vmem:[#allocation2 + $0x8] sm:$0x1] }
  0x16   : > { %295 = vst.msk [vmem:[#allocation2 + $0x50] sm:$0x1] %vm276_vm1, %v12215_v0  ;;  %298 = vst.msk [vmem:[#allocation2 + $0x5c] sm:$0x1] %vm276_vm1, %v12215_v0  ;;  %v1810_v5 = vld [vmem:[#allocation2] sm:$0xe] }
  0x17   : > { %296 = vst.msk [vmem:[#allocation2 + $0x54] sm:$0xf] %vm273_vm0, %v12215_v0  ;;  %297 = vst.msk [vmem:[#allocation2 + $0x58] sm:$0xf] %vm273_vm0, %v12215_v0  ;;  %v1446_v6 = vshll.u32 %v1407_v4, 16  ;;  %v11171_v7 = vrot.slane %v1810_v5, 9 }
  0x18   : > { %299 = vst.msk [vmem:[#allocation2 + $0x60] sm:$0xf] %vm273_vm0, %v12215_v0  ;;  %300 = vst.msk [vmem:[#allocation2 + $0x64] sm:$0xf] %vm273_vm0, %v12215_v0  ;;  %v1879_v8 = vrot.slane %v1376_v3, 5  ;;  %v1882_v9 = vrot.slane %v1407_v4, 5 }
  0x19   : > { %301 = vst.msk [vmem:[#allocation2 + $0x68] sm:$0x1] %vm276_vm1, %v12215_v0  ;;  %304 = vst.msk [vmem:[#allocation2 + $0x74] sm:$0x1] %vm276_vm1, %v12215_v0  ;;  %v1375_v10 = vld [vmem:[#allocation2] sm:$0xf] }
  0x1a   : > { %302 = vst.msk [vmem:[#allocation2 + $0x6c] sm:$0xf] %vm273_vm0, %v12215_v0  ;;  %303 = vst.msk [vmem:[#allocation2 + $0x70] sm:$0xf] %vm273_vm0, %v12215_v0  ;;  %v1427_v11 = vshrl.u32 %v1375_v10, 16  ;;  %v1430_v12 = vshll.u32 %v1375_v10, 16 }
  0x1b   : > { %305 = vst.msk [vmem:[#allocation2 + $0x78] sm:$0xf] %vm273_vm0, %v12215_v0  ;;  %306 = vst.msk [vmem:[#allocation2 + $0x7c] sm:$0xf] %vm273_vm0, %v12215_v0  ;;  %v1436_v13 = vshll.u32 %v1376_v3, 16  ;;  %v1440_v14 = vshrl.u32 %v1376_v3, 16 }
  0x1c   : > { %307 = vst.msk [vmem:[#allocation2 + $0x80] sm:$0x1] %vm276_vm1, %v12215_v0  ;;  %310 = vst.msk [vmem:[#allocation2 + $0x8c] sm:$0x1] %vm276_vm1, %v12215_v0  ;;  %v438_v15 = vld [vmem:[%s12604_s26 + $0x4] sm:$0xf] }
  0x1d   : > { %308 = vst.msk [vmem:[#allocation2 + $0x84] sm:$0xf] %vm273_vm0, %v12215_v0  ;;  %309 = vst.msk [vmem:[#allocation2 + $0x88] sm:$0xf] %vm273_vm0, %v12215_v0  ;;  %v1881_v17 = vrot.slane %v1879_v8, 4  ;;  %v1448_v18 = vrot.slane %v1446_v6, 5 }
  0x1e   : > { %311 = vst.msk [vmem:[#allocation2 + $0x90] sm:$0xf] %vm273_vm0, %v12215_v0  ;;  %312 = vst.msk [vmem:[#allocation2 + $0x94] sm:$0xf] %vm273_vm0, %v12215_v0  ;;  %v473_v19 = vshrl.u32 %v437_v2, 16  ;;  %v1429_v20 = vrot.slane %v1427_v11, 4 }
  0x1f   : > { %313 = vst.msk [vmem:[#allocation2 + $0x98] sm:$0x1] %vm276_vm1, %v12215_v0  ;;  %316 = vst.msk [vmem:[#allocation2 + $0xa4] sm:$0x1] %vm276_vm1, %v12215_v0  ;;  %v1432_v21 = vrot.slane %v1430_v12, 5  ;;  %v1438_v22 = vrot.slane %v1436_v13, 5 }
  0x20   : > { %314 = vst.msk [vmem:[#allocation2 + $0x9c] sm:$0xf] %vm273_vm0, %v12215_v0  ;;  %315 = vst.msk [vmem:[#allocation2 + $0xa0] sm:$0xf] %vm273_vm0, %v12215_v0  ;;  %v1442_v23 = vrot.slane %v1440_v14, 4  ;;  %v475_v27 = vrot.slane %v473_v19, 7 }
  0x21   : > { %317 = vst.msk [vmem:[#allocation2 + $0xa8] sm:$0xf] %vm273_vm0, %v12215_v0  ;;  %318 = vst.msk [vmem:[#allocation2 + $0xac] sm:$0xf] %vm273_vm0, %v12215_v0  ;;  %v439_v24 = vld [vmem:[%s12604_s26 + $0x8] sm:$0xf]  ;;  %v1433_v32 = vor.u32 %v1432_v21, %v1429_v20 }
  0x22   : > { %319 = vst.msk [vmem:[#allocation2 + $0xb0] sm:$0x1] %vm276_vm1, %v12215_v0  ;;  %322 = vst.msk [vmem:[#allocation2 + $0xbc] sm:$0x1] %vm276_vm1, %v12215_v0  ;;  %v476_v28 = vshll.u32 %v437_v2, 16  ;;  %v481_v29 = vshrl.u32 %v438_v15, 16  ;;  %v1443_v33 = vor.u32 %v1442_v23, %v1438_v22 }
  0x23   : > { %320 = vst.msk [vmem:[#allocation2 + $0xb4] sm:$0xf] %vm273_vm0, %v12215_v0  ;;  %321 = vst.msk [vmem:[#allocation2 + $0xb8] sm:$0xf] %vm273_vm0, %v12215_v0  ;;  %v440_v30 = vld [vmem:[%s12604_s26 + $0xc] sm:$0xf] }
  0x24   : > { %323 = vst.msk [vmem:[#allocation2 + $0xc0] sm:$0xf] %vm273_vm0, %v12215_v0  ;;  %324 = vst.msk [vmem:[#allocation2 + $0xc4] sm:$0xf] %vm273_vm0, %v12215_v0  ;;  %v484_v34 = vshll.u32 %v438_v15, 16  ;;  %v17758_v35 = vmov 0  ;;  %v478_v38 = vor.u32 %v476_v28, %v475_v27 }
  0x25   : > { %325 = vst.msk [vmem:[#allocation2 + $0xc8] sm:$0x1] %vm276_vm1, %v12215_v0  ;;  %328 = vst.msk [vmem:[#allocation2 + $0xd4] sm:$0x1] %vm276_vm1, %v12215_v0  ;;  %v796_v36 = vld [vmem:[#allocation2 + $0xc] sm:$0xf] }
  0x26   : > { %326 = vst.msk [vmem:[#allocation2 + $0xcc] sm:$0xf] %vm273_vm0, %v12215_v0  ;;  %327 = vst.msk [vmem:[#allocation2 + $0xd0] sm:$0xf] %vm273_vm0, %v12215_v0  ;;  %v17761_v37 = vmov 0  ;;  %v479_v39 = vrot.slane %v475_v27, 4 }
  0x27   : > { %329 = vst.msk [vmem:[#allocation3] sm:$0xf] %vm273_vm0, %v12215_v0  ;;  %330 = vst.msk [vmem:[#allocation3 + $0x4] sm:$0xf] %vm273_vm0, %v12215_v0  ;;  %v483_v40 = vrot.slane %v481_v29, 7  ;;  %v490_v41 = vshrl.u32 %v439_v24, 16 }
  0x28   : > { %331 = vst.msk [vmem:[#allocation3 + $0x8] sm:$0x1] %vm276_vm1, %v12215_v0  ;;  %334 = vst.msk [vmem:[#allocation3 + $0x14] sm:$0x1] %vm276_vm1, %v12215_v0  ;;  %v1434_v42 = vrot.slane %v1433_v32, 4  ;;  %v1444_v43 = vrot.slane %v1443_v33, 4 }
  0x29   : > { %332 = vst.msk [vmem:[#allocation3 + $0xc] sm:$0xf] %vm273_vm0, %v12215_v0  ;;  %333 = vst.msk [vmem:[#allocation3 + $0x10] sm:$0xf] %vm273_vm0, %v12215_v0  ;;  %v17764_v44 = vmov 0  ;;  %v493_v46 = vshll.u32 %v439_v24, 16  ;;  %v486_v48 = vor.u32 %v484_v34, %v483_v40 }
  0x2a   : > { %335 = vst.msk [vmem:[#allocation3 + $0x18] sm:$0xf] %vm273_vm0, %v12215_v0  ;;  %336 = vst.msk [vmem:[#allocation3 + $0x1c] sm:$0xf] %vm273_vm0, %v12215_v0  ;;  %v802_v45 = vld [vmem:[#allocation2 + $0x14] sm:$0x1] }
  0x2b   : > { %337 = vst.msk [vmem:[#allocation3 + $0x20] sm:$0x1] %vm276_vm1, %v12215_v0  ;;  %340 = vst.msk [vmem:[#allocation3 + $0x2c] sm:$0x1] %vm276_vm1, %v12215_v0  ;;  %v498_v47 = vshrl.u32 %v440_v30, 16  ;;  %v488_v49 = vrot.slane %v483_v40, 4 }
  0x2c   : > { %338 = vst.msk [vmem:[#allocation3 + $0x24] sm:$0xf] %vm273_vm0, %v12215_v0  ;;  %339 = vst.msk [vmem:[#allocation3 + $0x28] sm:$0xf] %vm273_vm0, %v12215_v0  ;;  %v492_v51 = vrot.slane %v490_v41, 7  ;;  %v501_v56 = vshll.u32 %v440_v30, 16 }
  0x2d   : > { %341 = vst.msk [vmem:[#allocation3 + $0x30] sm:$0xf] %vm273_vm0, %v12215_v0  ;;  %342 = vst.msk [vmem:[#allocation3 + $0x34] sm:$0xf] %vm273_vm0, %v12215_v0  ;;  %v441_v52 = vld [vmem:[%s12604_s26 + $0x10] sm:$0xf] }
  0x2e   : > { %343 = vst.msk [vmem:[#allocation3 + $0x38] sm:$0x1] %vm276_vm1, %v12215_v0  ;;  %346 = vst.msk [vmem:[#allocation3 + $0x44] sm:$0x1] %vm276_vm1, %v12215_v0  ;;  %v500_v55 = vrot.slane %v498_v47, 7  ;;  %v495_v62 = vor.u32 %v493_v46, %v492_v51  ;;  %v496_v2 = vrot.slane %v492_v51, 4 }
  0x2f   : > { %344 = vst.msk [vmem:[#allocation3 + $0x3c] sm:$0xf] %vm273_vm0, %v12215_v0  ;;  %345 = vst.msk [vmem:[#allocation3 + $0x40] sm:$0xf] %vm273_vm0, %v12215_v0  ;;  %v805_v57 = vld [vmem:[#allocation2 + $0x18] sm:$0xf] }
  0x30   : > { %347 = vst.msk [vmem:[#allocation3 + $0x48] sm:$0xf] %vm273_vm0, %v12215_v0  ;;  %348 = vst.msk [vmem:[#allocation3 + $0x4c] sm:$0xf] %vm273_vm0, %v12215_v0  ;;  %v442_v58 = vld [vmem:[%s12604_s26 + $0x14] sm:$0xf]  ;;  %v503_v3 = vor.u32 %v501_v56, %v500_v55 }
  0x31   : > { %349 = vst.msk [vmem:[#allocation3 + $0x50] sm:$0x1] %vm276_vm1, %v12215_v0  ;;  %352 = vst.msk [vmem:[#allocation3 + $0x5c] sm:$0x1] %vm276_vm1, %v12215_v0  ;;  %v809_v63 = vld [vmem:[#allocation2 + $0x20] sm:$0x1] }
  0x32   : > { %350 = vst.msk [vmem:[#allocation3 + $0x54] sm:$0xf] %vm273_vm0, %v12215_v0  ;;  %351 = vst.msk [vmem:[#allocation3 + $0x58] sm:$0xf] %vm273_vm0, %v12215_v0  ;;  %v505_v4 = vrot.slane %v500_v55, 4  ;;  %v507_v5 = vshrl.u32 %v441_v52, 16 }
  0x33   : > { %353 = vst.msk [vmem:[#allocation3 + $0x60] sm:$0xf] %vm273_vm0, %v12215_v0  ;;  %354 = vst.msk [vmem:[#allocation3 + $0x64] sm:$0xf] %vm273_vm0, %v12215_v0  ;;  %v444_v6 = vld [vmem:[%s12604_s26 + $0x1c] sm:$0xf] }
  0x34   : > { %355 = vst.msk [vmem:[#allocation3 + $0x68] sm:$0x1] %vm276_vm1, %v12215_v0  ;;  %358 = vst.msk [vmem:[#allocation3 + $0x74] sm:$0x1] %vm276_vm1, %v12215_v0  ;;  %s12217_s28 = smov 4   ;;  %v518_v10 = vshll.u32 %v442_v58, 16 }
  0x35   : > { %356 = vst.msk [vmem:[#allocation3 + $0x6c] sm:$0xf] %vm273_vm0, %v12215_v0  ;;  %357 = vst.msk [vmem:[#allocation3 + $0x70] sm:$0xf] %vm273_vm0, %v12215_v0  ;;  %v12662_v11 = vld [vmem:[%s12604_s26 + $0x20] sm:$0xf] }
  0x36   : > { %359 = vst.msk [vmem:[#allocation3 + $0x78] sm:$0xf] %vm273_vm0, %v12215_v0  ;;  %360 = vst.msk [vmem:[#allocation3 + $0x7c] sm:$0xf] %vm273_vm0, %v12215_v0  ;;  %v509_v14 = vrot.slane %v507_v5, 7  ;;  %v532_v19 = vshrl.u32 %v444_v6, 16 }
  0x37   : > { %361 = vst.msk [vmem:[#allocation3 + $0x80] sm:$0x1] %vm276_vm1, %v12215_v0  ;;  %364 = vst.msk [vmem:[#allocation3 + $0x8c] sm:$0x1] %vm276_vm1, %v12215_v0  ;;  %v535_v20 = vshll.u32 %v444_v6, 16  ;;  %s12218_s29 = smov 12  }
  0x38   : > { %362 = vst.msk [vmem:[#allocation3 + $0x84] sm:$0xf] %vm273_vm0, %v12215_v0  ;;  %363 = vst.msk [vmem:[#allocation3 + $0x88] sm:$0xf] %vm273_vm0, %v12215_v0  ;;  %v816_v23 = vld [vmem:[#allocation2 + $0x2c] sm:$0x1] }
  0x39   : > { %365 = vst.msk [vmem:[#allocation3 + $0x90] sm:$0xf] %vm273_vm0, %v12215_v0  ;;  %366 = vst.msk [vmem:[#allocation3 + $0x94] sm:$0xf] %vm273_vm0, %v12215_v0  ;;  %s12219_s30 = smov 16   ;;  %s12220_s7 = smov 20  }
  0x3a   : > { %367 = vst.msk [vmem:[#allocation3 + $0x98] sm:$0x1] %vm276_vm1, %v12215_v0  ;;  %370 = vst.msk [vmem:[#allocation3 + $0xa4] sm:$0x1] %vm276_vm1, %v12215_v0  ;;  %s12221_s11 = smov 24   ;;  %s12222_s12 = smov 28  }
  0x3b   : > { %368 = vst.msk [vmem:[#allocation3 + $0x9c] sm:$0xf] %vm273_vm0, %v12215_v0  ;;  %369 = vst.msk [vmem:[#allocation3 + $0xa0] sm:$0xf] %vm273_vm0, %v12215_v0  ;;  %s12223_s13 = smov 32   ;;  %vm3942_vm14 = vcmask 31744  }
  0x3c   : > { %371 = vst.msk [vmem:[#allocation3 + $0xa8] sm:$0xf] %vm273_vm0, %v12215_v0  ;;  %372 = vst.msk [vmem:[#allocation3 + $0xac] sm:$0xf] %vm273_vm0, %v12215_v0  ;;  %vm3991_vm15 = vcmask 64512   ;;  %s12224_s14 = smov 36  }
  0x3d   : > { %373 = vst.msk [vmem:[#allocation3 + $0xb0] sm:$0x1] %vm276_vm1, %v12215_v0  ;;  %376 = vst.msk [vmem:[#allocation3 + $0xbc] sm:$0x1] %vm276_vm1, %v12215_v0 }
  0x3e   : > { %374 = vst.msk [vmem:[#allocation3 + $0xb4] sm:$0xf] %vm273_vm0, %v12215_v0  ;;  %375 = vst.msk [vmem:[#allocation3 + $0xb8] sm:$0xf] %vm273_vm0, %v12215_v0 }
  0x3f   : > { %377 = vst.msk [vmem:[#allocation3 + $0xc0] sm:$0xf] %vm273_vm0, %v12215_v0  ;;  %378 = vst.msk [vmem:[#allocation3 + $0xc4] sm:$0xf] %vm273_vm0, %v12215_v0 }
  0x40   : > { %379 = vst.msk [vmem:[#allocation3 + $0xc8] sm:$0x1] %vm276_vm1, %v12215_v0  ;;  %382 = vst.msk [vmem:[#allocation3 + $0xd4] sm:$0x1] %vm276_vm1, %v12215_v0 }
  0x41   : > { %380 = vst.msk [vmem:[#allocation3 + $0xcc] sm:$0xf] %vm273_vm0, %v12215_v0  ;;  %381 = vst.msk [vmem:[#allocation3 + $0xd0] sm:$0xf] %vm273_vm0, %v12215_v0 }
  0x42   : > { %383 = vst.msk [vmem:[#allocation4] sm:$0xf] %vm273_vm0, %v12215_v0  ;;  %384 = vst.msk [vmem:[#allocation4 + $0x4] sm:$0xf] %vm273_vm0, %v12215_v0 }
  0x43   : > { %385 = vst.msk [vmem:[#allocation4 + $0x8] sm:$0x1] %vm276_vm1, %v12215_v0  ;;  %388 = vst.msk [vmem:[#allocation4 + $0x14] sm:$0x1] %vm276_vm1, %v12215_v0 }
  0x44   : > { %386 = vst.msk [vmem:[#allocation4 + $0xc] sm:$0xf] %vm273_vm0, %v12215_v0  ;;  %387 = vst.msk [vmem:[#allocation4 + $0x10] sm:$0xf] %vm273_vm0, %v12215_v0 }
  0x45   : > { %389 = vst.msk [vmem:[#allocation4 + $0x18] sm:$0xf] %vm273_vm0, %v12215_v0  ;;  %390 = vst.msk [vmem:[#allocation4 + $0x1c] sm:$0xf] %vm273_vm0, %v12215_v0 }
  0x46   : > { %391 = vst.msk [vmem:[#allocation4 + $0x20] sm:$0x1] %vm276_vm1, %v12215_v0  ;;  %394 = vst.msk [vmem:[#allocation4 + $0x2c] sm:$0x1] %vm276_vm1, %v12215_v0 }
  0x47   : > { %392 = vst.msk [vmem:[#allocation4 + $0x24] sm:$0xf] %vm273_vm0, %v12215_v0  ;;  %393 = vst.msk [vmem:[#allocation4 + $0x28] sm:$0xf] %vm273_vm0, %v12215_v0 }
  0x48   : > { %395 = vst.msk [vmem:[#allocation4 + $0x30] sm:$0xf] %vm273_vm0, %v12215_v0  ;;  %396 = vst.msk [vmem:[#allocation4 + $0x34] sm:$0xf] %vm273_vm0, %v12215_v0 }
  0x49   : > { %397 = vst.msk [vmem:[#allocation4 + $0x38] sm:$0x1] %vm276_vm1, %v12215_v0  ;;  %400 = vst.msk [vmem:[#allocation4 + $0x44] sm:$0x1] %vm276_vm1, %v12215_v0 }
  0x4a   : > { %398 = vst.msk [vmem:[#allocation4 + $0x3c] sm:$0xf] %vm273_vm0, %v12215_v0  ;;  %399 = vst.msk [vmem:[#allocation4 + $0x40] sm:$0xf] %vm273_vm0, %v12215_v0 }
  0x4b   : > { %401 = vst.msk [vmem:[#allocation4 + $0x48] sm:$0xf] %vm273_vm0, %v12215_v0  ;;  %402 = vst.msk [vmem:[#allocation4 + $0x4c] sm:$0xf] %vm273_vm0, %v12215_v0 }
  0x4c   : > { %403 = vst.msk [vmem:[#allocation4 + $0x50] sm:$0x1] %vm276_vm1, %v12215_v0  ;;  %406 = vst.msk [vmem:[#allocation4 + $0x5c] sm:$0x1] %vm276_vm1, %v12215_v0 }
  0x4d   : > { %404 = vst.msk [vmem:[#allocation4 + $0x54] sm:$0xf] %vm273_vm0, %v12215_v0  ;;  %405 = vst.msk [vmem:[#allocation4 + $0x58] sm:$0xf] %vm273_vm0, %v12215_v0 }
  0x4e   : > { %407 = vst.msk [vmem:[#allocation4 + $0x60] sm:$0xf] %vm273_vm0, %v12215_v0  ;;  %408 = vst.msk [vmem:[#allocation4 + $0x64] sm:$0xf] %vm273_vm0, %v12215_v0 }
  0x4f   : > { %409 = vst.msk [vmem:[#allocation4 + $0x68] sm:$0x1] %vm276_vm1, %v12215_v0  ;;  %412 = vst.msk [vmem:[#allocation4 + $0x74] sm:$0x1] %vm276_vm1, %v12215_v0 }
  0x50   : > { %410 = vst.msk [vmem:[#allocation4 + $0x6c] sm:$0xf] %vm273_vm0, %v12215_v0  ;;  %411 = vst.msk [vmem:[#allocation4 + $0x70] sm:$0xf] %vm273_vm0, %v12215_v0 }
  0x51   : > { %413 = vst.msk [vmem:[#allocation4 + $0x78] sm:$0xf] %vm273_vm0, %v12215_v0  ;;  %414 = vst.msk [vmem:[#allocation4 + $0x7c] sm:$0xf] %vm273_vm0, %v12215_v0 }
  0x52   : > { %415 = vst.msk [vmem:[#allocation4 + $0x80] sm:$0x1] %vm276_vm1, %v12215_v0  ;;  %418 = vst.msk [vmem:[#allocation4 + $0x8c] sm:$0x1] %vm276_vm1, %v12215_v0 }
  0x53   : > { %416 = vst.msk [vmem:[#allocation4 + $0x84] sm:$0xf] %vm273_vm0, %v12215_v0  ;;  %417 = vst.msk [vmem:[#allocation4 + $0x88] sm:$0xf] %vm273_vm0, %v12215_v0 }
  0x54   : > { %419 = vst.msk [vmem:[#allocation4 + $0x90] sm:$0xf] %vm273_vm0, %v12215_v0  ;;  %420 = vst.msk [vmem:[#allocation4 + $0x94] sm:$0xf] %vm273_vm0, %v12215_v0 }
  0x55   : > { %421 = vst.msk [vmem:[#allocation4 + $0x98] sm:$0x1] %vm276_vm1, %v12215_v0  ;;  %424 = vst.msk [vmem:[#allocation4 + $0xa4] sm:$0x1] %vm276_vm1, %v12215_v0 }
  0x56   : > { %422 = vst.msk [vmem:[#allocation4 + $0x9c] sm:$0xf] %vm273_vm0, %v12215_v0  ;;  %423 = vst.msk [vmem:[#allocation4 + $0xa0] sm:$0xf] %vm273_vm0, %v12215_v0 }
  0x57   : > { %425 = vst.msk [vmem:[#allocation4 + $0xa8] sm:$0xf] %vm273_vm0, %v12215_v0  ;;  %426 = vst.msk [vmem:[#allocation4 + $0xac] sm:$0xf] %vm273_vm0, %v12215_v0 }
  0x58   : > { %427 = vst.msk [vmem:[#allocation4 + $0xb0] sm:$0x1] %vm276_vm1, %v12215_v0  ;;  %430 = vst.msk [vmem:[#allocation4 + $0xbc] sm:$0x1] %vm276_vm1, %v12215_v0 }
  0x59   : > { %428 = vst.msk [vmem:[#allocation4 + $0xb4] sm:$0xf] %vm273_vm0, %v12215_v0  ;;  %429 = vst.msk [vmem:[#allocation4 + $0xb8] sm:$0xf] %vm273_vm0, %v12215_v0 }
  0x5a   : > { %431 = vst.msk [vmem:[#allocation4 + $0xc0] sm:$0xf] %vm273_vm0, %v12215_v0  ;;  %432 = vst.msk [vmem:[#allocation4 + $0xc4] sm:$0xf] %vm273_vm0, %v12215_v0 }
  0x5b   : > { %433 = vst.msk [vmem:[#allocation4 + $0xc8] sm:$0x1] %vm276_vm1, %v12215_v0  ;;  %436 = vst.msk [vmem:[#allocation4 + $0xd4] sm:$0x1] %vm276_vm1, %v12215_v0 }
  0x5c   : > { %434 = vst.msk [vmem:[#allocation4 + $0xcc] sm:$0xf] %vm273_vm0, %v12215_v0  ;;  %435 = vst.msk [vmem:[#allocation4 + $0xd0] sm:$0xf] %vm273_vm0, %v12215_v0  ;;  %v443_v0 = vld [vmem:[%s12604_s26 + $0x18] sm:$0xf] }
  0x5d   : > { %vm12606_vm7 = vmor %vm1874_vm2, %vm1875_vm4  ;;  %v524_v15 = vshrl.u32 %v443_v0, 16  ;;  %vm4057_vm2 = vcmask 130048   ;;  %vm4123_vm4 = vcmask 195584  }
  0x5e   : > { %v17754_v1 = vsel %vm12606_vm7, 4294967295, %v17753_v1  ;;  %v1880_v16 = vsel %vm12606_vm7, %v11171_v7, %v1879_v8  ;;  %v1883_v25 = vsel %vm12606_vm7, %v1881_v17, %v1882_v9  ;;  %vm12619_vm10 = vmor %vm1423_vm3, %vm1424_vm5  ;;  %v510_v8 = vshll.u32 %v441_v52, 16  ;;  %v812_v17 = vld [vmem:[#allocation2 + $0x24] sm:$0xf] }
  0x5f   : > { %17755 = vst [vmem:[#allocation5_spill] sm:$0xff] %v17754_v1  ;;  %v11251_v31 = vcombine.low %v1880_v16, %v1883_v25  ;;  %vm12626_vm11 = vmand %vm273_vm0, %vm794_vm9  ;;  %v1439_v53 = vsel %vm12619_vm10, %v1434_v42, %v1438_v22  ;;  %v1449_v54 = vsel %vm12619_vm10, %v1444_v43, %v1448_v18  ;;  %v515_v9 = vshrl.u32 %v442_v58, 16 }
  0x60   : > { %v17759_v35 = vsel %vm12626_vm11, 4294967295, %v17758_v35  ;;  %vm12632_vm12 = vmor %vm469_vm6, %vm470_vm8  ;;  %v797_v50 = vsel %vm12626_vm11, %v478_v38, %v796_v36  ;;  %v11235_v59 = vcombine.low %v1439_v53, %v1449_v54  ;;  %v806_v7 = vsel %vm12626_vm11, %v495_v62, %v805_v57  ;;  %v819_v38 = vld [vmem:[#allocation2 + $0x30] sm:$0xf] }
  0x61   : > { %17760 = vst [vmem:[#allocation6_spill] sm:$0xff] %v17759_v35  ;;  %v17762_v37 = vsel %vm12632_vm12, 4294967295, %v17761_v37  ;;  %3398 = vrot.lane.b32.xlu0 %v11251_v31, %s12216_s27  ;;  %vm12639_vm13 = vmand %vm276_vm1, %vm469_vm6  ;;  %v487_v60 = vsel %vm12632_vm12, %v479_v39, %v486_v48  ;;  %v504_v12 = vsel %vm12632_vm12, %v496_v2, %v503_v3  ;;  %v517_v16 = vrot.slane %v515_v9, 7 }
  0x62   : > { %17763 = vst [vmem:[#allocation7_spill] sm:$0xff] %v17762_v37  ;;  %v17765_v44 = vsel %vm12639_vm13, 4294967295, %v17764_v44  ;;  %798 = vst [vmem:[#allocation2 + $0xc] sm:$0xf] %v797_v50  ;;  %v803_v61 = vsel %vm12639_vm13, %v488_v49, %v802_v45  ;;  %v810_v13 = vsel %vm12639_vm13, %v505_v4, %v809_v63  ;;  %v527_v18 = vshll.u32 %v443_v0, 16 }
  0x63   : > { %17766 = vst [vmem:[#allocation8_spill] sm:$0xff] %v17765_v44  ;;  %799 = vst.msk [vmem:[#allocation2 + $0x10] sm:$0xf] %vm273_vm0, %v487_v60  ;;  %v512_v21 = vor.u32 %v510_v8, %v509_v14  ;;  %v513_v22 = vrot.slane %v509_v14, 4  ;;  %v12669_v24 = vrot.slane %v524_v15, 7  ;;  %v541_v25 = vshrl.u32 %v12662_v11, 16 }
  0x64   : > { %804 = vst [vmem:[#allocation2 + $0x14] sm:$0x1] %v803_v61  ;;  %807 = vst [vmem:[#allocation2 + $0x18] sm:$0xf] %v806_v7  ;;  %v520_v29 = vor.u32 %v518_v10, %v517_v16  ;;  %v522_v30 = vrot.slane %v517_v16, 4  ;;  %v12672_v31 = vrot.slane %v532_v19, 7 }
  0x65   : > { %3318 = vrot.lane.b32.xlu0 %v11235_v59, %s12217_s28  ;;  %808 = vst.msk [vmem:[#allocation2 + $0x1c] sm:$0xf] %vm273_vm0, %v504_v12  ;;  %811 = vst [vmem:[#allocation2 + $0x20] sm:$0x1] %v810_v13  ;;  %v813_v36 = vsel %vm12626_vm11, %v512_v21, %v812_v17  ;;  %v529_v43 = vor.u32 %v527_v18, %v12669_v24  ;;  %v530_v45 = vrot.slane %v12669_v24, 4  ;;  %vm4024_vm1 = vcmask 97280  }
  0x66   : > { %v521_v41 = vsel %vm12632_vm12, %v513_v22, %v520_v29  ;;  %814 = vst [vmem:[#allocation2 + $0x24] sm:$0xf] %v813_v36  ;;  %v817_v42 = vsel %vm12639_vm13, %v522_v30, %v816_v23  ;;  %v537_v54 = vor.u32 %v535_v20, %v12672_v31  ;;  %vm4090_vm3 = vcmask 162816  }
  0x67   : > { %815 = vst.msk [vmem:[#allocation2 + $0x28] sm:$0xf] %vm273_vm0, %v521_v41  ;;  %818 = vst [vmem:[#allocation2 + $0x2c] sm:$0x1] %v817_v42  ;;  %v820_v60 = vsel %vm12626_vm11, %v529_v43, %v819_v38  ;;  %vm4156_vm5 = vcmask 228352   ;;  %vm4189_vm6 = vcmask 261120  }
  0x68   : > { %821 = vst [vmem:[#allocation2 + $0x30] sm:$0xf] %v820_v60  ;;  %v538_v43 = vsel %vm12632_vm12, %v530_v45, %v537_v54  ;;  %v544_v60 = vshll.u32 %v12662_v11, 16  ;;  %vm7212_vm8 = vcmask 1043456   ;;  %vm7103_vm9 = vcmask 293888  }
  0x69   : > { %v1811_v27 = vld [vmem:[#allocation2 + $0xc] sm:$0xe]  ;;  %822 = vst.msk [vmem:[#allocation2 + $0x34] sm:$0xf] %vm273_vm0, %v538_v43 }
  0x6a   : > { %v1377_v28 = vld [vmem:[#allocation2 + $0xc] sm:$0xf]  ;;  %v11172_v32 = vrot.slane %v1811_v27, 9  ;;  %v1378_v39 = vld [vmem:[#allocation2 + $0x10] sm:$0xf] }
  0x6b   : > { %v1451_v33 = vshrl.u32 %v1377_v28, 16  ;;  %v1454_v34 = vshll.u32 %v1377_v28, 16  ;;  %v1408_v40 = vld [vmem:[#allocation2 + $0x14] sm:$0x1]  ;;  %v1886_v47 = vrot.slane %v1378_v39, 5  ;;  %v1460_v52 = vshll.u32 %v1378_v39, 16 }
  0x6c   : > { %v1470_v46 = vshll.u32 %v1408_v40, 16  ;;  %v1889_v48 = vrot.slane %v1408_v40, 5  ;;  %v1379_v50 = vld [vmem:[#allocation2 + $0x18] sm:$0xf]  ;;  %v1464_v53 = vshrl.u32 %v1378_v39, 16 }
  0x6d   : > { %v1453_v49 = vrot.slane %v1451_v33, 4  ;;  %v1456_v51 = vrot.slane %v1454_v34, 5  ;;  %v1887_v55 = vsel %vm12606_vm7, %v11172_v32, %v1886_v47  ;;  %v1888_v56 = vrot.slane %v1886_v47, 4  ;;  %v12686_v57 = vld [vmem:[#allocation2 + $0x1c] sm:$0xf] }
  0x6e   : > { %v12688_v58 = vld [vmem:[#allocation2 + $0x20] sm:$0x1]  ;;  %v1475_v59 = vshrl.u32 %v1379_v50, 16  ;;  %v1478_v61 = vshll.u32 %v1379_v50, 16  ;;  %v1484_v62 = vshll.u32 %v12686_v57, 16  ;;  %v1488_v63 = vshrl.u32 %v12686_v57, 16 }
  0x6f   : > { %v1494_v0 = vshll.u32 %v12688_v58, 16  ;;  %v1890_v2 = vsel %vm12606_vm7, %v1888_v56, %v1889_v48  ;;  %v1457_v4 = vor.u32 %v1456_v51, %v1453_v49  ;;  %v1462_v5 = vrot.slane %v1460_v52, 5  ;;  %v1381_v15 = vld [vmem:[#allocation2 + $0x24] sm:$0xf]  ;;  %v12698_v18 = vld [vmem:[#allocation2 + $0x28] sm:$0xf] }
  0x70   : > { %v1477_v3 = vrot.slane %v1475_v59, 4  ;;  %v11252_v6 = vcombine.low %v1887_v55, %v1890_v2  ;;  %v1480_v7 = vrot.slane %v1478_v61, 5  ;;  %v1486_v8 = vrot.slane %v1484_v62, 5  ;;  %v12700_v19 = vld [vmem:[#allocation2 + $0x2c] sm:$0x1] }
  0x71   : > { %v1490_v9 = vrot.slane %v1488_v63, 4  ;;  %v1496_v10 = vrot.slane %v1494_v0, 5  ;;  %v1458_v12 = vrot.slane %v1457_v4, 4  ;;  %v1466_v13 = vrot.slane %v1464_v53, 4  ;;  %v1383_v39 = vld [vmem:[#allocation2 + $0x30] sm:$0xf] }
  0x72   : > { %v1472_v14 = vrot.slane %v1470_v46, 5  ;;  %3400 = vrot.lane.b32.xlu1 %v11252_v6, %s12216_s27  ;;  %v1481_v16 = vor.u32 %v1480_v7, %v1477_v3  ;;  %v1499_v20 = vshrl.u32 %v1381_v15, 16  ;;  %v1502_v21 = vshll.u32 %v1381_v15, 16  ;;  %v823_v50 = vld [vmem:[#allocation2 + $0x38] sm:$0x1] }
  0x73   : > { %v1491_v17 = vor.u32 %v1490_v9, %v1486_v8  ;;  %v1463_v22 = vsel %vm12619_vm10, %v1458_v12, %v1462_v5  ;;  %v1467_v23 = vor.u32 %v1466_v13, %v1462_v5  ;;  %v1508_v24 = vshll.u32 %v12698_v18, 16  ;;  %v446_v51 = vld [vmem:[%s12604_s26 + $0x24] sm:$0xf]  ;;  %v447_v61 = vld [vmem:[%s12604_s26 + $0x28] sm:$0xf] }
  0x74   : > { %v1512_v27 = vshrl.u32 %v12698_v18, 16  ;;  %v1482_v28 = vrot.slane %v1481_v16, 4  ;;  %v1501_v30 = vrot.slane %v1499_v20, 4  ;;  %v1504_v32 = vrot.slane %v1502_v21, 5  ;;  %v826_v2 = vld [vmem:[#allocation2 + $0x3c] sm:$0xf] }
  0x75   : > { %v1492_v29 = vrot.slane %v1491_v17, 4  ;;  %v1468_v33 = vrot.slane %v1467_v23, 4  ;;  %v1510_v34 = vrot.slane %v1508_v24, 5  ;;  %v1518_v38 = vshll.u32 %v12700_v19, 16  ;;  %v448_v3 = vld [vmem:[%s12604_s26 + $0x2c] sm:$0xf] }
  0x76   : > { %v1514_v36 = vrot.slane %v1512_v27, 4  ;;  %v1487_v40 = vsel %vm12619_vm10, %v1482_v28, %v1486_v8  ;;  %v1505_v42 = vor.u32 %v1504_v32, %v1501_v30  ;;  %v539_v55 = vrot.slane %v12672_v31, 4  ;;  %v830_v9 = vld [vmem:[#allocation2 + $0x44] sm:$0x1]  ;;  %v833_v16 = vld [vmem:[#allocation2 + $0x48] sm:$0xf] }
  0x77   : > { %v1497_v41 = vsel %vm12619_vm10, %v1492_v29, %v1496_v10  ;;  %v1473_v47 = vsel %vm12619_vm10, %v1468_v33, %v1472_v14  ;;  %v1520_v49 = vrot.slane %v1518_v38, 5  ;;  %v1523_v56 = vshrl.u32 %v1383_v39, 16  ;;  %v449_v17 = vld [vmem:[%s12604_s26 + $0x30] sm:$0xf]  ;;  %v12735_v20 = vld [vmem:[#allocation2 + $0x34] sm:$0xf] }
  0x78   : > { %v11237_v46 = vcombine.low %v1487_v40, %v1497_v41  ;;  %v1515_v48 = vor.u32 %v1514_v36, %v1510_v34  ;;  %v11236_v52 = vcombine.low %v1463_v22, %v1473_v47  ;;  %v1506_v53 = vrot.slane %v1505_v42, 4  ;;  %v450_v32 = vld [vmem:[%s12604_s26 + $0x34] sm:$0xf] }
  0x79   : > { %v1526_v54 = vshll.u32 %v1383_v39, 16  ;;  %v543_v59 = vrot.slane %v541_v25, 7  ;;  %v824_v63 = vsel %vm12639_vm13, %v539_v55, %v823_v50  ;;  %v1525_v31 = vrot.slane %v1523_v56, 4  ;;  %v837_v39 = vld [vmem:[#allocation2 + $0x50] sm:$0x1] }
  0x7a   : > { %3322 = vrot.lane.b32.xlu1 %v11237_v46, %s12217_s28  ;;  %v1516_v45 = vrot.slane %v1515_v48, 4  ;;  %3320 = vrot.lane.b32.xlu0 %v11236_v52, %s12217_s28  ;;  %v1511_v62 = vsel %vm12619_vm10, %v1506_v53, %v1510_v34  ;;  %v549_v0 = vshrl.u32 %v446_v51, 16  ;;  %825 = vst [vmem:[#allocation2 + $0x38] sm:$0x1] %v824_v63  ;;  %v552_v8 = vshll.u32 %v446_v51, 16 }
  0x7b   : > { %v1528_v25 = vrot.slane %v1526_v54, 5  ;;  %v546_v11 = vor.u32 %v544_v60, %v543_v59  ;;  %v547_v5 = vrot.slane %v543_v59, 4  ;;  %v558_v10 = vshrl.u32 %v447_v61, 16  ;;  %v451_v46 = vld [vmem:[%s12604_s26 + $0x38] sm:$0xf] }
  0x7c   : > { %v1521_v4 = vsel %vm12619_vm10, %v1516_v45, %v1520_v49  ;;  %v551_v7 = vrot.slane %v549_v0, 7  ;;  %v561_v14 = vshll.u32 %v447_v61, 16  ;;  %v566_v15 = vshrl.u32 %v448_v3, 16  ;;  %v840_v61 = vld [vmem:[#allocation2 + $0x54] sm:$0xf] }
  0x7d   : > { %v11238_v6 = vcombine.low %v1511_v62, %v1521_v4  ;;  %v1529_v12 = vor.u32 %v1528_v25, %v1525_v31  ;;  %v827_v13 = vsel %vm12626_vm11, %v546_v11, %v826_v2  ;;  %v560_v23 = vrot.slane %v558_v10, 7 }
  0x7e   : > { %v554_v21 = vor.u32 %v552_v8, %v551_v7  ;;  %v556_v22 = vrot.slane %v551_v7, 4  ;;  %828 = vst [vmem:[#allocation2 + $0x3c] sm:$0xf] %v827_v13  ;;  %v569_v24 = vshll.u32 %v448_v3, 16  ;;  %v1532_v28 = vshll.u32 %v12735_v20, 16 }
  0x7f   : > { %3324 = vrot.lane.b32.xlu1 %v11238_v6, %s12217_s28  ;;  %v1530_v27 = vrot.slane %v1529_v12, 4  ;;  %v1536_v29 = vshrl.u32 %v12735_v20, 16  ;;  %v568_v30 = vrot.slane %v566_v15, 7  ;;  %v563_v36 = vor.u32 %v561_v14, %v560_v23  ;;  %v844_v8 = vld [vmem:[#allocation2 + $0x5c] sm:$0x1] }
  0x80   : > { %v555_v33 = vsel %vm12632_vm12, %v547_v5, %v554_v21  ;;  %v831_v34 = vsel %vm12639_vm13, %v556_v22, %v830_v9  ;;  %v564_v38 = vrot.slane %v560_v23, 4  ;;  %v1534_v40 = vrot.slane %v1532_v28, 5 }
  0x81   : > { %v1538_v41 = vrot.slane %v1536_v29, 4  ;;  %829 = vst.msk [vmem:[#allocation2 + $0x40] sm:$0xf] %vm273_vm0, %v555_v33  ;;  %832 = vst [vmem:[#allocation2 + $0x44] sm:$0x1] %v831_v34  ;;  %v571_v42 = vor.u32 %v569_v24, %v568_v30  ;;  %v573_v43 = vrot.slane %v568_v30, 4  ;;  %v834_v48 = vsel %vm12626_vm11, %v563_v36, %v833_v16 }
  0x82   : > { %v12746_v47 = vld [vmem:[#allocation2 + $0x38] sm:$0x1]  ;;  %v575_v49 = vshrl.u32 %v449_v17, 16  ;;  %v578_v50 = vshll.u32 %v449_v17, 16  ;;  %v583_v51 = vshrl.u32 %v450_v32, 16  ;;  %v1535_v52 = vsel %vm12619_vm10, %v1530_v27, %v1534_v40 }
  0x83   : > { %v1539_v53 = vor.u32 %v1538_v41, %v1534_v40  ;;  %v1542_v55 = vshll.u32 %v12746_v47, 16  ;;  %v572_v56 = vsel %vm12632_vm12, %v564_v38, %v571_v42  ;;  %835 = vst [vmem:[#allocation2 + $0x48] sm:$0xf] %v834_v48  ;;  %v838_v45 = vsel %vm12639_vm13, %v573_v43, %v837_v39  ;;  %v452_v29 = vld [vmem:[%s12604_s26 + $0x3c] sm:$0xf] }
  0x84   : > { %836 = vst.msk [vmem:[#allocation2 + $0x4c] sm:$0xf] %vm273_vm0, %v572_v56  ;;  %v577_v54 = vrot.slane %v575_v49, 7  ;;  %v585_v59 = vrot.slane %v583_v51, 7  ;;  %v586_v60 = vshll.u32 %v450_v32, 16  ;;  %v592_v0 = vshrl.u32 %v451_v46, 16 }
  0x85   : > { %v1540_v62 = vrot.slane %v1539_v53, 4  ;;  %v1544_v63 = vrot.slane %v1542_v55, 5  ;;  %v1385_v31 = vld [vmem:[#allocation2 + $0x3c] sm:$0xf]  ;;  %839 = vst [vmem:[#allocation2 + $0x50] sm:$0x1] %v838_v45 }
  0x86   : > { %v595_v2 = vshll.u32 %v451_v46, 16  ;;  %v1547_v3 = vshrl.u32 %v1385_v31, 16  ;;  %v1550_v4 = vshll.u32 %v1385_v31, 16  ;;  %v580_v25 = vor.u32 %v578_v50, %v577_v54  ;;  %v847_v40 = vld [vmem:[#allocation2 + $0x60] sm:$0xf] }
  0x87   : > { %v581_v11 = vrot.slane %v577_v54, 4  ;;  %v1545_v5 = vsel %vm12619_vm10, %v1540_v62, %v1544_v63  ;;  %v588_v6 = vor.u32 %v586_v60, %v585_v59  ;;  %v590_v7 = vrot.slane %v585_v59, 4  ;;  %v453_v53 = vld [vmem:[%s12604_s26 + $0x40] sm:$0xf] }
  0x88   : > { %v12760_v9 = vrot.slane %v592_v0, 7  ;;  %v11239_v10 = vcombine.low %v1535_v52, %v1545_v5  ;;  %v12762_v12 = vld [vmem:[#allocation2 + $0x40] sm:$0xf]  ;;  %v12764_v13 = vld [vmem:[#allocation2 + $0x44] sm:$0x1]  ;;  %v1549_v14 = vrot.slane %v1547_v3, 4  ;;  %v841_v16 = vsel %vm12626_vm11, %v580_v25, %v840_v61 }
  0x89   : > { %v1552_v15 = vrot.slane %v1550_v4, 5  ;;  %v1556_v17 = vshll.u32 %v12762_v12, 16  ;;  %v1560_v21 = vshrl.u32 %v12762_v12, 16  ;;  %v1566_v22 = vshll.u32 %v12764_v13, 16  ;;  %842 = vst [vmem:[#allocation2 + $0x54] sm:$0xf] %v841_v16 }
  0x8a   : > { %v589_v23 = vsel %vm12632_vm12, %v581_v11, %v588_v6  ;;  %3326 = vrot.lane.b32.xlu0 %v11239_v10, %s12217_s28  ;;  %v1387_v27 = vld [vmem:[#allocation2 + $0x48] sm:$0xf]  ;;  %v845_v28 = vsel %vm12639_vm13, %v590_v7, %v844_v8  ;;  %v597_v30 = vor.u32 %v595_v2, %v12760_v9  ;;  %v598_v32 = vrot.slane %v12760_v9, 4 }
  0x8b   : > { %v1553_v24 = vor.u32 %v1552_v15, %v1549_v14  ;;  %843 = vst.msk [vmem:[#allocation2 + $0x58] sm:$0xf] %vm273_vm0, %v589_v23  ;;  %v1558_v33 = vrot.slane %v1556_v17, 5  ;;  %v1562_v34 = vrot.slane %v1560_v21, 4  ;;  %v1568_v36 = vrot.slane %v1566_v22, 5 }
  0x8c   : > { %v12780_v38 = vld [vmem:[#allocation2 + $0x4c] sm:$0xf]  ;;  %v1571_v39 = vshrl.u32 %v1387_v27, 16  ;;  %846 = vst [vmem:[#allocation2 + $0x5c] sm:$0x1] %v845_v28  ;;  %v1574_v43 = vshll.u32 %v1387_v27, 16  ;;  %v848_v2 = vsel %vm12626_vm11, %v597_v30, %v847_v40 }
  0x8d   : > { %v1554_v41 = vrot.slane %v1553_v24, 4  ;;  %v12782_v42 = vld [vmem:[#allocation2 + $0x50] sm:$0x1]  ;;  %v1580_v46 = vshll.u32 %v12780_v38, 16  ;;  %v1584_v48 = vshrl.u32 %v12780_v38, 16  ;;  %v1563_v49 = vor.u32 %v1562_v34, %v1558_v33 }
  0x8e   : > { %v1573_v50 = vrot.slane %v1571_v39, 4  ;;  %v1590_v51 = vshll.u32 %v12782_v42, 16  ;;  %v600_v52 = vshrl.u32 %v452_v29, 16  ;;  %v1576_v56 = vrot.slane %v1574_v43, 5  ;;  %849 = vst [vmem:[#allocation2 + $0x60] sm:$0xf] %v848_v2 }
  0x8f   : > { %v1559_v55 = vsel %vm12619_vm10, %v1554_v41, %v1558_v33  ;;  %v1582_v45 = vrot.slane %v1580_v46, 5  ;;  %v1586_v54 = vrot.slane %v1584_v48, 4  ;;  %v1564_v59 = vrot.slane %v1563_v49, 4  ;;  %v454_v22 = vld [vmem:[%s12604_s26 + $0x44] sm:$0xf] }
  0x90   : > { %v1592_v60 = vrot.slane %v1590_v51, 5  ;;  %v602_v61 = vrot.slane %v600_v52, 7  ;;  %v603_v62 = vshll.u32 %v452_v29, 16  ;;  %v1577_v63 = vor.u32 %v1576_v56, %v1573_v50  ;;  %v1389_v0 = vld [vmem:[#allocation2 + $0x54] sm:$0xf] }
  0x91   : > { %v1587_v31 = vor.u32 %v1586_v54, %v1582_v45  ;;  %v609_v3 = vshrl.u32 %v453_v53, 16  ;;  %v1569_v4 = vsel %vm12619_vm10, %v1564_v59, %v1568_v36  ;;  %v1595_v11 = vshrl.u32 %v1389_v0, 16  ;;  %v455_v29 = vld [vmem:[%s12604_s26 + $0x48] sm:$0xf]  ;;  %v854_v51 = vld [vmem:[#allocation2 + $0x6c] sm:$0xf] }
  0x92   : > { %v12794_v25 = vld [vmem:[#allocation2 + $0x58] sm:$0xf]  ;;  %v1598_v5 = vshll.u32 %v1389_v0, 16  ;;  %v605_v6 = vor.u32 %v603_v62, %v602_v61  ;;  %v11240_v7 = vcombine.low %v1559_v55, %v1569_v4  ;;  %v1578_v8 = vrot.slane %v1577_v63, 4  ;;  %v851_v39 = vld [vmem:[#allocation2 + $0x68] sm:$0x1] }
  0x93   : > { %v1588_v9 = vrot.slane %v1587_v31, 4  ;;  %v12796_v10 = vld [vmem:[#allocation2 + $0x5c] sm:$0x1]  ;;  %v1604_v14 = vshll.u32 %v12794_v25, 16  ;;  %v1597_v15 = vrot.slane %v1595_v11, 4  ;;  %v1608_v17 = vshrl.u32 %v12794_v25, 16 }
  0x94   : > { %v1600_v16 = vrot.slane %v1598_v5, 5  ;;  %v1614_v21 = vshll.u32 %v12796_v10, 16  ;;  %3328 = vrot.lane.b32.xlu1 %v11240_v7, %s12217_s28  ;;  %v1583_v23 = vsel %vm12619_vm10, %v1578_v8, %v1582_v45  ;;  %v606_v28 = vsel %vm12632_vm12, %v598_v32, %v605_v6  ;;  %v858_v62 = vld [vmem:[#allocation2 + $0x74] sm:$0x1]  ;;  %v456_v2 = vld [vmem:[%s12604_s26 + $0x4c] sm:$0xf] }
  0x95   : > { %v1593_v24 = vsel %vm12619_vm10, %v1588_v9, %v1592_v60  ;;  %v1606_v27 = vrot.slane %v1604_v14, 5  ;;  %v1610_v34 = vrot.slane %v1608_v17, 4  ;;  %850 = vst.msk [vmem:[#allocation2 + $0x64] sm:$0xf] %vm273_vm0, %v606_v28  ;;  %v607_v40 = vrot.slane %v602_v61, 4 }
  0x96   : > { %v11241_v30 = vcombine.low %v1583_v23, %v1593_v24  ;;  %v1601_v33 = vor.u32 %v1600_v16, %v1597_v15  ;;  %v1616_v36 = vrot.slane %v1614_v21, 5  ;;  %v611_v41 = vrot.slane %v609_v3, 7  ;;  %v1391_v55 = vld [vmem:[#allocation2 + $0x60] sm:$0xf]  ;;  %v457_v7 = vld [vmem:[%s12604_s26 + $0x50] sm:$0xf] }
  0x97   : > { %v612_v43 = vshll.u32 %v453_v53, 16  ;;  %v617_v46 = vshrl.u32 %v454_v22, 16  ;;  %v1611_v49 = vor.u32 %v1610_v34, %v1606_v27  ;;  %v620_v50 = vshll.u32 %v454_v22, 16  ;;  %v861_v17 = vld [vmem:[#allocation2 + $0x78] sm:$0xf] }
  0x98   : > { %3330 = vrot.lane.b32.xlu0 %v11241_v30, %s12217_s28  ;;  %v1602_v48 = vrot.slane %v1601_v33, 4  ;;  %v626_v32 = vshrl.u32 %v455_v29, 16  ;;  %v852_v52 = vsel %vm12639_vm13, %v607_v40, %v851_v39  ;;  %v615_v45 = vrot.slane %v611_v41, 4  ;;  %v12834_v34 = vld [vmem:[%s12604_s26 + $0x58] sm:$0xf] }
  0x99   : > { %v614_v56 = vor.u32 %v612_v43, %v611_v41  ;;  %v619_v54 = vrot.slane %v617_v46, 7  ;;  %v1612_v53 = vrot.slane %v1611_v49, 4  ;;  %853 = vst [vmem:[#allocation2 + $0x68] sm:$0x1] %v852_v52  ;;  %v1619_v60 = vshrl.u32 %v1391_v55, 16 }
  0x9a   : > { %v1607_v59 = vsel %vm12619_vm10, %v1602_v48, %v1606_v27  ;;  %v1622_v61 = vshll.u32 %v1391_v55, 16  ;;  %v628_v3 = vrot.slane %v626_v32, 7  ;;  %v629_v6 = vshll.u32 %v455_v29, 16  ;;  %v458_v27 = vld [vmem:[%s12604_s26 + $0x54] sm:$0xf] }
  0x9b   : > { %v622_v63 = vor.u32 %v620_v50, %v619_v54  ;;  %v624_v31 = vrot.slane %v619_v54, 4  ;;  %v855_v0 = vsel %vm12626_vm11, %v614_v56, %v854_v51  ;;  %v1617_v4 = vsel %vm12619_vm10, %v1612_v53, %v1616_v36  ;;  %v865_v55 = vld [vmem:[#allocation2 + $0x80] sm:$0x1]  ;;  %v868_v56 = vld [vmem:[#allocation2 + $0x84] sm:$0xf] }
  0x9c   : > { %v1621_v11 = vrot.slane %v1619_v60, 4  ;;  %v1624_v5 = vrot.slane %v1622_v61, 5  ;;  %856 = vst [vmem:[#allocation2 + $0x6c] sm:$0xf] %v855_v0  ;;  %v11242_v8 = vcombine.low %v1607_v59, %v1617_v4  ;;  %v12822_v9 = vld [vmem:[#allocation2 + $0x64] sm:$0xf]  ;;  %v631_v24 = vor.u32 %v629_v6, %v628_v3 }
  0x9d   : > { %v623_v14 = vsel %vm12632_vm12, %v615_v45, %v622_v63  ;;  %v859_v15 = vsel %vm12639_vm13, %v624_v31, %v858_v62  ;;  %v632_v16 = vrot.slane %v628_v3, 4  ;;  %v1628_v22 = vshll.u32 %v12822_v9, 16 }
  0x9e   : > { %v1625_v21 = vor.u32 %v1624_v5, %v1621_v11  ;;  %v1632_v23 = vshrl.u32 %v12822_v9, 16  ;;  %857 = vst.msk [vmem:[#allocation2 + $0x70] sm:$0xf] %vm273_vm0, %v623_v14  ;;  %860 = vst [vmem:[#allocation2 + $0x74] sm:$0x1] %v859_v15  ;;  %3332 = vrot.lane.b32.xlu1 %v11242_v8, %s12217_s28  ;;  %v634_v28 = vshrl.u32 %v456_v2, 16  ;;  %v862_v41 = vsel %vm12626_vm11, %v631_v24, %v861_v17 }
  0x9f   : > { %v637_v29 = vshll.u32 %v456_v2, 16  ;;  %v643_v30 = vshrl.u32 %v457_v7, 16  ;;  %v646_v33 = vshll.u32 %v457_v7, 16  ;;  %v1630_v39 = vrot.slane %v1628_v22, 5  ;;  %863 = vst [vmem:[#allocation2 + $0x78] sm:$0xf] %v862_v41 }
  0xa0   : > { %v1626_v36 = vrot.slane %v1625_v21, 4  ;;  %v1634_v40 = vrot.slane %v1632_v23, 4  ;;  %v12838_v43 = vld [vmem:[#allocation2 + $0x68] sm:$0x1]  ;;  %v636_v46 = vrot.slane %v634_v28, 7  ;;  %v651_v49 = vshrl.u32 %v458_v27, 16 }
  0xa1   : > { %v645_v48 = vrot.slane %v643_v30, 7  ;;  %v654_v50 = vshll.u32 %v458_v27, 16  ;;  %v1638_v52 = vshll.u32 %v12838_v43, 16  ;;  %v660_v45 = vshrl.u32 %v12834_v34, 16  ;;  %v872_v23 = vld [vmem:[#allocation2 + $0x8c] sm:$0x1] }
  0xa2   : > { %v1631_v51 = vsel %vm12619_vm10, %v1626_v36, %v1630_v39  ;;  %v1635_v32 = vor.u32 %v1634_v40, %v1630_v39  ;;  %v639_v59 = vor.u32 %v637_v29, %v636_v46  ;;  %v641_v53 = vrot.slane %v636_v46, 4  ;;  %v460_v40 = vld [vmem:[%s12604_s26 + $0x5c] sm:$0xf] }
  0xa3   : > { %v1393_v54 = vld [vmem:[#allocation2 + $0x6c] sm:$0xf]  ;;  %v648_v60 = vor.u32 %v646_v33, %v645_v48  ;;  %v649_v61 = vrot.slane %v645_v48, 4  ;;  %v1640_v63 = vrot.slane %v1638_v52, 5  ;;  %v653_v5 = vrot.slane %v651_v49, 7 }
  0xa4   : > { %v1636_v62 = vrot.slane %v1635_v32, 4  ;;  %v1643_v31 = vshrl.u32 %v1393_v54, 16  ;;  %v1646_v0 = vshll.u32 %v1393_v54, 16  ;;  %v640_v4 = vsel %vm12632_vm12, %v632_v16, %v639_v59 }
  0xa5   : > { %v12844_v2 = vld [vmem:[#allocation2 + $0x70] sm:$0xf]  ;;  %v12846_v3 = vld [vmem:[#allocation2 + $0x74] sm:$0x1]  ;;  %v866_v11 = vsel %vm12639_vm13, %v641_v53, %v865_v55  ;;  %v869_v6 = vsel %vm12626_vm11, %v648_v60, %v868_v56  ;;  %864 = vst.msk [vmem:[#allocation2 + $0x7c] sm:$0xf] %vm273_vm0, %v640_v4  ;;  %v656_v22 = vor.u32 %v654_v50, %v653_v5 }
  0xa6   : > { %v1641_v7 = vsel %vm12619_vm10, %v1636_v62, %v1640_v63  ;;  %v1645_v8 = vrot.slane %v1643_v31, 4  ;;  %v1648_v14 = vrot.slane %v1646_v0, 5  ;;  %v1652_v15 = vshll.u32 %v12844_v2, 16  ;;  %867 = vst [vmem:[#allocation2 + $0x80] sm:$0x1] %v866_v11 }
  0xa7   : > { %870 = vst [vmem:[#allocation2 + $0x84] sm:$0xf] %v869_v6  ;;  %v11243_v16 = vcombine.low %v1631_v51, %v1641_v7  ;;  %v1656_v17 = vshrl.u32 %v12844_v2, 16  ;;  %v1662_v21 = vshll.u32 %v12846_v3, 16  ;;  %v1395_v28 = vld [vmem:[#allocation2 + $0x78] sm:$0xf]  ;;  %v657_v46 = vsel %vm12632_vm12, %v649_v61, %v656_v22 }
  0xa8   : > { %v1649_v24 = vor.u32 %v1648_v14, %v1645_v8  ;;  %v1654_v27 = vrot.slane %v1652_v15, 5  ;;  %v658_v29 = vrot.slane %v653_v5, 4  ;;  %v662_v30 = vrot.slane %v660_v45, 7  ;;  %v12868_v50 = vld [vmem:[%s12604_s26 + $0x60] sm:$0xf] }
  0xa9   : > { %3334 = vrot.lane.b32.xlu0 %v11243_v16, %s12217_s28  ;;  %v1658_v33 = vrot.slane %v1656_v17, 4  ;;  %v1667_v36 = vshrl.u32 %v1395_v28, 16  ;;  %v1670_v39 = vshll.u32 %v1395_v28, 16  ;;  %v663_v49 = vshll.u32 %v12834_v34, 16  ;;  %871 = vst.msk [vmem:[#allocation2 + $0x88] sm:$0xf] %vm273_vm0, %v657_v46 }
  0xaa   : > { %v1650_v41 = vrot.slane %v1649_v24, 4  ;;  %v873_v48 = vsel %vm12639_vm13, %v658_v29, %v872_v23  ;;  %v1664_v32 = vrot.slane %v1662_v21, 5  ;;  %v666_v45 = vrot.slane %v662_v30, 4  ;;  %v875_v15 = vld [vmem:[#allocation2 + $0x90] sm:$0xf] }
  0xab   : > { %v1659_v51 = vor.u32 %v1658_v33, %v1654_v27  ;;  %v1669_v52 = vrot.slane %v1667_v36, 4  ;;  %v1672_v55 = vrot.slane %v1670_v39, 5  ;;  %874 = vst [vmem:[#allocation2 + $0x8c] sm:$0x1] %v873_v48  ;;  %v668_v54 = vshrl.u32 %v460_v40, 16 }
  0xac   : > { %v1655_v56 = vsel %vm12619_vm10, %v1650_v41, %v1654_v27  ;;  %v671_v59 = vshll.u32 %v460_v40, 16  ;;  %v12873_v60 = vld [vmem:[#allocation2 + $0x7c] sm:$0xf]  ;;  %v665_v62 = vor.u32 %v663_v49, %v662_v30  ;;  %v677_v63 = vshrl.u32 %v12868_v50, 16  ;;  %v879_v29 = vld [vmem:[#allocation2 + $0x98] sm:$0x1] }
  0xad   : > { %v1660_v53 = vrot.slane %v1659_v51, 4  ;;  %v12875_v61 = vld [vmem:[#allocation2 + $0x80] sm:$0x1]  ;;  %v1673_v34 = vor.u32 %v1672_v55, %v1669_v52  ;;  %v1676_v31 = vshll.u32 %v12873_v60, 16  ;;  %v1680_v0 = vshrl.u32 %v12873_v60, 16 }
  0xae   : > { %v1686_v4 = vshll.u32 %v12875_v61, 16  ;;  %v1397_v11 = vld [vmem:[#allocation2 + $0x84] sm:$0xf]  ;;  %v670_v5 = vrot.slane %v668_v54, 7  ;;  %v876_v40 = vsel %vm12626_vm11, %v665_v62, %v875_v15  ;;  %v679_v41 = vrot.slane %v677_v63, 7 }
  0xaf   : > { %v1665_v6 = vsel %vm12619_vm10, %v1660_v53, %v1664_v32  ;;  %v1674_v7 = vrot.slane %v1673_v34, 4  ;;  %v1691_v8 = vshrl.u32 %v1397_v11, 16  ;;  %v1694_v14 = vshll.u32 %v1397_v11, 16  ;;  %877 = vst [vmem:[#allocation2 + $0x90] sm:$0xf] %v876_v40 }
  0xb0   : > { %v11244_v16 = vcombine.low %v1655_v56, %v1665_v6  ;;  %v1678_v17 = vrot.slane %v1676_v31, 5  ;;  %v1682_v21 = vrot.slane %v1680_v0, 4  ;;  %v1688_v22 = vrot.slane %v1686_v4, 5  ;;  %v12886_v36 = vld [vmem:[#allocation2 + $0x88] sm:$0xf] }
  0xb1   : > { %v1693_v23 = vrot.slane %v1691_v8, 4  ;;  %v1696_v24 = vrot.slane %v1694_v14, 5  ;;  %v673_v27 = vor.u32 %v671_v59, %v670_v5  ;;  %v675_v28 = vrot.slane %v670_v5, 4  ;;  %v462_v32 = vld [vmem:[%s12604_s26 + $0x64] sm:$0xf] }
  0xb2   : > { %3336 = vrot.lane.b32.xlu1 %v11244_v16, %s12217_s28  ;;  %v1679_v30 = vsel %vm12619_vm10, %v1674_v7, %v1678_v17  ;;  %v1683_v33 = vor.u32 %v1682_v21, %v1678_v17  ;;  %v12888_v39 = vld [vmem:[#allocation2 + $0x8c] sm:$0x1]  ;;  %v1700_v48 = vshll.u32 %v12886_v36, 16  ;;  %v1704_v49 = vshrl.u32 %v12886_v36, 16  ;;  %v882_v59 = vld [vmem:[#allocation2 + $0x9c] sm:$0xf] }
  0xb3   : > { %v1697_v46 = vor.u32 %v1696_v24, %v1693_v23  ;;  %v1710_v51 = vshll.u32 %v12888_v39, 16  ;;  %v674_v55 = vsel %vm12632_vm12, %v666_v45, %v673_v27  ;;  %v880_v56 = vsel %vm12639_vm13, %v675_v28, %v879_v29  ;;  %v463_v31 = vld [vmem:[%s12604_s26 + $0x68] sm:$0xf]  ;;  %v464_v5 = vld [vmem:[%s12604_s26 + $0x6c] sm:$0xf] }
  0xb4   : > { %v1684_v52 = vrot.slane %v1683_v33, 4  ;;  %v680_v54 = vshll.u32 %v12868_v50, 16  ;;  %v1702_v34 = vrot.slane %v1700_v48, 5  ;;  %v1706_v62 = vrot.slane %v1704_v49, 4  ;;  %878 = vst.msk [vmem:[#allocation2 + $0x94] sm:$0xf] %vm273_vm0, %v674_v55 }
  0xb5   : > { %v1698_v53 = vrot.slane %v1697_v46, 4  ;;  %v1712_v63 = vrot.slane %v1710_v51, 5  ;;  %881 = vst [vmem:[#allocation2 + $0x98] sm:$0x1] %v880_v56  ;;  %v683_v45 = vrot.slane %v679_v41, 4  ;;  %v685_v11 = vshrl.u32 %v462_v32, 16 }
  0xb6   : > { %v1689_v0 = vsel %vm12619_vm10, %v1684_v52, %v1688_v22  ;;  %v682_v4 = vor.u32 %v680_v54, %v679_v41  ;;  %v12907_v6 = vld [vmem:[%s12604_s26 + $0x70] sm:$0xf]  ;;  %v1707_v8 = vor.u32 %v1706_v62, %v1702_v34  ;;  %v688_v14 = vshll.u32 %v462_v32, 16  ;;  %v886_v23 = vld [vmem:[#allocation2 + $0xa4] sm:$0x1] }
  0xb7   : > { %v11245_v7 = vcombine.low %v1679_v30, %v1689_v0  ;;  %v1703_v50 = vsel %vm12619_vm10, %v1698_v53, %v1702_v34  ;;  %v687_v15 = vrot.slane %v685_v11, 7  ;;  %v694_v17 = vshrl.u32 %v463_v31, 16  ;;  %v1399_v29 = vld [vmem:[#allocation2 + $0x90] sm:$0xf]  ;;  %v889_v53 = vld [vmem:[#allocation2 + $0xa8] sm:$0xf] }
  0xb8   : > { %v883_v16 = vsel %vm12626_vm11, %v682_v4, %v882_v59  ;;  %v697_v21 = vshll.u32 %v463_v31, 16  ;;  %v1708_v22 = vrot.slane %v1707_v8, 4  ;;  %v702_v24 = vshrl.u32 %v464_v5, 16  ;;  %v893_v0 = vld [vmem:[#allocation2 + $0xb0] sm:$0x1] }
  0xb9   : > { %3338 = vrot.lane.b32.xlu0 %v11245_v7, %s12217_s28  ;;  %884 = vst [vmem:[#allocation2 + $0x9c] sm:$0xf] %v883_v16  ;;  %v705_v27 = vshll.u32 %v464_v5, 16  ;;  %v711_v28 = vshrl.u32 %v12907_v6, 16  ;;  %v690_v30 = vor.u32 %v688_v14, %v687_v15  ;;  %v692_v33 = vrot.slane %v687_v15, 4 }
  0xba   : > { %v696_v40 = vrot.slane %v694_v17, 7  ;;  %v714_v41 = vshll.u32 %v12907_v6, 16  ;;  %v1713_v46 = vsel %vm12619_vm10, %v1708_v22, %v1712_v63  ;;  %v1715_v48 = vshrl.u32 %v1399_v29, 16  ;;  %v466_v14 = vld [vmem:[%s12604_s26 + $0x74] sm:$0xf] }
  0xbb   : > { %v1718_v49 = vshll.u32 %v1399_v29, 16  ;;  %v704_v51 = vrot.slane %v702_v24, 7  ;;  %v11246_v32 = vcombine.low %v1703_v50, %v1713_v46  ;;  %v12918_v52 = vld [vmem:[#allocation2 + $0x94] sm:$0xf]  ;;  %v691_v56 = vsel %vm12632_vm12, %v683_v45, %v690_v30 }
  0xbc   : > { %v12920_v55 = vld [vmem:[#allocation2 + $0x98] sm:$0x1]  ;;  %v887_v54 = vsel %vm12639_vm13, %v692_v33, %v886_v23  ;;  %v699_v59 = vor.u32 %v697_v21, %v696_v40  ;;  %v1717_v34 = vrot.slane %v1715_v48, 4  ;;  %v1724_v63 = vshll.u32 %v12918_v52, 16  ;;  %885 = vst.msk [vmem:[#allocation2 + $0xa0] sm:$0xf] %vm273_vm0, %v691_v56 }
  0xbd   : > { %v1720_v62 = vrot.slane %v1718_v49, 5  ;;  %v1728_v31 = vshrl.u32 %v12918_v52, 16  ;;  %888 = vst [vmem:[#allocation2 + $0xa4] sm:$0x1] %v887_v54  ;;  %3340 = vrot.lane.b32.xlu1 %v11246_v32, %s12217_s28  ;;  %v1734_v4 = vshll.u32 %v12920_v55, 16  ;;  %v700_v45 = vrot.slane %v696_v40, 4 }
  0xbe   : > { %v707_v11 = vor.u32 %v705_v27, %v704_v51  ;;  %v709_v5 = vrot.slane %v704_v51, 4  ;;  %v1726_v7 = vrot.slane %v1724_v63, 5  ;;  %v890_v8 = vsel %vm12626_vm11, %v699_v59, %v889_v53  ;;  %v896_v30 = vld [vmem:[#allocation2 + $0xb4] sm:$0xf] }
  0xbf   : > { %v1721_v6 = vor.u32 %v1720_v62, %v1717_v34  ;;  %v1730_v50 = vrot.slane %v1728_v31, 4  ;;  %v1736_v15 = vrot.slane %v1734_v4, 5  ;;  %891 = vst [vmem:[#allocation2 + $0xa8] sm:$0xf] %v890_v8  ;;  %v713_v22 = vrot.slane %v711_v28, 7 }
  0xc0   : > { %v1401_v16 = vld [vmem:[#allocation2 + $0x9c] sm:$0xf]  ;;  %v708_v17 = vsel %vm12632_vm12, %v700_v45, %v707_v11  ;;  %v894_v21 = vsel %vm12639_vm13, %v709_v5, %v893_v0  ;;  %v719_v40 = vshrl.u32 %v466_v14, 16  ;;  %v722_v46 = vshll.u32 %v466_v14, 16 }
  0xc1   : > { %v1722_v23 = vrot.slane %v1721_v6, 4  ;;  %v1731_v24 = vor.u32 %v1730_v50, %v1726_v7  ;;  %v1739_v27 = vshrl.u32 %v1401_v16, 16  ;;  %v1742_v29 = vshll.u32 %v1401_v16, 16  ;;  %892 = vst.msk [vmem:[#allocation2 + $0xac] sm:$0xf] %vm273_vm0, %v708_v17 }
  0xc2   : > { %895 = vst [vmem:[#allocation2 + $0xb0] sm:$0x1] %v894_v21  ;;  %v716_v33 = vor.u32 %v714_v41, %v713_v22  ;;  %v717_v54 = vrot.slane %v713_v22, 4  ;;  %v721_v59 = vrot.slane %v719_v40, 7  ;;  %v900_v31 = vld [vmem:[#allocation2 + $0xbc] sm:$0x1] }
  0xc3   : > { %v1727_v48 = vsel %vm12619_vm10, %v1722_v23, %v1726_v7  ;;  %v1732_v49 = vrot.slane %v1731_v24, 4  ;;  %v1741_v51 = vrot.slane %v1739_v27, 4  ;;  %v1744_v32 = vrot.slane %v1742_v29, 5  ;;  %v12941_v56 = vld [vmem:[#allocation2 + $0xa0] sm:$0xf] }
  0xc4   : > { %v12943_v28 = vld [vmem:[#allocation2 + $0xa4] sm:$0x1]  ;;  %v897_v53 = vsel %vm12626_vm11, %v716_v33, %v896_v30  ;;  %v1748_v62 = vshll.u32 %v12941_v56, 16  ;;  %v1752_v63 = vshrl.u32 %v12941_v56, 16  ;;  %v724_v45 = vor.u32 %v722_v46, %v721_v59  ;;  %v1812_v29 = vld [vmem:[#allocation2 + $0x18] sm:$0xe] }
  0xc5   : > { %v1737_v41 = vsel %vm12619_vm10, %v1732_v49, %v1736_v15  ;;  %v1745_v34 = vor.u32 %v1744_v32, %v1741_v51  ;;  %898 = vst [vmem:[#allocation2 + $0xb4] sm:$0xf] %v897_v53  ;;  %v1758_v4 = vshll.u32 %v12943_v28, 16  ;;  %v726_v11 = vrot.slane %v721_v59, 4  ;;  %v1813_v51 = vld [vmem:[#allocation2 + $0x24] sm:$0xe] }
  0xc6   : > { %v11247_v0 = vcombine.low %v1727_v48, %v1737_v41  ;;  %v1750_v6 = vrot.slane %v1748_v62, 5  ;;  %v1754_v7 = vrot.slane %v1752_v63, 4  ;;  %v1403_v50 = vld [vmem:[#allocation2 + $0xa8] sm:$0xf]  ;;  %v725_v16 = vsel %vm12632_vm12, %v717_v54, %v724_v45 }
  0xc7   : > { %v1746_v5 = vrot.slane %v1745_v34, 4  ;;  %v1763_v15 = vshrl.u32 %v1403_v50, 16  ;;  %v901_v17 = vsel %vm12639_vm13, %v726_v11, %v900_v31  ;;  %v1893_v21 = vrot.slane %v12686_v57, 5  ;;  %899 = vst.msk [vmem:[#allocation2 + $0xb8] sm:$0xf] %vm273_vm0, %v725_v16 }
  0xc8   : > { %3342 = vrot.lane.b32.xlu0 %v11247_v0, %s12217_s28  ;;  %v12953_v8 = vld [vmem:[#allocation2 + $0xac] sm:$0xf]  ;;  %v1755_v22 = vor.u32 %v1754_v7, %v1750_v6  ;;  %v1760_v23 = vrot.slane %v1758_v4, 5  ;;  %v1766_v24 = vshll.u32 %v1403_v50, 16  ;;  %902 = vst [vmem:[#allocation2 + $0xbc] sm:$0x1] %v901_v17 }
  0xc9   : > { %v12955_v14 = vld [vmem:[#allocation2 + $0xb0] sm:$0x1]  ;;  %v1772_v27 = vshll.u32 %v12953_v8, 16  ;;  %v1765_v30 = vrot.slane %v1763_v15, 4  ;;  %v1776_v33 = vshrl.u32 %v12953_v8, 16  ;;  %v1751_v46 = vsel %vm12619_vm10, %v1746_v5, %v1750_v6 }
  0xca   : > { %v1782_v40 = vshll.u32 %v12955_v14, 16  ;;  %v1756_v48 = vrot.slane %v1755_v22, 4  ;;  %v1768_v49 = vrot.slane %v1766_v24, 5  ;;  %v11173_v59 = vrot.slane %v1812_v29, 9  ;;  %v1814_v15 = vld [vmem:[#allocation2 + $0x30] sm:$0xe] }
  0xcb   : > { %v1774_v57 = vrot.slane %v1772_v27, 5  ;;  %v1778_v32 = vrot.slane %v1776_v33, 4  ;;  %v1895_v53 = vrot.slane %v1893_v21, 4  ;;  %v1896_v41 = vrot.slane %v12688_v58, 5 }
  0xcc   : > { %v1405_v54 = vld [vmem:[#allocation2 + $0xb4] sm:$0xf]  ;;  %v1761_v34 = vsel %vm12619_vm10, %v1756_v48, %v1760_v23  ;;  %v1769_v62 = vor.u32 %v1768_v49, %v1765_v30  ;;  %v1784_v45 = vrot.slane %v1782_v40, 5  ;;  %v1900_v11 = vrot.slane %v12698_v18, 5 }
  0xcd   : > { %v1787_v63 = vshrl.u32 %v1405_v54, 16  ;;  %v1790_v31 = vshll.u32 %v1405_v54, 16  ;;  %v11248_v0 = vcombine.low %v1751_v46, %v1761_v34  ;;  %v1779_v4 = vor.u32 %v1778_v32, %v1774_v57  ;;  %v1815_v54 = vld [vmem:[#allocation2 + $0x3c] sm:$0xe]  ;;  %v1817_v34 = vld [vmem:[#allocation2 + $0x54] sm:$0xe] }
  0xce   : > { %v1770_v5 = vrot.slane %v1769_v62, 4  ;;  %v11174_v50 = vrot.slane %v1813_v51, 9  ;;  %v12973_v58 = vld [vmem:[#allocation2 + $0xb8] sm:$0xf]  ;;  %v1894_v22 = vsel %vm12606_vm7, %v11173_v59, %v1893_v21  ;;  %v1897_v23 = vsel %vm12606_vm7, %v1895_v53, %v1896_v41  ;;  %v1816_v41 = vld [vmem:[#allocation2 + $0x48] sm:$0xe] }
  0xcf   : > { %v1789_v6 = vrot.slane %v1787_v63, 4  ;;  %v1792_v7 = vrot.slane %v1790_v31, 5  ;;  %3344 = vrot.lane.b32.xlu1 %v11248_v0, %s12217_s28  ;;  %v1780_v16 = vrot.slane %v1779_v4, 4  ;;  %v12975_v17 = vld [vmem:[#allocation2 + $0xbc] sm:$0x1]  ;;  %v1902_v24 = vrot.slane %v1900_v11, 4 }
  0xd0   : > { %v1775_v18 = vsel %vm12619_vm10, %v1770_v5, %v1774_v57  ;;  %v1796_v29 = vshll.u32 %v12973_v58, 16  ;;  %v1800_v30 = vshrl.u32 %v12973_v58, 16  ;;  %v1806_v40 = vshll.u32 %v12975_v17, 16 }
  0xd1   : > { %v1793_v27 = vor.u32 %v1792_v7, %v1789_v6  ;;  %v1785_v33 = vsel %vm12619_vm10, %v1780_v16, %v1784_v45  ;;  %v1903_v46 = vrot.slane %v12700_v19, 5  ;;  %v11175_v21 = vrot.slane %v1814_v15, 9  ;;  %v1818_v45 = vld [vmem:[#allocation2 + $0x60] sm:$0xe] }
  0xd2   : > { %v11249_v48 = vcombine.low %v1775_v18, %v1785_v33  ;;  %v1798_v51 = vrot.slane %v1796_v29, 5  ;;  %v1802_v32 = vrot.slane %v1800_v30, 4  ;;  %v11253_v59 = vcombine.low %v1894_v22, %v1897_v23 }
  0xd3   : > { %v1794_v49 = vrot.slane %v1793_v27, 4  ;;  %v1907_v57 = vrot.slane %v12735_v20, 5  ;;  %v1910_v53 = vrot.slane %v12746_v47, 5  ;;  %v1808_v63 = vrot.slane %v1806_v40, 5 }
  0xd4   : > { %3346 = vrot.lane.b32.xlu0 %v11249_v48, %s12217_s28  ;;  %v1803_v62 = vor.u32 %v1802_v32, %v1798_v51  ;;  %v1901_v19 = vsel %vm12606_vm7, %v11174_v50, %v1900_v11  ;;  %v1904_v31 = vsel %vm12606_vm7, %v1902_v24, %v1903_v46  ;;  %v1914_v47 = vrot.slane %v12762_v12, 5  ;;  %v1820_v46 = vld [vmem:[#allocation2 + $0x78] sm:$0xe] }
  0xd5   : > { %v1799_v0 = vsel %vm12619_vm10, %v1794_v49, %v1798_v51  ;;  %v1908_v20 = vsel %vm12606_vm7, %v11175_v21, %v1907_v57  ;;  %v1909_v4 = vrot.slane %v1907_v57, 4  ;;  %v11177_v6 = vrot.slane %v1816_v41, 9 }
  0xd6   : > { %v1804_v5 = vrot.slane %v1803_v62, 4  ;;  %v1921_v7 = vrot.slane %v12780_v38, 5  ;;  %v1924_v15 = vrot.slane %v12782_v42, 5  ;;  %v11176_v50 = vrot.slane %v1815_v54, 9 }
  0xd7   : > { %v1911_v11 = vsel %vm12606_vm7, %v1909_v4, %v1910_v53  ;;  %v1916_v16 = vrot.slane %v1914_v47, 4  ;;  %v1917_v22 = vrot.slane %v12764_v13, 5  ;;  %v11178_v18 = vrot.slane %v1817_v34, 9 }
  0xd8   : > { %v1809_v23 = vsel %vm12619_vm10, %v1804_v5, %v1808_v63  ;;  %3402 = vrot.lane.b32.xlu0 %v11253_v59, %s12216_s27  ;;  %v11255_v12 = vcombine.low %v1908_v20, %v1911_v11  ;;  %v1923_v24 = vrot.slane %v1921_v7, 4  ;;  %v1922_v38 = vsel %vm12606_vm7, %v11177_v6, %v1921_v7  ;;  %v1821_v20 = vld [vmem:[#allocation2 + $0x84] sm:$0xe]  ;;  %v1824_v7 = vld [vmem:[#allocation2 + $0xa8] sm:$0xe] }
  0xd9   : > { %v11250_v27 = vcombine.low %v1799_v0, %v1809_v23  ;;  %v1928_v42 = vrot.slane %v12794_v25, 5  ;;  %v1931_v29 = vrot.slane %v12796_v10, 5  ;;  %v11254_v30 = vcombine.low %v1901_v19, %v1904_v31  ;;  %v1819_v10 = vld [vmem:[#allocation2 + $0x6c] sm:$0xe]  ;;  %v1822_v19 = vld [vmem:[#allocation2 + $0x90] sm:$0xe] }
  0xda   : > { %v1925_v13 = vsel %vm12606_vm7, %v1923_v24, %v1924_v15  ;;  %v11179_v33 = vrot.slane %v1818_v45, 9  ;;  %v1935_v40 = vrot.slane %v12822_v9, 5  ;;  %v1915_v21 = vsel %vm12606_vm7, %v11176_v50, %v1914_v47 }
  0xdb   : > { %3348 = vrot.lane.b32.xlu1 %v11250_v27, %s12217_s28  ;;  %v1918_v48 = vsel %vm12606_vm7, %v1916_v16, %v1917_v22  ;;  %v1930_v49 = vrot.slane %v1928_v42, 4  ;;  %v1938_v25 = vrot.slane %v12838_v43, 5  ;;  %v11257_v51 = vcombine.low %v1922_v38, %v1925_v13 }
  0xdc   : > { %3406 = vrot.lane.b32.xlu0 %v11255_v12, %s12216_s27  ;;  %v1929_v32 = vsel %vm12606_vm7, %v11178_v18, %v1928_v42  ;;  %v1937_v9 = vrot.slane %v1935_v40, 4  ;;  %v1942_v54 = vrot.slane %v12844_v2, 5  ;;  %v1936_v57 = vsel %vm12606_vm7, %v11179_v33, %v1935_v40  ;;  %v13061_v40 = vld [vmem:[#allocation2 + $0x10] sm:$0xf] }
  0xdd   : > { %v1932_v59 = vsel %vm12606_vm7, %v1930_v49, %v1931_v29  ;;  %v11181_v53 = vrot.slane %v1820_v46, 9  ;;  %v1949_v41 = vrot.slane %v12873_v60, 5  ;;  %v11180_v34 = vrot.slane %v1819_v10, 9  ;;  %v1825_v29 = vld [vmem:[#allocation2 + $0xb4] sm:$0xe]  ;;  %17767 = vst [vmem:[#allocation9_spill] sm:$0xff] %v13061_v40 }
  0xde   : > { %v1939_v43 = vsel %vm12606_vm7, %v1937_v9, %v1938_v25  ;;  %v1944_v62 = vrot.slane %v1942_v54, 4  ;;  %v1945_v63 = vrot.slane %v12846_v3, 5  ;;  %v11256_v2 = vcombine.low %v1915_v21, %v1918_v48  ;;  %v13075_v10 = vld [vmem:[#allocation2 + $0x18] sm:$0xf] }
  0xdf   : > { %3404 = vrot.lane.b32.xlu1 %v11254_v30, %s12216_s27  ;;  %v1951_v31 = vrot.slane %v1949_v41, 4  ;;  %v1952_v0 = vrot.slane %v12875_v61, 5  ;;  %v11258_v4 = vcombine.low %v1929_v32, %v1932_v59  ;;  %v11259_v47 = vcombine.low %v1936_v57, %v1939_v43  ;;  %v13057_v30 = vld [vmem:[#allocation2 + $0xc] sm:$0xf] }
  0xe0   : > { %3410 = vrot.lane.b32.xlu0 %v11257_v51, %s12216_s27  ;;  %v1956_v60 = vrot.slane %v12886_v36, 5  ;;  %v1950_v45 = vsel %vm12606_vm7, %v11181_v53, %v1949_v41  ;;  %v11183_v5 = vrot.slane %v1822_v19, 9  ;;  %v1963_v6 = vrot.slane %v12918_v52, 5  ;;  %v1823_v36 = vld [vmem:[#allocation2 + $0x9c] sm:$0xe] }
  0xe1   : > { %v1953_v3 = vsel %vm12606_vm7, %v1951_v31, %v1952_v0  ;;  %v1943_v61 = vsel %vm12606_vm7, %v11180_v34, %v1942_v54  ;;  %v1946_v15 = vsel %vm12606_vm7, %v1944_v62, %v1945_v63  ;;  %v11182_v11 = vrot.slane %v1821_v20, 9  ;;  %v13077_v51 = vld [vmem:[#allocation2 + $0x1c] sm:$0xf]  ;;  %v13087_v53 = vld [vmem:[#allocation2 + $0x24] sm:$0xf] }
  0xe2   : > { %v1966_v50 = vrot.slane %v12920_v55, 5  ;;  %v1958_v16 = vrot.slane %v1956_v60, 4  ;;  %v1959_v22 = vrot.slane %v12888_v39, 5  ;;  %v1965_v23 = vrot.slane %v1963_v6, 4  ;;  %v13106_v0 = vld [vmem:[#allocation2 + $0x30] sm:$0xf] }
  0xe3   : > { %3408 = vrot.lane.b32.xlu1 %v11256_v2, %s12216_s27  ;;  %v1970_v12 = vrot.slane %v12941_v56, 5  ;;  %v11261_v52 = vcombine.low %v1950_v45, %v1953_v3  ;;  %v1964_v24 = vsel %vm12606_vm7, %v11183_v5, %v1963_v6  ;;  %v11185_v18 = vrot.slane %v1824_v7, 9  ;;  %v13112_v45 = vld [vmem:[#allocation2 + $0x34] sm:$0xf]  ;;  %v13114_v3 = vld [vmem:[#allocation2 + $0x3c] sm:$0xf] }
  0xe4   : > { %3414 = vrot.lane.b32.xlu0 %v11259_v47, %s12216_s27  ;;  %v1977_v27 = vrot.slane %v12953_v8, 5  ;;  %v11260_v38 = vcombine.low %v1943_v61, %v1946_v15  ;;  %v1967_v55 = vsel %vm12606_vm7, %v1965_v23, %v1966_v50  ;;  %v11184_v42 = vrot.slane %v1823_v36, 9  ;;  %v13122_v15 = vld [vmem:[#allocation2 + $0x40] sm:$0xf] }
  0xe5   : > { %v1972_v39 = vrot.slane %v1970_v12, 4  ;;  %v1973_v56 = vrot.slane %v12943_v28, 5  ;;  %v1980_v33 = vrot.slane %v12955_v14, 5  ;;  %v1957_v8 = vsel %vm12606_vm7, %v11182_v11, %v1956_v60 }
  0xe6   : > { %v1979_v13 = vrot.slane %v1977_v27, 4  ;;  %v1960_v46 = vsel %vm12606_vm7, %v1958_v16, %v1959_v22  ;;  %v11263_v21 = vcombine.low %v1964_v24, %v1967_v55  ;;  %v1984_v48 = vrot.slane %v12973_v58, 5  ;;  %v13131_v22 = vld [vmem:[#allocation2 + $0x48] sm:$0xf]  ;;  %v467_v55 = vld [vmem:[%s12604_s26 + $0x78] sm:$0xf] }
  0xe7   : > { %3412 = vrot.lane.b32.xlu1 %v11258_v4, %s12216_s27  ;;  %v1978_v28 = vsel %vm12606_vm7, %v11185_v18, %v1977_v27  ;;  %v11186_v49 = vrot.slane %v1825_v29, 9  ;;  %v1987_v25 = vrot.slane %v12975_v17, 5  ;;  %v11267_v9 = vcombine.low %v13057_v30, %v13061_v40  ;;  %v13089_v17 = vld [vmem:[#allocation2 + $0x28] sm:$0xf]  ;;  %v13140_v18 = vld [vmem:[#allocation2 + $0x4c] sm:$0xf] }
  0xe8   : > { %3418 = vrot.lane.b32.xlu0 %v11261_v52, %s12216_s27  ;;  %v1981_v14 = vsel %vm12606_vm7, %v1979_v13, %v1980_v33  ;;  %v1986_v32 = vrot.slane %v1984_v48, 4  ;;  %v1971_v58 = vsel %vm12606_vm7, %v11184_v42, %v1970_v12  ;;  %v1974_v54 = vsel %vm12606_vm7, %v1972_v39, %v1973_v56  ;;  %v13142_v27 = vld [vmem:[#allocation2 + $0x54] sm:$0xf]  ;;  %v13151_v39 = vld [vmem:[#allocation2 + $0x60] sm:$0xf] }
  0xe9   : > { %v2038_v59 = vshrl.u32 %v13057_v30, 16  ;;  %v2041_v57 = vshll.u32 %v13057_v30, 16  ;;  %v11262_v41 = vcombine.low %v1957_v8, %v1960_v46  ;;  %v11265_v43 = vcombine.low %v1978_v28, %v1981_v14  ;;  %v13149_v30 = vld [vmem:[#allocation2 + $0x58] sm:$0xf]  ;;  %v13160_v46 = vld [vmem:[#allocation2 + $0x64] sm:$0xf] }
  0xea   : > { %v2062_v34 = vshrl.u32 %v13075_v10, 16  ;;  %v11268_v62 = vcombine.low %v13075_v10, %v13077_v51  ;;  %v13098_v63 = vsel %vm12606_vm7, %v11186_v49, %v1984_v48  ;;  %v13102_v19 = vsel %vm12606_vm7, %v1986_v32, %v1987_v25  ;;  %v13169_v49 = vld [vmem:[#allocation2 + $0x6c] sm:$0xf]  ;;  %v13227_v32 = vld [vmem:[#allocation2 + $0x94] sm:$0xf] }
  0xeb   : > { %3416 = vrot.lane.b32.xlu1 %v11260_v38, %s12216_s27  ;;  %v2065_v2 = vshll.u32 %v13075_v10, 16  ;;  %v2086_v31 = vshrl.u32 %v13087_v53, 16  ;;  %v11264_v20 = vcombine.low %v1971_v58, %v1974_v54  ;;  %v2089_v47 = vshll.u32 %v13087_v53, 16  ;;  %v13241_v52 = vld [vmem:[#allocation2 + $0xa0] sm:$0xf] }
  0xec   : > { %3422 = vrot.lane.b32.xlu0 %v11263_v21, %s12216_s27  ;;  %v11269_v60 = vcombine.low %v13087_v53, %v13089_v17  ;;  %v13116_v5 = vrot.slane %v2038_v59, 4  ;;  %v13118_v6 = vrot.slane %v2041_v57, 5  ;;  %v2110_v7 = vshrl.u32 %v13106_v0, 16  ;;  %v13177_v59 = vld [vmem:[#allocation2 + $0x70] sm:$0xf] }
  0xed   : > { %v2113_v61 = vshll.u32 %v13106_v0, 16  ;;  %v11266_v11 = vcombine.low %v13098_v63, %v13102_v19  ;;  %v13127_v50 = vrot.slane %v2062_v34, 4  ;;  %v2134_v16 = vshrl.u32 %v13114_v3, 16 }
  0xee   : > { %v13134_v23 = vrot.slane %v2065_v2, 5  ;;  %v13136_v12 = vrot.slane %v2086_v31, 4  ;;  %v2137_v24 = vshll.u32 %v13114_v3, 16  ;;  %v13144_v38 = vrot.slane %v2089_v47, 5  ;;  %v13194_v31 = vld [vmem:[#allocation2 + $0x7c] sm:$0xf] }
  0xef   : > { %3420 = vrot.lane.b32.xlu1 %v11262_v41, %s12216_s27  ;;  %v2158_v42 = vshrl.u32 %v13131_v22, 16  ;;  %v2161_v29 = vshll.u32 %v13131_v22, 16  ;;  %v13153_v56 = vrot.slane %v2110_v7, 4  ;;  %v13155_v13 = vrot.slane %v2113_v61, 5 }
  0xf0   : > { %3426 = vrot.lane.b32.xlu0 %v11265_v43, %s12216_s27  ;;  %v2182_v8 = vshrl.u32 %v13142_v27, 16  ;;  %v13163_v21 = vrot.slane %v2134_v16, 4  ;;  %v11271_v28 = vcombine.low %v13114_v3, %v13122_v15  ;;  %v2185_v14 = vshll.u32 %v13142_v27, 16  ;;  %v13205_v16 = vld [vmem:[#allocation2 + $0x88] sm:$0xf] }
  0xf1   : > { %v13172_v25 = vrot.slane %v2137_v24, 5  ;;  %v2206_v58 = vshrl.u32 %v13151_v39, 16  ;;  %v2209_v54 = vshll.u32 %v13151_v39, 16  ;;  %v13179_v57 = vrot.slane %v2158_v42, 4  ;;  %17768 = vst [vmem:[#allocation10_spill] sm:$0xff] %v13205_v16 }
  0xf2   : > { %v13181_v53 = vrot.slane %v2161_v29, 5  ;;  %v13188_v34 = vrot.slane %v2182_v8, 4  ;;  %v11273_v63 = vcombine.low %v13142_v27, %v13149_v30  ;;  %v2230_v19 = vshrl.u32 %v13169_v49, 16  ;;  %v13214_v29 = vld [vmem:[#allocation2 + $0x90] sm:$0xf] }
  0xf3   : > { %3424 = vrot.lane.b32.xlu1 %v11264_v20, %s12216_s27  ;;  %v2233_v2 = vshll.u32 %v13169_v49, 16  ;;  %v13196_v20 = vld [vmem:[#allocation2 + $0x84] sm:$0xf]  ;;  %v13199_v47 = vrot.slane %v2185_v14, 5  ;;  %v13208_v24 = vrot.slane %v2206_v58, 4  ;;  %v13210_v27 = vrot.slane %v2209_v54, 5 }
  0xf4   : > { %3494 = vrot.lane.b32.xlu0 %v11267_v9, %s12218_s29  ;;  %v13186_v9 = vld [vmem:[#allocation2 + $0x78] sm:$0xf]  ;;  %v2278_v42 = vshrl.u32 %v13196_v20, 16  ;;  %v11275_v14 = vcombine.low %v13169_v49, %v13177_v59  ;;  %v2281_v3 = vshll.u32 %v13196_v20, 16  ;;  %v13221_v43 = vld [vmem:[#allocation2 + $0x9c] sm:$0xf] }
  0xf5   : > { %v2254_v61 = vshrl.u32 %v13186_v9, 16  ;;  %v13223_v58 = vrot.slane %v2230_v19, 4  ;;  %v13225_v54 = vrot.slane %v2233_v2, 5  ;;  %v2305_v48 = vshll.u32 %v13214_v29, 16 }
  0xf6   : > { %v2326_v8 = vshrl.u32 %v13221_v43, 16  ;;  %v2329_v7 = vshll.u32 %v13221_v43, 16  ;;  %v13247_v41 = vrot.slane %v2278_v42, 4  ;;  %v13253_v19 = vrot.slane %v2281_v3, 5  ;;  %v13269_v3 = vld [vmem:[#allocation2 + $0xac] sm:$0xf] }
  0xf7   : > { %3428 = vrot.lane.b32.xlu1 %v11266_v11, %s12216_s27  ;;  %v2257_v11 = vshll.u32 %v13186_v9, 16  ;;  %v13236_v49 = vrot.slane %v2254_v61, 4  ;;  %v468_v61 = vld [vmem:[%s12604_s26 + $0x7c] sm:$0xf]  ;;  %v731_v1 = vshll.u32 %v467_v55, 16  ;;  %v2071_v10 = vshll.u32 %v13077_v51, 16 }
  0xf8   : > { %3498 = vrot.lane.b32.xlu0 %v11269_v60, %s12218_s29  ;;  %v2302_v60 = vshrl.u32 %v13214_v29, 16  ;;  %17769 = vst [vmem:[#allocation11_spill] sm:$0xff] %v13253_v19  ;;  %v13264_v42 = vrot.slane %v2326_v8, 4  ;;  %v13275_v2 = vrot.slane %v2329_v7, 5  ;;  %v728_v8 = vshrl.u32 %v467_v55, 16 }
  0xf9   : > { %v13245_v36 = vrot.slane %v2257_v11, 5  ;;  %v13262_v11 = vrot.slane %v2305_v48, 5  ;;  %v739_v44 = vshll.u32 %v468_v61, 16  ;;  %v2047_v7 = vshll.u32 %v13061_v40, 16  ;;  %v13292_v55 = vld [vmem:[#allocation2 + $0x20] sm:$0x1] }
  0xfa   : > { %v13255_v4 = vrot.slane %v2302_v60, 4  ;;  %17772 = vst [vmem:[#allocation14_spill] sm:$0xff] %v13264_v42  ;;  %v17773_v60 = vcombine.low %v13106_v0, %v13112_v45  ;;  %17774 = vst [vmem:[#allocation15_spill] sm:$0xff] %v13275_v2  ;;  %v13281_v42 = vld [vmem:[#allocation2 + $0x14] sm:$0x1]  ;;  %v17776_v2 = vshrl.u32 %v13061_v40, 16 }
  0xfb   : > { %3496 = vrot.lane.b32.xlu1 %v11268_v62, %s12218_s29  ;;  %v11277_v62 = vcombine.low %v13196_v20, %v13205_v16  ;;  %17771 = vst [vmem:[#allocation13_spill] sm:$0xff] %v13262_v11  ;;  %v736_v20 = vshrl.u32 %v468_v61, 16  ;;  %17775 = vst [vmem:[#allocation16_spill] sm:$0xff] %v13281_v42  ;;  %v2068_v61 = vor.u32 %v13134_v23, %v13127_v50  ;;  %v13301_v0 = vld [vmem:[#allocation2 + $0xb4] sm:$0xf]  ;;  %v13303_v40 = vrot.slane %v2047_v7, 5 }
  0xfc   : > { %3502 = vrot.lane.b32.xlu0 %v11271_v28, %s12218_s29  ;;  %17770 = vst [vmem:[#allocation12_spill] sm:$0xff] %v13255_v4  ;;  %v13260_v28 = vld [vmem:[#allocation2 + $0xa8] sm:$0xf]  ;;  %v2053_v11 = vrot.slane %v17776_v2, 4  ;;  %v903_v4 = vld [vmem:[#allocation2 + $0xc0] sm:$0xf] }
  0xfd   : > { %v2350_v33 = vshrl.u32 %v13260_v28, 16  ;;  %v13288_v48 = vrot.slane %v736_v20, 7  ;;  %v2073_v23 = vrot.slane %v2071_v10, 5  ;;  %v17778_v16 = vshrl.u32 %v13077_v51, 16 }
  0xfe   : > { %v2081_v7 = vshll.u32 %v13292_v55, 16  ;;  %v2069_v10 = vrot.slane %v2068_v61, 4 }
  0xff   : > { %3500 = vrot.lane.b32.xlu1 %v17773_v60, %s12218_s29  ;;  %v730_v60 = vrot.slane %v728_v8, 7  ;;  %v17777_v8 = vcombine.low %v13131_v22, %v13140_v18  ;;  %v741_v50 = vor.u32 %v739_v44, %v13288_v48  ;;  %v2077_v19 = vrot.slane %v17778_v16, 4  ;;  %v13324_v22 = vld [vmem:[#allocation2 + $0xb8] sm:$0xf] }
 0x100   : > { %3506 = vrot.lane.b32.xlu0 %v11273_v63, %s12218_s29  ;;  %v2044_v63 = vor.u32 %v13118_v6, %v13116_v5  ;;  %v2057_v5 = vshll.u32 %v13281_v42, 16  ;;  %v2374_v6 = vshrl.u32 %v13301_v0, 16  ;;  %v17779_v16 = vcombine.low %v13151_v39, %v13160_v46 }
 0x101   : > { %v733_v2 = vor.u32 %v731_v1, %v730_v60  ;;  %v734_v20 = vrot.slane %v730_v60, 4  ;;  %v2054_v60 = vor.u32 %v2053_v11, %v13303_v40  ;;  %v2078_v42 = vor.u32 %v2077_v19, %v2073_v23 }
 0x102   : > { %v2045_v44 = vrot.slane %v2044_v63, 4  ;;  %v2092_v11 = vor.u32 %v13144_v38, %v13136_v12  ;;  %v2119_v12 = vshll.u32 %v13112_v45, 16  ;;  %v17781_v38 = vshrl.u32 %v13112_v45, 16 }
 0x103   : > { %3504 = vrot.lane.b32.xlu1 %v17777_v8, %s12218_s29  ;;  %v904_v1 = vsel %vm12626_vm11, %v733_v2, %v903_v4  ;;  %v13316_v8 = vld [vmem:[#allocation2 + $0x2c] sm:$0x1]  ;;  %v2059_v4 = vrot.slane %v2057_v5, 5  ;;  %v2095_v2 = vshll.u32 %v13089_v17, 16  ;;  %v2055_v19 = vrot.slane %v2054_v60, 4 }
 0x104   : > { %3510 = vrot.lane.b32.xlu0 %v11275_v14, %s12218_s29  ;;  %v742_v14 = vsel %vm12632_vm12, %v734_v20, %v741_v50  ;;  %905 = vst [vmem:[#allocation2 + $0xc0] sm:$0xf] %v904_v1  ;;  %v17780_v20 = vshrl.u32 %v13089_v17, 16  ;;  %v2079_v61 = vrot.slane %v2078_v42, 4  ;;  %v2083_v50 = vrot.slane %v2081_v7, 5 }
 0x105   : > { %906 = vst.msk [vmem:[#allocation2 + $0xc4] sm:$0xf] %vm273_vm0, %v742_v14  ;;  %v2105_v39 = vshll.u32 %v13316_v8, 16  ;;  %v2097_v1 = vrot.slane %v2095_v2, 5  ;;  %v2116_v5 = vor.u32 %v13155_v13, %v13153_v56  ;;  %v2125_v14 = vrot.slane %v17781_v38, 4 }
 0x106   : > { %v2101_v63 = vrot.slane %v17780_v20, 4  ;;  %v13341_v35 = vrot.slane %v2350_v33, 4  ;;  %v2050_v42 = vsel %vm12619_vm10, %v2045_v44, %v13303_v40  ;;  %v2074_v60 = vsel %vm12619_vm10, %v2069_v10, %v2073_v23 }
 0x107   : > { %3508 = vrot.lane.b32.xlu1 %v17779_v16, %s12218_s29  ;;  %v13334_v16 = vld [vmem:[#allocation2 + $0x38] sm:$0x1]  ;;  %v17782_v56 = vcombine.low %v13186_v9, %v13194_v31  ;;  %v2093_v13 = vrot.slane %v2092_v11, 4  ;;  %v2107_v2 = vrot.slane %v2105_v39, 5  ;;  %v13354_v33 = vrot.slane %v2119_v12, 5 }
 0x108   : > { %3514 = vrot.lane.b32.xlu0 %v11277_v62, %s12218_s29  ;;  %v11281_v62 = vcombine.low %v13301_v0, %v13324_v22  ;;  %v2102_v7 = vor.u32 %v2101_v63, %v2097_v1  ;;  %v17783_v20 = vcombine.low %v13221_v43, %v13241_v52  ;;  %v2060_v40 = vsel %vm12619_vm10, %v2055_v19, %v2059_v4  ;;  %v13365_v9 = vld [vmem:[#allocation2 + $0x44] sm:$0x1] }
 0x109   : > { %v2084_v23 = vsel %vm12619_vm10, %v2079_v61, %v2083_v50  ;;  %v2129_v44 = vshll.u32 %v13334_v16, 16  ;;  %v2140_v10 = vor.u32 %v13172_v25, %v13163_v21  ;;  %v13369_v63 = vrot.slane %v2116_v5, 4 }
 0x10a   : > { %v2103_v11 = vrot.slane %v2102_v7, 4  ;;  %v2126_v39 = vor.u32 %v2125_v14, %v13354_v33  ;;  %v2143_v43 = vshll.u32 %v13122_v15, 16  ;;  %v17784_v12 = vshll.u32 %v13260_v28, 16 }
 0x10b   : > { %3512 = vrot.lane.b32.xlu1 %v17782_v56, %s12218_s29  ;;  %v13377_v19 = vrot.slane %v2374_v6, 4  ;;  %v17785_v50 = vshrl.u32 %v13122_v15, 16  ;;  %v17786_v21 = vcombine.low %v13214_v29, %v13227_v32  ;;  %v13386_v25 = vld [vmem:[#allocation2 + $0xc0] sm:$0xf]  ;;  %v2098_v14 = vsel %vm12619_vm10, %v2093_v13, %v2097_v1 }
 0x10c   : > { %3518 = vrot.lane.b32.xlu0 %v17783_v20, %s12218_s29  ;;  %v13375_v4 = vrot.slane %v17784_v12, 5  ;;  %v13388_v5 = vld [vmem:[#allocation2 + $0xc4] sm:$0xf]  ;;  %v2108_v6 = vsel %vm12619_vm10, %v2103_v11, %v2107_v2  ;;  %v2131_v56 = vrot.slane %v2129_v44, 5  ;;  %v2153_v7 = vshll.u32 %v13365_v9, 16 }
 0x10d   : > { %v2149_v38 = vrot.slane %v17785_v50, 4  ;;  %v11283_v20 = vcombine.low %v2050_v42, %v2060_v40  ;;  %v11284_v12 = vcombine.low %v2074_v60, %v2084_v23  ;;  %v2127_v50 = vrot.slane %v2126_v39, 4  ;;  %v13409_v23 = vld [vmem:[#allocation2 + $0x5c] sm:$0x1] }
 0x10e   : > { %v2141_v29 = vrot.slane %v2140_v10, 4  ;;  %v2122_v61 = vsel %vm12619_vm10, %v13369_v63, %v13354_v33  ;;  %v2145_v1 = vrot.slane %v2143_v43, 5  ;;  %v2164_v13 = vor.u32 %v13181_v53, %v13179_v57 }
 0x10f   : > { %3516 = vrot.lane.b32.xlu1 %v17786_v21, %s12218_s29  ;;  %v13396_v21 = vld [vmem:[#allocation2 + $0x50] sm:$0x1]  ;;  %v2167_v2 = vshll.u32 %v13140_v18, 16  ;;  %v11285_v42 = vcombine.low %v2098_v14, %v2108_v6  ;;  %v17787_v60 = vshrl.u32 %v13140_v18, 16  ;;  %v2188_v44 = vor.u32 %v13199_v47, %v13188_v34 }
 0x110   : > { %3522 = vrot.lane.b32.xlu0 %v11281_v62, %s12218_s29  ;;  %v11282_v62 = vcombine.low %v13386_v25, %v13388_v5  ;;  %v17788_v33 = vcombine.low %v13260_v28, %v13269_v3  ;;  %v2132_v57 = vsel %vm12619_vm10, %v2127_v50, %v2131_v56  ;;  %v2150_v53 = vor.u32 %v2149_v38, %v2145_v1 }
 0x111   : > { %v2173_v40 = vrot.slane %v17787_v60, 4  ;;  %v2155_v10 = vrot.slane %v2153_v7, 5  ;;  %v2177_v11 = vshll.u32 %v13396_v21, 16  ;;  %v2146_v63 = vsel %vm12619_vm10, %v2141_v29, %v2145_v1 }
 0x112   : > { %v2165_v39 = vrot.slane %v2164_v13, 4  ;;  %v2169_v34 = vrot.slane %v2167_v2, 5  ;;  %v2191_v47 = vshll.u32 %v13149_v30, 16  ;;  %v2151_v43 = vrot.slane %v2150_v53, 4  ;;  %v13437_v53 = vld [vmem:[#allocation2 + $0x74] sm:$0x1] }
 0x113   : > { %3520 = vrot.lane.b32.xlu1 %v17788_v33, %s12218_s29  ;;  %v17789_v28 = vshrl.u32 %v13149_v30, 16  ;;  %v2201_v6 = vshll.u32 %v13409_v23, 16  ;;  %v2212_v38 = vor.u32 %v13210_v27, %v13208_v24  ;;  %v2189_v7 = vrot.slane %v2188_v44, 4  ;;  %v13440_v44 = vpop.permute.xlu0 %3398 }
 0x114   : > { %3574 = vrot.lane.b32.xlu0 %v11283_v20, %s12219_s30  ;;  %v2174_v56 = vor.u32 %v2173_v40, %v2169_v34  ;;  %v2193_v50 = vrot.slane %v2191_v47, 5  ;;  %v13429_v20 = vld [vmem:[#allocation2 + $0x68] sm:$0x1]  ;;  %v2215_v29 = vshll.u32 %v13160_v46, 16  ;;  %v2156_v1 = vsel %vm12619_vm10, %v2151_v43, %v2155_v10  ;;  %17791 = vst [vmem:[#allocation17_spill] sm:$0xff] %v13440_v44 }
 0x115   : > { %v2197_v14 = vrot.slane %v17789_v28, 4  ;;  %v2179_v13 = vrot.slane %v2177_v11, 5  ;;  %v2203_v2 = vrot.slane %v2201_v6, 5  ;;  %v17790_v60 = vshrl.u32 %v13160_v46, 16 }
 0x116   : > { %v11287_v24 = vcombine.low %v2146_v63, %v2156_v1  ;;  %v2175_v27 = vrot.slane %v2174_v56, 4  ;;  %v2213_v47 = vrot.slane %v2212_v38, 4  ;;  %v2217_v28 = vrot.slane %v2215_v29, 5 }
 0x117   : > { %3524 = vrot.lane.b32.xlu1 %v11282_v62, %s12218_s29  ;;  %v2221_v33 = vrot.slane %v17790_v60, 4  ;;  %v2198_v40 = vor.u32 %v2197_v14, %v2193_v50  ;;  %v2225_v62 = vshll.u32 %v13429_v20, 16  ;;  %v2236_v10 = vor.u32 %v13225_v54, %v13223_v58  ;;  %v13459_v60 = vld [vmem:[#allocation2 + $0x80] sm:$0x1] }
 0x118   : > { %3578 = vrot.lane.b32.xlu0 %v11285_v42, %s12219_s30  ;;  %v2239_v11 = vshll.u32 %v13177_v59, 16  ;;  %v2194_v43 = vsel %vm12619_vm10, %v2189_v7, %v2193_v50  ;;  %v17792_v42 = vshrl.u32 %v13177_v59, 16  ;;  %v2249_v14 = vshll.u32 %v13437_v53, 16 }
 0x119   : > { %v2199_v6 = vrot.slane %v2198_v40, 4  ;;  %v11286_v38 = vcombine.low %v2122_v61, %v2132_v57  ;;  %v2170_v56 = vsel %vm12619_vm10, %v2165_v39, %v2169_v34  ;;  %v2222_v29 = vor.u32 %v2221_v33, %v2217_v28  ;;  %v13467_v33 = vpop.permute.xlu1 %3400 }
 0x11a   : > { %v2245_v63 = vrot.slane %v17792_v42, 4  ;;  %v2227_v1 = vrot.slane %v2225_v62, 5  ;;  %v2180_v58 = vsel %vm12619_vm10, %v2175_v27, %v2179_v13  ;;  %v2237_v7 = vrot.slane %v2236_v10, 4  ;;  %17794 = vst [vmem:[#allocation18_spill] sm:$0xff] %v13467_v33  ;;  %v13469_v27 = vpop.permute.xlu0 %3318 }
 0x11b   : > { %3576 = vrot.lane.b32.xlu1 %v11284_v12, %s12219_s30  ;;  %v2204_v54 = vsel %vm12619_vm10, %v2199_v6, %v2203_v2  ;;  %v2241_v50 = vrot.slane %v2239_v11, 5  ;;  %v17793_v12 = vshll.u32 %v13301_v0, 16  ;;  %v2218_v39 = vsel %vm12619_vm10, %v2213_v47, %v2217_v28  ;;  %17795 = vst [vmem:[#allocation19_spill] sm:$0xff] %v13469_v27  ;;  %v13480_v11 = vld [vmem:[#allocation2 + $0x8c] sm:$0x1] }
 0x11c   : > { %3582 = vrot.lane.b32.xlu0 %v11287_v24, %s12219_s30  ;;  %v11289_v57 = vcombine.low %v2194_v43, %v2204_v54  ;;  %v2223_v34 = vrot.slane %v2222_v29, 4  ;;  %v2251_v13 = vrot.slane %v2249_v14, 5  ;;  %v2260_v2 = vor.u32 %v13245_v36, %v13236_v49 }
 0x11d   : > { %v13463_v61 = vrot.slane %v17793_v12, 5  ;;  %v2246_v24 = vor.u32 %v2245_v63, %v2241_v50  ;;  %v2263_v40 = vshll.u32 %v13194_v31, 16  ;;  %v11288_v0 = vcombine.low %v2170_v56, %v2180_v58  ;;  %v17797_v63 = vld [vmem:[#allocation11_spill] sm:$0xff] }
 0x11e   : > { %v2228_v62 = vsel %vm12619_vm10, %v2223_v34, %v2227_v1  ;;  %v17796_v47 = vshrl.u32 %v13194_v31, 16  ;;  %v2273_v10 = vshll.u32 %v13459_v60, 16  ;;  %v2242_v36 = vsel %vm12619_vm10, %v2237_v7, %v2241_v50  ;;  %v13493_v7 = vld [vmem:[#allocation2 + $0x98] sm:$0x1]  ;;  %v13495_v50 = vpop.permute.xlu0 %3320 }
 0x11f   : > { %3580 = vrot.lane.b32.xlu1 %v11286_v38, %s12219_s30  ;;  %v2247_v49 = vrot.slane %v2246_v24, 4  ;;  %v2261_v43 = vrot.slane %v2260_v2, 4  ;;  %v2265_v6 = vrot.slane %v2263_v40, 5  ;;  %v11290_v42 = vcombine.low %v2218_v39, %v2228_v62  ;;  %v17798_v38 = vld [vmem:[#allocation10_spill] sm:$0xff]  ;;  %17800 = vst [vmem:[#allocation11_spill] sm:$0xff] %v13495_v50  ;;  %v17801_v24 = vld [vmem:[#allocation12_spill] sm:$0xff]  ;;  %v13500_v62 = vpop.permute.xlu1 %3322 }
 0x120   : > { %v2269_v28 = vrot.slane %v17796_v47, 4  ;;  %3586 = vrot.lane.b32.xlu0 %v11289_v57, %s12219_s30  ;;  %v2284_v14 = vor.u32 %v17797_v63, %v13247_v41  ;;  %v2287_v56 = vshll.u32 %v17798_v38, 16  ;;  %v17799_v29 = vshrl.u32 %v17798_v38, 16  ;;  %v17802_v2 = vld [vmem:[#allocation13_spill] sm:$0xff]  ;;  %17803 = vst [vmem:[#allocation10_spill] sm:$0xff] %v13500_v62 }
 0x121   : > { %v2252_v58 = vsel %vm12619_vm10, %v2247_v49, %v2251_v13  ;;  %v2275_v12 = vrot.slane %v2273_v10, 5  ;;  %v2297_v57 = vshll.u32 %v13480_v11, 16  ;;  %v2308_v40 = vor.u32 %v17802_v2, %v17801_v24 }
 0x122   : > { %v2293_v1 = vrot.slane %v17799_v29, 4  ;;  %v2270_v54 = vor.u32 %v2269_v28, %v2265_v6  ;;  %v11291_v39 = vcombine.low %v2242_v36, %v2252_v58  ;;  %v2285_v41 = vrot.slane %v2284_v14, 4  ;;  %v13511_v58 = vld [vmem:[#allocation2 + $0xa4] sm:$0x1]  ;;  %v13521_v62 = vpop.permute.xlu0 %3326 }
 0x123   : > { %3584 = vrot.lane.b32.xlu1 %v11288_v0, %s12219_s30  ;;  %v2289_v34 = vrot.slane %v2287_v56, 5  ;;  %v2266_v13 = vsel %vm12619_vm10, %v2261_v43, %v2265_v6  ;;  %v2311_v28 = vshll.u32 %v13227_v32, 16  ;;  %v17804_v10 = vshrl.u32 %v13227_v32, 16  ;;  %v17805_v43 = vld [vmem:[#allocation14_spill] sm:$0xff]  ;;  %v17806_v6 = vld [vmem:[#allocation15_spill] sm:$0xff]  ;;  %17808 = vst [vmem:[#allocation12_spill] sm:$0xff] %v13521_v62 }
 0x124   : > { %v2271_v47 = vrot.slane %v2270_v54, 4  ;;  %3590 = vrot.lane.b32.xlu0 %v11291_v39, %s12219_s30  ;;  %v2299_v36 = vrot.slane %v2297_v57, 5  ;;  %v2309_v63 = vrot.slane %v2308_v40, 4  ;;  %v2321_v14 = vshll.u32 %v13493_v7, 16 }
 0x125   : > { %v2317_v49 = vrot.slane %v17804_v10, 4  ;;  %v2294_v0 = vor.u32 %v2293_v1, %v2289_v34  ;;  %v2313_v29 = vrot.slane %v2311_v28, 5  ;;  %v2332_v54 = vor.u32 %v17806_v6, %v17805_v43 }
 0x126   : > { %v2276_v56 = vsel %vm12619_vm10, %v2271_v47, %v2275_v12  ;;  %v2335_v24 = vshll.u32 %v13241_v52, 16  ;;  %v2290_v1 = vsel %vm12619_vm10, %v2285_v41, %v2289_v34  ;;  %v17807_v39 = vshrl.u32 %v13241_v52, 16  ;;  %v13528_v41 = vpop.permute.xlu1 %3324 }
 0x127   : > { %3588 = vrot.lane.b32.xlu1 %v11290_v42, %s12219_s30  ;;  %v11292_v2 = vcombine.low %v2266_v13, %v2276_v56  ;;  %v2295_v57 = vrot.slane %v2294_v0, 4  ;;  %v2318_v10 = vor.u32 %v2317_v49, %v2313_v29  ;;  %v2323_v12 = vrot.slane %v2321_v14, 5  ;;  %17809 = vst [vmem:[#allocation13_spill] sm:$0xff] %v13528_v41  ;;  %v13532_v56 = vld [vmem:[#allocation2 + $0xb0] sm:$0x1] }
 0x128   : > { %v2341_v40 = vrot.slane %v17807_v39, 4  ;;  %v2333_v47 = vrot.slane %v2332_v54, 4  ;;  %v2337_v28 = vrot.slane %v2335_v24, 5  ;;  %v2398_v43 = vshrl.u32 %v13386_v25, 16 }
 0x129   : > { %v2401_v6 = vshll.u32 %v13386_v25, 16  ;;  %v2300_v42 = vsel %vm12619_vm10, %v2295_v57, %v2299_v36  ;;  %v2345_v13 = vshll.u32 %v13511_v58, 16  ;;  %v2314_v49 = vsel %vm12619_vm10, %v2309_v63, %v2313_v29 }
 0x12a   : > { %v11293_v34 = vcombine.low %v2290_v1, %v2300_v42  ;;  %v2319_v0 = vrot.slane %v2318_v10, 4  ;;  %v2342_v14 = vor.u32 %v2341_v40, %v2337_v28  ;;  %v2411_v54 = vshrl.u32 %v13388_v5, 16  ;;  %v2035_v40 = vld [vmem:[#allocation2 + $0xbc] sm:$0x1] }
 0x12b   : > { %3592 = vrot.lane.b32.xlu1 %v11292_v2, %s12219_s30  ;;  %v2338_v25 = vsel %vm12619_vm10, %v2333_v47, %v2337_v28  ;;  %v2347_v36 = vrot.slane %v2345_v13, 5  ;;  %v2356_v24 = vor.u32 %v13375_v4, %v13341_v35  ;;  %v2359_v1 = vshll.u32 %v13269_v3, 16 }
 0x12c   : > { %3594 = vrot.lane.b32.xlu0 %v11293_v34, %s12219_s30  ;;  %v2324_v63 = vsel %vm12619_vm10, %v2319_v0, %v2323_v12  ;;  %v2343_v29 = vrot.slane %v2342_v14, 4  ;;  %v17810_v57 = vshrl.u32 %v13269_v3, 16  ;;  %v2369_v47 = vshll.u32 %v13532_v56, 16  ;;  %v13554_v34 = vpop.permute.xlu0 %3330 }
 0x12d   : > { %v11294_v2 = vcombine.low %v2314_v49, %v2324_v63  ;;  %v2357_v10 = vrot.slane %v2356_v24, 4  ;;  %v2380_v28 = vor.u32 %v13463_v61, %v13377_v19  ;;  %v2361_v4 = vrot.slane %v2359_v1, 5  ;;  %17812 = vst [vmem:[#allocation14_spill] sm:$0xff] %v13554_v34  ;;  %v13557_v63 = vpop.permute.xlu1 %3328 }
 0x12e   : > { %v2365_v39 = vrot.slane %v17810_v57, 4  ;;  %v2348_v35 = vsel %vm12619_vm10, %v2343_v29, %v2347_v36  ;;  %v2383_v12 = vshll.u32 %v13324_v22, 16  ;;  %v17811_v42 = vshrl.u32 %v13324_v22, 16  ;;  %17813 = vst [vmem:[#allocation15_spill] sm:$0xff] %v13557_v63  ;;  %v907_v29 = vld [vmem:[#allocation2 + $0xc8] sm:$0x1] }
 0x12f   : > { %v2400_v0 = vrot.slane %v2398_v43, 4  ;;  %3596 = vrot.lane.b32.xlu1 %v11294_v2, %s12219_s30  ;;  %v11295_v49 = vcombine.low %v2338_v25, %v2348_v35  ;;  %v2381_v14 = vrot.slane %v2380_v28, 4  ;;  %v2393_v24 = vshll.u32 %v2035_v40, 16  ;;  %v2421_v25 = vld [vmem:[#allocation2 + $0xc] sm:$0xe] }
 0x130   : > { %v2389_v13 = vrot.slane %v17811_v42, 4  ;;  %v2403_v19 = vrot.slane %v2401_v6, 5  ;;  %v2366_v61 = vor.u32 %v2365_v39, %v2361_v4  ;;  %v2371_v57 = vrot.slane %v2369_v47, 5 }
 0x131   : > { %v2385_v36 = vrot.slane %v2383_v12, 5  ;;  %3598 = vrot.lane.b32.xlu0 %v11295_v49, %s12219_s30  ;;  %v743_v22 = vrot.slane %v13288_v48, 4  ;;  %v2362_v1 = vsel %vm12619_vm10, %v2357_v10, %v2361_v4  ;;  %v2395_v2 = vrot.slane %v2393_v24, 5  ;;  %v13570_v10 = vpop.permute.xlu0 %3334  ;;  %v17816_v24 = vld [vmem:[#allocation9_spill] sm:$0xff] }
 0x132   : > { %v2367_v43 = vrot.slane %v2366_v61, 4  ;;  %v2407_v39 = vshll.u32 %v13388_v5, 16  ;;  %v2404_v48 = vor.u32 %v2403_v19, %v2400_v0  ;;  %v2413_v12 = vrot.slane %v2411_v54, 4  ;;  %17815 = vst [vmem:[#allocation20_spill] sm:$0xff] %v13570_v10  ;;  %v17818_v5 = vld [vmem:[#allocation16_spill] sm:$0xff] }
 0x133   : > { %v2390_v42 = vor.u32 %v2389_v13, %v2385_v36  ;;  %v2386_v40 = vsel %vm12619_vm10, %v2381_v14, %v2385_v36  ;;  %v908_v6 = vsel %vm12639_vm13, %v743_v22, %v907_v29  ;;  %v11187_v49 = vrot.slane %v2421_v25, 9  ;;  %v13573_v14 = vpop.permute.xlu1 %3332  ;;  %v2422_v22 = vld [vmem:[#allocation2 + $0x18] sm:$0xe] }
 0x134   : > { %v2372_v47 = vsel %vm12619_vm10, %v2367_v43, %v2371_v57  ;;  %909 = vst [vmem:[#allocation2 + $0xc8] sm:$0x1] %v908_v6  ;;  %v2409_v13 = vrot.slane %v2407_v39, 5  ;;  %v2487_v61 = vrot.slane %v17816_v24, 5  ;;  %17817 = vst [vmem:[#allocation9_spill] sm:$0xff] %v13573_v14  ;;  %v2490_v29 = vrot.slane %v17818_v5, 5 }
 0x135   : > { %v2391_v35 = vrot.slane %v2390_v42, 4  ;;  %v11296_v4 = vcombine.low %v2362_v1, %v2372_v47  ;;  %v2423_v57 = vld [vmem:[#allocation2 + $0x24] sm:$0xe]  ;;  %v2405_v42 = vrot.slane %v2404_v48, 4  ;;  %v11188_v25 = vrot.slane %v2422_v22, 9 }
 0x136   : > { %v2414_v54 = vor.u32 %v2413_v12, %v2409_v13  ;;  %v2488_v1 = vsel %vm12606_vm7, %v11187_v49, %v2487_v61  ;;  %v2489_v43 = vrot.slane %v2487_v61, 4  ;;  %v2494_v6 = vrot.slane %v13077_v51, 5  ;;  %v2424_v61 = vld [vmem:[#allocation2 + $0x30] sm:$0xe]  ;;  %v2425_v22 = vld [vmem:[#allocation2 + $0x3c] sm:$0xe] }
 0x137   : > { %v2396_v36 = vsel %vm12619_vm10, %v2391_v35, %v2395_v2  ;;  %3600 = vrot.lane.b32.xlu1 %v11296_v4, %s12219_s30  ;;  %v11189_v39 = vrot.slane %v2423_v57, 9  ;;  %v2501_v47 = vrot.slane %v13089_v17, 5  ;;  %v2504_v35 = vrot.slane %v13316_v8, 5  ;;  %v13590_v48 = vpop.permute.xlu1 %3336 }
 0x138   : > { %v11297_v0 = vcombine.low %v2386_v40, %v2396_v36  ;;  %v2491_v2 = vsel %vm12606_vm7, %v2489_v43, %v2490_v29  ;;  %v13587_v40 = vpop.permute.xlu0 %3338  ;;  %v2415_v4 = vrot.slane %v2414_v54, 4  ;;  %v2497_v24 = vrot.slane %v13292_v55, 5  ;;  %17821 = vst [vmem:[#allocation5_spill] sm:$0xff] %v13590_v48 }
 0x139   : > { %17820 = vst [vmem:[#allocation16_spill] sm:$0xff] %v13587_v40  ;;  %v11299_v49 = vcombine.low %v2488_v1, %v2491_v2  ;;  %v2496_v51 = vrot.slane %v2494_v6, 4  ;;  %v2502_v5 = vsel %vm12606_vm7, %v11189_v39, %v2501_v47  ;;  %v2503_v29 = vrot.slane %v2501_v47, 4 }
 0x13a   : > { %3602 = vrot.lane.b32.xlu0 %v11297_v0, %s12219_s30  ;;  %v2410_v17 = vsel %vm12619_vm10, %v2405_v42, %v2409_v13  ;;  %v2495_v8 = vsel %vm12606_vm7, %v11188_v25, %v2494_v6  ;;  %v11190_v0 = vrot.slane %v2424_v61, 9  ;;  %v2508_v54 = vrot.slane %v13112_v45, 5 }
 0x13b   : > { %v2036_v12 = vld [vmem:[#allocation2 + $0xc8] sm:$0x1]  ;;  %v2505_v57 = vsel %vm12606_vm7, %v2503_v29, %v2504_v35  ;;  %v2511_v43 = vrot.slane %v13334_v16, 5  ;;  %v11191_v39 = vrot.slane %v2425_v22, 9  ;;  %v2515_v2 = vrot.slane %v13122_v15, 5  ;;  %v13614_v15 = vpop.permute.xlu1 %3340 }
 0x13c   : > { %v2417_v36 = vshll.u32 %v2036_v12, 16  ;;  %v11301_v1 = vcombine.low %v2502_v5, %v2505_v57  ;;  %v2498_v42 = vsel %vm12606_vm7, %v2496_v51, %v2497_v24  ;;  %v2510_v25 = vrot.slane %v2508_v54, 4  ;;  %v13609_v47 = vpop.permute.xlu0 %3342  ;;  %v2426_v12 = vld [vmem:[#allocation2 + $0x48] sm:$0xe]  ;;  %17823 = vst [vmem:[#allocation22_spill] sm:$0xff] %v13614_v15 }
 0x13d   : > { %v2518_v6 = vrot.slane %v13365_v9, 5  ;;  %17822 = vst [vmem:[#allocation21_spill] sm:$0xff] %v13609_v47  ;;  %v2516_v45 = vsel %vm12606_vm7, %v11191_v39, %v2515_v2  ;;  %v2517_v16 = vrot.slane %v2515_v2, 4  ;;  %v11300_v24 = vcombine.low %v2495_v8, %v2498_v42 }
 0x13e   : > { %3654 = vrot.lane.b32.xlu0 %v11299_v49, %s12220_s7  ;;  %v2419_v55 = vrot.slane %v2417_v36, 5  ;;  %v2427_v49 = vld [vmem:[#allocation2 + $0x54] sm:$0xe]  ;;  %v2509_v9 = vsel %vm12606_vm7, %v11190_v0, %v2508_v54  ;;  %v2512_v61 = vsel %vm12606_vm7, %v2510_v25, %v2511_v43  ;;  %v11192_v5 = vrot.slane %v2426_v12, 9  ;;  %v2429_v0 = vld [vmem:[#allocation2 + $0x6c] sm:$0xe] }
 0x13f   : > { %v2519_v36 = vsel %vm12606_vm7, %v2517_v16, %v2518_v6  ;;  %v2525_v22 = vrot.slane %v13396_v21, 5  ;;  %v2532_v8 = vrot.slane %v13409_v23, 5  ;;  %v2536_v57 = vrot.slane %v13160_v46, 5  ;;  %v2431_v12 = vld [vmem:[#allocation2 + $0x84] sm:$0xe] }
 0x140   : > { %v2420_v13 = vsel %vm12619_vm10, %v2415_v4, %v2419_v55  ;;  %v2522_v4 = vrot.slane %v13140_v18, 5  ;;  %v11303_v51 = vcombine.low %v2516_v45, %v2519_v36  ;;  %v11193_v18 = vrot.slane %v2427_v49, 9  ;;  %v2430_v45 = vld [vmem:[#allocation2 + $0x78] sm:$0xe] }
 0x141   : > { %v11298_v35 = vcombine.low %v2410_v17, %v2420_v13  ;;  %v2428_v17 = vld [vmem:[#allocation2 + $0x60] sm:$0xe]  ;;  %v2529_v55 = vrot.slane %v13149_v30, 5  ;;  %v13634_v2 = vpop.permute.xlu1 %3344  ;;  %v2538_v46 = vrot.slane %v2536_v57, 4  ;;  %v2539_v13 = vrot.slane %v13429_v20, 5 }
 0x142   : > { %3658 = vrot.lane.b32.xlu0 %v11301_v1, %s12220_s7  ;;  %v2524_v29 = vrot.slane %v2522_v4, 4  ;;  %v11302_v1 = vcombine.low %v2509_v9, %v2512_v61  ;;  %v11194_v39 = vrot.slane %v2428_v17, 9  ;;  %17825 = vst [vmem:[#allocation24_spill] sm:$0xff] %v13634_v2  ;;  %v2523_v30 = vsel %vm12606_vm7, %v11192_v5, %v2522_v4 }
 0x143   : > { %3604 = vrot.lane.b32.xlu1 %v11298_v35, %s12219_s30  ;;  %v2530_v43 = vsel %vm12606_vm7, %v11193_v18, %v2529_v55  ;;  %v2531_v21 = vrot.slane %v2529_v55, 4  ;;  %v11195_v25 = vrot.slane %v2429_v0, 9  ;;  %v2543_v6 = vrot.slane %v13177_v59, 5 }
 0x144   : > { %v2526_v23 = vsel %vm12606_vm7, %v2524_v29, %v2525_v22  ;;  %v2546_v35 = vrot.slane %v13437_v53, 5  ;;  %v2540_v59 = vsel %vm12606_vm7, %v2538_v46, %v2539_v13  ;;  %v11196_v53 = vrot.slane %v2430_v45, 9  ;;  %v4222_v45 = vld [vmem:[#allocation3] sm:$0xf] }
 0x145   : > { %v2533_v42 = vsel %vm12606_vm7, %v2531_v21, %v2532_v8  ;;  %v11304_v4 = vcombine.low %v2523_v30, %v2526_v23  ;;  %v2544_v20 = vsel %vm12606_vm7, %v11195_v25, %v2543_v6  ;;  %v2545_v9 = vrot.slane %v2543_v6, 4 }
 0x146   : > { %3662 = vrot.lane.b32.xlu0 %v11303_v51, %s12220_s7  ;;  %v13629_v54 = vpop.permute.xlu0 %3346  ;;  %v11305_v16 = vcombine.low %v2530_v43, %v2533_v42  ;;  %v2550_v61 = vrot.slane %v13194_v31, 5  ;;  %v2553_v36 = vrot.slane %v13459_v60, 5  ;;  %v2432_v51 = vld [vmem:[#allocation2 + $0x90] sm:$0xe]  ;;  %v11197_v29 = vrot.slane %v2431_v12, 9 }
 0x147   : > { %17824 = vst [vmem:[#allocation23_spill] sm:$0xff] %v13629_v54  ;;  %3656 = vrot.lane.b32.xlu1 %v11300_v24, %s12220_s7  ;;  %v2537_v24 = vsel %vm12606_vm7, %v11194_v39, %v2536_v57  ;;  %v2547_v5 = vsel %vm12606_vm7, %v2545_v9, %v2546_v35  ;;  %v2557_v22 = vrot.slane %v17798_v38, 5  ;;  %v2560_v17 = vrot.slane %v13480_v11, 5  ;;  %v2433_v57 = vld [vmem:[#allocation2 + $0x9c] sm:$0xe] }
 0x148   : > { %v11307_v55 = vcombine.low %v2544_v20, %v2547_v5  ;;  %v2552_v8 = vrot.slane %v2550_v61, 4  ;;  %v11306_v31 = vcombine.low %v2537_v24, %v2540_v59  ;;  %v11198_v43 = vrot.slane %v2432_v51, 9  ;;  %v2434_v39 = vld [vmem:[#allocation2 + $0xa8] sm:$0xe] }
 0x149   : > { %v2558_v60 = vsel %vm12606_vm7, %v11197_v29, %v2557_v22  ;;  %v2551_v11 = vsel %vm12606_vm7, %v11196_v53, %v2550_v61  ;;  %v2564_v21 = vrot.slane %v13227_v32, 5  ;;  %v2567_v23 = vrot.slane %v13493_v7, 5  ;;  %v13700_v61 = vld [vmem:[#allocation3 + $0x8] sm:$0x1] }
 0x14a   : > { %v13645_v49 = vpop.permute.xlu0 %3402  ;;  %3666 = vrot.lane.b32.xlu0 %v11305_v16, %s12220_s7  ;;  %v2554_v38 = vsel %vm12606_vm7, %v2552_v8, %v2553_v36  ;;  %v11199_v46 = vrot.slane %v2433_v57, 9  ;;  %v2571_v35 = vrot.slane %v13241_v52, 5  ;;  %v2574_v7 = vrot.slane %v13511_v58, 5 }
 0x14b   : > { %17826 = vst [vmem:[#allocation25_spill] sm:$0xff] %v13645_v49  ;;  %3660 = vrot.lane.b32.xlu1 %v11302_v1, %s12220_s7  ;;  %v2559_v1 = vrot.slane %v2557_v22, 4  ;;  %v2565_v25 = vsel %vm12606_vm7, %v11198_v43, %v2564_v21  ;;  %v2566_v6 = vrot.slane %v2564_v21, 4  ;;  %v11308_v32 = vcombine.low %v2551_v11, %v2554_v38  ;;  %v4654_v38 = vld [vmem:[#allocation3] sm:$0xe] }
 0x14c   : > { %v11200_v12 = vrot.slane %v2434_v39, 9  ;;  %v2572_v24 = vsel %vm12606_vm7, %v11199_v46, %v2571_v35  ;;  %v2573_v20 = vrot.slane %v2571_v35, 4  ;;  %v2578_v9 = vrot.slane %v13269_v3, 5 }
 0x14d   : > { %v13661_v18 = vpop.permute.xlu1 %3348  ;;  %v2561_v30 = vsel %vm12606_vm7, %v2559_v1, %v2560_v17  ;;  %v2568_v52 = vsel %vm12606_vm7, %v2566_v6, %v2567_v23  ;;  %v2581_v53 = vrot.slane %v13532_v56, 5  ;;  %v4271_v58 = vshrl.u32 %v4222_v45, 16 }
 0x14e   : > { %17827 = vst [vmem:[#allocation26_spill] sm:$0xff] %v13661_v18  ;;  %v13663_v0 = vpop.permute.xlu0 %3406  ;;  %3670 = vrot.lane.b32.xlu0 %v11307_v55, %s12220_s7  ;;  %v11309_v42 = vcombine.low %v2558_v60, %v2561_v30  ;;  %v11310_v59 = vcombine.low %v2565_v25, %v2568_v52  ;;  %v4274_v36 = vshll.u32 %v4222_v45, 16  ;;  %v2575_v5 = vsel %vm12606_vm7, %v2573_v20, %v2574_v7  ;;  %v910_v55 = vld [vmem:[%s13689_s10] sm:$0xf]  ;;  %v911_v60 = vld [vmem:[%s13689_s10 + $0x4] sm:$0xf] }
 0x14f   : > { %17828 = vst [vmem:[#allocation27_spill] sm:$0xff] %v13663_v0  ;;  %3664 = vrot.lane.b32.xlu1 %v11304_v4, %s12220_s7  ;;  %v4223_v4 = vld [vmem:[#allocation3 + $0x4] sm:$0xf]  ;;  %v2579_v29 = vsel %vm12606_vm7, %v11200_v12, %v2578_v9  ;;  %v2580_v22 = vrot.slane %v2578_v9, 4  ;;  %v11311_v56 = vcombine.low %v2572_v24, %v2575_v5  ;;  %v4273_v8 = vrot.slane %v4271_v58, 4 }
 0x150   : > { %v4280_v17 = vshll.u32 %v4223_v4, 16  ;;  %v4276_v57 = vrot.slane %v4274_v36, 5  ;;  %v4290_v11 = vshll.u32 %v13700_v61, 16  ;;  %v946_v25 = vshll.u32 %v910_v55, 16  ;;  %v1263_v58 = vld [vmem:[#allocation3 + $0xc] sm:$0xf] }
 0x151   : > { %v13677_v13 = vpop.permute.xlu1 %3404  ;;  %v2582_v1 = vsel %vm12606_vm7, %v2580_v22, %v2581_v53  ;;  %v951_v6 = vshrl.u32 %v911_v60, 16  ;;  %v954_v7 = vshll.u32 %v911_v60, 16  ;;  %v11363_v12 = vrot.slane %v4654_v38, 9  ;;  %v1267_v36 = vld [vmem:[#allocation3 + $0x14] sm:$0x1] }
 0x152   : > { %17829 = vst [vmem:[#allocation28_spill] sm:$0xff] %v13677_v13  ;;  %v13682_v16 = vpop.permute.xlu0 %3410  ;;  %3674 = vrot.lane.b32.xlu0 %v11309_v42, %s12220_s7  ;;  %v4282_v43 = vrot.slane %v4280_v17, 5  ;;  %v11312_v21 = vcombine.low %v2579_v29, %v2582_v1  ;;  %v4277_v39 = vor.u32 %v4276_v57, %v4273_v8  ;;  %v4292_v46 = vrot.slane %v4290_v11, 5 }
 0x153   : > { %17830 = vst [vmem:[#allocation29_spill] sm:$0xff] %v13682_v16  ;;  %3668 = vrot.lane.b32.xlu1 %v11306_v31, %s12220_s7  ;;  %v4284_v31 = vshrl.u32 %v4223_v4, 16  ;;  %v943_v42 = vshrl.u32 %v910_v55, 16  ;;  %v953_v24 = vrot.slane %v951_v6, 7  ;;  %v4720_v20 = vrot.slane %v4223_v4, 5 }
 0x154   : > { %v4278_v45 = vrot.slane %v4277_v39, 4  ;;  %v4723_v5 = vrot.slane %v13700_v61, 5  ;;  %v913_v61 = vld [vmem:[%s13689_s10 + $0xc] sm:$0xf] }
 0x155   : > { %v13702_v51 = vpop.permute.xlu1 %3408  ;;  %v4286_v30 = vrot.slane %v4284_v31, 4  ;;  %v945_v52 = vrot.slane %v943_v42, 7  ;;  %v956_v17 = vor.u32 %v954_v7, %v953_v24  ;;  %v958_v55 = vrot.slane %v953_v24, 4  ;;  %v914_v42 = vld [vmem:[%s13689_s10 + $0x10] sm:$0xf] }
 0x156   : > { %17831 = vst [vmem:[#allocation30_spill] sm:$0xff] %v13702_v51  ;;  %v13709_v3 = vpop.permute.xlu0 %3414  ;;  %3678 = vrot.lane.b32.xlu0 %v11311_v56, %s12220_s7  ;;  %v4283_v9 = vsel %vm12619_vm10, %v4278_v45, %v4282_v43  ;;  %v912_v56 = vld [vmem:[%s13689_s10 + $0x8] sm:$0xf]  ;;  %v4721_v57 = vsel %vm12606_vm7, %v11363_v12, %v4720_v20  ;;  %v4722_v31 = vrot.slane %v4720_v20, 4  ;;  %v968_v6 = vshrl.u32 %v913_v61, 16 }
 0x157   : > { %17832 = vst [vmem:[#allocation31_spill] sm:$0xff] %v13709_v3  ;;  %3672 = vrot.lane.b32.xlu1 %v11308_v32, %s12220_s7  ;;  %v4287_v32 = vor.u32 %v4286_v30, %v4282_v43  ;;  %v949_v22 = vrot.slane %v945_v52, 4  ;;  %v1268_v38 = vsel %vm12639_vm13, %v958_v55, %v1267_v36  ;;  %v960_v39 = vshrl.u32 %v912_v56, 16  ;;  %v13752_v7 = vld [vmem:[%s13689_s10 + $0x14] sm:$0xf] }
 0x158   : > { %1269 = vst [vmem:[#allocation3 + $0x14] sm:$0x1] %v1268_v38  ;;  %v963_v30 = vshll.u32 %v912_v56, 16  ;;  %v971_v45 = vshll.u32 %v913_v61, 16  ;;  %v1270_v24 = vld [vmem:[#allocation3 + $0x18] sm:$0xf] }
 0x159   : > { %v13717_v23 = vpop.permute.xlu1 %3412  ;;  %v4288_v53 = vrot.slane %v4287_v32, 4  ;;  %v957_v1 = vsel %vm12632_vm12, %v949_v22, %v956_v17  ;;  %v962_v12 = vrot.slane %v960_v39, 7  ;;  %v977_v20 = vshrl.u32 %v914_v42, 16  ;;  %v1274_v36 = vld [vmem:[#allocation3 + $0x20] sm:$0x1] }
 0x15a   : > { %17833 = vst [vmem:[#allocation32_spill] sm:$0xff] %v13717_v23  ;;  %v13719_v35 = vpop.permute.xlu0 %3418  ;;  %1266 = vst.msk [vmem:[#allocation3 + $0x10] sm:$0xf] %vm273_vm0, %v957_v1 }
 0x15b   : > { %17834 = vst [vmem:[#allocation33_spill] sm:$0xff] %v13719_v35  ;;  %3676 = vrot.lane.b32.xlu1 %v11310_v59, %s12220_s7  ;;  %v948_v59 = vor.u32 %v946_v25, %v945_v52  ;;  %v4293_v4 = vsel %vm12619_vm10, %v4288_v53, %v4292_v46  ;;  %v970_v52 = vrot.slane %v968_v6, 7  ;;  %v965_v53 = vor.u32 %v963_v30, %v962_v12 }
 0x15c   : > { %v11427_v60 = vcombine.low %v4283_v9, %v4293_v4  ;;  %v980_v9 = vshll.u32 %v914_v42, 16  ;;  %v13760_v56 = vrot.slane %v977_v20, 7 }
 0x15d   : > { %v13725_v29 = vpop.permute.xlu1 %3416  ;;  %v1264_v11 = vsel %vm12626_vm11, %v948_v59, %v1263_v58  ;;  %v966_v58 = vrot.slane %v962_v12, 4  ;;  %v985_v59 = vshrl.u32 %v13752_v7, 16  ;;  %v973_v22 = vor.u32 %v971_v45, %v970_v52 }
 0x15e   : > { %17835 = vst [vmem:[#allocation34_spill] sm:$0xff] %v13725_v29  ;;  %v13728_v8 = vpop.permute.xlu0 %3422  ;;  %1265 = vst [vmem:[#allocation3 + $0xc] sm:$0xf] %v1264_v11  ;;  %6159 = vrot.lane.b32.xlu0 %v11427_v60, %s12217_s28  ;;  %v975_v17 = vrot.slane %v970_v52, 4  ;;  %v1271_v4 = vsel %vm12626_vm11, %v965_v53, %v1270_v24 }
 0x15f   : > { %17836 = vst [vmem:[#allocation35_spill] sm:$0xff] %v13728_v8  ;;  %3680 = vrot.lane.b32.xlu1 %v11312_v21, %s12220_s7  ;;  %v4724_v21 = vsel %vm12606_vm7, %v4722_v31, %v4723_v5  ;;  %v4255_v1 = vld [vmem:[#allocation3 + $0x14] sm:$0x1]  ;;  %v974_v11 = vsel %vm12632_vm12, %v966_v58, %v973_v22  ;;  %1272 = vst [vmem:[#allocation3 + $0x18] sm:$0xf] %v1271_v4 }
 0x160   : > { %v11443_v25 = vcombine.low %v4721_v57, %v4724_v21  ;;  %v13764_v57 = vrot.slane %v985_v59, 7  ;;  %v1275_v38 = vsel %vm12639_vm13, %v975_v17, %v1274_v36  ;;  %v13772_v21 = vor.u32 %v980_v9, %v13760_v56  ;;  %1273 = vst.msk [vmem:[#allocation3 + $0x1c] sm:$0xf] %vm273_vm0, %v974_v11 }
 0x161   : > { %v13745_v46 = vpop.permute.xlu1 %3420  ;;  %v4225_v60 = vld [vmem:[#allocation3 + $0x10] sm:$0xf]  ;;  %1276 = vst [vmem:[#allocation3 + $0x20] sm:$0x1] %v1275_v38  ;;  %v4314_v12 = vshll.u32 %v4255_v1, 16  ;;  %v4730_v20 = vrot.slane %v4255_v1, 5 }
 0x162   : > { %17838 = vst [vmem:[#allocation36_spill] sm:$0xff] %v13745_v46  ;;  %v13749_v32 = vpop.permute.xlu0 %3426  ;;  %6239 = vrot.lane.b32.xlu0 %v11443_v25, %s12216_s27  ;;  %v4304_v42 = vshll.u32 %v4225_v60, 16  ;;  %v4308_v25 = vshrl.u32 %v4225_v60, 16  ;;  %v4727_v24 = vrot.slane %v4225_v60, 5  ;;  %v13779_v17 = vld [vmem:[#allocation3 + $0x10] sm:$0xf] }
 0x163   : > { %17839 = vst [vmem:[#allocation37_spill] sm:$0xff] %v13749_v32  ;;  %v4316_v4 = vrot.slane %v4314_v12, 5  ;;  %v4892_v60 = vshrl.u32 %v13779_v17, 16  ;;  %v4888_v12 = vshll.u32 %v13779_v17, 16 }
 0x164   : > { %v4306_v59 = vrot.slane %v4304_v42, 5  ;;  %v4310_v22 = vrot.slane %v4308_v25, 4  ;;  %v4729_v11 = vrot.slane %v4727_v24, 4  ;;  %v4862_v25 = vld [vmem:[#allocation3 + $0x14] sm:$0x1] }
 0x165   : > { %v13754_v5 = vpop.permute.xlu1 %3424  ;;  %v4224_v61 = vld [vmem:[#allocation3 + $0xc] sm:$0xf] }
 0x166   : > { %17840 = vst [vmem:[#allocation38_spill] sm:$0xff] %v13754_v5  ;;  %v13758_v55 = vpop.permute.xlu0 %3494  ;;  %v4295_v39 = vshrl.u32 %v4224_v61, 16  ;;  %v4298_v30 = vshll.u32 %v4224_v61, 16  ;;  %v4655_v6 = vld [vmem:[#allocation3 + $0xc] sm:$0xe] }
 0x167   : > { %17841 = vst [vmem:[#allocation39_spill] sm:$0xff] %v13758_v55  ;;  %v11364_v52 = vrot.slane %v4655_v6, 9  ;;  %v4830_v53 = vld [vmem:[#allocation3 + $0xc] sm:$0xf]  ;;  %v13795_v32 = vld [vmem:[#allocation3 + $0x1c] sm:$0xf] }
 0x168   : > { %v4297_v36 = vrot.slane %v4295_v39, 4  ;;  %v4300_v9 = vrot.slane %v4298_v30, 5  ;;  %v4879_v38 = vshrl.u32 %v4830_v53, 16  ;;  %v4882_v6 = vshll.u32 %v4830_v53, 16 }
 0x169   : > { %v13775_v45 = vpop.permute.xlu1 %3428  ;;  %v4728_v61 = vsel %vm12606_vm7, %v11364_v52, %v4727_v24  ;;  %v4731_v39 = vsel %vm12606_vm7, %v4729_v11, %v4730_v20  ;;  %v11459_v42 = vcombine.low %v4830_v53, %v13779_v17  ;;  %v4890_v53 = vrot.slane %v4888_v12, 5 }
 0x16a   : > { %17842 = vst [vmem:[#allocation40_spill] sm:$0xff] %v13775_v45  ;;  %v13777_v58 = vpop.permute.xlu0 %3498  ;;  %v4301_v31 = vor.u32 %v4300_v9, %v4297_v36  ;;  %v4311_v45 = vor.u32 %v4310_v22, %v4306_v59  ;;  %v4881_v30 = vrot.slane %v4879_v38, 4  ;;  %v11444_v36 = vcombine.low %v4728_v61, %v4731_v39  ;;  %v13792_v22 = vld [vmem:[#allocation3 + $0x18] sm:$0xf]  ;;  %v5262_v39 = vld [vmem:[#allocation3 + $0xc] sm:$0xe] }
 0x16b   : > { %17843 = vst [vmem:[#allocation41_spill] sm:$0xff] %v13777_v58  ;;  %v4884_v9 = vrot.slane %v4882_v6, 5  ;;  %6335 = vrot.lane.b32.xlu0 %v11459_v42, %s12218_s29  ;;  %v4903_v20 = vshrl.u32 %v13792_v22, 16  ;;  %v4906_v11 = vshll.u32 %v13792_v22, 16  ;;  %v4894_v38 = vrot.slane %v4892_v60, 4 }
 0x16c   : > { %v4302_v52 = vrot.slane %v4301_v31, 4  ;;  %v4312_v24 = vrot.slane %v4311_v45, 4  ;;  %v4916_v45 = vshrl.u32 %v13795_v32, 16  ;;  %v11460_v61 = vcombine.low %v13792_v22, %v13795_v32  ;;  %v4863_v6 = vld [vmem:[#allocation3 + $0x20] sm:$0x1] }
 0x16d   : > { %v13784_v1 = vpop.permute.xlu1 %3496  ;;  %v4905_v2 = vrot.slane %v4903_v20, 4  ;;  %v4908_v8 = vrot.slane %v4906_v11, 5  ;;  %v4885_v12 = vor.u32 %v4884_v9, %v4881_v30  ;;  %v4895_v47 = vor.u32 %v4894_v38, %v4890_v53  ;;  %v5263_v20 = vld [vmem:[#allocation3 + $0x18] sm:$0xe] }
 0x16e   : > { %17844 = vst [vmem:[#allocation42_spill] sm:$0xff] %v13784_v1  ;;  %v13790_v18 = vpop.permute.xlu0 %3502  ;;  %v4307_v54 = vsel %vm12619_vm10, %v4302_v52, %v4306_v59  ;;  %v4317_v31 = vsel %vm12619_vm10, %v4312_v24, %v4316_v4  ;;  %v4898_v59 = vshll.u32 %v4862_v25, 16  ;;  %v4912_v52 = vshll.u32 %v13795_v32, 16 }
 0x16f   : > { %17845 = vst [vmem:[#allocation43_spill] sm:$0xff] %v13790_v18  ;;  %v11428_v5 = vcombine.low %v4307_v54, %v4317_v31  ;;  %v4918_v4 = vrot.slane %v4916_v45, 4  ;;  %v4886_v24 = vrot.slane %v4885_v12, 4  ;;  %v4909_v46 = vor.u32 %v4908_v8, %v4905_v2  ;;  %v5439_v45 = vld [vmem:[#allocation3 + $0x18] sm:$0xf] }
 0x170   : > { %v4922_v22 = vshll.u32 %v4863_v6, 16  ;;  %v11379_v15 = vrot.slane %v5262_v39, 9  ;;  %v4896_v35 = vrot.slane %v4895_v47, 4  ;;  %v4900_v40 = vrot.slane %v4898_v59, 5  ;;  %v5440_v12 = vld [vmem:[#allocation3 + $0x1c] sm:$0xf] }
 0x171   : > { %v13806_v42 = vpop.permute.xlu1 %3500  ;;  %6161 = vrot.lane.b32.xlu1 %v11428_v5, %s12217_s28  ;;  %v4914_v29 = vrot.slane %v4912_v52, 5  ;;  %v5328_v54 = vrot.slane %v13779_v17, 5  ;;  %v4891_v9 = vsel %vm12619_vm10, %v4886_v24, %v4890_v53  ;;  %v4910_v11 = vrot.slane %v4909_v46, 4 }
 0x172   : > { %17846 = vst [vmem:[#allocation44_spill] sm:$0xff] %v13806_v42  ;;  %v13808_v60 = vpop.permute.xlu0 %3506  ;;  %v4924_v38 = vrot.slane %v4922_v22, 5  ;;  %v5331_v31 = vrot.slane %v4862_v25, 5  ;;  %v4901_v2 = vsel %vm12619_vm10, %v4896_v35, %v4900_v40  ;;  %v11380_v46 = vrot.slane %v5263_v20, 9  ;;  %v1277_v22 = vld [vmem:[#allocation3 + $0x24] sm:$0xf] }
 0x173   : > { %17847 = vst [vmem:[#allocation45_spill] sm:$0xff] %v13808_v60  ;;  %v4919_v47 = vor.u32 %v4918_v4, %v4914_v29  ;;  %v5329_v8 = vsel %vm12606_vm7, %v11379_v15, %v5328_v54  ;;  %v5330_v17 = vrot.slane %v5328_v54, 4  ;;  %v11475_v39 = vcombine.low %v4891_v9, %v4901_v2  ;;  %v5471_v9 = vld [vmem:[#allocation3 + $0x20] sm:$0x1] }
 0x174   : > { %v4915_v53 = vsel %vm12619_vm10, %v4910_v11, %v4914_v29  ;;  %v5335_v25 = vrot.slane %v13795_v32, 5  ;;  %v5338_v40 = vrot.slane %v4863_v6, 5  ;;  %v5488_v35 = vshrl.u32 %v5439_v45, 16 }
 0x175   : > { %v13813_v30 = vpop.permute.xlu1 %3504  ;;  %6241 = vrot.lane.b32.xlu1 %v11444_v36, %s12216_s27  ;;  %v4920_v59 = vrot.slane %v4919_v47, 4  ;;  %v5332_v52 = vsel %vm12606_vm7, %v5330_v17, %v5331_v31  ;;  %6415 = vrot.lane.b32.xlu0 %v11475_v39, %s12219_s30  ;;  %v5491_v24 = vshll.u32 %v5439_v45, 16  ;;  %v5501_v20 = vshrl.u32 %v5440_v12, 16 }
 0x176   : > { %17848 = vst [vmem:[#allocation46_spill] sm:$0xff] %v13813_v30  ;;  %v13817_v5 = vpop.permute.xlu0 %3510  ;;  %v11491_v15 = vcombine.low %v5329_v8, %v5332_v52  ;;  %v5337_v36 = vrot.slane %v5335_v25, 4  ;;  %v5490_v32 = vrot.slane %v5488_v35, 4  ;;  %v5336_v11 = vsel %vm12606_vm7, %v11380_v46, %v5335_v25  ;;  %v1281_v52 = vld [vmem:[#allocation3 + $0x2c] sm:$0x1] }
 0x177   : > { %17849 = vst [vmem:[#allocation47_spill] sm:$0xff] %v13817_v5  ;;  %v4925_v29 = vsel %vm12619_vm10, %v4920_v59, %v4924_v38  ;;  %v5493_v31 = vrot.slane %v5491_v24, 5  ;;  %v11507_v2 = vcombine.low %v5439_v45, %v5440_v12  ;;  %v983_v8 = vrot.slane %v13760_v56, 4  ;;  %v4226_v35 = vld [vmem:[#allocation3 + $0x18] sm:$0xf] }
 0x178   : > { %v11476_v6 = vcombine.low %v4915_v53, %v4925_v29  ;;  %v5339_v47 = vsel %vm12606_vm7, %v5337_v36, %v5338_v40  ;;  %v17852_v17 = vshll.u32 %v13752_v7, 16  ;;  %v1278_v39 = vsel %vm12626_vm11, %v13772_v21, %v1277_v22  ;;  %v13858_v22 = vld [vmem:[#allocation3 + $0x1c] sm:$0xf] }
 0x179   : > { %v13829_v4 = vpop.permute.xlu1 %3508  ;;  %6337 = vrot.lane.b32.xlu1 %v11460_v61, %s12218_s29  ;;  %v5871_v61 = vld [vmem:[#allocation3 + $0x18] sm:$0xe]  ;;  %6495 = vrot.lane.b32.xlu0 %v11491_v15, %s12220_s7  ;;  %1279 = vst [vmem:[#allocation3 + $0x24] sm:$0xf] %v1278_v39  ;;  %v5494_v45 = vor.u32 %v5493_v31, %v5490_v32  ;;  %v5497_v46 = vshll.u32 %v5440_v12, 16  ;;  %v5503_v25 = vrot.slane %v5501_v20, 4  ;;  %v11492_v21 = vcombine.low %v5336_v11, %v5339_v47 }
 0x17a   : > { %17850 = vst [vmem:[#allocation48_spill] sm:$0xff] %v13829_v4  ;;  %v13832_v54 = vpop.permute.xlu0 %3514  ;;  %v990_v38 = vor.u32 %v17852_v17, %v13764_v57  ;;  %v5507_v59 = vshll.u32 %v5471_v9, 16  ;;  %v992_v40 = vrot.slane %v13764_v57, 4  ;;  %v11395_v24 = vrot.slane %v5871_v61, 9  ;;  %v13862_v31 = vld [vmem:[#allocation3 + $0x20] sm:$0x1] }
 0x17b   : > { %17851 = vst [vmem:[#allocation49_spill] sm:$0xff] %v13832_v54  ;;  %v5495_v15 = vrot.slane %v5494_v45, 4  ;;  %v5499_v36 = vrot.slane %v5497_v46, 5  ;;  %v5937_v32 = vrot.slane %v5440_v12, 5  ;;  %v5940_v20 = vrot.slane %v5471_v9, 5 }
 0x17c   : > { %v991_v7 = vsel %vm12632_vm12, %v983_v8, %v990_v38  ;;  %v1282_v29 = vsel %vm12639_vm13, %v992_v40, %v1281_v52  ;;  %v5509_v11 = vrot.slane %v5507_v59, 5  ;;  %v4319_v47 = vshrl.u32 %v4226_v35, 16 }
 0x17d   : > { %v13848_v53 = vpop.permute.xlu1 %3512  ;;  %6417 = vrot.lane.b32.xlu1 %v11476_v6, %s12219_s30  ;;  %1280 = vst.msk [vmem:[#allocation3 + $0x28] sm:$0xf] %vm273_vm0, %v991_v7  ;;  %6591 = vrot.lane.b32.xlu0 %v11507_v2, %s12221_s11  ;;  %v5500_v57 = vsel %vm12619_vm10, %v5495_v15, %v5499_v36  ;;  %v5504_v6 = vor.u32 %v5503_v25, %v5499_v36  ;;  %1283 = vst [vmem:[#allocation3 + $0x2c] sm:$0x1] %v1282_v29  ;;  %v5939_v9 = vrot.slane %v5937_v32, 4 }
 0x17e   : > { %17853 = vst [vmem:[#allocation50_spill] sm:$0xff] %v13848_v53  ;;  %v13851_v56 = vpop.permute.xlu0 %3518  ;;  %v5938_v12 = vsel %vm12606_vm7, %v11395_v24, %v5937_v32  ;;  %v4322_v38 = vshll.u32 %v4226_v35, 16  ;;  %v4328_v39 = vshll.u32 %v13858_v22, 16  ;;  %v4321_v2 = vrot.slane %v4319_v47, 4 }
 0x17f   : > { %17854 = vst [vmem:[#allocation51_spill] sm:$0xff] %v13851_v56  ;;  %v5505_v61 = vrot.slane %v5504_v6, 4  ;;  %v4332_v45 = vshrl.u32 %v13858_v22, 16  ;;  %v4338_v46 = vshll.u32 %v13862_v31, 16  ;;  %v5941_v59 = vsel %vm12606_vm7, %v5939_v9, %v5940_v20 }
 0x180   : > { %v5441_v25 = vld [vmem:[#allocation3 + $0x24] sm:$0xf]  ;;  %v4324_v52 = vrot.slane %v4322_v38, 5  ;;  %v13879_v7 = vrot.slane %v4328_v39, 5  ;;  %v11539_v36 = vcombine.low %v5938_v12, %v5941_v59 }
 0x181   : > { %v13864_v8 = vpop.permute.xlu1 %3516  ;;  %6497 = vrot.lane.b32.xlu1 %v11492_v21, %s12220_s7  ;;  %v5512_v35 = vshrl.u32 %v5441_v25, 16  ;;  %v5515_v15 = vshll.u32 %v5441_v25, 16  ;;  %v5510_v21 = vsel %vm12619_vm10, %v5505_v61, %v5509_v11  ;;  %v5872_v24 = vld [vmem:[#allocation3 + $0x24] sm:$0xe]  ;;  %v4340_v56 = vrot.slane %v4338_v46, 5 }
 0x182   : > { %17855 = vst [vmem:[#allocation52_spill] sm:$0xff] %v13864_v8  ;;  %v13869_v17 = vpop.permute.xlu0 %3522  ;;  %v11523_v6 = vcombine.low %v5500_v57, %v5510_v21  ;;  %v4325_v47 = vor.u32 %v4324_v52, %v4321_v2  ;;  %v11396_v12 = vrot.slane %v5872_v24, 9  ;;  %v4228_v59 = vld [vmem:[#allocation3 + $0x24] sm:$0xf] }
 0x183   : > { %17856 = vst [vmem:[#allocation53_spill] sm:$0xff] %v13869_v17  ;;  %v4334_v17 = vrot.slane %v4332_v45, 4  ;;  %v5514_v20 = vrot.slane %v5512_v35, 4  ;;  %v5517_v9 = vrot.slane %v5515_v15, 5 }
 0x184   : > { %v5442_v32 = vld [vmem:[#allocation3 + $0x28] sm:$0xf]  ;;  %6671 = vrot.lane.b32.xlu0 %v11523_v6, %s12222_s12  ;;  %v4326_v54 = vrot.slane %v4325_v47, 4  ;;  %v4864_v48 = vld [vmem:[#allocation3 + $0x2c] sm:$0x1] }
 0x185   : > { %v13881_v40 = vpop.permute.xlu1 %3520  ;;  %v5525_v38 = vshrl.u32 %v5442_v32, 16  ;;  %v11508_v39 = vcombine.low %v5441_v25, %v5442_v32  ;;  %v5521_v8 = vshll.u32 %v5442_v32, 16  ;;  %v4335_v11 = vor.u32 %v4334_v17, %v13879_v7  ;;  %v13896_v24 = vld [vmem:[#allocation3 + $0x28] sm:$0xf] }
 0x186   : > { %17857 = vst [vmem:[#allocation54_spill] sm:$0xff] %v13881_v40  ;;  %v13885_v29 = vpop.permute.xlu0 %3574  ;;  %v5472_v40 = vld [vmem:[#allocation3 + $0x2c] sm:$0x1]  ;;  %v5518_v57 = vor.u32 %v5517_v9, %v5514_v20  ;;  %v5944_v46 = vrot.slane %v5442_v32, 5  ;;  %v4331_v32 = vsel %vm12619_vm10, %v4326_v54, %v13879_v7  ;;  %v4946_v3 = vshll.u32 %v4864_v48, 16 }
 0x187   : > { %17858 = vst [vmem:[#allocation55_spill] sm:$0xff] %v13885_v29  ;;  %6593 = vrot.lane.b32.xlu1 %v11508_v39, %s12221_s11  ;;  %v5527_v2 = vrot.slane %v5525_v38, 4  ;;  %v5531_v45 = vshll.u32 %v5472_v40, 16  ;;  %v5523_v25 = vrot.slane %v5521_v8, 5  ;;  %v4336_v35 = vrot.slane %v4335_v11, 4 }
 0x188   : > { %v5947_v15 = vrot.slane %v5472_v40, 5  ;;  %v5519_v21 = vrot.slane %v5518_v57, 4  ;;  %v5945_v6 = vsel %vm12606_vm7, %v11396_v12, %v5944_v46  ;;  %v5946_v17 = vrot.slane %v5944_v46, 4  ;;  %6751 = vrot.lane.b32.xlu0 %v11539_v36, %s12223_s13  ;;  %v13902_v20 = vld [vmem:[#allocation3 + $0x2c] sm:$0x1] }
 0x189   : > { %v13889_v61 = vpop.permute.xlu1 %3524  ;;  %v5528_v47 = vor.u32 %v5527_v2, %v5523_v25  ;;  %v4343_v8 = vshrl.u32 %v4228_v59, 16  ;;  %v4656_v40 = vld [vmem:[#allocation3 + $0x18] sm:$0xe]  ;;  %v4341_v39 = vsel %vm12619_vm10, %v4336_v35, %v4340_v56  ;;  %v4346_v36 = vshll.u32 %v4228_v59, 16 }
 0x18a   : > { %17859 = vst [vmem:[#allocation56_spill] sm:$0xff] %v13889_v61  ;;  %v13892_v52 = vpop.permute.xlu0 %3578  ;;  %v5533_v61 = vrot.slane %v5531_v45, 5  ;;  %v5524_v38 = vsel %vm12619_vm10, %v5519_v21, %v5523_v25  ;;  %v5948_v11 = vsel %vm12606_vm7, %v5946_v17, %v5947_v15  ;;  %v4352_v2 = vshll.u32 %v13896_v24, 16  ;;  %v4657_v21 = vld [vmem:[#allocation3 + $0x24] sm:$0xe] }
 0x18b   : > { %17860 = vst [vmem:[#allocation57_spill] sm:$0xff] %v13892_v52  ;;  %v5529_v57 = vrot.slane %v5528_v47, 4  ;;  %v11540_v54 = vcombine.low %v5945_v6, %v5948_v11  ;;  %v4345_v7 = vrot.slane %v4343_v8, 4  ;;  %v4348_v45 = vrot.slane %v4346_v36, 5  ;;  %v4834_v8 = vld [vmem:[#allocation3 + $0x24] sm:$0xf] }
 0x18c   : > { %v4356_v46 = vshrl.u32 %v13896_v24, 16  ;;  %v4362_v53 = vshll.u32 %v13902_v20, 16  ;;  %v11365_v25 = vrot.slane %v4656_v40, 9  ;;  %v4354_v35 = vrot.slane %v4352_v2, 5  ;;  %v13930_v2 = vld [vmem:[#allocation3 + $0x28] sm:$0xf] }
 0x18d   : > { %v13904_v9 = vpop.permute.xlu1 %3576  ;;  %v5534_v56 = vsel %vm12619_vm10, %v5529_v57, %v5533_v61  ;;  %6753 = vrot.lane.b32.xlu0 %v11540_v54, %s12223_s13  ;;  %v4734_v59 = vrot.slane %v13858_v22, 5  ;;  %v4737_v15 = vrot.slane %v13862_v31, 5  ;;  %v4349_v17 = vor.u32 %v4348_v45, %v4345_v7 }
 0x18e   : > { %17861 = vst [vmem:[#allocation58_spill] sm:$0xff] %v13904_v9  ;;  %v13912_v12 = vpop.permute.xlu0 %3582  ;;  %v11524_v6 = vcombine.low %v5524_v38, %v5534_v56  ;;  %v4358_v47 = vrot.slane %v4356_v46, 4  ;;  %v11429_v36 = vcombine.low %v4331_v32, %v4341_v39  ;;  %v4364_v40 = vrot.slane %v4362_v53, 5  ;;  %v916_v46 = vld [vmem:[%s13689_s10 + $0x18] sm:$0xf] }
 0x18f   : > { %17862 = vst [vmem:[#allocation59_spill] sm:$0xff] %v13912_v12  ;;  %v4735_v61 = vsel %vm12606_vm7, %v11365_v25, %v4734_v59  ;;  %v4736_v57 = vrot.slane %v4734_v59, 4  ;;  %v4350_v22 = vrot.slane %v4349_v17, 4  ;;  %v11366_v38 = vrot.slane %v4657_v21, 9 }
 0x190   : > { %6673 = vrot.lane.b32.xlu1 %v11524_v6, %s12222_s12  ;;  %v4359_v31 = vor.u32 %v4358_v47, %v4354_v35  ;;  %v4741_v7 = vrot.slane %v13896_v24, 5  ;;  %v4744_v53 = vrot.slane %v13902_v20, 5  ;;  %v4927_v39 = vshrl.u32 %v4834_v8, 16  ;;  %v917_v47 = vld [vmem:[%s13689_s10 + $0x1c] sm:$0xf] }
 0x191   : > { %v13922_v11 = vpop.permute.xlu1 %3580  ;;  %v4738_v32 = vsel %vm12606_vm7, %v4736_v57, %v4737_v15  ;;  %v4930_v45 = vshll.u32 %v4834_v8, 16  ;;  %v4355_v25 = vsel %vm12619_vm10, %v4350_v22, %v4354_v35  ;;  %v4940_v24 = vshrl.u32 %v13930_v2, 16 }
 0x192   : > { %17863 = vst [vmem:[#allocation60_spill] sm:$0xff] %v13922_v11  ;;  %v13926_v54 = vpop.permute.xlu0 %3586  ;;  %v4360_v56 = vrot.slane %v4359_v31, 4  ;;  %v11445_v59 = vcombine.low %v4735_v61, %v4738_v32  ;;  %v4743_v6 = vrot.slane %v4741_v7, 4  ;;  %v4929_v17 = vrot.slane %v4927_v39, 4 }
 0x193   : > { %17864 = vst [vmem:[#allocation61_spill] sm:$0xff] %v13926_v54  ;;  %v4932_v21 = vrot.slane %v4930_v45, 5  ;;  %v11461_v20 = vcombine.low %v4834_v8, %v13930_v2  ;;  %v994_v57 = vshrl.u32 %v916_v46, 16  ;;  %v4742_v22 = vsel %vm12606_vm7, %v11366_v38, %v4741_v7 }
 0x194   : > { %6163 = vrot.lane.b32.xlu1 %v11429_v36, %s12217_s28  ;;  %v4365_v15 = vsel %vm12619_vm10, %v4360_v56, %v4364_v40  ;;  %6243 = vrot.lane.b32.xlu0 %v11445_v59, %s12216_s27  ;;  %v4745_v31 = vsel %vm12606_vm7, %v4743_v6, %v4744_v53  ;;  %v997_v32 = vshll.u32 %v916_v46, 16  ;;  %v1002_v40 = vshrl.u32 %v917_v47, 16  ;;  %v1284_v56 = vld [vmem:[#allocation3 + $0x30] sm:$0xf]  ;;  %v5264_v46 = vld [vmem:[#allocation3 + $0x24] sm:$0xe] }
 0x195   : > { %v13945_v35 = vpop.permute.xlu1 %3584  ;;  %v11430_v61 = vcombine.low %v4355_v25, %v4365_v15  ;;  %v996_v39 = vrot.slane %v994_v57, 7  ;;  %v1005_v45 = vshll.u32 %v917_v47, 16  ;;  %v4933_v59 = vor.u32 %v4932_v21, %v4929_v17  ;;  %v1288_v47 = vld [vmem:[#allocation3 + $0x38] sm:$0x1] }
 0x196   : > { %17865 = vst [vmem:[#allocation62_spill] sm:$0xff] %v13945_v35  ;;  %v13951_v36 = vpop.permute.xlu0 %3590  ;;  %v4936_v8 = vshll.u32 %v13930_v2, 16  ;;  %v4942_v5 = vrot.slane %v4940_v24, 4  ;;  %v11446_v25 = vcombine.low %v4742_v22, %v4745_v31  ;;  %v1004_v53 = vrot.slane %v1002_v40, 7 }
 0x197   : > { %17866 = vst [vmem:[#allocation63_spill] sm:$0xff] %v13951_v36  ;;  %v999_v38 = vor.u32 %v997_v32, %v996_v39  ;;  %v1000_v7 = vrot.slane %v996_v39, 4  ;;  %v4934_v6 = vrot.slane %v4933_v59, 4  ;;  %v4948_v21 = vrot.slane %v4946_v3, 5  ;;  %v918_v36 = vld [vmem:[%s13689_s10 + $0x20] sm:$0xf] }
 0x198   : > { %6165 = vrot.lane.b32.xlu1 %v11430_v61, %s12217_s28  ;;  %6339 = vrot.lane.b32.xlu0 %v11461_v20, %s12218_s29  ;;  %v4938_v15 = vrot.slane %v4936_v8, 5  ;;  %v1007_v57 = vor.u32 %v1005_v45, %v1004_v53  ;;  %v1009_v24 = vrot.slane %v1004_v53, 4  ;;  %v11381_v20 = vrot.slane %v5264_v46, 9  ;;  %v919_v32 = vld [vmem:[%s13689_s10 + $0x24] sm:$0xf] }
 0x199   : > { %v1285_v17 = vsel %vm12626_vm11, %v999_v38, %v1284_v56  ;;  %v13959_v10 = vpop.permute.xlu1 %3588  ;;  %v5342_v22 = vrot.slane %v13930_v2, 5  ;;  %v5345_v31 = vrot.slane %v4864_v48, 5  ;;  %v1011_v48 = vshrl.u32 %v918_v36, 16 }
 0x19a   : > { %17867 = vst [vmem:[#allocation64_spill] sm:$0xff] %v13959_v10  ;;  %1286 = vst [vmem:[#allocation3 + $0x30] sm:$0xf] %v1285_v17  ;;  %v4943_v61 = vor.u32 %v4942_v5, %v4938_v15  ;;  %v1008_v40 = vsel %vm12632_vm12, %v1000_v7, %v1007_v57  ;;  %v1289_v3 = vsel %vm12639_vm13, %v1009_v24, %v1288_v47  ;;  %v1014_v56 = vshll.u32 %v918_v36, 16  ;;  %v1291_v47 = vld [vmem:[#allocation3 + $0x3c] sm:$0xf] }
 0x19b   : > { %1287 = vst.msk [vmem:[#allocation3 + $0x34] sm:$0xf] %vm273_vm0, %v1008_v40  ;;  %v4939_v5 = vsel %vm12619_vm10, %v4934_v6, %v4938_v15  ;;  %1290 = vst [vmem:[#allocation3 + $0x38] sm:$0x1] %v1289_v3  ;;  %v5344_v2 = vrot.slane %v5342_v22, 4  ;;  %v1019_v59 = vshrl.u32 %v919_v32, 16 }
 0x19c   : > { %6245 = vrot.lane.b32.xlu1 %v11446_v25, %s12216_s27  ;;  %v4944_v45 = vrot.slane %v4943_v61, 4  ;;  %v5343_v25 = vsel %vm12606_vm7, %v11381_v20, %v5342_v22  ;;  %v1013_v53 = vrot.slane %v1011_v48, 7  ;;  %v1022_v6 = vshll.u32 %v919_v32, 16 }
 0x19d   : > { %v5346_v38 = vsel %vm12606_vm7, %v5344_v2, %v5345_v31  ;;  %v13979_v46 = vrot.slane %v1019_v59, 7  ;;  %v13981_v15 = vpop.permute.xlu1 %3592 }
 0x19e   : > { %v13963_v39 = vpop.permute.xlu0 %3594  ;;  %v4949_v8 = vsel %vm12619_vm10, %v4944_v45, %v4948_v21  ;;  %17869 = vst [vmem:[#allocation66_spill] sm:$0xff] %v13981_v15  ;;  %v11493_v17 = vcombine.low %v5343_v25, %v5346_v38  ;;  %v1016_v61 = vor.u32 %v1014_v56, %v1013_v53 }
 0x19f   : > { %17868 = vst [vmem:[#allocation65_spill] sm:$0xff] %v13963_v39  ;;  %v11477_v7 = vcombine.low %v4939_v5, %v4949_v8  ;;  %v1024_v32 = vor.u32 %v1022_v6, %v13979_v46 }
 0x1a0   : > { %v1292_v45 = vsel %vm12626_vm11, %v1016_v61, %v1291_v47 }
 0x1a1   : > { %v4836_v36 = vld [vmem:[#allocation3 + $0x30] sm:$0xf]  ;;  %6419 = vrot.lane.b32.xlu0 %v11477_v7, %s12219_s30  ;;  %1293 = vst [vmem:[#allocation3 + $0x3c] sm:$0xf] %v1292_v45  ;;  %v13992_v39 = vpop.permute.xlu1 %3596 }
 0x1a2   : > { %v5265_v21 = vld [vmem:[#allocation3 + $0x30] sm:$0xe]  ;;  %v4951_v20 = vshrl.u32 %v4836_v36, 16  ;;  %v4954_v22 = vshll.u32 %v4836_v36, 16  ;;  %v4837_v40 = vld [vmem:[#allocation3 + $0x34] sm:$0xf] }
 0x1a3   : > { %v13983_v57 = vpop.permute.xlu0 %3598  ;;  %v5443_v24 = vld [vmem:[#allocation3 + $0x30] sm:$0xf]  ;;  %v4865_v3 = vld [vmem:[#allocation3 + $0x38] sm:$0x1]  ;;  %v11382_v5 = vrot.slane %v5265_v21, 9  ;;  %v4964_v59 = vshrl.u32 %v4837_v40, 16  ;;  %v11462_v8 = vcombine.low %v4836_v36, %v4837_v40 }
 0x1a4   : > { %17870 = vst [vmem:[#allocation67_spill] sm:$0xff] %v13983_v57  ;;  %v5536_v31 = vshrl.u32 %v5443_v24, 16  ;;  %v4953_v2 = vrot.slane %v4951_v20, 4  ;;  %v4956_v48 = vrot.slane %v4954_v22, 5  ;;  %v4960_v25 = vshll.u32 %v4837_v40, 16  ;;  %17871 = vst [vmem:[#allocation68_spill] sm:$0xff] %v13992_v39 }
 0x1a5   : > { %v4970_v38 = vshll.u32 %v4865_v3, 16  ;;  %6499 = vrot.lane.b32.xlu0 %v11493_v17, %s12220_s7  ;;  %v5349_v56 = vrot.slane %v4837_v40, 5  ;;  %v5352_v7 = vrot.slane %v4865_v3, 5  ;;  %v13990_v57 = vld [vmem:[#allocation3 + $0x34] sm:$0xf]  ;;  %6341 = vrot.lane.b32.xlu1 %v11462_v8, %s12218_s29  ;;  %v4966_v21 = vrot.slane %v4964_v59, 4 }
 0x1a6   : > { %v4957_v6 = vor.u32 %v4956_v48, %v4953_v2  ;;  %v5538_v47 = vrot.slane %v5536_v31, 4  ;;  %v5539_v61 = vshll.u32 %v5443_v24, 16  ;;  %v4962_v36 = vrot.slane %v4960_v25, 5  ;;  %v5473_v8 = vld [vmem:[#allocation3 + $0x38] sm:$0x1] }
 0x1a7   : > { %v4972_v22 = vrot.slane %v4970_v38, 5  ;;  %v13999_v45 = vsel %vm12606_vm7, %v11382_v5, %v5349_v56  ;;  %v5351_v17 = vrot.slane %v5349_v56, 4  ;;  %v5549_v15 = vshrl.u32 %v13990_v57, 16 }
 0x1a8   : > { %v4958_v40 = vrot.slane %v4957_v6, 4  ;;  %v5541_v3 = vrot.slane %v5539_v61, 5  ;;  %v11509_v39 = vcombine.low %v5443_v24, %v13990_v57  ;;  %v4967_v2 = vor.u32 %v4966_v21, %v4962_v36  ;;  %v5873_v6 = vld [vmem:[#allocation3 + $0x30] sm:$0xe]  ;;  %v14012_v21 = vld [vmem:[#allocation3 + $0x3c] sm:$0xf] }
 0x1a9   : > { %v5353_v31 = vsel %vm12606_vm7, %v5351_v17, %v5352_v7  ;;  %v1017_v48 = vrot.slane %v1013_v53, 4  ;;  %v5545_v59 = vshll.u32 %v13990_v57, 16  ;;  %v5551_v56 = vrot.slane %v5549_v15, 4  ;;  %v14014_v17 = vpop.permute.xlu1 %3600 }
 0x1aa   : > { %v4963_v25 = vsel %vm12619_vm10, %v4958_v40, %v4962_v36  ;;  %v11494_v5 = vcombine.low %v13999_v45, %v5353_v31  ;;  %6595 = vrot.lane.b32.xlu0 %v11509_v39, %s12221_s11  ;;  %v5542_v38 = vor.u32 %v5541_v3, %v5538_v47  ;;  %v4968_v61 = vrot.slane %v4967_v2, 4  ;;  %17873 = vst [vmem:[#allocation70_spill] sm:$0xff] %v14014_v17  ;;  %v1295_v45 = vld [vmem:[#allocation3 + $0x44] sm:$0x1]  ;;  %v4230_v31 = vld [vmem:[#allocation3 + $0x30] sm:$0xf] }
 0x1ab   : > { %v1025_v24 = vsel %vm12632_vm12, %v1017_v48, %v1024_v32  ;;  %v5547_v7 = vrot.slane %v5545_v59, 5  ;;  %v5555_v53 = vshll.u32 %v5473_v8, 16  ;;  %v5560_v36 = vshrl.u32 %v14012_v21, 16  ;;  %v14024_v48 = vld [vmem:[#allocation3 + $0x34] sm:$0xf] }
 0x1ac   : > { %v13995_v20 = vpop.permute.xlu0 %3602  ;;  %1294 = vst.msk [vmem:[#allocation3 + $0x40] sm:$0xf] %vm273_vm0, %v1025_v24  ;;  %v5563_v39 = vshll.u32 %v14012_v21, 16  ;;  %v5543_v15 = vrot.slane %v5542_v38, 4  ;;  %v1026_v47 = vrot.slane %v13979_v46, 4  ;;  %v4973_v32 = vsel %vm12619_vm10, %v4968_v61, %v4972_v22 }
 0x1ad   : > { %17872 = vst [vmem:[#allocation69_spill] sm:$0xff] %v13995_v20  ;;  %v5552_v40 = vor.u32 %v5551_v56, %v5547_v7  ;;  %v5557_v3 = vrot.slane %v5555_v53, 5  ;;  %v11397_v2 = vrot.slane %v5873_v6, 9  ;;  %v11478_v59 = vcombine.low %v4963_v25, %v4973_v32  ;;  %v14032_v56 = vld [vmem:[#allocation3 + $0x38] sm:$0x1] }
 0x1ae   : > { %v5562_v17 = vrot.slane %v5560_v36, 4  ;;  %v5565_v24 = vrot.slane %v5563_v39, 5  ;;  %v5548_v10 = vsel %vm12619_vm10, %v5543_v15, %v5547_v7  ;;  %v1296_v46 = vsel %vm12639_vm13, %v1026_v47, %v1295_v45 }
 0x1af   : > { %v5553_v4 = vrot.slane %v5552_v40, 4  ;;  %v5951_v38 = vrot.slane %v13990_v57, 5  ;;  %v5954_v23 = vrot.slane %v5473_v8, 5  ;;  %6421 = vrot.lane.b32.xlu1 %v11478_v59, %s12219_s30  ;;  %1297 = vst [vmem:[#allocation3 + $0x44] sm:$0x1] %v1296_v46  ;;  %v4367_v6 = vshrl.u32 %v4230_v31, 16 }
 0x1b0   : > { %v14016_v20 = vpop.permute.xlu0 %3654  ;;  %v5566_v22 = vor.u32 %v5565_v24, %v5562_v17  ;;  %v4370_v25 = vshll.u32 %v4230_v31, 16  ;;  %v4376_v61 = vshll.u32 %v14024_v48, 16  ;;  %v4380_v57 = vshrl.u32 %v14024_v48, 16  ;;  %v5874_v8 = vld [vmem:[#allocation3 + $0x3c] sm:$0xe] }
 0x1b1   : > { %17874 = vst [vmem:[#allocation71_spill] sm:$0xff] %v14016_v20  ;;  %v5558_v7 = vsel %vm12619_vm10, %v5553_v4, %v5557_v3  ;;  %v5952_v53 = vsel %vm12606_vm7, %v11397_v2, %v5951_v38  ;;  %v5953_v36 = vrot.slane %v5951_v38, 4  ;;  %v4369_v45 = vrot.slane %v4367_v6, 4  ;;  %v4232_v40 = vld [vmem:[#allocation3 + $0x3c] sm:$0xf] }
 0x1b2   : > { %v11525_v17 = vcombine.low %v5548_v10, %v5558_v7  ;;  %v5567_v47 = vrot.slane %v5566_v22, 4  ;;  %v4372_v32 = vrot.slane %v4370_v25, 5  ;;  %v4378_v3 = vrot.slane %v4376_v61, 5  ;;  %v930_v20 = vld [vmem:[%s13689_s10 + $0x50] sm:$0xf] }
 0x1b3   : > { %v5446_v31 = vld [vmem:[#allocation3 + $0x40] sm:$0xf]  ;;  %v5955_v4 = vsel %vm12606_vm7, %v5953_v36, %v5954_v23  ;;  %v4382_v59 = vrot.slane %v4380_v57, 4  ;;  %v4386_v2 = vshll.u32 %v14032_v56, 16  ;;  %6501 = vrot.lane.b32.xlu1 %v11494_v5, %s12220_s7  ;;  %v11398_v7 = vrot.slane %v5874_v8, 9 }
 0x1b4   : > { %v14042_v15 = vpop.permute.xlu0 %3658  ;;  %v5573_v24 = vshrl.u32 %v5446_v31, 16  ;;  %v11510_v46 = vcombine.low %v14012_v21, %v5446_v31  ;;  %6675 = vrot.lane.b32.xlu0 %v11525_v17, %s12222_s12  ;;  %v5569_v10 = vshll.u32 %v5446_v31, 16  ;;  %v11541_v38 = vcombine.low %v5952_v53, %v5955_v4 }
 0x1b5   : > { %v14040_v39 = vpop.permute.xlu1 %3604  ;;  %17876 = vst [vmem:[#allocation73_spill] sm:$0xff] %v14042_v15  ;;  %v4373_v22 = vor.u32 %v4372_v32, %v4369_v45  ;;  %v4383_v6 = vor.u32 %v4382_v59, %v4378_v3  ;;  %v4388_v25 = vrot.slane %v4386_v2, 5  ;;  %v5958_v23 = vrot.slane %v5446_v31, 5  ;;  %v4233_v45 = vld [vmem:[#allocation3 + $0x40] sm:$0xf] }
 0x1b6   : > { %17875 = vst [vmem:[#allocation72_spill] sm:$0xff] %v14040_v39  ;;  %v5571_v39 = vrot.slane %v5569_v10, 5  ;;  %v5575_v14 = vrot.slane %v5573_v24, 4  ;;  %v4391_v61 = vshrl.u32 %v4232_v40, 16  ;;  %v5474_v36 = vld [vmem:[#allocation3 + $0x44] sm:$0x1] }
 0x1b7   : > { %v4374_v57 = vrot.slane %v4373_v22, 4  ;;  %v4384_v54 = vrot.slane %v4383_v6, 4  ;;  %6597 = vrot.lane.b32.xlu1 %v11510_v46, %s12221_s11  ;;  %v5579_v17 = vshll.u32 %v5474_v36, 16  ;;  %v5959_v8 = vsel %vm12606_vm7, %v11398_v7, %v5958_v23  ;;  %v4259_v2 = vld [vmem:[#allocation3 + $0x44] sm:$0x1] }
 0x1b8   : > { %v14052_v5 = vpop.permute.xlu0 %3662  ;;  %v5572_v21 = vsel %vm12619_vm10, %v5567_v47, %v5571_v39  ;;  %v5576_v53 = vor.u32 %v5575_v14, %v5571_v39  ;;  %6755 = vrot.lane.b32.xlu0 %v11541_v38, %s12223_s13  ;;  %v5960_v4 = vrot.slane %v5958_v23, 4  ;;  %v5961_v59 = vrot.slane %v5474_v36, 5  ;;  %v4658_v24 = vld [vmem:[#allocation3 + $0x30] sm:$0xe]  ;;  %v4659_v7 = vld [vmem:[#allocation3 + $0x3c] sm:$0xe] }
 0x1b9   : > { %v14050_v60 = vpop.permute.xlu1 %3656  ;;  %17878 = vst [vmem:[#allocation75_spill] sm:$0xff] %v14052_v5  ;;  %v4379_v32 = vsel %vm12619_vm10, %v4374_v57, %v4378_v3  ;;  %v4389_v31 = vsel %vm12619_vm10, %v4384_v54, %v4388_v25  ;;  %v5581_v47 = vrot.slane %v5579_v17, 5  ;;  %v4393_v39 = vrot.slane %v4391_v61, 4  ;;  %v4838_v17 = vld [vmem:[#allocation3 + $0x3c] sm:$0xf] }
 0x1ba   : > { %17877 = vst [vmem:[#allocation74_spill] sm:$0xff] %v14050_v60  ;;  %v5577_v46 = vrot.slane %v5576_v53, 4  ;;  %v11431_v14 = vcombine.low %v4379_v32, %v4389_v31  ;;  %v5962_v10 = vsel %vm12606_vm7, %v5960_v4, %v5961_v59  ;;  %v4394_v38 = vshll.u32 %v4232_v40, 16 }
 0x1bb   : > { %v4400_v22 = vshll.u32 %v4233_v45, 16  ;;  %v4404_v6 = vshrl.u32 %v4233_v45, 16  ;;  %v11542_v57 = vcombine.low %v5959_v8, %v5962_v10  ;;  %v4410_v54 = vshll.u32 %v4259_v2, 16 }
 0x1bc   : > { %v5582_v3 = vsel %vm12619_vm10, %v5577_v46, %v5581_v47  ;;  %v11367_v25 = vrot.slane %v4658_v24, 9  ;;  %v4396_v36 = vrot.slane %v4394_v38, 5  ;;  %v14070_v61 = vpop.permute.xlu0 %3666  ;;  %v4748_v31 = vrot.slane %v14024_v48, 5  ;;  %v14076_v47 = vld [vmem:[#allocation3 + $0x40] sm:$0xf] }
 0x1bd   : > { %v11526_v23 = vcombine.low %v5572_v21, %v5582_v3  ;;  %v4402_v16 = vrot.slane %v4400_v22, 5  ;;  %v4406_v53 = vrot.slane %v4404_v6, 4  ;;  %v14068_v32 = vpop.permute.xlu1 %3660  ;;  %17880 = vst [vmem:[#allocation77_spill] sm:$0xff] %v14070_v61  ;;  %6757 = vrot.lane.b32.xlu0 %v11542_v57, %s12223_s13  ;;  %v4412_v40 = vrot.slane %v4410_v54, 5  ;;  %v920_v57 = vld [vmem:[%s13689_s10 + $0x28] sm:$0xf] }
 0x1be   : > { %17879 = vst [vmem:[#allocation76_spill] sm:$0xff] %v14068_v32  ;;  %v4751_v4 = vrot.slane %v14032_v56, 5  ;;  %v11368_v8 = vrot.slane %v4659_v7, 9  ;;  %v4397_v21 = vor.u32 %v4396_v36, %v4393_v39  ;;  %v4755_v24 = vrot.slane %v4233_v45, 5  ;;  %v1302_v61 = vld [vmem:[#allocation3 + $0x50] sm:$0x1] }
 0x1bf   : > { %6677 = vrot.lane.b32.xlu1 %v11526_v23, %s12222_s12  ;;  %v4407_v59 = vor.u32 %v4406_v53, %v4402_v16  ;;  %v4758_v46 = vrot.slane %v4259_v2, 5  ;;  %v4749_v10 = vsel %vm12606_vm7, %v11367_v25, %v4748_v31  ;;  %v4750_v38 = vrot.slane %v4748_v31, 4  ;;  %v921_v23 = vld [vmem:[%s13689_s10 + $0x2c] sm:$0xf]  ;;  %v4866_v31 = vld [vmem:[#allocation3 + $0x44] sm:$0x1] }
 0x1c0   : > { %v4975_v22 = vshrl.u32 %v4838_v17, 16  ;;  %v4978_v6 = vshll.u32 %v4838_v17, 16  ;;  %v4398_v48 = vrot.slane %v4397_v21, 4  ;;  %v4757_v56 = vrot.slane %v4755_v24, 4 }
 0x1c1   : > { %v4408_v3 = vrot.slane %v4407_v59, 4  ;;  %v11463_v7 = vcombine.low %v4838_v17, %v14076_v47  ;;  %v4752_v39 = vsel %vm12606_vm7, %v4750_v38, %v4751_v4  ;;  %v4988_v2 = vshrl.u32 %v14076_v47, 16  ;;  %v14093_v21 = vpop.permute.xlu1 %3664  ;;  %v14095_v4 = vpop.permute.xlu0 %3670 }
 0x1c2   : > { %v4977_v45 = vrot.slane %v4975_v22, 4  ;;  %v4980_v54 = vrot.slane %v4978_v6, 5  ;;  %v4403_v25 = vsel %vm12619_vm10, %v4398_v48, %v4402_v16  ;;  %v11447_v53 = vcombine.low %v4749_v10, %v4752_v39  ;;  %17881 = vst [vmem:[#allocation78_spill] sm:$0xff] %v14093_v21  ;;  %17882 = vst [vmem:[#allocation79_spill] sm:$0xff] %v14095_v4 }
 0x1c3   : > { %6167 = vrot.lane.b32.xlu1 %v11431_v14, %s12217_s28  ;;  %v4413_v36 = vsel %vm12619_vm10, %v4408_v3, %v4412_v40  ;;  %v4756_v17 = vsel %vm12606_vm7, %v11368_v8, %v4755_v24  ;;  %v4759_v38 = vsel %vm12606_vm7, %v4757_v56, %v4758_v46  ;;  %v1028_v14 = vshrl.u32 %v920_v57, 16  ;;  %v5266_v3 = vld [vmem:[#allocation3 + $0x3c] sm:$0xe] }
 0x1c4   : > { %v11432_v59 = vcombine.low %v4403_v25, %v4413_v36  ;;  %v1031_v22 = vshll.u32 %v920_v57, 16  ;;  %6247 = vrot.lane.b32.xlu0 %v11447_v53, %s12216_s27  ;;  %v1036_v16 = vshrl.u32 %v921_v23, 16  ;;  %v1039_v6 = vshll.u32 %v921_v23, 16  ;;  %v1298_v36 = vld [vmem:[#allocation3 + $0x48] sm:$0xf] }
 0x1c5   : > { %v4981_v40 = vor.u32 %v4980_v54, %v4977_v45  ;;  %v4984_v10 = vshll.u32 %v14076_v47, 16  ;;  %v1030_v48 = vrot.slane %v1028_v14, 7  ;;  %v4990_v8 = vrot.slane %v4988_v2, 4  ;;  %v14103_v14 = vpop.permute.xlu1 %3668 }
 0x1c6   : > { %v4994_v24 = vshll.u32 %v4866_v31, 16  ;;  %v11448_v39 = vcombine.low %v4756_v17, %v4759_v38  ;;  %v1038_v25 = vrot.slane %v1036_v16, 7  ;;  %v11383_v23 = vrot.slane %v5266_v3, 9  ;;  %17883 = vst [vmem:[#allocation80_spill] sm:$0xff] %v14103_v14  ;;  %v922_v16 = vld [vmem:[%s13689_s10 + $0x30] sm:$0xf] }
 0x1c7   : > { %6169 = vrot.lane.b32.xlu1 %v11432_v59, %s12217_s28  ;;  %v4982_v4 = vrot.slane %v4981_v40, 4  ;;  %v4986_v46 = vrot.slane %v4984_v10, 5  ;;  %v1033_v56 = vor.u32 %v1031_v22, %v1030_v48  ;;  %v1034_v57 = vrot.slane %v1030_v48, 4  ;;  %v14105_v59 = vpop.permute.xlu0 %3674  ;;  %v923_v48 = vld [vmem:[%s13689_s10 + $0x34] sm:$0xf] }
 0x1c8   : > { %v4996_v53 = vrot.slane %v4994_v24, 5  ;;  %6343 = vrot.lane.b32.xlu0 %v11463_v7, %s12218_s29  ;;  %v1041_v45 = vor.u32 %v1039_v6, %v1038_v25  ;;  %v1043_v2 = vrot.slane %v1038_v25, 4  ;;  %17884 = vst [vmem:[#allocation81_spill] sm:$0xff] %v14105_v59  ;;  %v5356_v38 = vrot.slane %v14076_v47, 5 }
 0x1c9   : > { %v4991_v54 = vor.u32 %v4990_v8, %v4986_v46  ;;  %v1299_v17 = vsel %vm12626_vm11, %v1033_v56, %v1298_v36  ;;  %v5359_v22 = vrot.slane %v4866_v31, 5  ;;  %v4987_v6 = vsel %vm12619_vm10, %v4982_v4, %v4986_v46  ;;  %v14126_v46 = vpop.permute.xlu1 %3672 }
 0x1ca   : > { %v1042_v7 = vsel %vm12632_vm12, %v1034_v57, %v1041_v45  ;;  %1300 = vst [vmem:[#allocation3 + $0x48] sm:$0xf] %v1299_v17  ;;  %v1303_v10 = vsel %vm12639_vm13, %v1043_v2, %v1302_v61  ;;  %v5358_v47 = vrot.slane %v5356_v38, 4  ;;  %v5357_v8 = vsel %vm12606_vm7, %v11383_v23, %v5356_v38  ;;  %17885 = vst [vmem:[#allocation82_spill] sm:$0xff] %v14126_v46  ;;  %v1305_v45 = vld [vmem:[#allocation3 + $0x54] sm:$0xf] }
 0x1cb   : > { %6249 = vrot.lane.b32.xlu1 %v11448_v39, %s12216_s27  ;;  %v4992_v40 = vrot.slane %v4991_v54, 4  ;;  %1301 = vst.msk [vmem:[#allocation3 + $0x4c] sm:$0xf] %vm273_vm0, %v1042_v7  ;;  %1304 = vst [vmem:[#allocation3 + $0x50] sm:$0x1] %v1303_v10  ;;  %v1045_v24 = vshrl.u32 %v922_v16, 16  ;;  %v14128_v56 = vpop.permute.xlu0 %3678 }
 0x1cc   : > { %v1048_v3 = vshll.u32 %v922_v16, 16  ;;  %v5360_v4 = vsel %vm12606_vm7, %v5358_v47, %v5359_v22  ;;  %v1053_v25 = vshrl.u32 %v923_v48, 16  ;;  %v1056_v61 = vshll.u32 %v923_v48, 16  ;;  %17886 = vst [vmem:[#allocation83_spill] sm:$0xff] %v14128_v56 }
 0x1cd   : > { %v4997_v31 = vsel %vm12619_vm10, %v4992_v40, %v4996_v53  ;;  %v1047_v36 = vrot.slane %v1045_v24, 7  ;;  %v11495_v57 = vcombine.low %v5357_v8, %v5360_v4 }
 0x1ce   : > { %v11479_v39 = vcombine.low %v4987_v6, %v4997_v31  ;;  %v14131_v53 = vrot.slane %v1053_v25, 7 }
 0x1cf   : > { %v1050_v54 = vor.u32 %v1048_v3, %v1047_v36  ;;  %v1051_v17 = vrot.slane %v1047_v36, 4  ;;  %v14139_v36 = vpop.permute.xlu1 %3676 }
 0x1d0   : > { %6423 = vrot.lane.b32.xlu0 %v11479_v39, %s12219_s30  ;;  %v1058_v6 = vor.u32 %v1056_v61, %v14131_v53  ;;  %17887 = vst [vmem:[#allocation84_spill] sm:$0xff] %v14139_v36  ;;  %v14141_v61 = vpop.permute.xlu0 %6159 }
 0x1d1   : > { %v4840_v2 = vld [vmem:[#allocation3 + $0x48] sm:$0xf]  ;;  %v1306_v40 = vsel %vm12626_vm11, %v1050_v54, %v1305_v45 }
 0x1d2   : > { %v5267_v23 = vld [vmem:[#allocation3 + $0x48] sm:$0xe]  ;;  %v4841_v38 = vld [vmem:[#allocation3 + $0x4c] sm:$0xf]  ;;  %v4999_v16 = vshrl.u32 %v4840_v2, 16  ;;  %v5002_v22 = vshll.u32 %v4840_v2, 16 }
 0x1d3   : > { %v4867_v7 = vld [vmem:[#allocation3 + $0x50] sm:$0x1]  ;;  %v5012_v10 = vshrl.u32 %v4841_v38, 16  ;;  %v11464_v48 = vcombine.low %v4840_v2, %v4841_v38  ;;  %v5008_v47 = vshll.u32 %v4841_v38, 16  ;;  %v5447_v8 = vld [vmem:[#allocation3 + $0x48] sm:$0xf] }
 0x1d4   : > { %v5018_v31 = vshll.u32 %v4867_v7, 16  ;;  %6503 = vrot.lane.b32.xlu0 %v11495_v57, %s12220_s7  ;;  %1307 = vst [vmem:[#allocation3 + $0x54] sm:$0xf] %v1306_v40  ;;  %v5001_v24 = vrot.slane %v4999_v16, 4  ;;  %v5004_v3 = vrot.slane %v5002_v22, 5  ;;  %v11384_v39 = vrot.slane %v5267_v23, 9 }
 0x1d5   : > { %v5363_v4 = vrot.slane %v4841_v38, 5  ;;  %v14137_v25 = vld [vmem:[#allocation3 + $0x4c] sm:$0xf]  ;;  %6345 = vrot.lane.b32.xlu1 %v11464_v48, %s12218_s29  ;;  %v5010_v45 = vrot.slane %v5008_v47, 5  ;;  %v5014_v54 = vrot.slane %v5012_v10, 4  ;;  %v5366_v56 = vrot.slane %v4867_v7, 5 }
 0x1d6   : > { %v5020_v2 = vrot.slane %v5018_v31, 5  ;;  %v5005_v59 = vor.u32 %v5004_v3, %v5001_v24  ;;  %v5584_v23 = vshrl.u32 %v5447_v8, 16  ;;  %v5587_v22 = vshll.u32 %v5447_v8, 16  ;;  %v5475_v46 = vld [vmem:[#allocation3 + $0x50] sm:$0x1] }
 0x1d7   : > { %v14146_v57 = vsel %vm12606_vm7, %v11384_v39, %v5363_v4  ;;  %v5365_v16 = vrot.slane %v5363_v4, 4  ;;  %v5015_v38 = vor.u32 %v5014_v54, %v5010_v45  ;;  %v5597_v40 = vshrl.u32 %v14137_v25, 16  ;;  %v1309_v47 = vld [vmem:[#allocation3 + $0x5c] sm:$0x1]  ;;  %v5875_v39 = vld [vmem:[#allocation3 + $0x48] sm:$0xe] }
 0x1d8   : > { %v11511_v36 = vcombine.low %v5447_v8, %v14137_v25  ;;  %v5006_v14 = vrot.slane %v5005_v59, 4  ;;  %v5586_v48 = vrot.slane %v5584_v23, 4  ;;  %v1059_v7 = vsel %vm12632_vm12, %v1051_v17, %v1058_v6  ;;  %v14163_v6 = vpop.permute.xlu1 %3680 }
 0x1d9   : > { %v5367_v10 = vsel %vm12606_vm7, %v5365_v16, %v5366_v56  ;;  %v5016_v31 = vrot.slane %v5015_v38, 4  ;;  %v5589_v3 = vrot.slane %v5587_v22, 5  ;;  %1308 = vst.msk [vmem:[#allocation3 + $0x58] sm:$0xf] %vm273_vm0, %v1059_v7  ;;  %v5593_v8 = vshll.u32 %v14137_v25, 16  ;;  %17888 = vst [vmem:[#allocation85_spill] sm:$0xff] %v14163_v6 }
 0x1da   : > { %v11496_v24 = vcombine.low %v14146_v57, %v5367_v10  ;;  %6599 = vrot.lane.b32.xlu0 %v11511_v36, %s12221_s11  ;;  %v5011_v59 = vsel %vm12619_vm10, %v5006_v14, %v5010_v45  ;;  %v5599_v4 = vrot.slane %v5597_v40, 4  ;;  %v5603_v54 = vshll.u32 %v5475_v46, 16  ;;  %v14165_v57 = vpop.permute.xlu0 %6239  ;;  %v4234_v22 = vld [vmem:[#allocation3 + $0x48] sm:$0xf] }
 0x1db   : > { %v14160_v56 = vld [vmem:[#allocation3 + $0x54] sm:$0xf]  ;;  %v1060_v17 = vrot.slane %v14131_v53, 4  ;;  %v5021_v36 = vsel %vm12619_vm10, %v5016_v31, %v5020_v2  ;;  %v5590_v38 = vor.u32 %v5589_v3, %v5586_v48  ;;  %v5595_v45 = vrot.slane %v5593_v8, 5  ;;  %v14173_v53 = vld [vmem:[#allocation3 + $0x4c] sm:$0xf] }
 0x1dc   : > { %v5608_v16 = vshrl.u32 %v14160_v56, 16  ;;  %v5611_v23 = vshll.u32 %v14160_v56, 16  ;;  %v11480_v14 = vcombine.low %v5011_v59, %v5021_v36  ;;  %v5605_v10 = vrot.slane %v5603_v54, 5  ;;  %v14179_v54 = vld [vmem:[#allocation3 + $0x50] sm:$0x1] }
 0x1dd   : > { %v1310_v40 = vsel %vm12639_vm13, %v1060_v17, %v1309_v47  ;;  %v5591_v34 = vrot.slane %v5590_v38, 4  ;;  %v11399_v21 = vrot.slane %v5875_v39, 9  ;;  %v5600_v2 = vor.u32 %v5599_v4, %v5595_v45 }
 0x1de   : > { %v5610_v7 = vrot.slane %v5608_v16, 4  ;;  %v5613_v6 = vrot.slane %v5611_v23, 5  ;;  %1311 = vst [vmem:[#allocation3 + $0x5c] sm:$0x1] %v1310_v40  ;;  %6425 = vrot.lane.b32.xlu1 %v11480_v14, %s12219_s30  ;;  %v5965_v31 = vrot.slane %v14137_v25, 5  ;;  %v5968_v48 = vrot.slane %v5475_v46, 5  ;;  %v14186_v46 = vpop.permute.xlu0 %6335 }
 0x1df   : > { %v4415_v3 = vshrl.u32 %v4234_v22, 16  ;;  %v5596_v8 = vsel %vm12619_vm10, %v5591_v34, %v5595_v45  ;;  %v4418_v47 = vshll.u32 %v4234_v22, 16  ;;  %v4424_v17 = vshll.u32 %v14173_v53, 16  ;;  %v5876_v45 = vld [vmem:[#allocation3 + $0x54] sm:$0xe] }
 0x1e0   : > { %v5614_v59 = vor.u32 %v5613_v6, %v5610_v7  ;;  %v5450_v36 = vld [vmem:[#allocation3 + $0x58] sm:$0xf]  ;;  %v5601_v16 = vrot.slane %v5600_v2, 4  ;;  %v5966_v39 = vsel %vm12606_vm7, %v11399_v21, %v5965_v31  ;;  %v5967_v23 = vrot.slane %v5965_v31, 4 }
 0x1e1   : > { %v4417_v4 = vrot.slane %v4415_v3, 4  ;;  %v5621_v25 = vshrl.u32 %v5450_v36, 16  ;;  %v11512_v34 = vcombine.low %v14160_v56, %v5450_v36  ;;  %v5617_v14 = vshll.u32 %v5450_v36, 16 }
 0x1e2   : > { %v5615_v6 = vrot.slane %v5614_v59, 4  ;;  %6505 = vrot.lane.b32.xlu1 %v11496_v24, %s12220_s7  ;;  %v5606_v22 = vsel %vm12619_vm10, %v5601_v16, %v5605_v10  ;;  %v5969_v21 = vsel %vm12606_vm7, %v5967_v23, %v5968_v48  ;;  %v4420_v40 = vrot.slane %v4418_v47, 5 }
 0x1e3   : > { %v14184_v38 = vpop.permute.xlu1 %6161  ;;  %v4426_v7 = vrot.slane %v4424_v17, 5  ;;  %v11527_v2 = vcombine.low %v5596_v8, %v5606_v22  ;;  %v5619_v31 = vrot.slane %v5617_v14, 5  ;;  %v5623_v3 = vrot.slane %v5621_v25, 4  ;;  %v4236_v17 = vld [vmem:[#allocation3 + $0x54] sm:$0xf] }
 0x1e4   : > { %v11543_v35 = vcombine.low %v5966_v39, %v5969_v21  ;;  %v4421_v51 = vor.u32 %v4420_v40, %v4417_v4  ;;  %v4428_v56 = vshrl.u32 %v14173_v53, 16  ;;  %v4434_v59 = vshll.u32 %v14179_v54, 16  ;;  %v4237_v25 = vld [vmem:[#allocation3 + $0x58] sm:$0xf] }
 0x1e5   : > { %v5476_v30 = vld [vmem:[#allocation3 + $0x5c] sm:$0x1]  ;;  %v11400_v63 = vrot.slane %v5876_v45, 9  ;;  %6679 = vrot.lane.b32.xlu0 %v11527_v2, %s12222_s12  ;;  %v5620_v24 = vsel %vm12619_vm10, %v5615_v6, %v5619_v31  ;;  %v5624_v10 = vor.u32 %v5623_v3, %v5619_v31  ;;  %v5972_v47 = vrot.slane %v5450_v36, 5 }
 0x1e6   : > { %v5627_v48 = vshll.u32 %v5476_v30, 16  ;;  %6601 = vrot.lane.b32.xlu1 %v11512_v34, %s12221_s11  ;;  %v4422_v16 = vrot.slane %v4421_v51, 4  ;;  %v4430_v39 = vrot.slane %v4428_v56, 4  ;;  %v4436_v23 = vrot.slane %v4434_v59, 5  ;;  %v4261_v2 = vld [vmem:[#allocation3 + $0x5c] sm:$0x1] }
 0x1e7   : > { %v14199_v8 = vpop.permute.xlu1 %6241  ;;  %v5975_v4 = vrot.slane %v5476_v30, 5  ;;  %v14202_v14 = vpop.permute.xlu0 %6415  ;;  %v5625_v45 = vrot.slane %v5624_v10, 4  ;;  %v5973_v6 = vsel %vm12606_vm7, %v11400_v63, %v5972_v47  ;;  %v5974_v21 = vrot.slane %v5972_v47, 4  ;;  %v4660_v59 = vld [vmem:[#allocation3 + $0x48] sm:$0xe] }
 0x1e8   : > { %v5629_v22 = vrot.slane %v5627_v48, 5  ;;  %v4427_v36 = vsel %vm12619_vm10, %v4422_v16, %v4426_v7  ;;  %v4431_v40 = vor.u32 %v4430_v39, %v4426_v7  ;;  %v4439_v31 = vshrl.u32 %v4236_v17, 16 }
 0x1e9   : > { %v4442_v34 = vshll.u32 %v4236_v17, 16  ;;  %6759 = vrot.lane.b32.xlu0 %v11543_v35, %s12223_s13  ;;  %v5976_v30 = vsel %vm12606_vm7, %v5974_v21, %v5975_v4  ;;  %v4448_v3 = vshll.u32 %v4237_v25, 16  ;;  %v4452_v56 = vshrl.u32 %v4237_v25, 16  ;;  %v4661_v17 = vld [vmem:[#allocation3 + $0x54] sm:$0xe] }
 0x1ea   : > { %v5630_v51 = vsel %vm12619_vm10, %v5625_v45, %v5629_v22  ;;  %v4432_v10 = vrot.slane %v4431_v40, 4  ;;  %v11544_v48 = vcombine.low %v5973_v6, %v5976_v30  ;;  %v4441_v47 = vrot.slane %v4439_v31, 4  ;;  %v4842_v6 = vld [vmem:[#allocation3 + $0x54] sm:$0xf] }
 0x1eb   : > { %v11528_v63 = vcombine.low %v5620_v24, %v5630_v51  ;;  %v4444_v16 = vrot.slane %v4442_v34, 5  ;;  %v4450_v7 = vrot.slane %v4448_v3, 5  ;;  %v4454_v39 = vrot.slane %v4452_v56, 4  ;;  %v14213_v12 = vpop.permute.xlu1 %6337  ;;  %v14215_v45 = vpop.permute.xlu0 %6495 }
 0x1ec   : > { %v4458_v5 = vshll.u32 %v4261_v2, 16  ;;  %v4437_v35 = vsel %vm12619_vm10, %v4432_v10, %v4436_v23  ;;  %v11369_v4 = vrot.slane %v4660_v59, 9  ;;  %v4762_v24 = vrot.slane %v14173_v53, 5 }
 0x1ed   : > { %6681 = vrot.lane.b32.xlu1 %v11528_v63, %s12222_s12  ;;  %v4765_v22 = vrot.slane %v14179_v54, 5  ;;  %v11433_v21 = vcombine.low %v4427_v36, %v4437_v35  ;;  %6761 = vrot.lane.b32.xlu0 %v11544_v48, %s12223_s13  ;;  %v4445_v40 = vor.u32 %v4444_v16, %v4441_v47  ;;  %v4455_v31 = vor.u32 %v4454_v39, %v4450_v7  ;;  %v14225_v63 = vld [vmem:[#allocation3 + $0x58] sm:$0xf]  ;;  %v924_v47 = vld [vmem:[%s13689_s10 + $0x38] sm:$0xf] }
 0x1ee   : > { %v4460_v34 = vrot.slane %v4458_v5, 5  ;;  %v4763_v51 = vsel %vm12606_vm7, %v11369_v4, %v4762_v24  ;;  %v4764_v30 = vrot.slane %v4762_v24, 4  ;;  %v11370_v3 = vrot.slane %v4661_v17, 9  ;;  %v925_v17 = vld [vmem:[%s13689_s10 + $0x3c] sm:$0xf] }
 0x1ef   : > { %v4769_v56 = vrot.slane %v4237_v25, 5  ;;  %v4446_v23 = vrot.slane %v4445_v40, 4  ;;  %v4456_v59 = vrot.slane %v4455_v31, 4  ;;  %v4772_v53 = vrot.slane %v4261_v2, 5  ;;  %v14238_v35 = vpop.permute.xlu1 %6417  ;;  %v14240_v4 = vpop.permute.xlu0 %6591  ;;  %v4868_v31 = vld [vmem:[#allocation3 + $0x5c] sm:$0x1] }
 0x1f0   : > { %v5023_v54 = vshrl.u32 %v4842_v6, 16  ;;  %v4766_v36 = vsel %vm12606_vm7, %v4764_v30, %v4765_v22  ;;  %v5026_v48 = vshll.u32 %v4842_v6, 16  ;;  %v5036_v40 = vshrl.u32 %v14225_v63, 16 }
 0x1f1   : > { %6171 = vrot.lane.b32.xlu1 %v11433_v21, %s12217_s28  ;;  %v4770_v5 = vsel %vm12606_vm7, %v11370_v3, %v4769_v56  ;;  %v4771_v10 = vrot.slane %v4769_v56, 4  ;;  %v4451_v25 = vsel %vm12619_vm10, %v4446_v23, %v4450_v7  ;;  %v4461_v2 = vsel %vm12619_vm10, %v4456_v59, %v4460_v34 }
 0x1f2   : > { %v11449_v16 = vcombine.low %v4763_v51, %v4766_v36  ;;  %v5025_v39 = vrot.slane %v5023_v54, 4  ;;  %v11434_v24 = vcombine.low %v4451_v25, %v4461_v2  ;;  %v5028_v21 = vrot.slane %v5026_v48, 5  ;;  %v5268_v54 = vld [vmem:[#allocation3 + $0x54] sm:$0xe]  ;;  %v1312_v25 = vld [vmem:[#allocation3 + $0x60] sm:$0xf] }
 0x1f3   : > { %v4773_v22 = vsel %vm12606_vm7, %v4771_v10, %v4772_v53  ;;  %v11465_v34 = vcombine.low %v4842_v6, %v14225_v63  ;;  %v1062_v51 = vshrl.u32 %v924_v47, 16  ;;  %v1065_v30 = vshll.u32 %v924_v47, 16 }
 0x1f4   : > { %6251 = vrot.lane.b32.xlu0 %v11449_v16, %s12216_s27  ;;  %v11450_v7 = vcombine.low %v4770_v5, %v4773_v22  ;;  %v1070_v3 = vshrl.u32 %v925_v17, 16  ;;  %v1073_v56 = vshll.u32 %v925_v17, 16  ;;  %v5029_v23 = vor.u32 %v5028_v21, %v5025_v39  ;;  %v1316_v16 = vld [vmem:[#allocation3 + $0x68] sm:$0x1]  ;;  %v14251_v17 = vpop.permute.xlu1 %6497 }
 0x1f5   : > { %6173 = vrot.lane.b32.xlu1 %v11434_v24, %s12217_s28  ;;  %v5032_v59 = vshll.u32 %v14225_v63, 16  ;;  %v1064_v53 = vrot.slane %v1062_v51, 7  ;;  %v5038_v36 = vrot.slane %v5036_v40, 4  ;;  %v5042_v10 = vshll.u32 %v4868_v31, 16 }
 0x1f6   : > { %v1072_v48 = vrot.slane %v1070_v3, 7  ;;  %v5030_v2 = vrot.slane %v5029_v23, 4  ;;  %v11385_v24 = vrot.slane %v5268_v54, 9  ;;  %v5370_v39 = vrot.slane %v14225_v63, 5  ;;  %v14253_v22 = vpop.permute.xlu0 %6671  ;;  %v926_v23 = vld [vmem:[%s13689_s10 + $0x40] sm:$0xf] }
 0x1f7   : > { %v5034_v5 = vrot.slane %v5032_v59, 5  ;;  %v1067_v6 = vor.u32 %v1065_v30, %v1064_v53  ;;  %v1068_v47 = vrot.slane %v1064_v53, 4  ;;  %v5044_v51 = vrot.slane %v5042_v10, 5  ;;  %v927_v53 = vld [vmem:[%s13689_s10 + $0x44] sm:$0xf] }
 0x1f8   : > { %6347 = vrot.lane.b32.xlu0 %v11465_v34, %s12218_s29  ;;  %v1075_v21 = vor.u32 %v1073_v56, %v1072_v48  ;;  %v1077_v3 = vrot.slane %v1072_v48, 4  ;;  %v5372_v30 = vrot.slane %v5370_v39, 4  ;;  %v5373_v59 = vrot.slane %v4868_v31, 5 }
 0x1f9   : > { %6253 = vrot.lane.b32.xlu1 %v11450_v7, %s12216_s27  ;;  %v5039_v40 = vor.u32 %v5038_v36, %v5034_v5  ;;  %v1313_v34 = vsel %vm12626_vm11, %v1067_v6, %v1312_v25  ;;  %v5035_v54 = vsel %vm12619_vm10, %v5030_v2, %v5034_v5  ;;  %v5371_v56 = vsel %vm12606_vm7, %v11385_v24, %v5370_v39  ;;  %v14273_v6 = vpop.permute.xlu1 %6593 }
 0x1fa   : > { %v1076_v63 = vsel %vm12632_vm12, %v1068_v47, %v1075_v21  ;;  %1314 = vst [vmem:[#allocation3 + $0x60] sm:$0xf] %v1313_v34  ;;  %v1317_v7 = vsel %vm12639_vm13, %v1077_v3, %v1316_v16  ;;  %v1079_v36 = vshrl.u32 %v926_v23, 16  ;;  %v5374_v10 = vsel %vm12606_vm7, %v5372_v30, %v5373_v59  ;;  %v14275_v47 = vpop.permute.xlu0 %6751 }
 0x1fb   : > { %v5040_v18 = vrot.slane %v5039_v40, 4  ;;  %1315 = vst.msk [vmem:[#allocation3 + $0x64] sm:$0xf] %vm273_vm0, %v1076_v63  ;;  %1318 = vst [vmem:[#allocation3 + $0x68] sm:$0x1] %v1317_v7  ;;  %v1082_v48 = vshll.u32 %v926_v23, 16  ;;  %v11497_v24 = vcombine.low %v5371_v56, %v5374_v10 }
 0x1fc   : > { %v1087_v25 = vshrl.u32 %v927_v53, 16  ;;  %v1081_v5 = vrot.slane %v1079_v36, 7  ;;  %v1090_v21 = vshll.u32 %v927_v53, 16  ;;  %v1319_v40 = vld [vmem:[#allocation3 + $0x6c] sm:$0xf] }
 0x1fd   : > { %v5045_v31 = vsel %vm12619_vm10, %v5040_v18, %v5044_v51  ;;  %v1323_v18 = vld [vmem:[#allocation3 + $0x74] sm:$0x1] }
 0x1fe   : > { %v11481_v2 = vcombine.low %v5035_v54, %v5045_v31  ;;  %v1089_v16 = vrot.slane %v1087_v25, 7  ;;  %v1084_v39 = vor.u32 %v1082_v48, %v1081_v5  ;;  %v1085_v3 = vrot.slane %v1081_v5, 4 }
 0x200   : > { %6427 = vrot.lane.b32.xlu0 %v11481_v2, %s12219_s30  ;;  %v1092_v51 = vor.u32 %v1090_v21, %v1089_v16  ;;  %v1094_v34 = vrot.slane %v1089_v16, 4  ;;  %v1320_v59 = vsel %vm12626_vm11, %v1084_v39, %v1319_v40  ;;  %v14288_v16 = vpop.permute.xlu0 %6753 }
 0x201   : > { %v4844_v30 = vld [vmem:[#allocation3 + $0x60] sm:$0xf]  ;;  %1321 = vst [vmem:[#allocation3 + $0x6c] sm:$0xf] %v1320_v59 }
 0x202   : > { %v5269_v23 = vld [vmem:[#allocation3 + $0x60] sm:$0xe]  ;;  %v4845_v63 = vld [vmem:[#allocation3 + $0x64] sm:$0xf]  ;;  %v5047_v54 = vshrl.u32 %v4844_v30, 16  ;;  %v5050_v7 = vshll.u32 %v4844_v30, 16  ;;  %v1093_v53 = vsel %vm12632_vm12, %v1085_v3, %v1092_v51  ;;  %v1324_v56 = vsel %vm12639_vm13, %v1094_v34, %v1323_v18  ;;  %v14286_v5 = vpop.permute.xlu1 %6673 }
 0x203   : > { %v4869_v36 = vld [vmem:[#allocation3 + $0x68] sm:$0x1]  ;;  %v5060_v31 = vshrl.u32 %v4845_v63, 16  ;;  %v11466_v10 = vcombine.low %v4844_v30, %v4845_v63  ;;  %v5056_v48 = vshll.u32 %v4845_v63, 16  ;;  %v5451_v2 = vld [vmem:[#allocation3 + $0x60] sm:$0xf] }
 0x204   : > { %v5066_v25 = vshll.u32 %v4869_v36, 16  ;;  %6507 = vrot.lane.b32.xlu0 %v11497_v24, %s12220_s7  ;;  %1322 = vst.msk [vmem:[#allocation3 + $0x70] sm:$0xf] %vm273_vm0, %v1093_v53  ;;  %1325 = vst [vmem:[#allocation3 + $0x74] sm:$0x1] %v1324_v56  ;;  %v5049_v21 = vrot.slane %v5047_v54, 4 }
 0x205   : > { %v5052_v40 = vrot.slane %v5050_v7, 5  ;;  %v11386_v39 = vrot.slane %v5269_v23, 9  ;;  %v5377_v3 = vrot.slane %v4845_v63, 5  ;;  %v14290_v51 = vld [vmem:[#allocation3 + $0x64] sm:$0xf]  ;;  %6349 = vrot.lane.b32.xlu1 %v11466_v10, %s12218_s29  ;;  %v5058_v18 = vrot.slane %v5056_v48, 5 }
 0x206   : > { %v5062_v34 = vrot.slane %v5060_v31, 4  ;;  %v5068_v30 = vrot.slane %v5066_v25, 5  ;;  %v5380_v24 = vrot.slane %v4869_v36, 5  ;;  %v5632_v0 = vshrl.u32 %v5451_v2, 16  ;;  %v5477_v31 = vld [vmem:[#allocation3 + $0x68] sm:$0x1] }
 0x207   : > { %v5053_v59 = vor.u32 %v5052_v40, %v5049_v21  ;;  %v5378_v53 = vsel %vm12606_vm7, %v11386_v39, %v5377_v3  ;;  %v5379_v56 = vrot.slane %v5377_v3, 4  ;;  %v5635_v32 = vshll.u32 %v5451_v2, 16  ;;  %v14303_v3 = vpop.permute.xlu1 %6163  ;;  %v4238_v52 = vld [vmem:[#allocation3 + $0x60] sm:$0xf] }
 0x208   : > { %v5063_v62 = vor.u32 %v5062_v34, %v5058_v18  ;;  %v5645_v54 = vshrl.u32 %v14290_v51, 16  ;;  %v11513_v23 = vcombine.low %v5451_v2, %v14290_v51  ;;  %v5634_v10 = vrot.slane %v5632_v0, 4  ;;  %v14301_v40 = vld [vmem:[#allocation3 + $0x6c] sm:$0xf]  ;;  %v14305_v34 = vpop.permute.xlu0 %6243  ;;  %v4662_v1 = vld [vmem:[#allocation3 + $0x60] sm:$0xe] }
 0x209   : > { %v5054_v63 = vrot.slane %v5053_v59, 4  ;;  %v5381_v7 = vsel %vm12606_vm7, %v5379_v56, %v5380_v24  ;;  %v5641_v36 = vshll.u32 %v14290_v51, 16  ;;  %v5637_v21 = vrot.slane %v5635_v32, 5 }
 0x20a   : > { %v5064_v48 = vrot.slane %v5063_v62, 4  ;;  %v11498_v25 = vcombine.low %v5378_v53, %v5381_v7  ;;  %6603 = vrot.lane.b32.xlu0 %v11513_v23, %s12221_s11  ;;  %v5647_v39 = vrot.slane %v5645_v54, 4  ;;  %v5656_v0 = vshrl.u32 %v14301_v40, 16  ;;  %v5877_v7 = vld [vmem:[#allocation3 + $0x60] sm:$0xe] }
 0x20b   : > { %v5059_v2 = vsel %vm12619_vm10, %v5054_v63, %v5058_v18  ;;  %v14309_v24 = vld [vmem:[#allocation3 + $0x70] sm:$0xf]  ;;  %v5659_v62 = vshll.u32 %v14301_v40, 16  ;;  %v5643_v59 = vrot.slane %v5641_v36, 5  ;;  %v5638_v54 = vor.u32 %v5637_v21, %v5634_v10  ;;  %v14318_v23 = vld [vmem:[#allocation3 + $0x74] sm:$0x1] }
 0x20c   : > { %v5069_v32 = vsel %vm12619_vm10, %v5064_v48, %v5068_v30  ;;  %v5669_v53 = vshrl.u32 %v14309_v24, 16  ;;  %v11514_v56 = vcombine.low %v14301_v40, %v14309_v24  ;;  %v5658_v63 = vrot.slane %v5656_v0, 4 }
 0x20d   : > { %v11482_v18 = vcombine.low %v5059_v2, %v5069_v32  ;;  %v5661_v11 = vrot.slane %v5659_v62, 5  ;;  %v5648_v42 = vor.u32 %v5647_v39, %v5643_v59  ;;  %v5639_v13 = vrot.slane %v5638_v54, 4  ;;  %v14326_v62 = vpop.permute.xlu1 %6165  ;;  %v14328_v32 = vpop.permute.xlu0 %6339 }
 0x20e   : > { %v5651_v41 = vshll.u32 %v5477_v31, 16  ;;  %v5665_v36 = vshll.u32 %v14309_v24, 16  ;;  %v5671_v15 = vrot.slane %v5669_v53, 4  ;;  %v5675_v40 = vshll.u32 %v14318_v23, 16 }
 0x20f   : > { %6429 = vrot.lane.b32.xlu1 %v11482_v18, %s12219_s30  ;;  %v5649_v30 = vrot.slane %v5648_v42, 4  ;;  %v5662_v48 = vor.u32 %v5661_v11, %v5658_v63  ;;  %v11401_v10 = vrot.slane %v5877_v7, 9  ;;  %v5644_v21 = vsel %vm12619_vm10, %v5639_v13, %v5643_v59  ;;  %v14330_v18 = vld [vmem:[#allocation3 + $0x64] sm:$0xf]  ;;  %v14336_v59 = vld [vmem:[#allocation3 + $0x68] sm:$0x1] }
 0x210   : > { %v5653_v2 = vrot.slane %v5651_v41, 5  ;;  %v5667_v0 = vrot.slane %v5665_v36, 5  ;;  %v5979_v39 = vrot.slane %v14290_v51, 5  ;;  %v5677_v54 = vrot.slane %v5675_v40, 5  ;;  %v5878_v51 = vld [vmem:[#allocation3 + $0x6c] sm:$0xe] }
 0x211   : > { %v5663_v53 = vrot.slane %v5662_v48, 4  ;;  %v5982_v58 = vrot.slane %v5477_v31, 5  ;;  %v4463_v42 = vshrl.u32 %v4238_v52, 16  ;;  %v4466_v48 = vshll.u32 %v4238_v52, 16 }
 0x212   : > { %v5654_v11 = vsel %vm12619_vm10, %v5649_v30, %v5653_v2  ;;  %v5672_v7 = vor.u32 %v5671_v15, %v5667_v0  ;;  %v5980_v41 = vsel %vm12606_vm7, %v11401_v10, %v5979_v39  ;;  %v5981_v13 = vrot.slane %v5979_v39, 4 }
 0x213   : > { %6509 = vrot.lane.b32.xlu1 %v11498_v25, %s12220_s7  ;;  %v11529_v63 = vcombine.low %v5644_v21, %v5654_v11  ;;  %v5668_v31 = vsel %vm12619_vm10, %v5663_v53, %v5667_v0  ;;  %v4465_v36 = vrot.slane %v4463_v42, 4  ;;  %v4472_v15 = vshll.u32 %v14330_v18, 16  ;;  %v4240_v11 = vld [vmem:[#allocation3 + $0x6c] sm:$0xf] }
 0x214   : > { %v5673_v40 = vrot.slane %v5672_v7, 4  ;;  %v5983_v30 = vsel %vm12606_vm7, %v5981_v13, %v5982_v58  ;;  %v4476_v10 = vshrl.u32 %v14330_v18, 16  ;;  %v4468_v39 = vrot.slane %v4466_v48, 5  ;;  %v4241_v58 = vld [vmem:[#allocation3 + $0x70] sm:$0xf]  ;;  %v14350_v7 = vpop.permute.xlu1 %6245  ;;  %v14352_v13 = vpop.permute.xlu0 %6419 }
 0x215   : > { %6683 = vrot.lane.b32.xlu0 %v11529_v63, %s12222_s12  ;;  %v11545_v2 = vcombine.low %v5980_v41, %v5983_v30  ;;  %v4482_v25 = vshll.u32 %v14336_v59, 16  ;;  %v11402_v21 = vrot.slane %v5878_v51, 9  ;;  %v4474_v52 = vrot.slane %v4472_v15, 5  ;;  %v4263_v30 = vld [vmem:[#allocation3 + $0x74] sm:$0x1] }
 0x216   : > { %v5678_v0 = vsel %vm12619_vm10, %v5673_v40, %v5677_v54  ;;  %v4478_v53 = vrot.slane %v4476_v10, 4  ;;  %v5986_v42 = vrot.slane %v14309_v24, 5  ;;  %v4469_v63 = vor.u32 %v4468_v39, %v4465_v36 }
 0x217   : > { %6605 = vrot.lane.b32.xlu1 %v11514_v56, %s12221_s11  ;;  %v11530_v41 = vcombine.low %v5668_v31, %v5678_v0  ;;  %v4484_v48 = vrot.slane %v4482_v25, 5  ;;  %v5989_v51 = vrot.slane %v14318_v23, 5  ;;  %v4487_v15 = vshrl.u32 %v4240_v11, 16 }
 0x218   : > { %v4479_v49 = vor.u32 %v4478_v53, %v4474_v52  ;;  %v5987_v54 = vsel %vm12606_vm7, %v11402_v21, %v5986_v42  ;;  %v5988_v40 = vrot.slane %v5986_v42, 4  ;;  %v4470_v24 = vrot.slane %v4469_v63, 4  ;;  %v14368_v63 = vpop.permute.xlu0 %6499 }
 0x219   : > { %6763 = vrot.lane.b32.xlu0 %v11545_v2, %s12223_s13  ;;  %v4490_v10 = vshll.u32 %v4240_v11, 16  ;;  %v4496_v60 = vshll.u32 %v4241_v58, 16  ;;  %v4500_v9 = vshrl.u32 %v4241_v58, 16  ;;  %v4489_v36 = vrot.slane %v4487_v15, 4  ;;  %v4663_v2 = vld [vmem:[#allocation3 + $0x6c] sm:$0xe] }
 0x21a   : > { %v4480_v56 = vrot.slane %v4479_v49, 4  ;;  %v5990_v31 = vsel %vm12606_vm7, %v5988_v40, %v5989_v51  ;;  %v4506_v23 = vshll.u32 %v4263_v30, 16  ;;  %v4475_v39 = vsel %vm12619_vm10, %v4470_v24, %v4474_v52  ;;  %v14366_v49 = vpop.permute.xlu1 %6341 }
 0x21b   : > { %6685 = vrot.lane.b32.xlu1 %v11530_v41, %s12222_s12  ;;  %v11546_v25 = vcombine.low %v5987_v54, %v5990_v31  ;;  %v4492_v21 = vrot.slane %v4490_v10, 5  ;;  %v4498_v0 = vrot.slane %v4496_v60, 5  ;;  %v4502_v53 = vrot.slane %v4500_v9, 4 }
 0x21c   : > { %v4485_v11 = vsel %vm12619_vm10, %v4480_v56, %v4484_v48  ;;  %v11371_v42 = vrot.slane %v4662_v1, 9  ;;  %v4776_v40 = vrot.slane %v14330_v18, 5  ;;  %v4779_v52 = vrot.slane %v14336_v59, 5  ;;  %v4846_v48 = vld [vmem:[#allocation3 + $0x6c] sm:$0xf] }
 0x21d   : > { %v11435_v51 = vcombine.low %v4475_v39, %v4485_v11  ;;  %6765 = vrot.lane.b32.xlu0 %v11546_v25, %s12223_s13  ;;  %v4493_v41 = vor.u32 %v4492_v21, %v4489_v36  ;;  %v4503_v54 = vor.u32 %v4502_v53, %v4498_v0  ;;  %v4508_v60 = vrot.slane %v4506_v23, 5  ;;  %v14376_v56 = vld [vmem:[#allocation3 + $0x70] sm:$0xf] }
 0x21e   : > { %v11372_v15 = vrot.slane %v4663_v2, 9  ;;  %v4783_v24 = vrot.slane %v4241_v58, 5  ;;  %v4777_v9 = vsel %vm12606_vm7, %v11371_v42, %v4776_v40  ;;  %v4778_v10 = vrot.slane %v4776_v40, 4  ;;  %v928_v21 = vld [vmem:[%s13689_s10 + $0x48] sm:$0xf] }
 0x21f   : > { %6175 = vrot.lane.b32.xlu1 %v11435_v51, %s12217_s28  ;;  %v4494_v1 = vrot.slane %v4493_v41, 4  ;;  %v4504_v31 = vrot.slane %v4503_v54, 4  ;;  %v4786_v36 = vrot.slane %v4263_v30, 5  ;;  %v5071_v39 = vshrl.u32 %v4846_v48, 16  ;;  %v929_v51 = vld [vmem:[%s13689_s10 + $0x4c] sm:$0xf]  ;;  %v14393_v41 = vpop.permute.xlu0 %6595 }
 0x220   : > { %v4784_v18 = vsel %vm12606_vm7, %v11372_v15, %v4783_v24  ;;  %v4785_v59 = vrot.slane %v4783_v24, 4  ;;  %v4780_v23 = vsel %vm12606_vm7, %v4778_v10, %v4779_v52  ;;  %v5074_v25 = vshll.u32 %v4846_v48, 16 }
 0x221   : > { %v4499_v58 = vsel %vm12619_vm10, %v4494_v1, %v4498_v0  ;;  %v4509_v2 = vsel %vm12619_vm10, %v4504_v31, %v4508_v60  ;;  %v11451_v11 = vcombine.low %v4777_v9, %v4780_v23  ;;  %v5084_v42 = vshrl.u32 %v14376_v56, 16  ;;  %v14391_v30 = vpop.permute.xlu1 %6421  ;;  %v4870_v60 = vld [vmem:[#allocation3 + $0x74] sm:$0x1] }
 0x222   : > { %v4787_v53 = vsel %vm12606_vm7, %v4785_v59, %v4786_v36  ;;  %v11436_v0 = vcombine.low %v4499_v58, %v4509_v2  ;;  %v5073_v40 = vrot.slane %v5071_v39, 4  ;;  %v5076_v52 = vrot.slane %v5074_v25, 5  ;;  %v1326_v39 = vld [vmem:[#allocation3 + $0x78] sm:$0xf]  ;;  %v5270_v2 = vld [vmem:[#allocation3 + $0x6c] sm:$0xe] }
 0x223   : > { %6255 = vrot.lane.b32.xlu0 %v11451_v11, %s12216_s27  ;;  %v11467_v54 = vcombine.low %v4846_v48, %v14376_v56  ;;  %v1096_v15 = vshrl.u32 %v928_v21, 16  ;;  %v11452_v24 = vcombine.low %v4784_v18, %v4787_v53  ;;  %v1099_v1 = vshll.u32 %v928_v21, 16  ;;  %v1330_v53 = vld [vmem:[#allocation3 + $0x80] sm:$0x1] }
 0x224   : > { %6177 = vrot.lane.b32.xlu1 %v11436_v0, %s12217_s28  ;;  %v1104_v9 = vshrl.u32 %v929_v51, 16  ;;  %v1107_v10 = vshll.u32 %v929_v51, 16  ;;  %v5077_v59 = vor.u32 %v5076_v52, %v5073_v40  ;;  %v5080_v36 = vshll.u32 %v14376_v56, 16 }
 0x225   : > { %v1098_v31 = vrot.slane %v1096_v15, 7  ;;  %v5086_v23 = vrot.slane %v5084_v42, 4  ;;  %v5090_v25 = vshll.u32 %v4870_v60, 16  ;;  %v14399_v11 = vpop.permute.xlu1 %6501  ;;  %v11387_v33 = vrot.slane %v5270_v2, 9 }
 0x226   : > { %v1106_v58 = vrot.slane %v1104_v9, 7  ;;  %v5078_v18 = vrot.slane %v5077_v59, 4  ;;  %v5082_v21 = vrot.slane %v5080_v36, 5  ;;  %v14402_v51 = vpop.permute.xlu0 %6675  ;;  %v5387_v59 = vrot.slane %v4870_v60, 5 }
 0x227   : > { %6351 = vrot.lane.b32.xlu0 %v11467_v54, %s12218_s29  ;;  %v1101_v48 = vor.u32 %v1099_v1, %v1098_v31  ;;  %v1102_v0 = vrot.slane %v1098_v31, 4  ;;  %17889 = vst [vmem:[#allocation86_spill] sm:$0xff] %v14402_v51  ;;  %v5092_v9 = vrot.slane %v5090_v25, 5  ;;  %v5384_v31 = vrot.slane %v14376_v56, 5 }
 0x228   : > { %6257 = vrot.lane.b32.xlu1 %v11452_v24, %s12216_s27  ;;  %v1109_v42 = vor.u32 %v1107_v10, %v1106_v58  ;;  %v1111_v40 = vrot.slane %v1106_v58, 4  ;;  %v5087_v15 = vor.u32 %v5086_v23, %v5082_v21  ;;  %v931_v24 = vld [vmem:[%s13689_s10 + $0x54] sm:$0xf]  ;;  %v5083_v10 = vsel %vm12619_vm10, %v5078_v18, %v5082_v21 }
 0x229   : > { %v1327_v52 = vsel %vm12626_vm11, %v1101_v48, %v1326_v39  ;;  %v5386_v23 = vrot.slane %v5384_v31, 4  ;;  %v1113_v58 = vshrl.u32 %v930_v20, 16  ;;  %v14417_v39 = vpop.permute.xlu1 %6597  ;;  %v5385_v2 = vsel %vm12606_vm7, %v11387_v33, %v5384_v31 }
 0x22a   : > { %v1110_v54 = vsel %vm12632_vm12, %v1102_v0, %v1109_v42  ;;  %1328 = vst [vmem:[#allocation3 + $0x78] sm:$0xf] %v1327_v52  ;;  %v1331_v1 = vsel %vm12639_vm13, %v1111_v40, %v1330_v53  ;;  %v5088_v36 = vrot.slane %v5087_v15, 4  ;;  %v1116_v56 = vshll.u32 %v930_v20, 16  ;;  %v14423_v48 = vpop.permute.xlu0 %6755  ;;  %v1333_v40 = vld [vmem:[#allocation3 + $0x84] sm:$0xf] }
 0x22b   : > { %1329 = vst.msk [vmem:[#allocation3 + $0x7c] sm:$0xf] %vm273_vm0, %v1110_v54  ;;  %1332 = vst [vmem:[#allocation3 + $0x80] sm:$0x1] %v1331_v1  ;;  %v1121_v60 = vshrl.u32 %v931_v24, 16  ;;  %v5388_v18 = vsel %vm12606_vm7, %v5386_v23, %v5387_v59  ;;  %v1115_v21 = vrot.slane %v1113_v58, 7 }
 0x22c   : > { %v5093_v25 = vsel %vm12619_vm10, %v5088_v36, %v5092_v9  ;;  %17890 = vst [vmem:[#allocation87_spill] sm:$0xff] %v14423_v48  ;;  %v1124_v53 = vshll.u32 %v931_v24, 16  ;;  %v11499_v52 = vcombine.low %v5385_v2, %v5388_v18  ;;  %v14430_v9 = vld [vmem:[#allocation2 + $0xb8] sm:$0xf] }
 0x22d   : > { %v11483_v0 = vcombine.low %v5083_v10, %v5093_v25  ;;  %v14427_v42 = vrot.slane %v1121_v60, 7  ;;  %v1118_v15 = vor.u32 %v1116_v56, %v1115_v21  ;;  %17891 = vst [vmem:[#allocation88_spill] sm:$0xff] %v14430_v9  ;;  %v1119_v1 = vrot.slane %v1115_v21, 4 }
 0x22f   : > { %6431 = vrot.lane.b32.xlu0 %v11483_v0, %s12219_s30  ;;  %v1126_v24 = vor.u32 %v1124_v53, %v14427_v42  ;;  %v1334_v23 = vsel %vm12626_vm11, %v1118_v15, %v1333_v40  ;;  %v14438_v18 = vpop.permute.xlu0 %6757 }
 0x230   : > { %1335 = vst [vmem:[#allocation3 + $0x84] sm:$0xf] %v1334_v23  ;;  %17893 = vst [vmem:[#allocation90_spill] sm:$0xff] %v14438_v18 }
 0x231   : > { %v4848_v20 = vld [vmem:[#allocation3 + $0x78] sm:$0xf]  ;;  %v14436_v58 = vpop.permute.xlu1 %6677 }
 0x232   : > { %v5271_v54 = vld [vmem:[#allocation3 + $0x78] sm:$0xe]  ;;  %v4849_v31 = vld [vmem:[#allocation3 + $0x7c] sm:$0xf]  ;;  %v5095_v10 = vshrl.u32 %v4848_v20, 16  ;;  %v5098_v36 = vshll.u32 %v4848_v20, 16 }
 0x233   : > { %v4871_v59 = vld [vmem:[#allocation3 + $0x80] sm:$0x1]  ;;  %17892 = vst [vmem:[#allocation89_spill] sm:$0xff] %v14436_v58  ;;  %v5108_v25 = vshrl.u32 %v4849_v31, 16  ;;  %v11468_v2 = vcombine.low %v4848_v20, %v4849_v31  ;;  %v5104_v56 = vshll.u32 %v4849_v31, 16  ;;  %6511 = vrot.lane.b32.xlu0 %v11499_v52, %s12220_s7  ;;  %v11388_v29 = vrot.slane %v5271_v54, 9 }
 0x234   : > { %v5114_v60 = vshll.u32 %v4871_v59, 16  ;;  %v5455_v0 = vld [vmem:[#allocation3 + $0x78] sm:$0xf]  ;;  %v5097_v21 = vrot.slane %v5095_v10, 4  ;;  %v5100_v33 = vrot.slane %v5098_v36, 5  ;;  %v5391_v50 = vrot.slane %v4849_v31, 5 }
 0x235   : > { %v14441_v53 = vld [vmem:[#allocation3 + $0x7c] sm:$0xf]  ;;  %6353 = vrot.lane.b32.xlu1 %v11468_v2, %s12218_s29  ;;  %v5106_v40 = vrot.slane %v5104_v56, 5  ;;  %v5110_v15 = vrot.slane %v5108_v25, 4  ;;  %v5394_v20 = vrot.slane %v4871_v59, 5  ;;  %v5680_v10 = vshrl.u32 %v5455_v0, 16 }
 0x236   : > { %v5116_v55 = vrot.slane %v5114_v60, 5  ;;  %v5101_v44 = vor.u32 %v5100_v33, %v5097_v21  ;;  %v14446_v23 = vsel %vm12606_vm7, %v11388_v29, %v5391_v50  ;;  %v5393_v27 = vrot.slane %v5391_v50, 4  ;;  %v5479_v31 = vld [vmem:[#allocation3 + $0x80] sm:$0x1]  ;;  %v1337_v59 = vld [vmem:[#allocation3 + $0x8c] sm:$0x1]  ;;  %v14454_v29 = vpop.permute.xlu1 %6167  ;;  %v14460_v21 = vpop.permute.xlu0 %6247 }
 0x237   : > { %v5111_v36 = vor.u32 %v5110_v15, %v5106_v40  ;;  %v5683_v9 = vshll.u32 %v5455_v0, 16  ;;  %v5693_v52 = vshrl.u32 %v14441_v53, 16  ;;  %v11515_v54 = vcombine.low %v5455_v0, %v14441_v53  ;;  %17894 = vst [vmem:[#allocation91_spill] sm:$0xff] %v14454_v29  ;;  %v5879_v0 = vld [vmem:[#allocation3 + $0x78] sm:$0xe]  ;;  %17895 = vst [vmem:[#allocation92_spill] sm:$0xff] %v14460_v21 }
 0x238   : > { %v5102_v18 = vrot.slane %v5101_v44, 4  ;;  %v5395_v25 = vsel %vm12606_vm7, %v5393_v27, %v5394_v20  ;;  %v5682_v2 = vrot.slane %v5680_v10, 4  ;;  %v1127_v33 = vsel %vm12632_vm12, %v1119_v1, %v1126_v24  ;;  %v14464_v1 = vld [vmem:[#allocation3 + $0x84] sm:$0xf] }
 0x239   : > { %v5112_v50 = vrot.slane %v5111_v36, 4  ;;  %v11500_v56 = vcombine.low %v14446_v23, %v5395_v25  ;;  %v5685_v60 = vrot.slane %v5683_v9, 5  ;;  %6607 = vrot.lane.b32.xlu0 %v11515_v54, %s12221_s11  ;;  %1336 = vst.msk [vmem:[#allocation3 + $0x88] sm:$0xf] %vm273_vm0, %v1127_v33  ;;  %v5689_v44 = vshll.u32 %v14441_v53, 16 }
 0x23a   : > { %v5107_v27 = vsel %vm12619_vm10, %v5102_v18, %v5106_v40  ;;  %v5695_v24 = vrot.slane %v5693_v52, 4  ;;  %v5699_v15 = vshll.u32 %v5479_v31, 16  ;;  %v1128_v20 = vrot.slane %v14427_v42, 4  ;;  %v4242_v54 = vld [vmem:[#allocation3 + $0x78] sm:$0xf] }
 0x23b   : > { %v5117_v9 = vsel %vm12619_vm10, %v5112_v50, %v5116_v55  ;;  %v5704_v23 = vshrl.u32 %v14464_v1, 16  ;;  %v5707_v10 = vshll.u32 %v14464_v1, 16  ;;  %v5686_v36 = vor.u32 %v5685_v60, %v5682_v2  ;;  %v14473_v40 = vld [vmem:[#allocation3 + $0x7c] sm:$0xf] }
 0x23c   : > { %v11484_v25 = vcombine.low %v5107_v27, %v5117_v9  ;;  %v5691_v33 = vrot.slane %v5689_v44, 5  ;;  %v5701_v48 = vrot.slane %v5699_v15, 5  ;;  %v1338_v18 = vsel %vm12639_vm13, %v1128_v20, %v1337_v59  ;;  %v14477_v27 = vpop.permute.xlu1 %6169  ;;  %v14481_v15 = vld [vmem:[#allocation3 + $0x80] sm:$0x1] }
 0x23d   : > { %v5706_v52 = vrot.slane %v5704_v23, 4  ;;  %v5709_v58 = vrot.slane %v5707_v10, 5  ;;  %v5687_v42 = vrot.slane %v5686_v36, 4  ;;  %1339 = vst [vmem:[#allocation3 + $0x8c] sm:$0x1] %v1338_v18  ;;  %v11403_v21 = vrot.slane %v5879_v0, 9  ;;  %v14484_v23 = vpop.permute.xlu0 %6343 }
 0x23e   : > { %6433 = vrot.lane.b32.xlu1 %v11484_v25, %s12219_s30  ;;  %v5696_v55 = vor.u32 %v5695_v24, %v5691_v33  ;;  %v5993_v50 = vrot.slane %v14441_v53, 5  ;;  %v5996_v2 = vrot.slane %v5479_v31, 5  ;;  %v4511_v60 = vshrl.u32 %v4242_v54, 16  ;;  %17896 = vst [vmem:[#allocation93_spill] sm:$0xff] %v14477_v27  ;;  %17897 = vst [vmem:[#allocation94_spill] sm:$0xff] %v14484_v23 }
 0x23f   : > { %v5692_v44 = vsel %vm12619_vm10, %v5687_v42, %v5691_v33  ;;  %v5710_v59 = vor.u32 %v5709_v58, %v5706_v52  ;;  %v4514_v20 = vshll.u32 %v4242_v54, 16  ;;  %v4520_v9 = vshll.u32 %v14473_v40, 16  ;;  %v5880_v58 = vld [vmem:[#allocation3 + $0x84] sm:$0xe] }
 0x240   : > { %v5458_v0 = vld [vmem:[#allocation3 + $0x88] sm:$0xf]  ;;  %v5697_v10 = vrot.slane %v5696_v55, 4  ;;  %v5994_v53 = vsel %vm12606_vm7, %v11403_v21, %v5993_v50  ;;  %v5995_v31 = vrot.slane %v5993_v50, 4  ;;  %v4513_v24 = vrot.slane %v4511_v60, 4 }
 0x241   : > { %v5717_v36 = vshrl.u32 %v5458_v0, 16  ;;  %v11516_v25 = vcombine.low %v14464_v1, %v5458_v0  ;;  %v5711_v18 = vrot.slane %v5710_v59, 4  ;;  %v5713_v33 = vshll.u32 %v5458_v0, 16 }
 0x242   : > { %6513 = vrot.lane.b32.xlu1 %v11500_v56, %s12220_s7  ;;  %v5702_v54 = vsel %vm12619_vm10, %v5697_v10, %v5701_v48  ;;  %v5997_v52 = vsel %vm12606_vm7, %v5995_v31, %v5996_v2  ;;  %v4516_v42 = vrot.slane %v4514_v20, 5  ;;  %v4522_v55 = vrot.slane %v4520_v9, 5  ;;  %v14496_v56 = vpop.permute.xlu1 %6249  ;;  %v4244_v9 = vld [vmem:[#allocation3 + $0x84] sm:$0xf]  ;;  %v14501_v10 = vpop.permute.xlu0 %6423 }
 0x243   : > { %v11531_v23 = vcombine.low %v5692_v44, %v5702_v54  ;;  %v5715_v21 = vrot.slane %v5713_v33, 5  ;;  %v5719_v50 = vrot.slane %v5717_v36, 4  ;;  %v11547_v60 = vcombine.low %v5994_v53, %v5997_v52  ;;  %17898 = vst [vmem:[#allocation95_spill] sm:$0xff] %v14501_v10  ;;  %v4245_v33 = vld [vmem:[#allocation3 + $0x88] sm:$0xf] }
 0x244   : > { %v5480_v27 = vld [vmem:[#allocation3 + $0x8c] sm:$0x1]  ;;  %v4517_v29 = vor.u32 %v4516_v42, %v4513_v24  ;;  %v4524_v1 = vshrl.u32 %v14473_v40, 16  ;;  %v4530_v59 = vshll.u32 %v14481_v15, 16  ;;  %v11404_v51 = vrot.slane %v5880_v58, 9 }
 0x245   : > { %6687 = vrot.lane.b32.xlu0 %v11531_v23, %s12222_s12  ;;  %v5716_v48 = vsel %vm12619_vm10, %v5711_v18, %v5715_v21  ;;  %v5720_v2 = vor.u32 %v5719_v50, %v5715_v21  ;;  %v5723_v20 = vshll.u32 %v5480_v27, 16  ;;  %v6000_v44 = vrot.slane %v5458_v0, 5  ;;  %v14508_v42 = vld [vmem:[#allocation3 + $0x8c] sm:$0x1] }
 0x246   : > { %6609 = vrot.lane.b32.xlu1 %v11516_v25, %s12221_s11  ;;  %v4518_v53 = vrot.slane %v4517_v29, 4  ;;  %v4526_v31 = vrot.slane %v4524_v1, 4  ;;  %v4532_v24 = vrot.slane %v4530_v59, 5  ;;  %v6003_v36 = vrot.slane %v5480_v27, 5 }
 0x247   : > { %v5721_v58 = vrot.slane %v5720_v2, 4  ;;  %v5725_v54 = vrot.slane %v5723_v20, 5  ;;  %v6001_v23 = vsel %vm12606_vm7, %v11404_v51, %v6000_v44  ;;  %v6002_v52 = vrot.slane %v6000_v44, 4  ;;  %v4664_v51 = vld [vmem:[#allocation3 + $0x78] sm:$0xe] }
 0x248   : > { %v4523_v18 = vsel %vm12619_vm10, %v4518_v53, %v4522_v55  ;;  %v4527_v0 = vor.u32 %v4526_v31, %v4522_v55  ;;  %v4535_v21 = vshrl.u32 %v4244_v9, 16  ;;  %v4538_v50 = vshll.u32 %v4244_v9, 16  ;;  %v14515_v55 = vpop.permute.xlu1 %6345 }
 0x249   : > { %v5726_v29 = vsel %vm12619_vm10, %v5721_v58, %v5725_v54  ;;  %6767 = vrot.lane.b32.xlu0 %v11547_v60, %s12223_s13  ;;  %v6004_v27 = vsel %vm12606_vm7, %v6002_v52, %v6003_v36  ;;  %v4544_v25 = vshll.u32 %v4245_v33, 16  ;;  %v4548_v1 = vshrl.u32 %v4245_v33, 16  ;;  %v4665_v58 = vld [vmem:[#allocation3 + $0x84] sm:$0xe]  ;;  %v14518_v54 = vpop.permute.xlu0 %6503 }
 0x24a   : > { %v11532_v59 = vcombine.low %v5716_v48, %v5726_v29  ;;  %v4528_v2 = vrot.slane %v4527_v0, 4  ;;  %v11548_v20 = vcombine.low %v6001_v23, %v6004_v27  ;;  %v4537_v44 = vrot.slane %v4535_v21, 4  ;;  %17899 = vst [vmem:[#allocation96_spill] sm:$0xff] %v14518_v54  ;;  %v4850_v29 = vld [vmem:[#allocation3 + $0x84] sm:$0xf] }
 0x24b   : > { %v4540_v53 = vrot.slane %v4538_v50, 5  ;;  %v4546_v31 = vrot.slane %v4544_v25, 5  ;;  %v4550_v9 = vrot.slane %v4548_v1, 4  ;;  %v4554_v10 = vshll.u32 %v14508_v42, 16  ;;  %v14526_v27 = vld [vmem:[#allocation3 + $0x88] sm:$0xf] }
 0x24c   : > { %6689 = vrot.lane.b32.xlu1 %v11532_v59, %s12222_s12  ;;  %v4533_v60 = vsel %vm12619_vm10, %v4528_v2, %v4532_v24  ;;  %v11373_v36 = vrot.slane %v4664_v51, 9  ;;  %v4790_v48 = vrot.slane %v14473_v40, 5  ;;  %v4793_v23 = vrot.slane %v14481_v15, 5  ;;  %v14528_v25 = vld [vmem:[#allocation2 + $0xc4] sm:$0xf] }
 0x24d   : > { %v11437_v52 = vcombine.low %v4523_v18, %v4533_v60  ;;  %6769 = vrot.lane.b32.xlu0 %v11548_v20, %s12223_s13  ;;  %v4541_v0 = vor.u32 %v4540_v53, %v4537_v44  ;;  %v4551_v21 = vor.u32 %v4550_v9, %v4546_v31  ;;  %v4556_v50 = vrot.slane %v4554_v10, 5  ;;  %17900 = vst [vmem:[#allocation97_spill] sm:$0xff] %v14528_v25  ;;  %v932_v9 = vld [vmem:[%s13689_s10 + $0x58] sm:$0xf]  ;;  %v12115_v25 = vld [vmem:[#allocation3 + $0x4] sm:$0xf] }
 0x24e   : > { %v4791_v24 = vsel %vm12606_vm7, %v11373_v36, %v4790_v48  ;;  %v4792_v40 = vrot.slane %v4790_v48, 4  ;;  %v11374_v51 = vrot.slane %v4665_v58, 9  ;;  %v4797_v59 = vrot.slane %v4245_v33, 5  ;;  %v933_v48 = vld [vmem:[%s13689_s10 + $0x5c] sm:$0xf] }
 0x24f   : > { %v4542_v15 = vrot.slane %v4541_v0, 4  ;;  %v4552_v18 = vrot.slane %v4551_v21, 4  ;;  %v4800_v2 = vrot.slane %v14508_v42, 5  ;;  %v5119_v20 = vshrl.u32 %v4850_v29, 16  ;;  %v12114_v1 = vld [vmem:[#allocation3] sm:$0xf] }
 0x250   : > { %6179 = vrot.lane.b32.xlu1 %v11437_v52, %s12217_s28  ;;  %v4794_v10 = vsel %vm12606_vm7, %v4792_v40, %v4793_v23  ;;  %v5122_v44 = vshll.u32 %v4850_v29, 16  ;;  %v5132_v53 = vshrl.u32 %v14526_v27, 16  ;;  %v14539_v60 = vpop.permute.xlu1 %6425  ;;  %v4798_v42 = vsel %vm12606_vm7, %v11374_v51, %v4797_v59  ;;  %v14548_v52 = vpop.permute.xlu0 %6599 }
 0x251   : > { %v4547_v58 = vsel %vm12619_vm10, %v4542_v15, %v4546_v31  ;;  %v4557_v33 = vsel %vm12619_vm10, %v4552_v18, %v4556_v50  ;;  %v11453_v36 = vcombine.low %v4791_v24, %v4794_v10  ;;  %17901 = vst [vmem:[#allocation98_spill] sm:$0xff] %v14548_v52  ;;  %v4799_v0 = vrot.slane %v4797_v59, 4  ;;  %v4872_v24 = vld [vmem:[#allocation3 + $0x8c] sm:$0x1] }
 0x252   : > { %v11438_v23 = vcombine.low %v4547_v58, %v4557_v33  ;;  %v5121_v21 = vrot.slane %v5119_v20, 4  ;;  %v5124_v40 = vrot.slane %v5122_v44, 5  ;;  %v11411_v54 = vcombine.low %v12114_v1, %v12115_v25  ;;  %v1340_v44 = vld [vmem:[#allocation3 + $0x90] sm:$0xf] }
 0x253   : > { %6259 = vrot.lane.b32.xlu0 %v11453_v36, %s12216_s27  ;;  %v11469_v31 = vcombine.low %v4850_v29, %v14526_v27  ;;  %v1130_v50 = vshrl.u32 %v932_v9, 16  ;;  %v4801_v51 = vsel %vm12606_vm7, %v4799_v0, %v4800_v2  ;;  %v1133_v15 = vshll.u32 %v932_v9, 16  ;;  %v5272_v36 = vld [vmem:[#allocation3 + $0x84] sm:$0xe] }
 0x254   : > { %6181 = vrot.lane.b32.xlu1 %v11438_v23, %s12217_s28  ;;  %v1138_v18 = vshrl.u32 %v933_v48, 16  ;;  %v1141_v59 = vshll.u32 %v933_v48, 16  ;;  %v11454_v10 = vcombine.low %v4798_v42, %v4801_v51  ;;  %v5125_v58 = vor.u32 %v5124_v40, %v5121_v21  ;;  %v14556_v52 = vpop.permute.xlu1 %6505  ;;  %v1344_v42 = vld [vmem:[#allocation3 + $0x98] sm:$0x1]  ;;  %v12116_v40 = vld [vmem:[#allocation3 + $0xc] sm:$0xf] }
 0x255   : > { %v1132_v20 = vrot.slane %v1130_v50, 7  ;;  %v5128_v25 = vshll.u32 %v14526_v27, 16  ;;  %v5134_v33 = vrot.slane %v5132_v53, 4  ;;  %v5138_v29 = vshll.u32 %v4872_v24, 16  ;;  %v12117_v53 = vld [vmem:[#allocation3 + $0x10] sm:$0xf] }
 0x256   : > { %v1140_v1 = vrot.slane %v1138_v18, 7  ;;  %v5126_v9 = vrot.slane %v5125_v58, 4  ;;  %v6785_v21 = vsel %vm3942_vm14, %v11411_v54, %v14141_v61  ;;  %v11412_v50 = vcombine.low %v12116_v40, %v12117_v53 }
 0x257   : > { %6355 = vrot.lane.b32.xlu0 %v11469_v31, %s12218_s29  ;;  %v1135_v23 = vor.u32 %v1133_v15, %v1132_v20  ;;  %v1136_v2 = vrot.slane %v1132_v20, 4  ;;  %v5130_v48 = vrot.slane %v5128_v25, 5  ;;  %v14559_v0 = vpop.permute.xlu0 %6679  ;;  %v5140_v20 = vrot.slane %v5138_v29, 5  ;;  %v934_v25 = vld [vmem:[%s13689_s10 + $0x60] sm:$0xf] }
 0x258   : > { %17902 = vst [vmem:[#allocation99_spill] sm:$0xff] %v14559_v0  ;;  %6261 = vrot.lane.b32.xlu1 %v11454_v10, %s12216_s27  ;;  %v1143_v51 = vor.u32 %v1141_v59, %v1140_v1  ;;  %v1145_v18 = vrot.slane %v1140_v1, 4  ;;  %v11389_v58 = vrot.slane %v5272_v36, 9  ;;  %v5398_v54 = vrot.slane %v14526_v27, 5  ;;  %v935_v10 = vld [vmem:[%s13689_s10 + $0x64] sm:$0xf]  ;;  %v14580_v27 = vpop.permute.xlu1 %6601 }
 0x259   : > { %v1341_v31 = vsel %vm12626_vm11, %v1135_v23, %v1340_v44  ;;  %v5135_v15 = vor.u32 %v5134_v33, %v5130_v48  ;;  %v5401_v40 = vrot.slane %v4872_v24, 5  ;;  %v5131_v59 = vsel %vm12619_vm10, %v5126_v9, %v5130_v48 }
 0x25a   : > { %v1144_v0 = vsel %vm12632_vm12, %v1136_v2, %v1143_v51  ;;  %1342 = vst [vmem:[#allocation3 + $0x90] sm:$0xf] %v1341_v31  ;;  %v1345_v61 = vsel %vm12639_vm13, %v1145_v18, %v1344_v42  ;;  %v6788_v1 = vsel %vm3942_vm14, %v11412_v50, %v14184_v38  ;;  %v6832_v33 = vsel %vm3991_vm15, %v6785_v21, %v14165_v57  ;;  %v1347_v51 = vld [vmem:[#allocation3 + $0x9c] sm:$0xf] }
 0x25b   : > { %1343 = vst.msk [vmem:[#allocation3 + $0x94] sm:$0xf] %vm273_vm0, %v1144_v0  ;;  %v5136_v44 = vrot.slane %v5135_v15, 4  ;;  %1346 = vst [vmem:[#allocation3 + $0x98] sm:$0x1] %v1345_v61  ;;  %v5400_v29 = vrot.slane %v5398_v54, 4  ;;  %v5399_v23 = vsel %vm12606_vm7, %v11389_v58, %v5398_v54  ;;  %v14586_v48 = vpop.permute.xlu0 %6759  ;;  %v6834_v21 = vsel %vm3991_vm15, %v6788_v1, %v14199_v8 }
 0x25c   : > { %v1147_v36 = vshrl.u32 %v934_v25, 16  ;;  %v1150_v2 = vshll.u32 %v934_v25, 16  ;;  %v1155_v9 = vshrl.u32 %v935_v10, 16  ;;  %v1158_v57 = vshll.u32 %v935_v10, 16  ;;  %v14601_v58 = vld [vmem:[#allocation2 + $0xbc] sm:$0x1] }
 0x25d   : > { %v5141_v24 = vsel %vm12619_vm10, %v5136_v44, %v5140_v20  ;;  %v5402_v38 = vsel %vm12606_vm7, %v5400_v29, %v5401_v40  ;;  %v6864_v53 = vsel %vm4024_vm1, %v6832_v33, %v14186_v46  ;;  %v6866_v18 = vsel %vm4024_vm1, %v6834_v21, %v14213_v12  ;;  %17903 = vst [vmem:[#allocation100_spill] sm:$0xff] %v14601_v58 }
 0x25e   : > { %v11485_v42 = vcombine.low %v5131_v59, %v5141_v24  ;;  %v1149_v0 = vrot.slane %v1147_v36, 7  ;;  %v14594_v50 = vrot.slane %v1155_v9, 7  ;;  %v6896_v31 = vsel %vm4057_vm2, %v6864_v53, %v14202_v14 }
 0x25f   : > { %v11501_v15 = vcombine.low %v5399_v23, %v5402_v38  ;;  %v14606_v46 = vsel %vm4057_vm2, %v6866_v18, %v14238_v35  ;;  %v14610_v25 = vsel %vm4090_vm3, %v6896_v31, %v14215_v45  ;;  %v14615_v33 = vpop.permute.xlu1 %6681  ;;  %v14617_v23 = vpop.permute.xlu0 %6761 }
 0x260   : > { %6435 = vrot.lane.b32.xlu0 %v11485_v42, %s12219_s30  ;;  %v1152_v20 = vor.u32 %v1150_v2, %v1149_v0  ;;  %v1153_v54 = vrot.slane %v1149_v0, 4  ;;  %v1160_v44 = vor.u32 %v1158_v57, %v14594_v50  ;;  %17904 = vst [vmem:[#allocation101_spill] sm:$0xff] %v14617_v23 }
 0x261   : > { %v4852_v12 = vld [vmem:[#allocation3 + $0x90] sm:$0xf] }
 0x262   : > { %v5273_v61 = vld [vmem:[#allocation3 + $0x90] sm:$0xe]  ;;  %v4853_v14 = vld [vmem:[#allocation3 + $0x94] sm:$0xf]  ;;  %v5143_v40 = vshrl.u32 %v4852_v12, 16  ;;  %v5146_v10 = vshll.u32 %v4852_v12, 16  ;;  %v1348_v1 = vsel %vm12626_vm11, %v1152_v20, %v1347_v51 }
 0x263   : > { %v4873_v59 = vld [vmem:[#allocation3 + $0x98] sm:$0x1]  ;;  %v5156_v35 = vshrl.u32 %v4853_v14, 16  ;;  %v11470_v29 = vcombine.low %v4852_v12, %v4853_v14  ;;  %v5152_v36 = vshll.u32 %v4853_v14, 16  ;;  %v5459_v45 = vld [vmem:[#allocation3 + $0x90] sm:$0xf] }
 0x264   : > { %v5162_v24 = vshll.u32 %v4873_v59, 16  ;;  %1349 = vst [vmem:[#allocation3 + $0x9c] sm:$0xf] %v1348_v1  ;;  %v5145_v2 = vrot.slane %v5143_v40, 4  ;;  %v5148_v9 = vrot.slane %v5146_v10, 5  ;;  %6515 = vrot.lane.b32.xlu0 %v11501_v15, %s12220_s7  ;;  %v11390_v42 = vrot.slane %v5273_v61, 9 }
 0x265   : > { %v5405_v38 = vrot.slane %v4853_v14, 5  ;;  %v14620_v0 = vld [vmem:[#allocation3 + $0x94] sm:$0xf]  ;;  %6357 = vrot.lane.b32.xlu1 %v11470_v29, %s12218_s29  ;;  %v5154_v57 = vrot.slane %v5152_v36, 5  ;;  %v5158_v21 = vrot.slane %v5156_v35, 4  ;;  %v5408_v51 = vrot.slane %v4873_v59, 5 }
 0x266   : > { %v5164_v53 = vrot.slane %v5162_v24, 5  ;;  %v5149_v18 = vor.u32 %v5148_v9, %v5145_v2  ;;  %v5728_v12 = vshrl.u32 %v5459_v45, 16  ;;  %v5731_v10 = vshll.u32 %v5459_v45, 16  ;;  %v5481_v14 = vld [vmem:[#allocation3 + $0x98] sm:$0x1]  ;;  %v14633_v24 = vpop.permute.xlu1 %6171 }
 0x267   : > { %v14625_v31 = vsel %vm12606_vm7, %v11390_v42, %v5405_v38  ;;  %v5407_v20 = vrot.slane %v5405_v38, 4  ;;  %v5159_v40 = vor.u32 %v5158_v21, %v5154_v57  ;;  %v5741_v15 = vshrl.u32 %v14620_v0, 16  ;;  %v1351_v36 = vld [vmem:[#allocation3 + $0xa4] sm:$0x1]  ;;  %17905 = vst [vmem:[#allocation102_spill] sm:$0xff] %v14633_v24  ;;  %v14639_v21 = vpop.permute.xlu0 %6251 }
 0x268   : > { %v11517_v61 = vcombine.low %v5459_v45, %v14620_v0  ;;  %v5150_v1 = vrot.slane %v5149_v18, 4  ;;  %v5730_v29 = vrot.slane %v5728_v12, 4  ;;  %v1161_v59 = vsel %vm12632_vm12, %v1153_v54, %v1160_v44  ;;  %v5881_v38 = vld [vmem:[#allocation3 + $0x90] sm:$0xe]  ;;  %17906 = vst [vmem:[#allocation103_spill] sm:$0xff] %v14639_v21 }
 0x269   : > { %v5409_v35 = vsel %vm12606_vm7, %v5407_v20, %v5408_v51  ;;  %v5160_v2 = vrot.slane %v5159_v40, 4  ;;  %v5733_v42 = vrot.slane %v5731_v10, 5  ;;  %1350 = vst.msk [vmem:[#allocation3 + $0xa0] sm:$0xf] %vm273_vm0, %v1161_v59  ;;  %v5737_v45 = vshll.u32 %v14620_v0, 16 }
 0x26a   : > { %v11502_v9 = vcombine.low %v14625_v31, %v5409_v35  ;;  %6611 = vrot.lane.b32.xlu0 %v11517_v61, %s12221_s11  ;;  %v5155_v51 = vsel %vm12619_vm10, %v5150_v1, %v5154_v57  ;;  %v5743_v44 = vrot.slane %v5741_v15, 4  ;;  %v5747_v18 = vshll.u32 %v5481_v14, 16  ;;  %v4246_v61 = vld [vmem:[#allocation3 + $0x90] sm:$0xf]  ;;  %v14652_v1 = vld [vmem:[#allocation3 + $0x94] sm:$0xf] }
 0x26b   : > { %v14643_v54 = vld [vmem:[#allocation3 + $0x9c] sm:$0xf]  ;;  %v1162_v20 = vrot.slane %v14594_v50, 4  ;;  %v5165_v31 = vsel %vm12619_vm10, %v5160_v2, %v5164_v53  ;;  %v5734_v10 = vor.u32 %v5733_v42, %v5730_v29  ;;  %v5739_v59 = vrot.slane %v5737_v45, 5 }
 0x26c   : > { %v5752_v12 = vshrl.u32 %v14643_v54, 16  ;;  %v5755_v40 = vshll.u32 %v14643_v54, 16  ;;  %v11486_v35 = vcombine.low %v5155_v51, %v5165_v31  ;;  %v5749_v8 = vrot.slane %v5747_v18, 5  ;;  %v14656_v51 = vpop.permute.xlu1 %6173  ;;  %v14660_v18 = vld [vmem:[#allocation3 + $0x98] sm:$0x1] }
 0x26d   : > { %v1352_v57 = vsel %vm12639_vm13, %v1162_v20, %v1351_v36  ;;  %v5735_v50 = vrot.slane %v5734_v10, 4  ;;  %v11405_v21 = vrot.slane %v5881_v38, 9  ;;  %v5744_v53 = vor.u32 %v5743_v44, %v5739_v59  ;;  %17907 = vst [vmem:[#allocation104_spill] sm:$0xff] %v14656_v51 }
 0x26e   : > { %v5754_v15 = vrot.slane %v5752_v12, 4  ;;  %v5757_v58 = vrot.slane %v5755_v40, 5  ;;  %1353 = vst [vmem:[#allocation3 + $0xa4] sm:$0x1] %v1352_v57  ;;  %6437 = vrot.lane.b32.xlu1 %v11486_v35, %s12219_s30  ;;  %v6007_v2 = vrot.slane %v14620_v0, 5  ;;  %v6010_v29 = vrot.slane %v5481_v14, 5  ;;  %v14663_v12 = vpop.permute.xlu0 %6347 }
 0x26f   : > { %v4559_v42 = vshrl.u32 %v4246_v61, 16  ;;  %v5740_v45 = vsel %vm12619_vm10, %v5735_v50, %v5739_v59  ;;  %v4562_v20 = vshll.u32 %v4246_v61, 16  ;;  %v4568_v31 = vshll.u32 %v14652_v1, 16  ;;  %17908 = vst [vmem:[#allocation105_spill] sm:$0xff] %v14663_v12 }
 0x270   : > { %v5758_v36 = vor.u32 %v5757_v58, %v5754_v15  ;;  %v5462_v38 = vld [vmem:[#allocation3 + $0xa0] sm:$0xf]  ;;  %v5745_v40 = vrot.slane %v5744_v53, 4  ;;  %v6008_v0 = vsel %vm12606_vm7, %v11405_v21, %v6007_v2  ;;  %v6009_v14 = vrot.slane %v6007_v2, 4  ;;  %v5882_v58 = vld [vmem:[#allocation3 + $0x9c] sm:$0xe] }
 0x271   : > { %v4561_v44 = vrot.slane %v4559_v42, 4  ;;  %v5765_v10 = vshrl.u32 %v5462_v38, 16  ;;  %v11518_v35 = vcombine.low %v14643_v54, %v5462_v38  ;;  %v5761_v59 = vshll.u32 %v5462_v38, 16 }
 0x272   : > { %v5759_v57 = vrot.slane %v5758_v36, 4  ;;  %6517 = vrot.lane.b32.xlu1 %v11502_v9, %s12220_s7  ;;  %v5750_v61 = vsel %vm12619_vm10, %v5745_v40, %v5749_v8  ;;  %v6011_v15 = vsel %vm12606_vm7, %v6009_v14, %v6010_v29  ;;  %v4564_v50 = vrot.slane %v4562_v20, 5  ;;  %v14675_v9 = vpop.permute.xlu1 %6253  ;;  %v14680_v40 = vpop.permute.xlu0 %6427 }
 0x273   : > { %v4570_v53 = vrot.slane %v4568_v31, 5  ;;  %v11533_v12 = vcombine.low %v5740_v45, %v5750_v61  ;;  %v5763_v21 = vrot.slane %v5761_v59, 5  ;;  %v5767_v2 = vrot.slane %v5765_v10, 4  ;;  %v4248_v31 = vld [vmem:[#allocation3 + $0x9c] sm:$0xf]  ;;  %17909 = vst [vmem:[#allocation106_spill] sm:$0xff] %v14680_v40 }
 0x274   : > { %v11549_v42 = vcombine.low %v6008_v0, %v6011_v15  ;;  %v4565_v23 = vor.u32 %v4564_v50, %v4561_v44  ;;  %v4572_v54 = vshrl.u32 %v14652_v1, 16  ;;  %v4578_v36 = vshll.u32 %v14660_v18, 16  ;;  %v4249_v59 = vld [vmem:[#allocation3 + $0xa0] sm:$0xf] }
 0x275   : > { %v5482_v51 = vld [vmem:[#allocation3 + $0xa4] sm:$0x1]  ;;  %v11406_v24 = vrot.slane %v5882_v58, 9  ;;  %6691 = vrot.lane.b32.xlu0 %v11533_v12, %s12222_s12  ;;  %v5764_v8 = vsel %vm12619_vm10, %v5759_v57, %v5763_v21  ;;  %v5768_v29 = vor.u32 %v5767_v2, %v5763_v21  ;;  %v6014_v45 = vrot.slane %v5462_v38, 5 }
 0x276   : > { %v5771_v20 = vshll.u32 %v5482_v51, 16  ;;  %6613 = vrot.lane.b32.xlu1 %v11518_v35, %s12221_s11  ;;  %v4566_v0 = vrot.slane %v4565_v23, 4  ;;  %v4574_v14 = vrot.slane %v4572_v54, 4  ;;  %v4580_v44 = vrot.slane %v4578_v36, 5  ;;  %v14687_v50 = vld [vmem:[#allocation3 + $0xa4] sm:$0x1] }
 0x277   : > { %v6017_v10 = vrot.slane %v5482_v51, 5  ;;  %v5769_v58 = vrot.slane %v5768_v29, 4  ;;  %v6015_v12 = vsel %vm12606_vm7, %v11406_v24, %v6014_v45  ;;  %v6016_v15 = vrot.slane %v6014_v45, 4  ;;  %v4666_v24 = vld [vmem:[#allocation3 + $0x90] sm:$0xe] }
 0x278   : > { %v5773_v61 = vrot.slane %v5771_v20, 5  ;;  %v4571_v57 = vsel %vm12619_vm10, %v4566_v0, %v4570_v53  ;;  %v4575_v38 = vor.u32 %v4574_v14, %v4570_v53  ;;  %v4583_v21 = vshrl.u32 %v4248_v31, 16  ;;  %v14694_v53 = vpop.permute.xlu1 %6349 }
 0x279   : > { %v4586_v2 = vshll.u32 %v4248_v31, 16  ;;  %6771 = vrot.lane.b32.xlu0 %v11549_v42, %s12223_s13  ;;  %v6018_v51 = vsel %vm12606_vm7, %v6016_v15, %v6017_v10  ;;  %v4592_v35 = vshll.u32 %v4249_v59, 16  ;;  %v4596_v54 = vshrl.u32 %v4249_v59, 16 }
 0x27a   : > { %v5774_v23 = vsel %vm12619_vm10, %v5769_v58, %v5773_v61  ;;  %v4576_v29 = vrot.slane %v4575_v38, 4  ;;  %v11550_v20 = vcombine.low %v6015_v12, %v6018_v51  ;;  %v4585_v45 = vrot.slane %v4583_v21, 4  ;;  %v4667_v58 = vld [vmem:[#allocation3 + $0x9c] sm:$0xe]  ;;  %v14697_v61 = vpop.permute.xlu0 %6507  ;;  %v14705_v51 = vld [vmem:[#allocation3 + $0xa0] sm:$0xf] }
 0x27b   : > { %v11534_v36 = vcombine.low %v5764_v8, %v5774_v23  ;;  %v4588_v0 = vrot.slane %v4586_v2, 5  ;;  %v4594_v14 = vrot.slane %v4592_v35, 5  ;;  %v4598_v31 = vrot.slane %v4596_v54, 4  ;;  %17910 = vst [vmem:[#allocation107_spill] sm:$0xff] %v14697_v61  ;;  %v4854_v23 = vld [vmem:[#allocation3 + $0x9c] sm:$0xf] }
 0x27c   : > { %v4602_v40 = vshll.u32 %v14687_v50, 16  ;;  %v4581_v42 = vsel %vm12619_vm10, %v4576_v29, %v4580_v44  ;;  %v11375_v10 = vrot.slane %v4666_v24, 9  ;;  %v4804_v8 = vrot.slane %v14652_v1, 5 }
 0x27d   : > { %6693 = vrot.lane.b32.xlu1 %v11534_v36, %s12222_s12  ;;  %v4807_v12 = vrot.slane %v14660_v18, 5  ;;  %v11439_v15 = vcombine.low %v4571_v57, %v4581_v42  ;;  %6773 = vrot.lane.b32.xlu0 %v11550_v20, %s12223_s13  ;;  %v4589_v38 = vor.u32 %v4588_v0, %v4585_v45  ;;  %v4599_v21 = vor.u32 %v4598_v31, %v4594_v14 }
 0x27e   : > { %v4604_v2 = vrot.slane %v4602_v40, 5  ;;  %v6930_v35 = vsel %vm4090_vm3, %v14606_v46, %v14251_v17  ;;  %v4805_v44 = vsel %vm12606_vm7, %v11375_v10, %v4804_v8  ;;  %v4806_v1 = vrot.slane %v4804_v8, 4  ;;  %v936_v46 = vld [vmem:[%s13689_s10 + $0x68] sm:$0xf]  ;;  %v14727_v42 = vpop.permute.xlu0 %6603 }
 0x27f   : > { %v11376_v54 = vrot.slane %v4667_v58, 9  ;;  %v4590_v18 = vrot.slane %v4589_v38, 4  ;;  %v4600_v57 = vrot.slane %v4599_v21, 4  ;;  %v4811_v24 = vrot.slane %v4249_v59, 5  ;;  %v937_v58 = vld [vmem:[%s13689_s10 + $0x6c] sm:$0xf] }
 0x280   : > { %v4814_v36 = vrot.slane %v14687_v50, 5  ;;  %v4808_v40 = vsel %vm12606_vm7, %v4806_v1, %v4807_v12  ;;  %v5167_v29 = vshrl.u32 %v4854_v23, 16  ;;  %v5170_v20 = vshll.u32 %v4854_v23, 16  ;;  %17911 = vst [vmem:[#allocation108_spill] sm:$0xff] %v14727_v42  ;;  %v14729_v38 = vld [vmem:[#allocation3 + $0x18] sm:$0xf] }
 0x281   : > { %6183 = vrot.lane.b32.xlu1 %v11439_v15, %s12217_s28  ;;  %v5180_v17 = vshrl.u32 %v14705_v51, 16  ;;  %v14718_v45 = vpop.permute.xlu1 %6429  ;;  %v4595_v0 = vsel %vm12619_vm10, %v4590_v18, %v4594_v14  ;;  %v4605_v59 = vsel %vm12619_vm10, %v4600_v57, %v4604_v2  ;;  %v11455_v31 = vcombine.low %v4805_v44, %v4808_v40  ;;  %v14731_v21 = vld [vmem:[#allocation3 + $0x1c] sm:$0xf]  ;;  %v4874_v1 = vld [vmem:[#allocation3 + $0xa4] sm:$0x1] }
 0x282   : > { %v4812_v50 = vsel %vm12606_vm7, %v11376_v54, %v4811_v24  ;;  %v11440_v10 = vcombine.low %v4595_v0, %v4605_v59  ;;  %v4813_v8 = vrot.slane %v4811_v24, 4  ;;  %v5169_v12 = vrot.slane %v5167_v29, 4 }
 0x283   : > { %v5172_v15 = vrot.slane %v5170_v20, 5  ;;  %6263 = vrot.lane.b32.xlu0 %v11455_v31, %s12216_s27  ;;  %v11471_v2 = vcombine.low %v4854_v23, %v14705_v51  ;;  %v1164_v44 = vshrl.u32 %v936_v46, 16  ;;  %v1167_v18 = vshll.u32 %v936_v46, 16  ;;  %v1354_v20 = vld [vmem:[#allocation3 + $0xa8] sm:$0xf] }
 0x284   : > { %v4815_v54 = vsel %vm12606_vm7, %v4813_v8, %v4814_v36  ;;  %v1172_v57 = vshrl.u32 %v937_v58, 16  ;;  %v1175_v24 = vshll.u32 %v937_v58, 16  ;;  %v5176_v59 = vshll.u32 %v14705_v51, 16  ;;  %v1358_v8 = vld [vmem:[#allocation3 + $0xb0] sm:$0x1] }
 0x285   : > { %6185 = vrot.lane.b32.xlu1 %v11440_v10, %s12217_s28  ;;  %v11456_v40 = vcombine.low %v4812_v50, %v4815_v54  ;;  %v1166_v29 = vrot.slane %v1164_v44, 7  ;;  %v5173_v0 = vor.u32 %v5172_v15, %v5169_v12  ;;  %v6960_v23 = vsel %vm4123_vm4, %v14610_v25, %v14240_v4  ;;  %v5274_v10 = vld [vmem:[#allocation3 + $0x9c] sm:$0xe]  ;;  %v14744_v61 = vpop.permute.xlu1 %6509 }
 0x286   : > { %v1174_v31 = vrot.slane %v1172_v57, 7  ;;  %v5182_v14 = vrot.slane %v5180_v17, 4  ;;  %v5186_v42 = vshll.u32 %v4874_v1, 16  ;;  %v5178_v58 = vrot.slane %v5176_v59, 5 }
 0x287   : > { %6359 = vrot.lane.b32.xlu0 %v11471_v2, %s12218_s29  ;;  %v1169_v36 = vor.u32 %v1167_v18, %v1166_v29  ;;  %v1170_v46 = vrot.slane %v1166_v29, 4  ;;  %v5174_v50 = vrot.slane %v5173_v0, 4  ;;  %v14747_v12 = vpop.permute.xlu0 %6683  ;;  %v6962_v4 = vsel %vm4123_vm4, %v6930_v35, %v14273_v6  ;;  %v938_v18 = vld [vmem:[%s13689_s10 + $0x70] sm:$0xf]  ;;  %v12121_v0 = vld [vmem:[#allocation3 + $0x24] sm:$0xf] }
 0x288   : > { %v1177_v25 = vor.u32 %v1175_v24, %v1174_v31  ;;  %v1179_v17 = vrot.slane %v1174_v31, 4  ;;  %v5183_v2 = vor.u32 %v5182_v14, %v5178_v58  ;;  %v5188_v44 = vrot.slane %v5186_v42, 5 }
 0x289   : > { %6265 = vrot.lane.b32.xlu1 %v11456_v40, %s12216_s27  ;;  %v1355_v15 = vsel %vm12626_vm11, %v1169_v36, %v1354_v20  ;;  %v11391_v54 = vrot.slane %v5274_v10, 9  ;;  %v5412_v6 = vrot.slane %v14705_v51, 5  ;;  %v5415_v35 = vrot.slane %v4874_v1, 5  ;;  %v939_v40 = vld [vmem:[%s13689_s10 + $0x74] sm:$0xf]  ;;  %v14768_v10 = vpop.permute.xlu1 %6605 }
 0x28a   : > { %v1178_v57 = vsel %vm12632_vm12, %v1170_v46, %v1177_v25  ;;  %1356 = vst [vmem:[#allocation3 + $0xa8] sm:$0xf] %v1355_v15  ;;  %v1359_v29 = vsel %vm12639_vm13, %v1179_v17, %v1358_v8  ;;  %v6992_v24 = vsel %vm4156_vm5, %v6960_v23, %v14253_v22  ;;  %v12122_v20 = vld [vmem:[#allocation3 + $0x28] sm:$0xf]  ;;  %v5179_v42 = vsel %vm12619_vm10, %v5174_v50, %v5178_v58 }
 0x28b   : > { %v11414_v14 = vcombine.low %v12121_v0, %v12122_v20  ;;  %1357 = vst.msk [vmem:[#allocation3 + $0xac] sm:$0xf] %vm273_vm0, %v1178_v57  ;;  %v5184_v59 = vrot.slane %v5183_v2, 4  ;;  %1360 = vst [vmem:[#allocation3 + $0xb0] sm:$0x1] %v1359_v29  ;;  %v6994_v31 = vsel %vm4156_vm5, %v6962_v4, %v14286_v5  ;;  %v5414_v51 = vrot.slane %v5412_v6, 4  ;;  %v14774_v8 = vpop.permute.xlu0 %6763 }
 0x28c   : > { %v1181_v1 = vshrl.u32 %v938_v18, 16  ;;  %v5413_v23 = vsel %vm12606_vm7, %v11391_v54, %v5412_v6  ;;  %v1184_v36 = vshll.u32 %v938_v18, 16  ;;  %v1189_v46 = vshrl.u32 %v939_v40, 16  ;;  %v1361_v54 = vld [vmem:[#allocation3 + $0xb4] sm:$0xf] }
 0x28d   : > { %v5189_v22 = vsel %vm12619_vm10, %v5184_v59, %v5188_v44  ;;  %v5416_v58 = vsel %vm12606_vm7, %v5414_v51, %v5415_v35  ;;  %v1192_v4 = vshll.u32 %v939_v40, 16  ;;  %v14780_v25 = vsel %vm4189_vm6, %v6992_v24, %v14275_v47  ;;  %v14811_v20 = vpop.permute.xlu1 %6685 }
 0x28e   : > { %v11487_v50 = vcombine.low %v5179_v42, %v5189_v22  ;;  %v1183_v5 = vrot.slane %v1181_v1, 7  ;;  %v17912_v17 = vcombine.low %v14729_v38, %v14731_v21  ;;  %v6794_v2 = vsel %vm3942_vm14, %v11414_v14, %v14326_v62 }
 0x28f   : > { %v14789_v44 = vrot.slane %v1189_v46, 7  ;;  %v6838_v57 = vsel %vm3991_vm15, %v6794_v2, %v14350_v7  ;;  %v11503_v47 = vcombine.low %v5413_v23, %v5416_v58  ;;  %v14798_v38 = vsel %vm4189_vm6, %v6994_v31, %v14288_v16  ;;  %v14813_v31 = vpop.permute.xlu0 %6765 }
 0x290   : > { %v6791_v15 = vsel %vm3942_vm14, %v17912_v17, %v14303_v3  ;;  %6439 = vrot.lane.b32.xlu0 %v11487_v50, %s12219_s30  ;;  %v1186_v29 = vor.u32 %v1184_v36, %v1183_v5  ;;  %v14806_v62 = vsel %vm4024_vm1, %v6838_v57, %v14366_v49  ;;  %v1187_v6 = vrot.slane %v1183_v5, 4  ;;  %17913 = vst [vmem:[#allocation109_spill] sm:$0xff] %v14813_v31 }
 0x291   : > { %v6836_v18 = vsel %vm3991_vm15, %v6791_v15, %v14305_v34  ;;  %v4856_v34 = vld [vmem:[#allocation3 + $0xa8] sm:$0xf]  ;;  %v1194_v0 = vor.u32 %v1192_v4, %v14789_v44 }
 0x292   : > { %v14802_v3 = vsel %vm4024_vm1, %v6836_v18, %v14328_v32  ;;  %v5275_v21 = vld [vmem:[#allocation3 + $0xa8] sm:$0xe]  ;;  %v4857_v7 = vld [vmem:[#allocation3 + $0xac] sm:$0xf]  ;;  %v5191_v35 = vshrl.u32 %v4856_v34, 16  ;;  %v5194_v40 = vshll.u32 %v4856_v34, 16  ;;  %v1362_v16 = vsel %vm12626_vm11, %v1186_v29, %v1361_v54 }
 0x293   : > { %v4875_v24 = vld [vmem:[#allocation3 + $0xb0] sm:$0x1]  ;;  %v5204_v32 = vshrl.u32 %v4857_v7, 16  ;;  %v11472_v14 = vcombine.low %v4856_v34, %v4857_v7  ;;  %v5200_v42 = vshll.u32 %v4857_v7, 16  ;;  %v5463_v49 = vld [vmem:[#allocation3 + $0xa8] sm:$0xf] }
 0x294   : > { %v5210_v59 = vshll.u32 %v4875_v24, 16  ;;  %1363 = vst [vmem:[#allocation3 + $0xb4] sm:$0xf] %v1362_v16  ;;  %v5193_v51 = vrot.slane %v5191_v35, 4  ;;  %v5196_v1 = vrot.slane %v5194_v40, 5  ;;  %6519 = vrot.lane.b32.xlu0 %v11503_v47, %s12220_s7  ;;  %v11392_v22 = vrot.slane %v5275_v21, 9 }
 0x295   : > { %v5419_v23 = vrot.slane %v4857_v7, 5  ;;  %v14816_v36 = vld [vmem:[#allocation3 + $0xac] sm:$0xf]  ;;  %6361 = vrot.lane.b32.xlu1 %v11472_v14, %s12218_s29  ;;  %v5202_v46 = vrot.slane %v5200_v42, 5  ;;  %v5206_v50 = vrot.slane %v5204_v32, 4  ;;  %v5422_v5 = vrot.slane %v4875_v24, 5  ;;  %v14829_v24 = vpop.permute.xlu1 %6175 }
 0x296   : > { %v5212_v58 = vrot.slane %v5210_v59, 5  ;;  %v5197_v4 = vor.u32 %v5196_v1, %v5193_v51  ;;  %v5776_v2 = vshrl.u32 %v5463_v49, 16  ;;  %v5779_v18 = vshll.u32 %v5463_v49, 16  ;;  %v5483_v29 = vld [vmem:[#allocation3 + $0xb0] sm:$0x1] }
 0x297   : > { %v14821_v17 = vsel %vm12606_vm7, %v11392_v22, %v5419_v23  ;;  %v5421_v15 = vrot.slane %v5419_v23, 4  ;;  %v5207_v54 = vor.u32 %v5206_v50, %v5202_v46  ;;  %v5789_v57 = vshrl.u32 %v14816_v36, 16  ;;  %v1365_v40 = vld [vmem:[#allocation3 + $0xbc] sm:$0x1]  ;;  %v5883_v59 = vld [vmem:[#allocation3 + $0xa8] sm:$0xe] }
 0x298   : > { %v11519_v47 = vcombine.low %v5463_v49, %v14816_v36  ;;  %v5198_v34 = vrot.slane %v5197_v4, 4  ;;  %v5778_v7 = vrot.slane %v5776_v2, 4  ;;  %v1195_v35 = vsel %vm12632_vm12, %v1187_v6, %v1194_v0  ;;  %v14835_v49 = vpop.permute.xlu0 %6255 }
 0x299   : > { %v5423_v21 = vsel %vm12606_vm7, %v5421_v15, %v5422_v5  ;;  %v5208_v16 = vrot.slane %v5207_v54, 4  ;;  %v5781_v14 = vrot.slane %v5779_v18, 5  ;;  %1364 = vst.msk [vmem:[#allocation3 + $0xb8] sm:$0xf] %vm273_vm0, %v1195_v35  ;;  %v5785_v42 = vshll.u32 %v14816_v36, 16 }
 0x29a   : > { %v11504_v32 = vcombine.low %v14821_v17, %v5423_v21  ;;  %6615 = vrot.lane.b32.xlu0 %v11519_v47, %s12221_s11  ;;  %v5203_v51 = vsel %vm12619_vm10, %v5198_v34, %v5202_v46  ;;  %v5791_v0 = vrot.slane %v5789_v57, 4  ;;  %v5795_v1 = vshll.u32 %v5483_v29, 16  ;;  %v4250_v17 = vld [vmem:[#allocation3 + $0xa8] sm:$0xf]  ;;  %v14848_v18 = vld [vmem:[#allocation3 + $0xac] sm:$0xf] }
 0x29b   : > { %v14839_v6 = vld [vmem:[#allocation3 + $0xb4] sm:$0xf]  ;;  %v1196_v22 = vrot.slane %v14789_v44, 4  ;;  %v5213_v23 = vsel %vm12619_vm10, %v5208_v16, %v5212_v58  ;;  %v5782_v4 = vor.u32 %v5781_v14, %v5778_v7  ;;  %v5787_v2 = vrot.slane %v5785_v42, 5  ;;  %v14852_v16 = vpop.permute.xlu1 %6177  ;;  %v14856_v42 = vld [vmem:[#allocation3 + $0xb0] sm:$0x1] }
 0x29c   : > { %v5800_v50 = vshrl.u32 %v14839_v6, 16  ;;  %v5803_v5 = vshll.u32 %v14839_v6, 16  ;;  %v11488_v15 = vcombine.low %v5203_v51, %v5213_v23  ;;  %v5797_v54 = vrot.slane %v5795_v1, 5 }
 0x29d   : > { %v1366_v46 = vsel %vm12639_vm13, %v1196_v22, %v1365_v40  ;;  %v5783_v44 = vrot.slane %v5782_v4, 4  ;;  %v11407_v34 = vrot.slane %v5883_v59, 9  ;;  %v5792_v58 = vor.u32 %v5791_v0, %v5787_v2  ;;  %v14859_v22 = vpop.permute.xlu0 %6351 }
 0x29e   : > { %v5802_v57 = vrot.slane %v5800_v50, 4  ;;  %v5805_v47 = vrot.slane %v5803_v5, 5  ;;  %1367 = vst [vmem:[#allocation3 + $0xbc] sm:$0x1] %v1366_v46  ;;  %6441 = vrot.lane.b32.xlu1 %v11488_v15, %s12219_s30  ;;  %v6021_v21 = vrot.slane %v14816_v36, 5  ;;  %v6024_v7 = vrot.slane %v5483_v29, 5 }
 0x29f   : > { %v4607_v35 = vshrl.u32 %v4250_v17, 16  ;;  %v5788_v14 = vsel %vm12619_vm10, %v5783_v44, %v5787_v2  ;;  %v4610_v51 = vshll.u32 %v4250_v17, 16  ;;  %v4616_v1 = vshll.u32 %v14848_v18, 16  ;;  %17914 = vst [vmem:[#allocation110_spill] sm:$0xff] %v14859_v22  ;;  %v5884_v2 = vld [vmem:[#allocation3 + $0xb4] sm:$0xe] }
 0x2a0   : > { %v5806_v40 = vor.u32 %v5805_v47, %v5802_v57  ;;  %v5466_v59 = vld [vmem:[#allocation3 + $0xb8] sm:$0xf]  ;;  %v5793_v23 = vrot.slane %v5792_v58, 4  ;;  %v6022_v36 = vsel %vm12606_vm7, %v11407_v34, %v6021_v21  ;;  %v6023_v29 = vrot.slane %v6021_v21, 4 }
 0x2a1   : > { %v4609_v0 = vrot.slane %v4607_v35, 4  ;;  %v5813_v50 = vshrl.u32 %v5466_v59, 16  ;;  %v11520_v5 = vcombine.low %v14839_v6, %v5466_v59  ;;  %v5809_v15 = vshll.u32 %v5466_v59, 16 }
 0x2a2   : > { %v5807_v4 = vrot.slane %v5806_v40, 4  ;;  %6521 = vrot.lane.b32.xlu1 %v11504_v32, %s12220_s7  ;;  %v5798_v17 = vsel %vm12619_vm10, %v5793_v23, %v5797_v54  ;;  %v6025_v46 = vsel %vm12606_vm7, %v6023_v29, %v6024_v7  ;;  %v4612_v57 = vrot.slane %v4610_v51, 5  ;;  %v14871_v32 = vpop.permute.xlu1 %6257  ;;  %v14876_v23 = vpop.permute.xlu0 %6431 }
 0x2a3   : > { %v4618_v47 = vrot.slane %v4616_v1, 5  ;;  %v11535_v44 = vcombine.low %v5788_v14, %v5798_v17  ;;  %v5811_v34 = vrot.slane %v5809_v15, 5  ;;  %v5815_v58 = vrot.slane %v5813_v50, 4  ;;  %v4252_v1 = vld [vmem:[#allocation3 + $0xb4] sm:$0xf]  ;;  %17915 = vst [vmem:[#allocation111_spill] sm:$0xff] %v14876_v23 }
 0x2a4   : > { %v11551_v21 = vcombine.low %v6022_v36, %v6025_v46  ;;  %v4613_v31 = vor.u32 %v4612_v57, %v4609_v0  ;;  %v4620_v6 = vshrl.u32 %v14848_v18, 16  ;;  %v4626_v40 = vshll.u32 %v14856_v42, 16  ;;  %v4253_v15 = vld [vmem:[#allocation3 + $0xb8] sm:$0xf] }
 0x2a5   : > { %v5484_v35 = vld [vmem:[#allocation3 + $0xbc] sm:$0x1]  ;;  %v11408_v22 = vrot.slane %v5884_v2, 9  ;;  %6695 = vrot.lane.b32.xlu0 %v11535_v44, %s12222_s12  ;;  %v5812_v54 = vsel %vm12619_vm10, %v5807_v4, %v5811_v34  ;;  %v5816_v7 = vor.u32 %v5815_v58, %v5811_v34  ;;  %v6028_v14 = vrot.slane %v5466_v59, 5 }
 0x2a6   : > { %v5819_v51 = vshll.u32 %v5484_v35, 16  ;;  %6617 = vrot.lane.b32.xlu1 %v11520_v5, %s12221_s11  ;;  %v4614_v36 = vrot.slane %v4613_v31, 4  ;;  %v4622_v29 = vrot.slane %v4620_v6, 4  ;;  %v4628_v0 = vrot.slane %v4626_v40, 5  ;;  %v14883_v44 = vld [vmem:[#allocation3 + $0xbc] sm:$0x1] }
 0x2a7   : > { %v6031_v50 = vrot.slane %v5484_v35, 5  ;;  %v5817_v2 = vrot.slane %v5816_v7, 4  ;;  %v6029_v46 = vsel %vm12606_vm7, %v11408_v22, %v6028_v14  ;;  %v6030_v57 = vrot.slane %v6028_v14, 4  ;;  %v4668_v22 = vld [vmem:[#allocation3 + $0xa8] sm:$0xe] }
 0x2a8   : > { %v5821_v17 = vrot.slane %v5819_v51, 5  ;;  %v4619_v4 = vsel %vm12619_vm10, %v4614_v36, %v4618_v47  ;;  %v4623_v59 = vor.u32 %v4622_v29, %v4618_v47  ;;  %v4631_v34 = vshrl.u32 %v4252_v1, 16  ;;  %v14890_v47 = vpop.permute.xlu1 %6353 }
 0x2a9   : > { %v4634_v58 = vshll.u32 %v4252_v1, 16  ;;  %6775 = vrot.lane.b32.xlu0 %v11551_v21, %s12223_s13  ;;  %v6032_v5 = vsel %vm12606_vm7, %v6030_v57, %v6031_v50  ;;  %v4640_v35 = vshll.u32 %v4253_v15, 16  ;;  %v4644_v6 = vshrl.u32 %v4253_v15, 16 }
 0x2aa   : > { %v5822_v31 = vsel %vm12619_vm10, %v5817_v2, %v5821_v17  ;;  %v4624_v7 = vrot.slane %v4623_v59, 4  ;;  %v11552_v51 = vcombine.low %v6029_v46, %v6032_v5  ;;  %v4633_v14 = vrot.slane %v4631_v34, 4  ;;  %v4669_v2 = vld [vmem:[#allocation3 + $0xb4] sm:$0xe]  ;;  %v14893_v17 = vpop.permute.xlu0 %6511  ;;  %v14901_v5 = vld [vmem:[#allocation3 + $0xb8] sm:$0xf] }
 0x2ab   : > { %v11536_v40 = vcombine.low %v5812_v54, %v5822_v31  ;;  %v4636_v36 = vrot.slane %v4634_v58, 5  ;;  %v4642_v29 = vrot.slane %v4640_v35, 5  ;;  %v4646_v1 = vrot.slane %v4644_v6, 4  ;;  %v4858_v31 = vld [vmem:[#allocation3 + $0xb4] sm:$0xf] }
 0x2ac   : > { %v4650_v23 = vshll.u32 %v14883_v44, 16  ;;  %v4629_v21 = vsel %vm12619_vm10, %v4624_v7, %v4628_v0  ;;  %v11377_v50 = vrot.slane %v4668_v22, 9  ;;  %v4818_v54 = vrot.slane %v14848_v18, 5 }
 0x2ad   : > { %6697 = vrot.lane.b32.xlu1 %v11536_v40, %s12222_s12  ;;  %v4821_v46 = vrot.slane %v14856_v42, 5  ;;  %v11441_v57 = vcombine.low %v4619_v4, %v4629_v21  ;;  %6777 = vrot.lane.b32.xlu0 %v11552_v51, %s12223_s13  ;;  %v4637_v59 = vor.u32 %v4636_v36, %v4633_v14  ;;  %v4647_v34 = vor.u32 %v4646_v1, %v4642_v29 }
 0x2ae   : > { %v4652_v58 = vrot.slane %v4650_v23, 5  ;;  %v6900_v35 = vsel %vm4057_vm2, %v14802_v3, %v14352_v13  ;;  %v4819_v0 = vsel %vm12606_vm7, %v11377_v50, %v4818_v54  ;;  %v4820_v18 = vrot.slane %v4818_v54, 4  ;;  %v940_v3 = vld [vmem:[%s13689_s10 + $0x78] sm:$0xf]  ;;  %v14923_v21 = vpop.permute.xlu0 %6607 }
 0x2af   : > { %v11378_v6 = vrot.slane %v4669_v2, 9  ;;  %v4638_v42 = vrot.slane %v4637_v59, 4  ;;  %v4648_v4 = vrot.slane %v4647_v34, 4  ;;  %v4825_v22 = vrot.slane %v4253_v15, 5  ;;  %v941_v2 = vld [vmem:[%s13689_s10 + $0x7c] sm:$0xf] }
 0x2b0   : > { %v4828_v40 = vrot.slane %v14883_v44, 5  ;;  %v4822_v23 = vsel %vm12606_vm7, %v4820_v18, %v4821_v46  ;;  %v5215_v7 = vshrl.u32 %v4858_v31, 16  ;;  %v5218_v51 = vshll.u32 %v4858_v31, 16  ;;  %v14914_v14 = vpop.permute.xlu1 %6433 }
 0x2b1   : > { %6187 = vrot.lane.b32.xlu1 %v11441_v57, %s12217_s28  ;;  %v5228_v13 = vshrl.u32 %v14901_v5, 16  ;;  %v4643_v36 = vsel %vm12619_vm10, %v4638_v42, %v4642_v29  ;;  %v4653_v15 = vsel %vm12619_vm10, %v4648_v4, %v4652_v58  ;;  %v11457_v1 = vcombine.low %v4819_v0, %v4822_v23  ;;  %v14932_v0 = vld [vmem:[#allocation3 + $0xbc] sm:$0x1] }
 0x2b2   : > { %v4826_v44 = vsel %vm12606_vm7, %v11378_v6, %v4825_v22  ;;  %v11442_v50 = vcombine.low %v4643_v36, %v4653_v15  ;;  %v4827_v54 = vrot.slane %v4825_v22, 4  ;;  %v5217_v46 = vrot.slane %v5215_v7, 4  ;;  %v12124_v7 = vld [vmem:[#allocation3 + $0x34] sm:$0xf] }
 0x2b3   : > { %v5220_v57 = vrot.slane %v5218_v51, 5  ;;  %v6902_v59 = vsel %vm4057_vm2, %v14806_v62, %v14391_v30  ;;  %v6932_v29 = vsel %vm4090_vm3, %v6900_v35, %v14368_v63  ;;  %6267 = vrot.lane.b32.xlu0 %v11457_v1, %s12216_s27  ;;  %v11473_v34 = vcombine.low %v4858_v31, %v14901_v5  ;;  %v1368_v62 = vld [vmem:[#allocation3 + $0xc0] sm:$0xf]  ;;  %v12123_v35 = vld [vmem:[#allocation3 + $0x30] sm:$0xf] }
 0x2b4   : > { %v1198_v58 = vshrl.u32 %v940_v3, 16  ;;  %v4829_v18 = vsel %vm12606_vm7, %v4827_v54, %v4828_v40  ;;  %v1201_v6 = vshll.u32 %v940_v3, 16  ;;  %v1206_v42 = vshrl.u32 %v941_v2, 16  ;;  %v5276_v1 = vld [vmem:[#allocation3 + $0xb4] sm:$0xe] }
 0x2b5   : > { %6189 = vrot.lane.b32.xlu1 %v11442_v50, %s12217_s28  ;;  %v1209_v4 = vshll.u32 %v941_v2, 16  ;;  %v11458_v22 = vcombine.low %v4826_v44, %v4829_v18  ;;  %v5221_v23 = vor.u32 %v5220_v57, %v5217_v46  ;;  %v5224_v63 = vshll.u32 %v14901_v5, 16  ;;  %v14939_v50 = vpop.permute.xlu1 %6513  ;;  %v1372_v54 = vld [vmem:[#allocation3 + $0xc8] sm:$0x1]  ;;  %v12126_v18 = vld [vmem:[#allocation3 + $0x40] sm:$0xf] }
 0x2b6   : > { %v1200_v30 = vrot.slane %v1198_v58, 7  ;;  %v11415_v31 = vcombine.low %v12123_v35, %v12124_v7  ;;  %v1208_v51 = vrot.slane %v1206_v42, 7  ;;  %v5230_v36 = vrot.slane %v5228_v13, 4  ;;  %v12125_v58 = vld [vmem:[#allocation3 + $0x3c] sm:$0xf] }
 0x2b7   : > { %v5234_v15 = vshll.u32 %v14932_v0, 16  ;;  %6363 = vrot.lane.b32.xlu0 %v11473_v34, %s12218_s29  ;;  %v5222_v44 = vrot.slane %v5221_v23, 4  ;;  %v5226_v2 = vrot.slane %v5224_v63, 5  ;;  %v14942_v46 = vpop.permute.xlu0 %6687  ;;  %v6934_v57 = vsel %vm4090_vm3, %v6902_v59, %v14399_v11  ;;  %v14949_v63 = vld [vmem:[#allocation3 + $0xcc] sm:$0xf] }
 0x2b8   : > { %v1203_v40 = vor.u32 %v1201_v6, %v1200_v30  ;;  %v1204_v3 = vrot.slane %v1200_v30, 4  ;;  %17916 = vst [vmem:[#allocation112_spill] sm:$0xff] %v14942_v46  ;;  %v11416_v13 = vcombine.low %v12125_v58, %v12126_v18  ;;  %v1211_v42 = vor.u32 %v1209_v4, %v1208_v51 }
 0x2b9   : > { %6269 = vrot.lane.b32.xlu1 %v11458_v22, %s12216_s27  ;;  %v1213_v35 = vrot.slane %v1208_v51, 4  ;;  %v5231_v6 = vor.u32 %v5230_v36, %v5226_v2  ;;  %v5236_v30 = vrot.slane %v5234_v15, 5  ;;  %v11393_v23 = vrot.slane %v5276_v1, 9  ;;  %v17917_v15 = vld [vmem:[#allocation86_spill] sm:$0xff] }
 0x2ba   : > { %v1369_v34 = vsel %vm12626_vm11, %v1203_v40, %v1368_v62  ;;  %v1212_v7 = vsel %vm12632_vm12, %v1204_v3, %v1211_v42  ;;  %v5426_v59 = vrot.slane %v14901_v5, 5  ;;  %v5429_v4 = vrot.slane %v14932_v0, 5  ;;  %v17918_v40 = vld [vmem:[#allocation91_spill] sm:$0xff] }
 0x2bb   : > { %1370 = vst [vmem:[#allocation3 + $0xc0] sm:$0xf] %v1369_v34  ;;  %v1373_v11 = vsel %vm12639_vm13, %v1213_v35, %v1372_v54  ;;  %v6964_v22 = vsel %vm4123_vm4, %v6932_v29, %v14393_v41  ;;  %v6966_v62 = vsel %vm4123_vm4, %v6934_v57, %v14417_v39  ;;  %1371 = vst.msk [vmem:[#allocation3 + $0xc4] sm:$0xf] %vm273_vm0, %v1212_v7  ;;  %v5232_v36 = vrot.slane %v5231_v6, 4  ;;  %v14969_v41 = vpop.permute.xlu1 %6609  ;;  %v17920_v29 = vld [vmem:[#allocation93_spill] sm:$0xff]  ;;  %v14980_v58 = vpop.permute.xlu0 %6767 }
 0x2bc   : > { %v5227_v51 = vsel %vm12619_vm10, %v5222_v44, %v5226_v2  ;;  %1374 = vst [vmem:[#allocation3 + $0xc8] sm:$0x1] %v1373_v11  ;;  %v6996_v1 = vsel %vm4156_vm5, %v6964_v22, %v17917_v15  ;;  %v6797_v5 = vsel %vm3942_vm14, %v11415_v31, %v17918_v40  ;;  %v5428_v0 = vrot.slane %v5426_v59, 4  ;;  %17919 = vst [vmem:[#allocation86_spill] sm:$0xff] %v14969_v41  ;;  %v14977_v2 = vld [vmem:[#allocation3 + $0xd0] sm:$0xf] }
 0x2bd   : > { %v5848_v3 = vshrl.u32 %v14949_v63, 16  ;;  %v6800_v39 = vsel %vm3942_vm14, %v11416_v13, %v17920_v29  ;;  %v5237_v54 = vsel %vm12619_vm10, %v5232_v36, %v5236_v30  ;;  %v5427_v44 = vsel %vm12606_vm7, %v11393_v23, %v5426_v59  ;;  %17921 = vst [vmem:[#allocation91_spill] sm:$0xff] %v14980_v58  ;;  %v17922_v31 = vld [vmem:[#allocation92_spill] sm:$0xff]  ;;  %v14988_v34 = vld [vmem:[#allocation2 + $0x18] sm:$0xf]  ;;  %v17923_v6 = vld [vmem:[#allocation89_spill] sm:$0xff] }
 0x2be   : > { %v5851_v57 = vshll.u32 %v14949_v63, 16  ;;  %v6840_v18 = vsel %vm3991_vm15, %v6797_v5, %v17922_v31  ;;  %v6842_v42 = vsel %vm3991_vm15, %v6800_v39, %v14496_v56  ;;  %v11489_v35 = vcombine.low %v5227_v51, %v5237_v54  ;;  %v17924_v23 = vld [vmem:[#allocation87_spill] sm:$0xff]  ;;  %v17925_v11 = vld [vmem:[#allocation94_spill] sm:$0xff]  ;;  %v17927_v29 = vld [vmem:[#allocation96_spill] sm:$0xff] }
 0x2bf   : > { %v5430_v13 = vsel %vm12606_vm7, %v5428_v0, %v5429_v4  ;;  %v14992_v30 = vsel %vm4156_vm5, %v6966_v62, %v17923_v6  ;;  %v14996_v7 = vsel %vm4189_vm6, %v6996_v1, %v17924_v23  ;;  %v6872_v59 = vsel %vm4024_vm1, %v6840_v18, %v17925_v11  ;;  %v17926_v36 = vld [vmem:[#allocation95_spill] sm:$0xff]  ;;  %v15022_v18 = vpop.permute.xlu1 %6689  ;;  %v15024_v23 = vpop.permute.xlu0 %6769 }
 0x2c0   : > { %v6874_v56 = vsel %vm4024_vm1, %v6842_v42, %v14515_v55  ;;  %6443 = vrot.lane.b32.xlu0 %v11489_v35, %s12219_s30  ;;  %v11505_v22 = vcombine.low %v5427_v44, %v5430_v13  ;;  %v15003_v4 = vrot.slane %v5848_v3, 4  ;;  %v15005_v51 = vrot.slane %v5851_v57, 5  ;;  %17928 = vst [vmem:[#allocation93_spill] sm:$0xff] %v15022_v18  ;;  %17929 = vst [vmem:[#allocation92_spill] sm:$0xff] %v15024_v23  ;;  %v15036_v23 = vld [vmem:[#allocation2 + $0x1c] sm:$0xf] }
 0x2c1   : > { %v6904_v15 = vsel %vm4057_vm2, %v6872_v59, %v17926_v36  ;;  %v15012_v1 = vsel %vm4057_vm2, %v6874_v56, %v14539_v60  ;;  %v2647_v55 = vshrl.u32 %v14988_v34, 16  ;;  %v5857_v18 = vshll.u32 %v14977_v2, 16 }
 0x2c2   : > { %v4860_v40 = vld [vmem:[#allocation3 + $0xc0] sm:$0xf]  ;;  %v15018_v3 = vsel %vm4090_vm3, %v6904_v15, %v17927_v29  ;;  %v4861_v39 = vld [vmem:[#allocation3 + $0xc4] sm:$0xf] }
 0x2c3   : > { %v5277_v5 = vld [vmem:[#allocation3 + $0xc0] sm:$0xe]  ;;  %v5239_v54 = vshrl.u32 %v4860_v40, 16  ;;  %v5242_v44 = vshll.u32 %v4860_v40, 16  ;;  %v4877_v57 = vld [vmem:[#allocation3 + $0xc8] sm:$0x1]  ;;  %v11474_v42 = vcombine.low %v4860_v40, %v4861_v39 }
 0x2c4   : > { %v5252_v60 = vshrl.u32 %v4861_v39, 16  ;;  %v5248_v35 = vshll.u32 %v4861_v39, 16  ;;  %v5258_v13 = vshll.u32 %v4877_v57, 16  ;;  %v5467_v6 = vld [vmem:[#allocation3 + $0xc0] sm:$0xf]  ;;  %6523 = vrot.lane.b32.xlu0 %v11505_v22, %s12220_s7  ;;  %v11394_v56 = vrot.slane %v5277_v5, 9 }
 0x2c5   : > { %v5241_v11 = vrot.slane %v5239_v54, 4  ;;  %v5244_v59 = vrot.slane %v5242_v44, 5  ;;  %v5433_v36 = vrot.slane %v4861_v39, 5  ;;  %v15027_v15 = vld [vmem:[#allocation3 + $0xc4] sm:$0xf]  ;;  %6365 = vrot.lane.b32.xlu1 %v11474_v42, %s12218_s29  ;;  %v5436_v62 = vrot.slane %v4877_v57, 5 }
 0x2c6   : > { %v5250_v29 = vrot.slane %v5248_v35, 5  ;;  %v5254_v31 = vrot.slane %v5252_v60, 4  ;;  %v5260_v0 = vrot.slane %v5258_v13, 5  ;;  %v5824_v43 = vshrl.u32 %v5467_v6, 16  ;;  %v15034_v39 = vld [vmem:[#allocation3 + $0xc8] sm:$0x1]  ;;  %v15041_v13 = vpop.permute.xlu1 %6179 }
 0x2c7   : > { %v5245_v40 = vor.u32 %v5244_v59, %v5241_v11  ;;  %v5434_v28 = vsel %vm12606_vm7, %v11394_v56, %v5433_v36  ;;  %v5435_v37 = vrot.slane %v5433_v36, 4  ;;  %v5827_v44 = vshll.u32 %v5467_v6, 16  ;;  %17930 = vst [vmem:[#allocation89_spill] sm:$0xff] %v15041_v13  ;;  %v15046_v56 = vpop.permute.xlu0 %6259  ;;  %v5885_v41 = vld [vmem:[#allocation3 + $0xc0] sm:$0xe] }
 0x2c8   : > { %v5255_v54 = vor.u32 %v5254_v31, %v5250_v29  ;;  %v5837_v22 = vshrl.u32 %v15027_v15, 16  ;;  %v11521_v5 = vcombine.low %v5467_v6, %v15027_v15  ;;  %v5826_v60 = vrot.slane %v5824_v43, 4  ;;  %17931 = vst [vmem:[#allocation87_spill] sm:$0xff] %v15046_v56  ;;  %v15057_v56 = vld [vmem:[#allocation2 + $0x24] sm:$0xf] }
 0x2c9   : > { %v5246_v42 = vrot.slane %v5245_v40, 4  ;;  %v5437_v57 = vsel %vm12606_vm7, %v5435_v37, %v5436_v62  ;;  %v5833_v35 = vshll.u32 %v15027_v15, 16  ;;  %v5829_v31 = vrot.slane %v5827_v44, 5  ;;  %v15052_v62 = vld [vmem:[#allocation3 + $0xd4] sm:$0x1] }
 0x2ca   : > { %v5256_v11 = vrot.slane %v5255_v54, 4  ;;  %6619 = vrot.lane.b32.xlu0 %v11521_v5, %s12221_s11  ;;  %v5839_v59 = vrot.slane %v5837_v22, 4  ;;  %v5854_v6 = vor.u32 %v15005_v51, %v15003_v4  ;;  %v5843_v37 = vshll.u32 %v15034_v39, 16 }
 0x2cb   : > { %v5251_v36 = vsel %vm12619_vm10, %v5246_v42, %v5250_v29  ;;  %v5835_v40 = vrot.slane %v5833_v35, 5  ;;  %v2660_v43 = vshrl.u32 %v15036_v23, 16  ;;  %v11506_v44 = vcombine.low %v5434_v28, %v5437_v57 }
 0x2cc   : > { %v5261_v54 = vsel %vm12619_vm10, %v5256_v11, %v5260_v0  ;;  %v5830_v22 = vor.u32 %v5829_v31, %v5826_v60  ;;  %v2649_v5 = vrot.slane %v2647_v55, 4  ;;  %v5845_v51 = vrot.slane %v5843_v37, 5  ;;  %v15066_v11 = vpop.permute.xlu1 %6181 }
 0x2cd   : > { %v11490_v58 = vcombine.low %v5251_v36, %v5261_v54  ;;  %v5840_v4 = vor.u32 %v5839_v59, %v5835_v40  ;;  %v5855_v42 = vrot.slane %v5854_v6, 4  ;;  %v17932_v35 = vshrl.u32 %v14977_v2, 16  ;;  %17934 = vst [vmem:[#allocation94_spill] sm:$0xff] %v15066_v11 }
 0x2ce   : > { %v5831_v29 = vrot.slane %v5830_v22, 4  ;;  %v5867_v46 = vshll.u32 %v15052_v62, 16  ;;  %v17933_v55 = vshll.u32 %v14988_v34, 16  ;;  %v5859_v57 = vrot.slane %v5857_v18, 5  ;;  %v15078_v22 = vld [vmem:[#allocation2 + $0x20] sm:$0x1] }
 0x2cf   : > { %v5863_v13 = vrot.slane %v17932_v35, 4  ;;  %6445 = vrot.lane.b32.xlu1 %v11490_v58, %s12219_s30  ;;  %v5841_v28 = vrot.slane %v5840_v4, 4  ;;  %v6035_v60 = vrot.slane %v15027_v15, 5  ;;  %v11315_v59 = vcombine.low %v14988_v34, %v15036_v23  ;;  %v15074_v58 = vpop.permute.xlu0 %6355  ;;  %v5886_v4 = vld [vmem:[#allocation3 + $0xcc] sm:$0xe] }
 0x2d0   : > { %v2652_v0 = vrot.slane %v17933_v55, 5  ;;  %v5836_v31 = vsel %vm12619_vm10, %v5831_v29, %v5835_v40  ;;  %v2671_v6 = vshrl.u32 %v15057_v56, 16  ;;  %v2674_v36 = vshll.u32 %v15057_v56, 16  ;;  %17935 = vst [vmem:[#allocation95_spill] sm:$0xff] %v15074_v58  ;;  %v15083_v55 = vld [vmem:[#allocation2 + $0x28] sm:$0xf] }
 0x2d1   : > { %v5846_v37 = vsel %vm12619_vm10, %v5841_v28, %v5845_v51  ;;  %v5864_v18 = vor.u32 %v5863_v13, %v5859_v57  ;;  %v5869_v54 = vrot.slane %v5867_v46, 5  ;;  %v11409_v15 = vrot.slane %v5885_v41, 9 }
 0x2d2   : > { %v11537_v35 = vcombine.low %v5836_v31, %v5846_v37  ;;  %v5860_v40 = vsel %vm12619_vm10, %v5855_v42, %v5859_v57  ;;  %v6037_v34 = vrot.slane %v6035_v60, 4  ;;  %v6038_v29 = vrot.slane %v15034_v39, 5  ;;  %v15100_v37 = vld [vmem:[#allocation2 + $0x2c] sm:$0x1] }
 0x2d3   : > { %6525 = vrot.lane.b32.xlu1 %v11506_v44, %s12220_s7  ;;  %v5865_v58 = vrot.slane %v5864_v18, 4  ;;  %v2673_v11 = vrot.slane %v2671_v6, 4  ;;  %v2653_v51 = vor.u32 %v2652_v0, %v2649_v5  ;;  %v2656_v46 = vshll.u32 %v15036_v23, 16  ;;  %v15094_v6 = vpop.permute.xlu1 %6261  ;;  %v3030_v18 = vld [vmem:[#allocation2 + $0x18] sm:$0xe] }
 0x2d4   : > { %6699 = vrot.lane.b32.xlu0 %v11537_v35, %s12222_s12  ;;  %v2676_v41 = vrot.slane %v2674_v36, 5  ;;  %v2662_v13 = vrot.slane %v2660_v43, 4  ;;  %v2666_v28 = vshll.u32 %v15078_v22, 16  ;;  %v11410_v31 = vrot.slane %v5886_v4, 9 }
 0x2d5   : > { %v5870_v42 = vsel %vm12619_vm10, %v5865_v58, %v5869_v54  ;;  %v2684_v39 = vshrl.u32 %v15083_v55, 16  ;;  %v11316_v44 = vcombine.low %v15057_v56, %v15083_v55  ;;  %v2658_v57 = vrot.slane %v2656_v46, 5  ;;  %v15102_v58 = vpop.permute.xlu0 %6435 }
 0x2d6   : > { %v11538_v5 = vcombine.low %v5860_v40, %v5870_v42  ;;  %v6036_v0 = vsel %vm12606_vm7, %v11409_v15, %v6035_v60  ;;  %v6042_v43 = vrot.slane %v14977_v2, 5  ;;  %v6045_v36 = vrot.slane %v15052_v62, 5  ;;  %17936 = vst [vmem:[#allocation96_spill] sm:$0xff] %v15102_v58 }
 0x2d7   : > { %v17937_v56 = vcombine.low %v14949_v63, %v14977_v2  ;;  %v6039_v54 = vsel %vm12606_vm7, %v6037_v34, %v6038_v29  ;;  %v2654_v4 = vrot.slane %v2653_v51, 4  ;;  %v2663_v35 = vor.u32 %v2662_v13, %v2658_v57 }
 0x2d8   : > { %v2668_v60 = vrot.slane %v2666_v28, 5  ;;  %6701 = vrot.lane.b32.xlu0 %v11538_v5, %s12222_s12  ;;  %v6043_v62 = vsel %vm12606_vm7, %v11410_v31, %v6042_v43  ;;  %v6044_v15 = vrot.slane %v6042_v43, 4  ;;  %v2677_v40 = vor.u32 %v2676_v41, %v2673_v11 }
 0x2d9   : > { %6621 = vrot.lane.b32.xlu1 %v17937_v56, %s12221_s11  ;;  %v2680_v46 = vshll.u32 %v15083_v55, 16  ;;  %v2664_v42 = vrot.slane %v2663_v35, 4  ;;  %v2686_v58 = vrot.slane %v2684_v39, 4  ;;  %v2690_v63 = vshll.u32 %v15100_v37, 16  ;;  %v15124_v39 = vpop.permute.xlu1 %6357  ;;  %v15144_v35 = vld [vmem:[#allocation2 + $0x34] sm:$0xf] }
 0x2da   : > { %v11203_v2 = vrot.slane %v3030_v18, 9  ;;  %v6046_v34 = vsel %vm12606_vm7, %v6044_v15, %v6045_v36  ;;  %v2678_v29 = vrot.slane %v2677_v40, 4  ;;  %v3096_v13 = vrot.slane %v15036_v23, 5  ;;  %v15130_v36 = vld [vmem:[#allocation2 + $0x30] sm:$0xf] }
 0x2db   : > { %v2682_v51 = vrot.slane %v2680_v46, 5  ;;  %v11553_v28 = vcombine.low %v6036_v0, %v6039_v54  ;;  %v2659_v11 = vsel %vm12619_vm10, %v2654_v4, %v2658_v57  ;;  %v2669_v41 = vsel %vm12619_vm10, %v2664_v42, %v2668_v60  ;;  %v3031_v0 = vld [vmem:[#allocation2 + $0x24] sm:$0xe]  ;;  %v15132_v57 = vpop.permute.xlu0 %6515  ;;  %v17938_v18 = vld [vmem:[#allocation98_spill] sm:$0xff]  ;;  %v15155_v42 = vld [vmem:[#allocation2 + $0x3c] sm:$0xf] }
 0x2dc   : > { %v3099_v31 = vrot.slane %v15078_v22, 5  ;;  %v6938_v5 = vsel %vm4090_vm3, %v15012_v1, %v14556_v52  ;;  %3752 = vrot.lane.b32.xlu0 %v11316_v44, %s12221_s11  ;;  %v11554_v23 = vcombine.low %v6043_v62, %v6046_v34  ;;  %v6968_v22 = vsel %vm4123_vm4, %v15018_v3, %v17938_v18 }
 0x2dd   : > { %3750 = vrot.lane.b32.xlu1 %v11315_v59, %s12221_s11  ;;  %v2687_v43 = vor.u32 %v2686_v58, %v2682_v51  ;;  %v2692_v59 = vrot.slane %v2690_v63, 5  ;;  %v6970_v56 = vsel %vm4123_vm4, %v6938_v5, %v14580_v27  ;;  %v3097_v52 = vsel %vm12606_vm7, %v11203_v2, %v3096_v13  ;;  %v15157_v63 = vld [vmem:[#allocation2 + $0x40] sm:$0xf]  ;;  %v17939_v2 = vld [vmem:[#allocation99_spill] sm:$0xff] }
 0x2de   : > { %v3098_v1 = vrot.slane %v3096_v13, 4  ;;  %v11331_v44 = vcombine.low %v2659_v11, %v2669_v41  ;;  %v2683_v58 = vsel %vm12619_vm10, %v2678_v29, %v2682_v51  ;;  %v3103_v4 = vrot.slane %v15083_v55, 5  ;;  %v17940_v11 = vld [vmem:[#allocation90_spill] sm:$0xff]  ;;  %v12127_v5 = vld [vmem:[#allocation3 + $0x48] sm:$0xf] }
 0x2df   : > { %v2688_v54 = vrot.slane %v2687_v43, 4  ;;  %v11204_v60 = vrot.slane %v3031_v0, 9  ;;  %v2695_v27 = vshrl.u32 %v15130_v36, 16  ;;  %v2698_v62 = vshll.u32 %v15130_v36, 16  ;;  %v15175_v0 = vpop.permute.xlu0 %6611 }
 0x2e0   : > { %v3100_v3 = vsel %vm12606_vm7, %v3098_v1, %v3099_v31  ;;  %6781 = vrot.lane.b32.xlu0 %v11554_v23, %s12223_s13  ;;  %v3105_v46 = vrot.slane %v3103_v4, 4  ;;  %v3106_v55 = vrot.slane %v15100_v37, 5  ;;  %v7000_v34 = vsel %vm4156_vm5, %v6968_v22, %v17939_v2  ;;  %v12128_v23 = vld [vmem:[#allocation3 + $0x4c] sm:$0xf]  ;;  %v12129_v2 = vld [vmem:[#allocation3 + $0x54] sm:$0xf] }
 0x2e1   : > { %6779 = vrot.lane.b32.xlu1 %v11553_v28, %s12223_s13  ;;  %v2693_v15 = vsel %vm12619_vm10, %v2688_v54, %v2692_v59  ;;  %v11347_v40 = vcombine.low %v3097_v52, %v3100_v3  ;;  %v2697_v29 = vrot.slane %v2695_v27, 4  ;;  %v2700_v51 = vrot.slane %v2698_v62, 5  ;;  %v15162_v28 = vpop.permute.xlu1 %6437  ;;  %v2632_v59 = vld [vmem:[#allocation2 + $0x38] sm:$0x1]  ;;  %v15187_v27 = vld [vmem:[#allocation2 + $0x44] sm:$0x1] }
 0x2e2   : > { %v2708_v13 = vshrl.u32 %v15144_v35, 16  ;;  %v15167_v41 = vsel %vm4189_vm6, %v14992_v30, %v17940_v11  ;;  %v7002_v37 = vsel %vm4156_vm5, %v6970_v56, %v14615_v33  ;;  %v15173_v31 = vsel %vm4189_vm6, %v7000_v34, %v14586_v48  ;;  %v17941_v62 = vld [vmem:[#allocation102_spill] sm:$0xff] }
 0x2e3   : > { %v11417_v43 = vcombine.low %v12127_v5, %v12128_v23  ;;  %v11332_v18 = vcombine.low %v2683_v58, %v2693_v15  ;;  %v2719_v22 = vshrl.u32 %v15155_v42, 16  ;;  %v2722_v30 = vshll.u32 %v15155_v42, 16 }
 0x2e4   : > { %v2732_v52 = vshrl.u32 %v15157_v63, 16  ;;  %3910 = vrot.lane.b32.xlu0 %v11347_v40, %s12223_s13  ;;  %v3104_v48 = vsel %vm12606_vm7, %v11204_v60, %v3103_v4  ;;  %v3107_v33 = vsel %vm12606_vm7, %v3105_v46, %v3106_v55  ;;  %v2701_v56 = vor.u32 %v2700_v51, %v2697_v29  ;;  %v12130_v40 = vld [vmem:[#allocation3 + $0x58] sm:$0xf] }
 0x2e5   : > { %3830 = vrot.lane.b32.xlu1 %v11331_v44, %s12222_s12  ;;  %v2704_v1 = vshll.u32 %v15144_v35, 16  ;;  %v2721_v54 = vrot.slane %v2719_v22, 4  ;;  %v2724_v44 = vrot.slane %v2722_v30, 5  ;;  %v2710_v58 = vrot.slane %v2708_v13, 4  ;;  %v3032_v60 = vld [vmem:[#allocation2 + $0x30] sm:$0xe]  ;;  %v15193_v13 = vpop.permute.xlu1 %6517 }
 0x2e6   : > { %v2714_v3 = vshll.u32 %v2632_v59, 16  ;;  %v6803_v15 = vsel %vm3942_vm14, %v11417_v43, %v17941_v62  ;;  %v11418_v34 = vcombine.low %v12129_v2, %v12130_v40  ;;  %v2702_v11 = vrot.slane %v2701_v56, 4  ;;  %v17944_v40 = vld [vmem:[#allocation104_spill] sm:$0xff] }
 0x2e7   : > { %v2706_v4 = vrot.slane %v2704_v1, 5  ;;  %v11348_v46 = vcombine.low %v3104_v48, %v3107_v33  ;;  %v2725_v55 = vor.u32 %v2724_v44, %v2721_v54  ;;  %v2728_v29 = vshll.u32 %v15157_v63, 16  ;;  %v15200_v30 = vpop.permute.xlu0 %6691  ;;  %v3033_v44 = vld [vmem:[#allocation2 + $0x3c] sm:$0xe] }
 0x2e8   : > { %v2734_v51 = vrot.slane %v2732_v52, 4  ;;  %7071 = vrot.lane.b32.xlu0 %v14780_v25, %s12224_s14  ;;  %v11317_v5 = vcombine.low %v15130_v36, %v15144_v35  ;;  %v2716_v43 = vrot.slane %v2714_v3, 5  ;;  %v2738_v22 = vshll.u32 %v15187_v27, 16 }
 0x2e9   : > { %3832 = vrot.lane.b32.xlu1 %v11332_v18, %s12222_s12  ;;  %v2711_v23 = vor.u32 %v2710_v58, %v2706_v4  ;;  %v17942_v18 = vld [vmem:[#allocation101_spill] sm:$0xff]  ;;  %v2730_v52 = vrot.slane %v2728_v29, 5  ;;  %v11205_v33 = vrot.slane %v3032_v60, 9  ;;  %v3110_v56 = vrot.slane %v15144_v35, 5  ;;  %v17943_v58 = vld [vmem:[#allocation103_spill] sm:$0xff] }
 0x2ea   : > { %v15204_v48 = vsel %vm4189_vm6, %v7002_v37, %v17942_v18  ;;  %v2707_v25 = vsel %vm12619_vm10, %v2702_v11, %v2706_v4  ;;  %v2726_v54 = vrot.slane %v2725_v55, 4  ;;  %v3113_v36 = vrot.slane %v2632_v59, 5  ;;  %v15220_v4 = vld [vmem:[#allocation2 + $0x48] sm:$0xf]  ;;  %v15235_v18 = vld [vmem:[#allocation2 + $0x54] sm:$0xf] }
 0x2eb   : > { %v2712_v1 = vrot.slane %v2711_v23, 4  ;;  %v6844_v3 = vsel %vm3991_vm15, %v6803_v15, %v17943_v58  ;;  %v2735_v62 = vor.u32 %v2734_v51, %v2730_v52  ;;  %v2740_v2 = vrot.slane %v2738_v22, 5  ;;  %v15224_v51 = vld [vmem:[#allocation2 + $0x4c] sm:$0xf] }
 0x2ec   : > { %v3112_v37 = vrot.slane %v3110_v56, 4  ;;  %v6806_v60 = vsel %vm3942_vm14, %v11418_v34, %v17944_v40  ;;  %3754 = vrot.lane.b32.xlu0 %v11317_v5, %s12221_s11  ;;  %v3111_v59 = vsel %vm12606_vm7, %v11205_v33, %v3110_v56  ;;  %v3117_v11 = vrot.slane %v15157_v63, 5  ;;  %v15226_v34 = vpop.permute.xlu1 %6613  ;;  %v15237_v33 = vpop.permute.xlu0 %6771 }
 0x2ed   : > { %3912 = vrot.lane.b32.xlu1 %v11348_v46, %s12223_s13  ;;  %v2717_v35 = vsel %vm12619_vm10, %v2712_v1, %v2716_v43  ;;  %v2736_v46 = vrot.slane %v2735_v62, 4  ;;  %v11206_v29 = vrot.slane %v3033_v44, 9  ;;  %v6846_v5 = vsel %vm3991_vm15, %v6806_v60, %v14675_v9 }
 0x2ee   : > { %v11333_v15 = vcombine.low %v2707_v25, %v2717_v35  ;;  %v3114_v55 = vsel %vm12606_vm7, %v3112_v37, %v3113_v36  ;;  %v11318_v23 = vcombine.low %v15155_v42, %v15157_v63  ;;  %v2731_v43 = vsel %vm12619_vm10, %v2726_v54, %v2730_v52  ;;  %v15245_v63 = vld [vmem:[#allocation2 + $0x58] sm:$0xf]  ;;  %v17945_v52 = vld [vmem:[#allocation105_spill] sm:$0xff]  ;;  %v17946_v36 = vld [vmem:[#allocation106_spill] sm:$0xff] }
 0x2ef   : > { %v3120_v22 = vrot.slane %v15187_v27, 5  ;;  %v2741_v56 = vsel %vm12619_vm10, %v2736_v46, %v2740_v2  ;;  %v3119_v25 = vrot.slane %v3117_v11, 4  ;;  %v2743_v9 = vshrl.u32 %v15220_v4, 16  ;;  %v2634_v37 = vld [vmem:[#allocation2 + $0x50] sm:$0x1] }
 0x2f0   : > { %v2746_v42 = vshll.u32 %v15220_v4, 16  ;;  %v6876_v27 = vsel %vm4024_vm1, %v6844_v3, %v17945_v52  ;;  %v6878_v1 = vsel %vm4024_vm1, %v6846_v5, %v14694_v53  ;;  %3834 = vrot.lane.b32.xlu0 %v11333_v15, %s12222_s12  ;;  %v11349_v54 = vcombine.low %v3111_v59, %v3114_v55 }
 0x2f1   : > { %7073 = vrot.lane.b32.xlu1 %v14798_v38, %s12224_s14  ;;  %v2756_v38 = vshrl.u32 %v15224_v51, 16  ;;  %v6908_v44 = vsel %vm4057_vm2, %v6876_v27, %v17946_v36  ;;  %v3118_v58 = vsel %vm12606_vm7, %v11206_v29, %v3117_v11  ;;  %v2745_v62 = vrot.slane %v2743_v9, 4  ;;  %v15264_v11 = vpop.permute.xlu1 %6693  ;;  %v17947_v9 = vld [vmem:[#allocation107_spill] sm:$0xff]  ;;  %v3034_v27 = vld [vmem:[#allocation2 + $0x48] sm:$0xe] }
 0x2f2   : > { %v2748_v2 = vrot.slane %v2746_v42, 5  ;;  %v11334_v40 = vcombine.low %v2731_v43, %v2741_v56  ;;  %v2767_v3 = vshrl.u32 %v15235_v18, 16  ;;  %v2770_v60 = vshll.u32 %v15235_v18, 16  ;;  %v15269_v56 = vld [vmem:[#allocation2 + $0x5c] sm:$0x1] }
 0x2f3   : > { %v2780_v53 = vshrl.u32 %v15245_v63, 16  ;;  %v3121_v35 = vsel %vm12606_vm7, %v3119_v25, %v3120_v22  ;;  %v2752_v15 = vshll.u32 %v15224_v51, 16  ;;  %v2758_v46 = vrot.slane %v2756_v38, 4  ;;  %v15276_v38 = vld [vmem:[#allocation3 + $0x60] sm:$0xf] }
 0x2f4   : > { %v2749_v59 = vor.u32 %v2748_v2, %v2745_v62  ;;  %v6910_v55 = vsel %vm4057_vm2, %v6878_v1, %v14718_v45  ;;  %3914 = vrot.lane.b32.xlu0 %v11349_v54, %s12223_s13  ;;  %v2769_v29 = vrot.slane %v2767_v3, 4  ;;  %v2772_v5 = vrot.slane %v2770_v60, 5  ;;  %v15278_v45 = vld [vmem:[#allocation3 + $0x64] sm:$0xf] }
 0x2f5   : > { %3756 = vrot.lane.b32.xlu1 %v11318_v23, %s12221_s11  ;;  %v2762_v43 = vshll.u32 %v2634_v37, 16  ;;  %v15271_v23 = vpop.permute.xlu0 %6773  ;;  %v6940_v22 = vsel %vm4090_vm3, %v6908_v44, %v17947_v9  ;;  %v2754_v42 = vrot.slane %v2752_v15, 5  ;;  %v2776_v52 = vshll.u32 %v15245_v63, 16 }
 0x2f6   : > { %v2750_v25 = vrot.slane %v2749_v59, 4  ;;  %v11419_v1 = vcombine.low %v15276_v38, %v15278_v45  ;;  %v11350_v54 = vcombine.low %v3118_v58, %v3121_v35  ;;  %v2773_v36 = vor.u32 %v2772_v5, %v2769_v29  ;;  %v15296_v29 = vpop.permute.xlu1 %6183  ;;  %v17948_v5 = vld [vmem:[#allocation108_spill] sm:$0xff] }
 0x2f7   : > { %v2782_v62 = vrot.slane %v2780_v53, 4  ;;  %v2759_v2 = vor.u32 %v2758_v46, %v2754_v42  ;;  %v2764_v3 = vrot.slane %v2762_v43, 5  ;;  %v15283_v44 = vrot.slane %v2776_v52, 5  ;;  %v15309_v52 = vld [vmem:[#allocation2 + $0x60] sm:$0xf] }
 0x2f8   : > { %v2786_v60 = vshll.u32 %v15269_v56, 16  ;;  %7075 = vrot.lane.b32.xlu0 %v14996_v7, %s12224_s14  ;;  %v11319_v59 = vcombine.low %v15220_v4, %v15224_v51  ;;  %v11207_v15 = vrot.slane %v3034_v27, 9  ;;  %v3124_v9 = vrot.slane %v15224_v51, 5 }
 0x2f9   : > { %3836 = vrot.lane.b32.xlu1 %v11334_v40, %s12222_s12  ;;  %v3127_v58 = vrot.slane %v2634_v37, 5  ;;  %v6942_v53 = vsel %vm4090_vm3, %v6910_v55, %v14744_v61  ;;  %v2755_v40 = vsel %vm12619_vm10, %v2750_v25, %v2754_v42  ;;  %v2760_v35 = vrot.slane %v2759_v2, 4  ;;  %v15302_v37 = vpop.permute.xlu0 %6263 }
 0x2fa   : > { %v2783_v46 = vor.u32 %v2782_v62, %v15283_v44  ;;  %v6972_v7 = vsel %vm4123_vm4, %v6940_v22, %v17948_v5  ;;  %v6974_v4 = vsel %vm4123_vm4, %v6942_v53, %v14768_v10  ;;  %v2774_v43 = vrot.slane %v2773_v36, 4  ;;  %v15311_v22 = vld [vmem:[#allocation2 + $0x64] sm:$0xf]  ;;  %v3035_v36 = vld [vmem:[#allocation2 + $0x54] sm:$0xe]  ;;  %v15344_v5 = vpop.permute.xlu1 %6185 }
 0x2fb   : > { %v3126_v51 = vrot.slane %v3124_v9, 4  ;;  %v7004_v61 = vsel %vm4156_vm5, %v6972_v7, %v14747_v12  ;;  %v2765_v55 = vsel %vm12619_vm10, %v2760_v35, %v2764_v3  ;;  %v2788_v42 = vrot.slane %v2786_v60, 5  ;;  %v12133_v3 = vld [vmem:[#allocation3 + $0x6c] sm:$0xf]  ;;  %v12134_v60 = vld [vmem:[#allocation3 + $0x70] sm:$0xf] }
 0x2fc   : > { %v2784_v25 = vrot.slane %v2783_v46, 4  ;;  %3758 = vrot.lane.b32.xlu0 %v11319_v59, %s12221_s11  ;;  %v11335_v10 = vcombine.low %v2755_v40, %v2765_v55  ;;  %v3125_v27 = vsel %vm12606_vm7, %v11207_v15, %v3124_v9  ;;  %v15321_v62 = vsel %vm4156_vm5, %v6974_v4, %v14811_v20  ;;  %v15329_v9 = vld [vmem:[#allocation2 + $0x6c] sm:$0xf] }
 0x2fd   : > { %3916 = vrot.lane.b32.xlu1 %v11350_v54, %s12223_s13  ;;  %v3128_v12 = vsel %vm12606_vm7, %v3126_v51, %v3127_v58  ;;  %v3131_v54 = vrot.slane %v15245_v63, 5  ;;  %v15325_v2 = vsel %vm4189_vm6, %v7004_v61, %v14774_v8  ;;  %v11420_v59 = vcombine.low %v12133_v3, %v12134_v60  ;;  %v15337_v8 = vld [vmem:[#allocation2 + $0x70] sm:$0xf]  ;;  %v15348_v51 = vld [vmem:[#allocation2 + $0x68] sm:$0x1]  ;;  %v15350_v61 = vpop.permute.xlu0 %6359 }
 0x2fe   : > { %v11320_v15 = vcombine.low %v15235_v18, %v15245_v63  ;;  %v2779_v58 = vsel %vm12619_vm10, %v2774_v43, %v15283_v44  ;;  %v2791_v53 = vshrl.u32 %v15309_v52, 16  ;;  %v2794_v20 = vshll.u32 %v15309_v52, 16 }
 0x2ff   : > { %v2804_v40 = vshrl.u32 %v15311_v22, 16  ;;  %v2789_v18 = vsel %vm12619_vm10, %v2784_v25, %v2788_v42  ;;  %v11351_v63 = vcombine.low %v3125_v27, %v3128_v12  ;;  %v11208_v35 = vrot.slane %v3035_v36, 9 }
 0x300   : > { %v3134_v46 = vrot.slane %v15269_v56, 5  ;;  %3838 = vrot.lane.b32.xlu0 %v11335_v10, %s12222_s12  ;;  %v3133_v44 = vrot.slane %v3131_v54, 4  ;;  %v2793_v7 = vrot.slane %v2791_v53, 4  ;;  %v2796_v4 = vrot.slane %v2794_v20, 5  ;;  %v3036_v20 = vld [vmem:[#allocation2 + $0x60] sm:$0xe] }
 0x301   : > { %7077 = vrot.lane.b32.xlu1 %v15167_v41, %s12224_s14  ;;  %v2815_v43 = vshrl.u32 %v15329_v9, 16  ;;  %v6809_v41 = vsel %vm3942_vm14, %v11419_v1, %v14829_v24  ;;  %v6812_v56 = vsel %vm3942_vm14, %v11420_v59, %v14852_v16  ;;  %v2818_v55 = vshll.u32 %v15329_v9, 16  ;;  %v15366_v1 = vld [vmem:[#allocation2 + $0x74] sm:$0x1] }
 0x302   : > { %v2828_v25 = vshrl.u32 %v15337_v8, 16  ;;  %v2797_v10 = vor.u32 %v2796_v4, %v2793_v7  ;;  %v2800_v27 = vshll.u32 %v15311_v22, 16  ;;  %v2806_v12 = vrot.slane %v2804_v40, 4  ;;  %v15376_v40 = vpop.permute.xlu1 %6265  ;;  %v17949_v7 = vld [vmem:[#allocation110_spill] sm:$0xff] }
 0x303   : > { %v2817_v42 = vrot.slane %v2815_v43, 4  ;;  %v11336_v36 = vcombine.low %v2779_v58, %v2789_v18  ;;  %v3132_v38 = vsel %vm12606_vm7, %v11208_v35, %v3131_v54  ;;  %v2820_v45 = vrot.slane %v2818_v55, 5 }
 0x304   : > { %v2810_v24 = vshll.u32 %v15348_v51, 16  ;;  %3918 = vrot.lane.b32.xlu0 %v11351_v63, %s12223_s13  ;;  %v3135_v16 = vsel %vm12606_vm7, %v3133_v44, %v3134_v46  ;;  %v2802_v3 = vrot.slane %v2800_v27, 5  ;;  %v2824_v60 = vshll.u32 %v15337_v8, 16  ;;  %v15381_v44 = vpop.permute.xlu0 %6439 }
 0x305   : > { %3760 = vrot.lane.b32.xlu1 %v11320_v15, %s12221_s11  ;;  %v2830_v59 = vrot.slane %v2828_v25, 4  ;;  %v6848_v15 = vsel %vm3991_vm15, %v6809_v41, %v14835_v49  ;;  %v6850_v54 = vsel %vm3991_vm15, %v6812_v56, %v14871_v32  ;;  %v2798_v58 = vrot.slane %v2797_v10, 4 }
 0x306   : > { %v2821_v53 = vor.u32 %v2820_v45, %v2817_v42  ;;  %v2807_v18 = vor.u32 %v2806_v12, %v2802_v3  ;;  %v2812_v63 = vrot.slane %v2810_v24, 5  ;;  %v15378_v35 = vrot.slane %v2824_v60, 5  ;;  %v15401_v45 = vld [vmem:[#allocation2 + $0x78] sm:$0xf]  ;;  %v15403_v24 = vld [vmem:[#allocation2 + $0x7c] sm:$0xf] }
 0x307   : > { %v2834_v46 = vshll.u32 %v15366_v1, 16  ;;  %v6880_v4 = vsel %vm4024_vm1, %v6848_v15, %v17949_v7  ;;  %v11352_v49 = vcombine.low %v3132_v38, %v3135_v16  ;;  %v11321_v32 = vcombine.low %v15309_v52, %v15311_v22  ;;  %v17950_v52 = vld [vmem:[#allocation111_spill] sm:$0xff]  ;;  %v17951_v16 = vld [vmem:[#allocation109_spill] sm:$0xff]  ;;  %v15416_v15 = vpop.permute.xlu1 %6361 }
 0x308   : > { %v3138_v43 = vrot.slane %v15311_v22, 5  ;;  %7079 = vrot.lane.b32.xlu0 %v15173_v31, %s12224_s14  ;;  %v2808_v41 = vrot.slane %v2807_v18, 4  ;;  %v2822_v56 = vrot.slane %v2821_v53, 4  ;;  %v2831_v55 = vor.u32 %v2830_v59, %v15378_v35  ;;  %v3037_v60 = vld [vmem:[#allocation2 + $0x6c] sm:$0xe]  ;;  %v15428_v53 = vpop.permute.xlu0 %6519 }
 0x309   : > { %3840 = vrot.lane.b32.xlu1 %v11336_v36, %s12222_s12  ;;  %v11209_v25 = vrot.slane %v3036_v20, 9  ;;  %v6882_v42 = vsel %vm4024_vm1, %v6850_v54, %v14890_v47  ;;  %v2803_v10 = vsel %vm12619_vm10, %v2798_v58, %v2802_v3  ;;  %v3141_v12 = vrot.slane %v15348_v51, 5  ;;  %v15418_v54 = vld [vmem:[#allocation2 + $0x84] sm:$0xf] }
 0x30a   : > { %v3140_v27 = vrot.slane %v3138_v43, 4  ;;  %v6912_v22 = vsel %vm4057_vm2, %v6880_v4, %v17950_v52  ;;  %v2813_v31 = vsel %vm12619_vm10, %v2808_v41, %v2812_v63  ;;  %v2832_v36 = vrot.slane %v2831_v55, 4 }
 0x30b   : > { %v2836_v38 = vrot.slane %v2834_v46, 5  ;;  %v15408_v47 = vsel %vm4189_vm6, %v15321_v62, %v17951_v16  ;;  %v6914_v51 = vsel %vm4057_vm2, %v6882_v42, %v14914_v14  ;;  %v6944_v3 = vsel %vm4090_vm3, %v6912_v22, %v14893_v17 }
 0x30c   : > { %v3145_v59 = vrot.slane %v15337_v8, 5  ;;  %3762 = vrot.lane.b32.xlu0 %v11321_v32, %s12221_s11  ;;  %v11322_v62 = vcombine.low %v15329_v9, %v15337_v8  ;;  %v11337_v58 = vcombine.low %v2803_v10, %v2813_v31  ;;  %v2827_v14 = vsel %vm12619_vm10, %v2822_v56, %v15378_v35  ;;  %v15435_v9 = vld [vmem:[#allocation2 + $0x88] sm:$0xf] }
 0x30d   : > { %3920 = vrot.lane.b32.xlu1 %v11352_v49, %s12223_s13  ;;  %v3139_v17 = vsel %vm12606_vm7, %v11209_v25, %v3138_v43  ;;  %v3142_v20 = vsel %vm12606_vm7, %v3140_v27, %v3141_v12  ;;  %v2839_v18 = vshrl.u32 %v15401_v45, 16  ;;  %v2842_v63 = vshll.u32 %v15401_v45, 16  ;;  %v15441_v49 = vld [vmem:[#allocation2 + $0x80] sm:$0x1] }
 0x30e   : > { %v2852_v46 = vshrl.u32 %v15403_v24, 16  ;;  %v2837_v8 = vsel %vm12619_vm10, %v2832_v36, %v2836_v38  ;;  %v11210_v35 = vrot.slane %v3037_v60, 9  ;;  %v3148_v7 = vrot.slane %v15366_v1, 5  ;;  %v15456_v38 = vpop.permute.xlu0 %6615 }
 0x30f   : > { %v2863_v4 = vshrl.u32 %v15418_v54, 16  ;;  %v3147_v32 = vrot.slane %v3145_v59, 4  ;;  %v2841_v43 = vrot.slane %v2839_v18, 4  ;;  %v2844_v41 = vrot.slane %v2842_v63, 5  ;;  %v3038_v63 = vld [vmem:[#allocation2 + $0x78] sm:$0xe] }
 0x310   : > { %v2866_v56 = vshll.u32 %v15418_v54, 16  ;;  %3842 = vrot.lane.b32.xlu0 %v11337_v58, %s12222_s12  ;;  %v11353_v55 = vcombine.low %v3139_v17, %v3142_v20  ;;  %v2876_v42 = vshrl.u32 %v15435_v9, 16  ;;  %v2848_v1 = vshll.u32 %v15403_v24, 16  ;;  %v15449_v10 = vpop.permute.xlu1 %6441  ;;  %v15464_v20 = vld [vmem:[#allocation2 + $0x8c] sm:$0x1] }
 0x311   : > { %7081 = vrot.lane.b32.xlu1 %v15204_v48, %s12224_s14  ;;  %v2865_v25 = vrot.slane %v2863_v4, 4  ;;  %v2845_v12 = vor.u32 %v2844_v41, %v2841_v43  ;;  %v2854_v52 = vrot.slane %v2852_v46, 4  ;;  %v2858_v48 = vshll.u32 %v15441_v49, 16  ;;  %v12135_v46 = vld [vmem:[#allocation3 + $0x78] sm:$0xf]  ;;  %v17953_v41 = vld [vmem:[#allocation112_spill] sm:$0xff] }
 0x312   : > { %v2868_v27 = vrot.slane %v2866_v56, 5  ;;  %v6946_v22 = vsel %vm4090_vm3, %v6914_v51, %v14939_v50  ;;  %v6976_v31 = vsel %vm4123_vm4, %v6944_v3, %v14923_v21  ;;  %v2850_v36 = vrot.slane %v2848_v1, 5  ;;  %v12138_v4 = vld [vmem:[#allocation3 + $0x88] sm:$0xf]  ;;  %v15475_v1 = vld [vmem:[#allocation2 + $0x90] sm:$0xf] }
 0x313   : > { %v2872_v16 = vshll.u32 %v15435_v9, 16  ;;  %v11338_v60 = vcombine.low %v2827_v14, %v2837_v8  ;;  %v3146_v58 = vsel %vm12606_vm7, %v11210_v35, %v3145_v59  ;;  %v3149_v17 = vsel %vm12606_vm7, %v3147_v32, %v3148_v7  ;;  %v12137_v8 = vld [vmem:[#allocation3 + $0x84] sm:$0xf]  ;;  %v17952_v32 = vld [vmem:[#allocation86_spill] sm:$0xff] }
 0x314   : > { %v2878_v50 = vrot.slane %v2876_v42, 4  ;;  %3922 = vrot.lane.b32.xlu0 %v11353_v55, %s12223_s13  ;;  %v2846_v21 = vrot.slane %v2845_v12, 4  ;;  %v2855_v51 = vor.u32 %v2854_v52, %v2850_v36  ;;  %v2860_v3 = vrot.slane %v2858_v48, 5 }
 0x315   : > { %3764 = vrot.lane.b32.xlu1 %v11322_v62, %s12221_s11  ;;  %v15467_v18 = vrot.slane %v2872_v16, 5  ;;  %v12136_v62 = vld [vmem:[#allocation3 + $0x7c] sm:$0xf]  ;;  %v11422_v59 = vcombine.low %v12137_v8, %v12138_v4  ;;  %v2869_v35 = vor.u32 %v2868_v27, %v2865_v25  ;;  %v3152_v7 = vrot.slane %v15403_v24, 5  ;;  %v15480_v25 = vpop.permute.xlu1 %6521 }
 0x316   : > { %v11421_v14 = vcombine.low %v12135_v46, %v12136_v62  ;;  %v6978_v43 = vsel %vm4123_vm4, %v6946_v22, %v17952_v32  ;;  %v7008_v56 = vsel %vm4156_vm5, %v6976_v31, %v17953_v41  ;;  %v2856_v55 = vrot.slane %v2855_v51, 4  ;;  %v3039_v46 = vld [vmem:[#allocation2 + $0x84] sm:$0xe] }
 0x317   : > { %v2882_v42 = vshll.u32 %v15464_v20, 16  ;;  %v11354_v12 = vcombine.low %v3146_v58, %v3149_v17  ;;  %v11323_v52 = vcombine.low %v15401_v45, %v15403_v24  ;;  %v2879_v27 = vor.u32 %v2878_v50, %v15467_v18  ;;  %v15490_v58 = vpop.permute.xlu0 %6695  ;;  %v17954_v45 = vld [vmem:[#allocation89_spill] sm:$0xff]  ;;  %v17955_v17 = vld [vmem:[#allocation94_spill] sm:$0xff] }
 0x318   : > { %v11211_v48 = vrot.slane %v3038_v63, 9  ;;  %7083 = vrot.lane.b32.xlu0 %v15325_v2, %s12224_s14  ;;  %v2851_v22 = vsel %vm12619_vm10, %v2846_v21, %v2850_v36  ;;  %v2861_v31 = vsel %vm12619_vm10, %v2856_v55, %v2860_v3  ;;  %v3154_v16 = vrot.slane %v3152_v7, 4  ;;  %v15496_v63 = vld [vmem:[#allocation2 + $0x94] sm:$0xf]  ;;  %v17956_v36 = vld [vmem:[#allocation87_spill] sm:$0xff] }
 0x319   : > { %3844 = vrot.lane.b32.xlu1 %v11338_v60, %s12222_s12  ;;  %v3155_v60 = vrot.slane %v15441_v49, 5  ;;  %v6815_v24 = vsel %vm3942_vm14, %v11421_v14, %v17954_v45  ;;  %v6818_v50 = vsel %vm3942_vm14, %v11422_v59, %v17955_v17  ;;  %v2870_v51 = vrot.slane %v2869_v35, 4 }
 0x31a   : > { %v2887_v2 = vshrl.u32 %v15475_v1, 16  ;;  %v6852_v21 = vsel %vm3991_vm15, %v6815_v24, %v17956_v36  ;;  %v6854_v3 = vsel %vm3991_vm15, %v6818_v50, %v15094_v6  ;;  %v2884_v49 = vrot.slane %v2882_v42, 5  ;;  %v15515_v42 = vld [vmem:[#allocation2 + $0x9c] sm:$0xf]  ;;  %v17957_v36 = vld [vmem:[#allocation93_spill] sm:$0xff] }
 0x31b   : > { %v3159_v62 = vrot.slane %v15435_v9, 5  ;;  %v11339_v14 = vcombine.low %v2851_v22, %v2861_v31  ;;  %v2880_v8 = vrot.slane %v2879_v27, 4  ;;  %v3153_v4 = vsel %vm12606_vm7, %v11211_v48, %v3152_v7  ;;  %v15511_v32 = vpop.permute.xlu0 %6775  ;;  %v15524_v22 = vld [vmem:[#allocation2 + $0x98] sm:$0x1]  ;;  %v15526_v31 = vld [vmem:[#allocation2 + $0xa0] sm:$0xf] }
 0x31c   : > { %v2890_v59 = vshll.u32 %v15475_v1, 16  ;;  %3766 = vrot.lane.b32.xlu0 %v11323_v52, %s12221_s11  ;;  %v3156_v35 = vsel %vm12606_vm7, %v3154_v16, %v3155_v60  ;;  %v2889_v6 = vrot.slane %v2887_v2, 4  ;;  %v2900_v41 = vshrl.u32 %v15496_v63, 16  ;;  %v15522_v52 = vpop.permute.xlu1 %6617 }
 0x31d   : > { %3924 = vrot.lane.b32.xlu1 %v11354_v12, %s12223_s13  ;;  %v2896_v55 = vshll.u32 %v15496_v63, 16  ;;  %v11324_v12 = vcombine.low %v15418_v54, %v15435_v9  ;;  %v2875_v7 = vsel %vm12619_vm10, %v2870_v51, %v15467_v18  ;;  %v11212_v27 = vrot.slane %v3039_v46, 9  ;;  %v17958_v46 = vld [vmem:[#allocation91_spill] sm:$0xff] }
 0x31e   : > { %v2892_v48 = vrot.slane %v2890_v59, 5  ;;  %v3161_v16 = vrot.slane %v3159_v62, 4  ;;  %v3162_v60 = vrot.slane %v15464_v20, 5  ;;  %v2902_v24 = vrot.slane %v2900_v41, 4 }
 0x31f   : > { %v15529_v45 = vrot.slane %v2896_v55, 5  ;;  %v2885_v54 = vsel %vm12619_vm10, %v2880_v8, %v2884_v49  ;;  %v11355_v9 = vcombine.low %v3153_v4, %v3156_v35  ;;  %v2911_v18 = vshrl.u32 %v15515_v42, 16  ;;  %v17959_v8 = vld [vmem:[#allocation95_spill] sm:$0xff] }
 0x320   : > { %v2914_v17 = vshll.u32 %v15515_v42, 16  ;;  %3846 = vrot.lane.b32.xlu0 %v11339_v14, %s12222_s12  ;;  %v2893_v50 = vor.u32 %v2892_v48, %v2889_v6  ;;  %v2906_v20 = vshll.u32 %v15524_v22, 16  ;;  %v2924_v2 = vshrl.u32 %v15526_v31, 16  ;;  %v17960_v14 = vld [vmem:[#allocation96_spill] sm:$0xff] }
 0x321   : > { %7085 = vrot.lane.b32.xlu1 %v15408_v47, %s12224_s14  ;;  %v2903_v51 = vor.u32 %v2902_v24, %v15529_v45  ;;  %v7010_v47 = vsel %vm4156_vm5, %v6978_v43, %v17957_v36  ;;  %v7040_v49 = vsel %vm4189_vm6, %v7008_v56, %v17958_v46  ;;  %v6884_v4 = vsel %vm4024_vm1, %v6852_v21, %v17959_v8  ;;  %v15555_v43 = vpop.permute.xlu0 %6777  ;;  %v15558_v56 = vpop.permute.xlu1 %6697  ;;  %v3040_v24 = vld [vmem:[#allocation2 + $0x90] sm:$0xe] }
 0x322   : > { %v6886_v59 = vsel %vm4024_vm1, %v6854_v3, %v15124_v39  ;;  %v6916_v35 = vsel %vm4057_vm2, %v6884_v4, %v17960_v14  ;;  %v11340_v6 = vcombine.low %v2875_v7, %v2885_v54  ;;  %v3160_v41 = vsel %vm12606_vm7, %v11212_v27, %v3159_v62 }
 0x323   : > { %v3163_v55 = vsel %vm12606_vm7, %v3161_v16, %v3162_v60  ;;  %v2913_v21 = vrot.slane %v2911_v18, 4  ;;  %v2916_v48 = vrot.slane %v2914_v17, 5  ;;  %v3166_v39 = vrot.slane %v15496_v63, 5  ;;  %v17961_v16 = vld [vmem:[#allocation92_spill] sm:$0xff] }
 0x324   : > { %v2920_v3 = vshll.u32 %v15526_v31, 16  ;;  %3926 = vrot.lane.b32.xlu0 %v11355_v9, %s12223_s13  ;;  %v2894_v7 = vrot.slane %v2893_v50, 4  ;;  %v2904_v62 = vrot.slane %v2903_v51, 4  ;;  %v2908_v27 = vrot.slane %v2906_v20, 5  ;;  %v15569_v17 = vld [vmem:[#allocation2 + $0xa4] sm:$0x1] }
 0x325   : > { %3768 = vrot.lane.b32.xlu1 %v11324_v12, %s12221_s11  ;;  %v2926_v54 = vrot.slane %v2924_v2, 4  ;;  %v7042_v60 = vsel %vm4189_vm6, %v7010_v47, %v17961_v16  ;;  %v6918_v12 = vsel %vm4057_vm2, %v6886_v59, %v15162_v28  ;;  %v6948_v18 = vsel %vm4090_vm3, %v6916_v35, %v15132_v57  ;;  %v15579_v2 = vld [vmem:[#allocation2 + $0xa8] sm:$0xf]  ;;  %v15581_v28 = vld [vmem:[#allocation2 + $0xac] sm:$0xf] }
 0x326   : > { %v15571_v36 = vrot.slane %v2920_v3, 5  ;;  %v6950_v9 = vsel %vm4090_vm3, %v6918_v12, %v15193_v13  ;;  %v6980_v50 = vsel %vm4123_vm4, %v6948_v18, %v15175_v0  ;;  %v11325_v51 = vcombine.low %v15475_v1, %v15496_v63  ;;  %v15591_v1 = vpop.permute.xlu0 %6267  ;;  %v12139_v16 = vld [vmem:[#allocation3 + $0x90] sm:$0xf]  ;;  %v12140_v12 = vld [vmem:[#allocation3 + $0x94] sm:$0xf] }
 0x327   : > { %v11213_v20 = vrot.slane %v3040_v24, 9  ;;  %v11356_v57 = vcombine.low %v3160_v41, %v3163_v55  ;;  %v3168_v47 = vrot.slane %v3166_v39, 4  ;;  %v3169_v46 = vrot.slane %v15524_v22, 5  ;;  %v15597_v22 = vpop.permute.xlu1 %6187  ;;  %v3041_v41 = vld [vmem:[#allocation2 + $0x9c] sm:$0xe] }
 0x328   : > { %v2917_v8 = vor.u32 %v2916_v48, %v2913_v21  ;;  %7087 = vrot.lane.b32.xlu0 %v7040_v49, %s12224_s14  ;;  %v2899_v0 = vsel %vm12619_vm10, %v2894_v7, %v15529_v45  ;;  %v2909_v13 = vsel %vm12619_vm10, %v2904_v62, %v2908_v27  ;;  %v2927_v63 = vor.u32 %v2926_v54, %v15571_v36  ;;  %v15611_v7 = vld [vmem:[#allocation2 + $0xb4] sm:$0xf]  ;;  %v15614_v27 = vld [vmem:[#allocation2 + $0xb0] sm:$0x1] }
 0x329   : > { %3848 = vrot.lane.b32.xlu1 %v11340_v6, %s12222_s12  ;;  %v2930_v4 = vshll.u32 %v15569_v17, 16  ;;  %v6982_v59 = vsel %vm4123_vm4, %v6950_v9, %v15226_v34  ;;  %v2935_v49 = vshrl.u32 %v15579_v2, 16  ;;  %v2938_v14 = vshll.u32 %v15579_v2, 16 }
 0x32a   : > { %v2948_v45 = vshrl.u32 %v15581_v28, 16  ;;  %v7012_v35 = vsel %vm4156_vm5, %v6980_v50, %v15200_v30  ;;  %v3167_v6 = vsel %vm12606_vm7, %v11213_v20, %v3166_v39  ;;  %v3173_v55 = vrot.slane %v15526_v31, 5 }
 0x32b   : > { %v2944_v21 = vshll.u32 %v15581_v28, 16  ;;  %v11341_v34 = vcombine.low %v2899_v0, %v2909_v13  ;;  %v3170_v48 = vsel %vm12606_vm7, %v3168_v47, %v3169_v46  ;;  %v2918_v24 = vrot.slane %v2917_v8, 4  ;;  %v15622_v47 = vpop.permute.xlu0 %6363  ;;  %v15628_v13 = vpop.permute.xlu1 %6189 }
 0x32c   : > { %v2937_v3 = vrot.slane %v2935_v49, 4  ;;  %3770 = vrot.lane.b32.xlu0 %v11325_v51, %s12221_s11  ;;  %v2928_v30 = vrot.slane %v2927_v63, 4  ;;  %v2932_v62 = vrot.slane %v2930_v4, 5  ;;  %v2940_v39 = vrot.slane %v2938_v14, 5 }
 0x32d   : > { %3928 = vrot.lane.b32.xlu1 %v11356_v57, %s12223_s13  ;;  %v15616_v54 = vrot.slane %v2944_v21, 5  ;;  %v11423_v18 = vcombine.low %v12139_v16, %v12140_v12  ;;  %v11326_v9 = vcombine.low %v15515_v42, %v15526_v31  ;;  %v11214_v50 = vrot.slane %v3041_v41, 9  ;;  %v15620_v57 = vld [vmem:[#allocation2 + $0xb8] sm:$0xf] }
 0x32e   : > { %v2950_v20 = vrot.slane %v2948_v45, 4  ;;  %v3175_v51 = vrot.slane %v3173_v55, 4  ;;  %v3176_v46 = vrot.slane %v15569_v17, 5  ;;  %v2959_v8 = vshrl.u32 %v15611_v7, 16  ;;  %v15640_v45 = vld [vmem:[#allocation2 + $0xc8] sm:$0x1] }
 0x32f   : > { %v2962_v0 = vshll.u32 %v15611_v7, 16  ;;  %v11357_v63 = vcombine.low %v3167_v6, %v3170_v48  ;;  %v2941_v4 = vor.u32 %v2940_v39, %v2937_v3  ;;  %v2954_v31 = vshll.u32 %v15614_v27, 16 }
 0x330   : > { %v2951_v42 = vor.u32 %v2950_v20, %v15616_v54  ;;  %3850 = vrot.lane.b32.xlu0 %v11341_v34, %s12222_s12  ;;  %v2923_v17 = vsel %vm12619_vm10, %v2918_v24, %v15571_v36  ;;  %v2933_v49 = vsel %vm12619_vm10, %v2928_v30, %v2932_v62  ;;  %v2972_v14 = vshrl.u32 %v15620_v57, 16  ;;  %v3042_v30 = vld [vmem:[#allocation2 + $0xa8] sm:$0xe]  ;;  %v2435_v62 = vld [vmem:[#allocation2 + $0xb4] sm:$0xe] }
 0x331   : > { %7089 = vrot.lane.b32.xlu1 %v7042_v60, %s12224_s14  ;;  %v2968_v60 = vshll.u32 %v15620_v57, 16  ;;  %v2595_v6 = vrot.slane %v15640_v45, 5  ;;  %v7014_v41 = vsel %vm4156_vm5, %v6982_v59, %v15264_v11  ;;  %v7044_v21 = vsel %vm4189_vm6, %v7012_v35, %v15237_v33  ;;  %v12060_v33 = vld [vmem:[%s17729_s2 + $0x20] ss:$0 sps:$4 sm:$0xff]  }
 0x332   : > { %v3180_v34 = vrot.slane %v15581_v28, 5  ;;  %v3174_v36 = vsel %vm12606_vm7, %v11214_v50, %v3173_v55  ;;  %v3177_v48 = vsel %vm12606_vm7, %v3175_v51, %v3176_v46  ;;  %v2961_v24 = vrot.slane %v2959_v8, 4  ;;  %v15663_v12 = vpop.permute.xlu0 %6443  ;;  %v15669_v51 = vpop.permute.xlu1 %6269  ;;  %11978 = vmatprep.subr.msk.bf16.mxu0 %vm7212_vm8, %v12060_v33 }
 0x333   : > { %v2964_v3 = vrot.slane %v2962_v0, 5  ;;  %v11342_v39 = vcombine.low %v2923_v17, %v2933_v49  ;;  %v2942_v16 = vrot.slane %v2941_v4, 4  ;;  %v2952_v11 = vrot.slane %v2951_v42, 4  ;;  %v12061_v4 = vld [vmem:[%s17729_s2 + $0x18] sm:$0xff]  }
 0x334   : > { %v2956_v59 = vrot.slane %v2954_v31, 5  ;;  %v6821_v35 = vsel %vm3942_vm14, %v11423_v18, %v15296_v29  ;;  %v15660_v55 = vsel %vm4189_vm6, %v7014_v41, %v15271_v23  ;;  %3930 = vrot.lane.b32.xlu0 %v11357_v63, %s12223_s13  ;;  %v2974_v50 = vrot.slane %v2972_v14, 4  ;;  %v15672_v18 = vld [vmem:[#allocation2 + $0xbc] sm:$0x1] }
 0x335   : > { %3772 = vrot.lane.b32.xlu1 %v11326_v9, %s12221_s11  ;;  %v15665_v9 = vrot.slane %v2968_v60, 5  ;;  %v6856_v20 = vsel %vm3991_vm15, %v6821_v35, %v15302_v37  ;;  %v11215_v46 = vrot.slane %v3042_v30, 9  ;;  %v3182_v8 = vrot.slane %v3180_v34, 4 }
 0x336   : > { %v3183_v29 = vrot.slane %v15614_v27, 5  ;;  %v11358_v23 = vcombine.low %v3174_v36, %v3177_v48  ;;  %v2965_v0 = vor.u32 %v2964_v3, %v2961_v24  ;;  %v11201_v63 = vrot.slane %v2435_v62, 9  ;;  %v17962_v27 = vld [vmem:[#allocation88_spill] sm:$0xff] }
 0x337   : > { %v2947_v37 = vsel %vm12619_vm10, %v2942_v16, %v15616_v54  ;;  %v2957_v42 = vsel %vm12619_vm10, %v2952_v11, %v2956_v59  ;;  %v17963_v31 = vrot.slane %v17962_v27, 5  ;;  %v7214_v49 = vsel %vm7212_vm8, %v12060_v33, 0  ;;  %v15696_v48 = vld [vmem:[#allocation2 + $0xc0] sm:$0xf]  ;;  %v15716_v16 = vpop.permute.xlu0 %6523  ;;  %v12063_v33 = vld [vmem:[%s17729_s2 + $0x10] sm:$0xff]   ;;  %v15725_v35 = vpop.permute.xlu1 %6365 }
 0x338   : > { %7091 = vrot.lane.b32.xlu0 %v7044_v21, %s12224_s14  ;;  %v11327_v14 = vcombine.low %v15579_v2, %v15581_v28  ;;  %v2975_v60 = vor.u32 %v2974_v50, %v15665_v9  ;;  %v2978_v41 = vshll.u32 %v15672_v18, 16  ;;  %v2436_v24 = vld [vmem:[#allocation2 + $0xc0] sm:$0xe]  ;;  %v6888_v3 = vsel %vm4024_vm1, %v6856_v20, %v15350_v61  ;;  %11899 = vmatpush3.bf16.msra.mxu0 %v7214_v49  ;;  %v3043_v50 = vld [vmem:[#allocation2 + $0xb4] sm:$0xe] }
 0x339   : > { %3852 = vrot.lane.b32.xlu1 %v11342_v39, %s12222_s12  ;;  %v2587_v17 = vrot.slane %v17963_v31, 4  ;;  %v17964_v36 = vmov %v17963_v31  ;;  %v15702_v21 = vsel %vm12606_vm7, %v11215_v46, %v3180_v34  ;;  %v15706_v2 = vsel %vm12606_vm7, %v3182_v8, %v3183_v29  ;;  %v17965_v28 = vld [vmem:[#allocation100_spill] sm:$0xff]  ;;  %11900 = vmatprep.subr.bf16.mxu0 %v12061_v4  ;;  %v17967_v29 = vld [vmem:[#allocation97_spill] sm:$0xff] }
 0x33a   : > { %v15694_v54 = vsel %vm12606_vm7, %v11201_v63, %v17964_v36  ;;  %v17966_v30 = vrot.slane %v17965_v28, 5  ;;  %v15714_v39 = vld [vmem:[#allocation2 + $0xc4] sm:$0xf]  ;;  %v11343_v61 = vcombine.low %v2947_v37, %v2957_v42  ;;  %v2966_v11 = vrot.slane %v2965_v0, 4 }
 0x33b   : > { %v3187_v34 = vrot.slane %v15620_v57, 5  ;;  %v2983_v20 = vshrl.u32 %v15696_v48, 16  ;;  %v2986_v46 = vshll.u32 %v15696_v48, 16  ;;  %v11202_v8 = vrot.slane %v2436_v24, 9 }
 0x33c   : > { %v15712_v62 = vsel %vm12606_vm7, %v2587_v17, %v17966_v30  ;;  %v17968_v0 = vrot.slane %v17967_v29, 5  ;;  %3774 = vrot.lane.b32.xlu0 %v11327_v14, %s12221_s11  ;;  %v2976_v37 = vrot.slane %v2975_v60, 4  ;;  %v2980_v42 = vrot.slane %v2978_v41, 5  ;;  %v12143_v17 = vld [vmem:[#allocation3 + $0xa0] sm:$0xf]  ;;  %11901 = vmatpush3.bf16.msra.mxu0 %v12061_v4 }
 0x33d   : > { %v11313_v59 = vcombine.low %v15694_v54, %v15712_v62  ;;  %3932 = vrot.lane.b32.xlu1 %v11358_v23, %s12223_s13  ;;  %v2996_v27 = vshrl.u32 %v15714_v39, 16  ;;  %v2992_v31 = vshll.u32 %v15714_v39, 16  ;;  %v12142_v23 = vld [vmem:[#allocation3 + $0x9c] sm:$0xf]  ;;  %v6920_v36 = vsel %vm4057_vm2, %v6888_v3, %v15381_v44  ;;  %11902 = vmatprep.subr.bf16.mxu0 %v12063_v33  ;;  %v12065_v3 = vld [vmem:[%s17729_s2 + $0x8] sm:$0xff]   ;;  %v17970_v62 = vld [vmem:[#allocation19_spill] sm:$0xff] }
 0x33e   : > { %v2594_v63 = vrot.slane %v17968_v0, 4  ;;  %v11424_v49 = vcombine.low %v12142_v23, %v12143_v17  ;;  %v17969_v28 = vmov %v17968_v0  ;;  %v11216_v60 = vrot.slane %v3043_v50, 9 }
 0x33f   : > { %v15740_v24 = vsel %vm12606_vm7, %v11202_v8, %v17969_v28  ;;  %v3189_v41 = vrot.slane %v3187_v34, 4  ;;  %v3190_v30 = vrot.slane %v15672_v18, 5  ;;  %v11328_v45 = vcombine.low %v15611_v7, %v15620_v57  ;;  %v15761_v18 = vpop.permute.xlu0 %6619  ;;  %v15772_v57 = vld [vmem:[#allocation2 + $0xcc] sm:$0xf] }
 0x340   : > { %v15746_v14 = vsel %vm12606_vm7, %v2594_v63, %v2595_v6  ;;  %v11359_v6 = vcombine.low %v15702_v21, %v15706_v2  ;;  %v2985_v4 = vrot.slane %v2983_v20, 4  ;;  %v2988_v50 = vrot.slane %v2986_v46, 5  ;;  %3854 = vrot.lane.b32.xlu0 %v11343_v61, %s12222_s12  ;;  %v15780_v20 = vld [vmem:[#allocation2 + $0xd0] sm:$0xf]  ;;  %11903 = vmatpush3.bf16.msra.mxu0 %v12063_v33 }
 0x341   : > { %v11314_v44 = vcombine.low %v15740_v24, %v15746_v14  ;;  %7093 = vrot.lane.b32.xlu1 %v15660_v55, %s12224_s14  ;;  %v2971_v8 = vsel %vm12619_vm10, %v2966_v11, %v15665_v9  ;;  %v2981_v29 = vsel %vm12619_vm10, %v2976_v37, %v2980_v42  ;;  %v15768_v55 = vld [vmem:[#allocation2 + $0xc8] sm:$0x1]  ;;  %v15770_v0 = vrot.slane %v2992_v31, 5  ;;  %v15778_v61 = vpop.permute.xlu1 %6445  ;;  %11904 = vmatprep.subr.bf16.mxu0 %v12065_v3 }
 0x342   : > { %v2998_v7 = vrot.slane %v2996_v27, 4  ;;  %v6824_v21 = vsel %vm3942_vm14, %v11424_v49, %v15344_v5  ;;  %v6952_v2 = vsel %vm4090_vm3, %v6920_v36, %v15428_v53  ;;  %v3188_v46 = vsel %vm12606_vm7, %v11216_v60, %v3187_v34  ;;  %v12066_v53 = vld [vmem:[%s17729_s2] sm:$0xff]  }
 0x343   : > { %v6858_v9 = vsel %vm3991_vm15, %v6824_v21, %v15376_v40  ;;  %v6984_v11 = vsel %vm4123_vm4, %v6952_v2, %v15456_v38  ;;  %v3191_v5 = vsel %vm12606_vm7, %v3189_v41, %v3190_v30  ;;  %v11344_v33 = vcombine.low %v2971_v8, %v2981_v29  ;;  %v15822_v8 = vld [vmem:[#allocation2 + $0xd4] sm:$0x1]  ;;  %v12144_v29 = vld [vmem:[#allocation2 + $0x4] sm:$0xf] }
 0x344   : > { %v2989_v63 = vor.u32 %v2988_v50, %v2985_v4  ;;  %v3002_v40 = vshll.u32 %v15768_v55, 16  ;;  %v3007_v37 = vshrl.u32 %v15772_v57, 16  ;;  %3934 = vrot.lane.b32.xlu0 %v11359_v6, %s12223_s13  ;;  %v2999_v38 = vor.u32 %v2998_v7, %v15770_v0  ;;  %11905 = vmatpush3.bf16.msra.mxu0 %v12065_v3  ;;  %v3044_v6 = vld [vmem:[#allocation2 + $0xc0] sm:$0xe] }
 0x345   : > { %3776 = vrot.lane.b32.xlu1 %v11328_v45, %s12221_s11  ;;  %v3010_v34 = vshll.u32 %v15772_v57, 16  ;;  %v3020_v42 = vshrl.u32 %v15780_v20, 16  ;;  %v3016_v27 = vshll.u32 %v15780_v20, 16  ;;  %v6890_v31 = vsel %vm4024_vm1, %v6858_v9, %v15416_v15  ;;  %v15805_v17 = vpop.permute.xlu1 %6525  ;;  %11906 = vmatprep.subr.bf16.mxu0 %v12066_v53  ;;  %v12145_v7 = vld [vmem:[#allocation2] sm:$0xf] }
 0x346   : > { %v7016_v23 = vsel %vm4156_vm5, %v6984_v11, %v15490_v58  ;;  %v6922_v49 = vsel %vm4057_vm2, %v6890_v31, %v15449_v10  ;;  %v15811_v28 = vpop.permute.xlu0 %6699  ;;  %v11360_v60 = vcombine.low %v3188_v46, %v3191_v5  ;;  %v2990_v41 = vrot.slane %v2989_v63, 4 }
 0x347   : > { %v7048_v36 = vsel %vm4189_vm6, %v7016_v23, %v15511_v32  ;;  %v3004_v15 = vrot.slane %v3002_v40, 5  ;;  %v3009_v30 = vrot.slane %v3007_v37, 4  ;;  %v3194_v58 = vrot.slane %v15714_v39, 5  ;;  %v12146_v40 = vld [vmem:[#allocation3 + $0xa8] sm:$0xf] }
 0x348   : > { %7095 = vrot.lane.b32.xlu0 %v7048_v36, %s12224_s14  ;;  %v3000_v3 = vrot.slane %v2999_v38, 4  ;;  %v3012_v45 = vrot.slane %v3010_v34, 5  ;;  %v15816_v10 = vrot.slane %v3016_v27, 5  ;;  %v3022_v4 = vrot.slane %v3020_v42, 4  ;;  %11907 = vmatpush3.bf16.msra.mxu0 %v12066_v53  ;;  %v12147_v37 = vld [vmem:[#allocation3 + $0xac] sm:$0xf] }
 0x349   : > { %3856 = vrot.lane.b32.xlu1 %v11344_v33, %s12222_s12  ;;  %v6954_v32 = vsel %vm4090_vm3, %v6922_v49, %v15480_v25  ;;  %v11219_v21 = vcombine.low %v12145_v7, %v12144_v29  ;;  %v11329_v11 = vcombine.low %v15696_v48, %v15714_v39  ;;  %v2995_v25 = vsel %vm12619_vm10, %v2990_v41, %v15770_v0  ;;  %v12149_v41 = vld [vmem:[#allocation2 + $0x10] sm:$0xf] }
 0x34a   : > { %v6986_v2 = vsel %vm4123_vm4, %v6954_v32, %v15522_v52  ;;  %v15826_v9 = vpop.permute.xlu0 %6701  ;;  %v11217_v46 = vrot.slane %v3044_v6, 9  ;;  %v3196_v5 = vrot.slane %v3194_v58, 4  ;;  %v3197_v53 = vrot.slane %v15768_v55, 5 }
 0x34b   : > { %v15820_v50 = vpop.permute.xlu1 %6621  ;;  %v3005_v52 = vsel %vm12619_vm10, %v3000_v3, %v3004_v15  ;;  %v3013_v33 = vor.u32 %v3012_v45, %v3009_v30  ;;  %v3023_v48 = vor.u32 %v3022_v4, %v15816_v10  ;;  %v3026_v39 = vshll.u32 %v15822_v8, 16  ;;  %v17971_v30 = vld [vmem:[#allocation17_spill] sm:$0xff] }
 0x34c   : > { %3682 = vrot.lane.b32.xlu0 %v11313_v59, %s12220_s7  ;;  %v7018_v0 = vsel %vm4156_vm5, %v6986_v2, %v15558_v56  ;;  %v11425_v55 = vcombine.low %v12146_v40, %v12147_v37  ;;  %v3945_v59 = vsel %vm3942_vm14, %v11219_v21, %v17970_v62  ;;  %v11345_v34 = vcombine.low %v2995_v25, %v3005_v52  ;;  %v17972_v2 = vld [vmem:[#allocation39_spill] sm:$0xff]  ;;  %v12151_v52 = vld [vmem:[#allocation3 + $0xb8] sm:$0xf] }
 0x34d   : > { %3936 = vrot.lane.b32.xlu1 %v11360_v60, %s12223_s13  ;;  %v7050_v38 = vsel %vm4189_vm6, %v7018_v0, %v15555_v43  ;;  %v3195_v42 = vsel %vm12606_vm7, %v11217_v46, %v3194_v58  ;;  %v3198_v56 = vsel %vm12606_vm7, %v3196_v5, %v3197_v53  ;;  %v3014_v27 = vrot.slane %v3013_v33, 4  ;;  %v3045_v43 = vld [vmem:[#allocation2 + $0xcc] sm:$0xe]  ;;  %v17975_v5 = vld [vmem:[#allocation71_spill] sm:$0xff] }
 0x34e   : > { %v15847_v54 = vpop.permute.xlu0 %3752  ;;  %v3024_v31 = vrot.slane %v3023_v48, 4  ;;  %v3028_v23 = vrot.slane %v3026_v39, 5  ;;  %v3201_v49 = vrot.slane %v15780_v20, 5  ;;  %v12148_v60 = vld [vmem:[#allocation2 + $0xc] sm:$0xf]  ;;  %v3993_v3 = vsel %vm3991_vm15, %v3945_v59, %v17971_v30 }
 0x34f   : > { %v3751_v63 = vpop.permute.xlu1 %3750  ;;  %v11220_v15 = vcombine.low %v12148_v60, %v12149_v41  ;;  %v6827_v58 = vsel %vm3942_vm14, %v11425_v55, %v15597_v22  ;;  %v11330_v4 = vcombine.low %v15772_v57, %v15780_v20  ;;  %v11361_v32 = vcombine.low %v3195_v42, %v3198_v56  ;;  %v17973_v57 = vld [vmem:[#allocation11_spill] sm:$0xff]  ;;  %v12150_v53 = vld [vmem:[#allocation3 + $0xb4] sm:$0xf]  ;;  %v17976_v55 = vld [vmem:[#allocation18_spill] sm:$0xff] }
 0x350   : > { %3778 = vrot.lane.b32.xlu0 %v11329_v11, %s12221_s11  ;;  %v6860_v6 = vsel %vm3991_vm15, %v6827_v58, %v15591_v1  ;;  %v11218_v29 = vrot.slane %v3045_v43, 9  ;;  %v3019_v22 = vsel %vm12619_vm10, %v3014_v27, %v15816_v10  ;;  %v3029_v7 = vsel %vm12619_vm10, %v3024_v31, %v3028_v23  ;;  %v17974_v11 = vld [vmem:[#allocation55_spill] sm:$0xff]  ;;  %v17977_v27 = vld [vmem:[#allocation42_spill] sm:$0xff] }
 0x351   : > { %7097 = vrot.lane.b32.xlu1 %v7050_v38, %s12224_s14  ;;  %v3203_v1 = vrot.slane %v3201_v49, 4  ;;  %v3204_v21 = vrot.slane %v15822_v8, 5  ;;  %v4026_v24 = vsel %vm4024_vm1, %v3993_v3, %v17972_v2  ;;  %v6892_v14 = vsel %vm4024_vm1, %v6860_v6, %v15622_v47  ;;  %v12152_v30 = vld [vmem:[#allocation2 + $0x18] sm:$0xf] }
 0x352   : > { %v15862_v45 = vpop.permute.xlu0 %6781  ;;  %v3948_v20 = vsel %vm3942_vm14, %v11220_v15, %v17973_v57  ;;  %v4059_v25 = vsel %vm4057_vm2, %v4026_v24, %v17974_v11  ;;  %v6924_v10 = vsel %vm4057_vm2, %v6892_v14, %v15663_v12  ;;  %v11426_v33 = vcombine.low %v12150_v53, %v12151_v52  ;;  %v12154_v14 = vld [vmem:[#allocation2 + $0x24] sm:$0xf]  ;;  %v17983_v57 = vld [vmem:[#allocation57_spill] sm:$0xff] }
 0x353   : > { %v6780_v36 = vpop.permute.xlu1 %6779  ;;  %v4092_v8 = vsel %vm4090_vm3, %v4059_v25, %v17975_v5  ;;  %v6956_v47 = vsel %vm4090_vm3, %v6924_v10, %v15716_v16  ;;  %v11346_v48 = vcombine.low %v3019_v22, %v3029_v7  ;;  %v3202_v12 = vsel %vm12606_vm7, %v11218_v29, %v3201_v49  ;;  %v17984_v25 = vld [vmem:[#allocation73_spill] sm:$0xff] }
 0x354   : > { %3858 = vrot.lane.b32.xlu0 %v11345_v34, %s12222_s12  ;;  %v4125_v39 = vsel %vm4123_vm4, %v4092_v8, %v3751_v63  ;;  %v3205_v0 = vsel %vm12606_vm7, %v3203_v1, %v3204_v21  ;;  %v6988_v40 = vsel %vm4123_vm4, %v6956_v47, %v15761_v18  ;;  %vm7179_vm8 = vcmask 588800   ;;  %v17985_v53 = vld [vmem:[#allocation13_spill] sm:$0xff] }
 0x355   : > { %3684 = vrot.lane.b32.xlu1 %v11314_v44, %s12220_s7  ;;  %v3995_v38 = vsel %vm3991_vm15, %v3948_v20, %v17976_v55  ;;  %v7020_v63 = vsel %vm4156_vm5, %v6988_v40, %v15811_v28  ;;  %v6830_v34 = vsel %vm3942_vm14, %v11426_v33, %v15628_v13  ;;  %v11362_v18 = vcombine.low %v3202_v12, %v3205_v0  ;;  %v17978_v28 = vld [vmem:[#allocation58_spill] sm:$0xff]  ;;  %v17987_v0 = vld [vmem:[#allocation44_spill] sm:$0xff] }
 0x356   : > { %v3911_v46 = vpop.permute.xlu0 %3910  ;;  %v7052_v42 = vsel %vm4189_vm6, %v7020_v63, %v6780_v36  ;;  %v4028_v31 = vsel %vm4024_vm1, %v3995_v38, %v17977_v27  ;;  %v6862_v23 = vsel %vm3991_vm15, %v6830_v34, %v15669_v51  ;;  %v17979_v36 = vld [vmem:[#allocation74_spill] sm:$0xff]  ;;  %v12153_v51 = vld [vmem:[#allocation2 + $0x1c] sm:$0xf]  ;;  %v17989_v38 = vld [vmem:[#allocation76_spill] sm:$0xff] }
 0x357   : > { %v3831_v44 = vpop.permute.xlu1 %3830  ;;  %v4061_v13 = vsel %vm4057_vm2, %v4028_v31, %v17978_v28  ;;  %v6894_v43 = vsel %vm4024_vm1, %v6862_v23, %v15725_v35  ;;  %v11221_v3 = vcombine.low %v12152_v30, %v12153_v51  ;;  %v12157_v34 = vld [vmem:[#allocation2 + $0x34] sm:$0xf]  ;;  %v12158_v30 = vld [vmem:[#allocation2 + $0x3c] sm:$0xf]  ;;  %v12159_v51 = vld [vmem:[#allocation2 + $0x40] sm:$0xf] }
 0x358   : > { %3938 = vrot.lane.b32.xlu0 %v11361_v32, %s12223_s13  ;;  %v4158_v37 = vsel %vm4156_vm5, %v4125_v39, %v3831_v44  ;;  %v4094_v60 = vsel %vm4090_vm3, %v4061_v13, %v17979_v36  ;;  %v6926_v41 = vsel %vm4057_vm2, %v6894_v43, %v15778_v61  ;;  %v12155_v44 = vld [vmem:[#allocation2 + $0x28] sm:$0xf]  ;;  %v17990_v13 = vld [vmem:[#allocation12_spill] sm:$0xff] }
 0x359   : > { %3780 = vrot.lane.b32.xlu1 %v11330_v4, %s12221_s11  ;;  %v4191_v62 = vsel %vm4189_vm6, %v4158_v37, %v3911_v46  ;;  %v6958_v58 = vsel %vm4090_vm3, %v6926_v41, %v15805_v17  ;;  %v4127_v6 = vsel %vm4123_vm4, %v4094_v60, %v15847_v54  ;;  %v17980_v54 = vld [vmem:[#allocation10_spill] sm:$0xff]  ;;  %v17988_v37 = vld [vmem:[#allocation60_spill] sm:$0xff]  ;;  %v17992_v60 = vld [vmem:[#allocation43_spill] sm:$0xff] }
 0x35a   : > { %v7072_v59 = vpop.permute.xlu0 %7071  ;;  %v6990_v35 = vsel %vm4123_vm4, %v6958_v58, %v15820_v50  ;;  %v3951_v1 = vsel %vm3942_vm14, %v11221_v3, %v17980_v54  ;;  %v17981_v50 = vld [vmem:[#allocation25_spill] sm:$0xff]  ;;  %v11224_v3 = vcombine.low %v12158_v30, %v12159_v51  ;;  %v17993_v58 = vld [vmem:[#allocation59_spill] sm:$0xff]  ;;  %v18008_v30 = vld [vmem:[#allocation64_spill] sm:$0xff] }
 0x35b   : > { %v3833_v16 = vpop.permute.xlu1 %3832  ;;  %v7105_v56 = vsel %vm7103_vm9, %v4191_v62, %v7072_v59  ;;  %v7022_v61 = vsel %vm4156_vm5, %v6990_v35, %v15826_v9  ;;  %v3997_v21 = vsel %vm3991_vm15, %v3951_v1, %v17981_v50  ;;  %v17982_v9 = vld [vmem:[#allocation41_spill] sm:$0xff]  ;;  %v12156_v59 = vld [vmem:[#allocation2 + $0x30] sm:$0xf] }
 0x35c   : > { %7099 = vrot.lane.b32.xlu0 %v7052_v42, %s12224_s14  ;;  %11908 = vmatprep.mubr.msk.bf16.mxu0 %vm7179_vm8, %v7105_v56  ;;  %v4160_v4 = vsel %vm4156_vm5, %v4127_v6, %v3833_v16  ;;  %v7054_v22 = vsel %vm4189_vm6, %v7022_v61, %v15862_v45  ;;  %v4030_v2 = vsel %vm4024_vm1, %v3997_v21, %v17982_v9  ;;  %v17996_v50 = vld [vmem:[#allocation30_spill] sm:$0xff] }
 0x35d   : > { %3860 = vrot.lane.b32.xlu1 %v11346_v48, %s12222_s12  ;;  %v11222_v45 = vcombine.low %v12154_v14, %v12155_v44  ;;  %v4063_v20 = vsel %vm4057_vm2, %v4030_v2, %v17983_v57  ;;  %v17986_v48 = vld [vmem:[#allocation28_spill] sm:$0xff]  ;;  %v11223_v42 = vcombine.low %v12156_v59, %v12157_v34  ;;  %v17997_v2 = vld [vmem:[#allocation46_spill] sm:$0xff] }
 0x35e   : > { %v3755_v15 = vpop.permute.xlu0 %3754  ;;  %v4096_v10 = vsel %vm4090_vm3, %v4063_v20, %v17984_v25  ;;  %v17998_v14 = vld [vmem:[#allocation62_spill] sm:$0xff]  ;;  %v12160_v25 = vld [vmem:[#allocation2 + $0x48] sm:$0xf] }
 0x35f   : > { %v3913_v49 = vpop.permute.xlu1 %3912  ;;  %v4129_v46 = vsel %vm4123_vm4, %v4096_v10, %v3755_v15  ;;  %v3954_v52 = vsel %vm3942_vm14, %v11222_v45, %v17985_v53  ;;  %v3957_v43 = vsel %vm3942_vm14, %v11223_v42, %v17990_v13  ;;  %v17999_v57 = vld [vmem:[#allocation78_spill] sm:$0xff]  ;;  %v12161_v10 = vld [vmem:[#allocation2 + $0x4c] sm:$0xf] }
 0x360   : > { %v4193_v32 = vsel %vm4189_vm6, %v4160_v4, %v3913_v49  ;;  %v3999_v39 = vsel %vm3991_vm15, %v3954_v52, %v17986_v48  ;;  %v17991_v49 = vld [vmem:[#allocation27_spill] sm:$0xff]  ;;  %v18000_v48 = vld [vmem:[#allocation14_spill] sm:$0xff]  ;;  %v18004_v42 = vld [vmem:[#allocation77_spill] sm:$0xff] }
 0x361   : > { %3940 = vrot.lane.b32.xlu1 %v11362_v18, %s12223_s13  ;;  %v4032_v40 = vsel %vm4024_vm1, %v3999_v39, %v17987_v0  ;;  %v4001_v36 = vsel %vm3991_vm15, %v3957_v43, %v17991_v49  ;;  %v17994_v4 = vld [vmem:[#allocation75_spill] sm:$0xff]  ;;  %v18006_v49 = vld [vmem:[#allocation32_spill] sm:$0xff] }
 0x362   : > { %v3835_v7 = vpop.permute.xlu0 %3834  ;;  %v4065_v16 = vsel %vm4057_vm2, %v4032_v40, %v17988_v37  ;;  %v4034_v41 = vsel %vm4024_vm1, %v4001_v36, %v17992_v60  ;;  %v18002_v40 = vld [vmem:[#allocation45_spill] sm:$0xff] }
 0x363   : > { %v7074_v29 = vpop.permute.xlu1 %7073  ;;  %v4162_v5 = vsel %vm4156_vm5, %v4129_v46, %v3835_v7  ;;  %v4098_v63 = vsel %vm4090_vm3, %v4065_v16, %v17989_v38  ;;  %v4067_v6 = vsel %vm4057_vm2, %v4034_v41, %v17993_v58  ;;  %v11225_v46 = vcombine.low %v12160_v25, %v12161_v10  ;;  %v12163_v38 = vld [vmem:[#allocation2 + $0x58] sm:$0xf]  ;;  %v18007_v41 = vld [vmem:[#allocation48_spill] sm:$0xff] }
 0x364   : > { %v7107_v17 = vsel %vm7103_vm9, %v4193_v32, %v7074_v29  ;;  %v4100_v61 = vsel %vm4090_vm3, %v4067_v6, %v17994_v4  ;;  %v18009_v58 = vld [vmem:[#allocation80_spill] sm:$0xff] }
 0x365   : > { %7101 = vrot.lane.b32.xlu1 %v7054_v22, %s12224_s14  ;;  %11909 = vmatmul.mubr.msk.bf16.vlgmr.msra.gmra.mxu0 %vm7179_vm8, %v7107_v17  ;;  %v17995_v17 = vld [vmem:[#allocation15_spill] sm:$0xff]  ;;  %v3963_v39 = vsel %vm3942_vm14, %v11225_v46, %v18000_v48  ;;  %v12164_v4 = vld [vmem:[#allocation2 + $0x60] sm:$0xf] }
 0x366   : > { %v3915_v11 = vpop.permute.xlu0 %3914  ;;  %v3960_v7 = vsel %vm3942_vm14, %v11224_v3, %v17995_v17  ;;  %v18014_v46 = vld [vmem:[#allocation79_spill] sm:$0xff] }
 0x367   : > { %v3757_v24 = vpop.permute.xlu1 %3756  ;;  %v4195_v33 = vsel %vm4189_vm6, %v4162_v5, %v3915_v11  ;;  %v4003_v21 = vsel %vm3991_vm15, %v3960_v7, %v17996_v50  ;;  %v18010_v50 = vld [vmem:[#allocation20_spill] sm:$0xff] }
 0x368   : > { %v4131_v18 = vsel %vm4123_vm4, %v4098_v63, %v3757_v24  ;;  %v4036_v24 = vsel %vm4024_vm1, %v4003_v21, %v17997_v2 }
 0x369   : > { %v4069_v44 = vsel %vm4057_vm2, %v4036_v24, %v17998_v14  ;;  %v18012_v24 = vld [vmem:[#allocation47_spill] sm:$0xff] }
 0x36a   : > { %v7076_v47 = vpop.permute.xlu0 %7075  ;;  %v4102_v20 = vsel %vm4090_vm3, %v4069_v44, %v17999_v57  ;;  %v12167_v57 = vld [vmem:[#allocation2 + $0x70] sm:$0xf] }
 0x36b   : > { %v3837_v8 = vpop.permute.xlu1 %3836  ;;  %v7109_v12 = vsel %vm7103_vm9, %v4195_v33, %v7076_v47 }
 0x36c   : > { %11912 = vmatprep.mubr.msk.bf16.mxu0 %vm7179_vm8, %v7109_v12  ;;  %v4164_v56 = vsel %vm4156_vm5, %v4131_v18, %v3837_v8  ;;  %v18001_v12 = vld [vmem:[#allocation29_spill] sm:$0xff] }
 0x36d   : > { %v4005_v0 = vsel %vm3991_vm15, %v3963_v39, %v18001_v12  ;;  %v18016_v12 = vld [vmem:[#allocation34_spill] sm:$0xff] }
 0x36e   : > { %v3759_v62 = vpop.permute.xlu0 %3758  ;;  %v4038_v37 = vsel %vm4024_vm1, %v4005_v0, %v18002_v40 }
 0x36f   : > { %v3917_v55 = vpop.permute.xlu1 %3916  ;;  %v4133_v32 = vsel %vm4123_vm4, %v4100_v61, %v3759_v62  ;;  %v18003_v62 = vld [vmem:[#allocation61_spill] sm:$0xff]  ;;  %v12165_v61 = vld [vmem:[#allocation2 + $0x64] sm:$0xf] }
 0x370   : > { %v4197_v27 = vsel %vm4189_vm6, %v4164_v56, %v3917_v55  ;;  %v12162_v55 = vld [vmem:[#allocation2 + $0x54] sm:$0xf]  ;;  %v4071_v59 = vsel %vm4057_vm2, %v4038_v37, %v18003_v62 }
 0x371   : > { %v11226_v63 = vcombine.low %v12162_v55, %v12163_v38  ;;  %v4104_v18 = vsel %vm4090_vm3, %v4071_v59, %v18004_v42  ;;  %v18017_v37 = vld [vmem:[#allocation50_spill] sm:$0xff]  ;;  %v12168_v42 = vld [vmem:[#allocation2 + $0x78] sm:$0xf] }
 0x372   : > { %v3839_v28 = vpop.permute.xlu0 %3838  ;;  %v18018_v55 = vld [vmem:[#allocation66_spill] sm:$0xff] }
 0x373   : > { %v7078_v31 = vpop.permute.xlu1 %7077  ;;  %v4166_v29 = vsel %vm4156_vm5, %v4133_v32, %v3839_v28  ;;  %v11227_v32 = vcombine.low %v12164_v4, %v12165_v61  ;;  %v18019_v62 = vld [vmem:[#allocation82_spill] sm:$0xff] }
 0x374   : > { %v7111_v23 = vsel %vm7103_vm9, %v4197_v27, %v7078_v31 }
 0x375   : > { %11913 = vmatmul.mubr.msk.bf16.gmra.mxu0 %vm7179_vm8, %v7111_v23  ;;  %v18005_v23 = vld [vmem:[#allocation9_spill] sm:$0xff]  ;;  %v3969_v21 = vsel %vm3942_vm14, %v11227_v32, %v18010_v50 }
 0x376   : > { %v3919_v35 = vpop.permute.xlu0 %3918  ;;  %v3966_v28 = vsel %vm3942_vm14, %v11226_v63, %v18005_v23  ;;  %v18024_v32 = vld [vmem:[#allocation81_spill] sm:$0xff] }
 0x377   : > { %v3761_v15 = vpop.permute.xlu1 %3760  ;;  %v4199_v54 = vsel %vm4189_vm6, %v4166_v29, %v3919_v35  ;;  %v4007_v36 = vsel %vm3991_vm15, %v3966_v28, %v18006_v49  ;;  %v18020_v49 = vld [vmem:[#allocation16_spill] sm:$0xff] }
 0x378   : > { %v4135_v5 = vsel %vm4123_vm4, %v4102_v20, %v3761_v15  ;;  %v4040_v15 = vsel %vm4024_vm1, %v4007_v36, %v18007_v41 }
 0x379   : > { %v4073_v51 = vsel %vm4057_vm2, %v4040_v15, %v18008_v30  ;;  %v18022_v15 = vld [vmem:[#allocation49_spill] sm:$0xff] }
 0x37a   : > { %v7080_v1 = vpop.permute.xlu0 %7079  ;;  %v4106_v6 = vsel %vm4090_vm3, %v4073_v51, %v18009_v58  ;;  %v12171_v58 = vld [vmem:[#allocation2 + $0x88] sm:$0xf] }
 0x37b   : > { %v3841_v22 = vpop.permute.xlu1 %3840  ;;  %v7113_v9 = vsel %vm7103_vm9, %v4199_v54, %v7080_v1 }
 0x37c   : > { %11916 = vmatprep.mubr.msk.bf16.mxu0 %vm7179_vm8, %v7113_v9  ;;  %v4168_v8 = vsel %vm4156_vm5, %v4135_v5, %v3841_v22  ;;  %v18011_v9 = vld [vmem:[#allocation31_spill] sm:$0xff] }
 0x37d   : > { %v4009_v2 = vsel %vm3991_vm15, %v3969_v21, %v18011_v9  ;;  %v18026_v9 = vld [vmem:[#allocation36_spill] sm:$0xff] }
 0x37e   : > { %v3763_v11 = vpop.permute.xlu0 %3762  ;;  %v4042_v14 = vsel %vm4024_vm1, %v4009_v2, %v18012_v24 }
 0x37f   : > { %v3921_v45 = vpop.permute.xlu1 %3920  ;;  %v4137_v56 = vsel %vm4123_vm4, %v4104_v18, %v3763_v11  ;;  %v18013_v11 = vld [vmem:[#allocation63_spill] sm:$0xff] }
 0x380   : > { %v4201_v53 = vsel %vm4189_vm6, %v4168_v8, %v3921_v45  ;;  %v12166_v45 = vld [vmem:[#allocation2 + $0x6c] sm:$0xf]  ;;  %v4075_v25 = vsel %vm4057_vm2, %v4042_v14, %v18013_v11  ;;  %v12169_v18 = vld [vmem:[#allocation2 + $0x7c] sm:$0xf]  ;;  %v18027_v14 = vld [vmem:[#allocation52_spill] sm:$0xff] }
 0x381   : > { %v11228_v20 = vcombine.low %v12166_v45, %v12167_v57  ;;  %v4108_v5 = vsel %vm4090_vm3, %v4075_v25, %v18014_v46  ;;  %v18028_v45 = vld [vmem:[#allocation68_spill] sm:$0xff]  ;;  %v12172_v11 = vld [vmem:[#allocation2 + $0x90] sm:$0xf]  ;;  %v12173_v25 = vld [vmem:[#allocation2 + $0x94] sm:$0xf] }
 0x382   : > { %v3843_v47 = vpop.permute.xlu0 %3842  ;;  %v18029_v46 = vld [vmem:[#allocation84_spill] sm:$0xff] }
 0x383   : > { %v7082_v52 = vpop.permute.xlu1 %7081  ;;  %v4170_v27 = vsel %vm4156_vm5, %v4137_v56, %v3843_v47  ;;  %v11229_v56 = vcombine.low %v12168_v42, %v12169_v18  ;;  %v7970_v42 = vld [vmem:[#allocation4 + $0x8] sm:$0x1] }
 0x384   : > { %v7115_v33 = vsel %vm7103_vm9, %v4201_v53, %v7082_v52 }
 0x385   : > { %11917 = vmatmul.mubr.msk.bf16.gmra.mxu0 %vm7179_vm8, %v7115_v33  ;;  %v18015_v33 = vld [vmem:[#allocation5_spill] sm:$0xff]  ;;  %v3975_v36 = vsel %vm3942_vm14, %v11229_v56, %v18020_v49  ;;  %v18031_v56 = vld [vmem:[#allocation35_spill] sm:$0xff] }
 0x386   : > { %v3923_v34 = vpop.permute.xlu0 %3922  ;;  %v3972_v47 = vsel %vm3942_vm14, %v11228_v20, %v18015_v33  ;;  %v18033_v49 = vld [vmem:[#allocation67_spill] sm:$0xff] }
 0x387   : > { %v3765_v16 = vpop.permute.xlu1 %3764  ;;  %v4203_v13 = vsel %vm4189_vm6, %v4170_v27, %v3923_v34  ;;  %v4011_v0 = vsel %vm3991_vm15, %v3972_v47, %v18016_v12 }
 0x388   : > { %v4139_v29 = vsel %vm4123_vm4, %v4106_v6, %v3765_v16  ;;  %v4044_v16 = vsel %vm4024_vm1, %v4011_v0, %v18017_v37 }
 0x389   : > { %v4077_v38 = vsel %vm4057_vm2, %v4044_v16, %v18018_v55 }
 0x38a   : > { %v7084_v43 = vpop.permute.xlu0 %7083  ;;  %v4110_v59 = vsel %vm4090_vm3, %v4077_v38, %v18019_v62 }
 0x38b   : > { %v3845_v31 = vpop.permute.xlu1 %3844  ;;  %v7117_v60 = vsel %vm7103_vm9, %v4203_v13, %v7084_v43 }
 0x38c   : > { %11920 = vmatprep.mubr.msk.bf16.mxu0 %vm7179_vm8, %v7117_v60  ;;  %v4172_v22 = vsel %vm4156_vm5, %v4139_v29, %v3845_v31  ;;  %v18021_v60 = vld [vmem:[#allocation33_spill] sm:$0xff] }
 0x38d   : > { %v4013_v41 = vsel %vm3991_vm15, %v3975_v36, %v18021_v60 }
 0x38e   : > { %v3767_v35 = vpop.permute.xlu0 %3766  ;;  %v4046_v30 = vsel %vm4024_vm1, %v4013_v41, %v18022_v15 }
 0x38f   : > { %v3925_v3 = vpop.permute.xlu1 %3924  ;;  %v4141_v8 = vsel %vm4123_vm4, %v4108_v5, %v3767_v35  ;;  %v18023_v35 = vld [vmem:[#allocation65_spill] sm:$0xff] }
 0x390   : > { %v4205_v17 = vsel %vm4189_vm6, %v4172_v22, %v3925_v3  ;;  %v12170_v3 = vld [vmem:[#allocation2 + $0x84] sm:$0xf]  ;;  %v4079_v4 = vsel %vm4057_vm2, %v4046_v30, %v18023_v35  ;;  %v12174_v30 = vld [vmem:[#allocation2 + $0x9c] sm:$0xf] }
 0x391   : > { %v11230_v6 = vcombine.low %v12170_v3, %v12171_v58  ;;  %v4112_v29 = vsel %vm4090_vm3, %v4079_v4, %v18024_v32  ;;  %v18034_v58 = vld [vmem:[#allocation83_spill] sm:$0xff] }
 0x392   : > { %v3847_v1 = vpop.permute.xlu0 %3846 }
 0x393   : > { %v7086_v7 = vpop.permute.xlu1 %7085  ;;  %v4174_v53 = vsel %vm4156_vm5, %v4141_v8, %v3847_v1 }
 0x394   : > { %v7119_v54 = vsel %vm7103_vm9, %v4205_v17, %v7086_v7 }
 0x395   : > { %11921 = vmatmul.mubr.msk.bf16.gmra.mxu0 %vm7179_vm8, %v7119_v54  ;;  %v18025_v54 = vld [vmem:[#allocation22_spill] sm:$0xff] }
 0x396   : > { %v3927_v10 = vpop.permute.xlu0 %3926  ;;  %v3978_v1 = vsel %vm3942_vm14, %v11230_v6, %v18025_v54 }
 0x397   : > { %v3769_v44 = vpop.permute.xlu1 %3768  ;;  %v4207_v48 = vsel %vm4189_vm6, %v4174_v53, %v3927_v10  ;;  %v4015_v2 = vsel %vm3991_vm15, %v3978_v1, %v18026_v9  ;;  %v11231_v10 = vcombine.low %v12172_v11, %v12173_v25  ;;  %v7938_v53 = vld [vmem:[#allocation4] sm:$0xf]  ;;  %v8439_v9 = vrot.slane %v7970_v42, 5 }
 0x398   : > { %v4143_v27 = vsel %vm4123_vm4, %v4110_v59, %v3769_v44  ;;  %v4048_v44 = vsel %vm4024_vm1, %v4015_v2, %v18027_v14  ;;  %v7987_v47 = vshrl.u32 %v7938_v53, 16  ;;  %v18035_v2 = vld [vmem:[#allocation24_spill] sm:$0xff] }
 0x399   : > { %v4081_v57 = vsel %vm4057_vm2, %v4048_v44, %v18028_v45  ;;  %v18036_v45 = vld [vmem:[#allocation38_spill] sm:$0xff] }
 0x39a   : > { %v7088_v39 = vpop.permute.xlu0 %7087  ;;  %v4114_v5 = vsel %vm4090_vm3, %v4081_v57, %v18029_v46  ;;  %v7989_v16 = vrot.slane %v7987_v47, 4 }
 0x39b   : > { %v3849_v52 = vpop.permute.xlu1 %3848  ;;  %v7121_v40 = vsel %vm7103_vm9, %v4207_v48, %v7088_v39  ;;  %v7990_v48 = vshll.u32 %v7938_v53, 16 }
 0x39c   : > { %11924 = vmatprep.mubr.msk.bf16.mxu0 %vm7179_vm8, %v7121_v40  ;;  %v4176_v31 = vsel %vm4156_vm5, %v4143_v27, %v3849_v52  ;;  %v7939_v52 = vld [vmem:[#allocation4 + $0x4] sm:$0xf] }
 0x39d   : > { %v7996_v39 = vshll.u32 %v7939_v52, 16  ;;  %v8000_v0 = vshrl.u32 %v7939_v52, 16  ;;  %v7992_v55 = vrot.slane %v7990_v48, 5 }
 0x39e   : > { %v3771_v34 = vpop.permute.xlu0 %3770 }
 0x39f   : > { %v3929_v63 = vpop.permute.xlu1 %3928  ;;  %v4145_v22 = vsel %vm4123_vm4, %v4112_v29, %v3771_v34  ;;  %v7998_v38 = vrot.slane %v7996_v39, 5  ;;  %v8002_v18 = vrot.slane %v8000_v0, 4  ;;  %v8436_v29 = vrot.slane %v7939_v52, 5 }
 0x3a0   : > { %v4209_v23 = vsel %vm4189_vm6, %v4176_v31, %v3929_v63  ;;  %v18030_v63 = vld [vmem:[#allocation21_spill] sm:$0xff]  ;;  %v7993_v31 = vor.u32 %v7992_v55, %v7989_v16 }
 0x3a1   : > { %v3981_v62 = vsel %vm3942_vm14, %v11231_v10, %v18030_v63  ;;  %v18037_v10 = vld [vmem:[#allocation54_spill] sm:$0xff]  ;;  %v12176_v55 = vld [vmem:[#allocation2 + $0xa8] sm:$0xf] }
 0x3a2   : > { %v3851_v43 = vpop.permute.xlu0 %3850  ;;  %v4017_v27 = vsel %vm3991_vm15, %v3981_v62, %v18031_v56  ;;  %v7994_v41 = vrot.slane %v7993_v31, 4 }
 0x3a3   : > { %v7090_v28 = vpop.permute.xlu1 %7089  ;;  %v4178_v17 = vsel %vm4156_vm5, %v4145_v22, %v3851_v43  ;;  %v8003_v43 = vor.u32 %v8002_v18, %v7998_v38  ;;  %v18041_v18 = vld [vmem:[#allocation37_spill] sm:$0xff] }
 0x3a4   : > { %v7123_v13 = vsel %vm7103_vm9, %v4209_v23, %v7090_v28  ;;  %v8006_v23 = vshll.u32 %v7970_v42, 16  ;;  %v18032_v28 = vld [vmem:[#allocation51_spill] sm:$0xff]  ;;  %v7999_v32 = vsel %vm12619_vm10, %v7994_v41, %v7998_v38  ;;  %v12177_v38 = vld [vmem:[#allocation2 + $0xac] sm:$0xf] }
 0x3a5   : > { %11925 = vmatmul.mubr.msk.bf16.gmra.mxu0 %vm7179_vm8, %v7123_v13  ;;  %v4050_v13 = vsel %vm4024_vm1, %v4017_v27, %v18032_v28  ;;  %v8004_v4 = vrot.slane %v8003_v43, 4  ;;  %v11233_v63 = vcombine.low %v12176_v55, %v12177_v38  ;;  %v18042_v27 = vld [vmem:[#allocation53_spill] sm:$0xff]  ;;  %v12178_v28 = vld [vmem:[#allocation2 + $0xb4] sm:$0xf] }
 0x3a6   : > { %v3931_v61 = vpop.permute.xlu0 %3930  ;;  %v4083_v36 = vsel %vm4057_vm2, %v4050_v13, %v18033_v49  ;;  %v8008_v15 = vrot.slane %v8006_v23, 5  ;;  %v12179_v13 = vld [vmem:[#allocation2 + $0xb8] sm:$0xf]  ;;  %v18043_v49 = vld [vmem:[#allocation69_spill] sm:$0xff] }
 0x3a7   : > { %v3773_v51 = vpop.permute.xlu1 %3772  ;;  %v4211_v50 = vsel %vm4189_vm6, %v4178_v17, %v3931_v61  ;;  %v4116_v6 = vsel %vm4090_vm3, %v4083_v36, %v18034_v58  ;;  %v11234_v43 = vcombine.low %v12178_v28, %v12179_v13 }
 0x3a8   : > { %v4147_v33 = vsel %vm4123_vm4, %v4114_v5, %v3773_v51  ;;  %v12175_v51 = vld [vmem:[#allocation2 + $0xa0] sm:$0xf]  ;;  %v8009_v17 = vsel %vm12619_vm10, %v8004_v4, %v8008_v15 }
 0x3a9   : > { %v11232_v3 = vcombine.low %v12174_v30, %v12175_v51  ;;  %v11673_v1 = vcombine.low %v7999_v32, %v8009_v17  ;;  %v18045_v4 = vld [vmem:[#allocation40_spill] sm:$0xff] }
 0x3aa   : > { %v7092_v21 = vpop.permute.xlu0 %7091  ;;  %v18047_v17 = vld [vmem:[#allocation72_spill] sm:$0xff] }
 0x3ab   : > { %v3853_v7 = vpop.permute.xlu1 %3852  ;;  %v7125_v24 = vsel %vm7103_vm9, %v4211_v50, %v7092_v21  ;;  %v8438_v21 = vrot.slane %v8436_v29, 4  ;;  %9875 = vrot.lane.b32.xlu0 %v11673_v1, %s12217_s28 }
 0x3ac   : > { %11928 = vmatprep.mubr.msk.bf16.mxu0 %vm7179_vm8, %v7125_v24  ;;  %v4180_v12 = vsel %vm4156_vm5, %v4147_v33, %v3853_v7  ;;  %v8370_v7 = vld [vmem:[#allocation4] sm:$0xe]  ;;  %v3984_v24 = vsel %vm3942_vm14, %v11232_v3, %v18035_v2  ;;  %v18039_v33 = vld [vmem:[#allocation85_spill] sm:$0xff] }
 0x3ad   : > { %v11609_v50 = vrot.slane %v8370_v7, 9  ;;  %v4019_v57 = vsel %vm3991_vm15, %v3984_v24, %v18036_v45  ;;  %v8440_v25 = vsel %vm12606_vm7, %v8438_v21, %v8439_v9  ;;  %v18044_v3 = vld [vmem:[#allocation26_spill] sm:$0xff] }
 0x3ae   : > { %v3775_v8 = vpop.permute.xlu0 %3774  ;;  %v4052_v46 = vsel %vm4024_vm1, %v4019_v57, %v18037_v10  ;;  %v3990_v58 = vsel %vm3942_vm14, %v11234_v43, %v18044_v3 }
 0x3af   : > { %v3933_v20 = vpop.permute.xlu1 %3932  ;;  %v4149_v61 = vsel %vm4123_vm4, %v4116_v6, %v3775_v8  ;;  %v8437_v11 = vsel %vm12606_vm7, %v11609_v50, %v8436_v29  ;;  %v18038_v8 = vld [vmem:[#allocation70_spill] sm:$0xff]  ;;  %v18046_v29 = vld [vmem:[#allocation56_spill] sm:$0xff] }
 0x3b0   : > { %v4213_v40 = vsel %vm4189_vm6, %v4180_v12, %v3933_v20  ;;  %v11689_v5 = vcombine.low %v8437_v11, %v8440_v25  ;;  %v4085_v53 = vsel %vm4057_vm2, %v4052_v46, %v18038_v8 }
 0x3b1   : > { %v4118_v47 = vsel %vm4090_vm3, %v4085_v53, %v18039_v33 }
 0x3b2   : > { %v3855_v34 = vpop.permute.xlu0 %3854  ;;  %9955 = vrot.lane.b32.xlu0 %v11689_v5, %s12216_s27 }
 0x3b3   : > { %v7094_v37 = vpop.permute.xlu1 %7093  ;;  %v4182_v22 = vsel %vm4156_vm5, %v4149_v61, %v3855_v34  ;;  %v18040_v34 = vld [vmem:[#allocation23_spill] sm:$0xff]  ;;  %v4023_v61 = vsel %vm3991_vm15, %v3990_v58, %v18045_v4  ;;  %v7830_v58 = vld [vmem:[#allocation4 + $0x14] sm:$0x1] }
 0x3b4   : > { %v7127_v59 = vsel %vm7103_vm9, %v4213_v40, %v7094_v37  ;;  %v3987_v42 = vsel %vm3942_vm14, %v11233_v63, %v18040_v34 }
 0x3b5   : > { %11929 = vmatmul.mubr.msk.bf16.gmra.mxu0 %vm7179_vm8, %v7127_v59  ;;  %v4021_v56 = vsel %vm3991_vm15, %v3987_v42, %v18041_v18 }
 0x3b6   : > { %v3935_v35 = vpop.permute.xlu0 %3934  ;;  %v4054_v31 = vsel %vm4024_vm1, %v4021_v56, %v18042_v27 }
 0x3b7   : > { %v3777_v60 = vpop.permute.xlu1 %3776  ;;  %v4215_v14 = vsel %vm4189_vm6, %v4182_v22, %v3935_v35  ;;  %v4087_v36 = vsel %vm4057_vm2, %v4054_v31, %v18043_v49  ;;  %v4056_v22 = vsel %vm4024_vm1, %v4023_v61, %v18046_v29  ;;  %v7837_v31 = vld [vmem:[#allocation4 + $0x20] sm:$0x1] }
 0x3b8   : > { %v4151_v39 = vsel %vm4123_vm4, %v4118_v47, %v3777_v60  ;;  %v4089_v7 = vsel %vm4057_vm2, %v4056_v22, %v18047_v17 }
 0x3ba   : > { %v7096_v44 = vpop.permute.xlu0 %7095 }
 0x3bb   : > { %v3857_v54 = vpop.permute.xlu1 %3856  ;;  %v7129_v20 = vsel %vm7103_vm9, %v4215_v14, %v7096_v44  ;;  %v16164_v14 = vld [vmem:[%s17730_s3] ss:$0 sm:$0xff] }
 0x3bc   : > { %11932 = vmatprep.mubr.msk.bf16.mxu0 %vm7179_vm8, %v7129_v20  ;;  %v4184_v12 = vsel %vm4156_vm5, %v4151_v39, %v3857_v54 }
 0x3be   : > { %v3683_v48 = vpop.permute.xlu0 %3682 }
 0x3bf   : > { %v3937_v52 = vpop.permute.xlu1 %3936  ;;  %v4120_v41 = vsel %vm4090_vm3, %v4087_v36, %v3683_v48 }
 0x3c0   : > { %v4217_v0 = vsel %vm4189_vm6, %v4184_v12, %v3937_v52 }
 0x3c2   : > { %v3779_v16 = vpop.permute.xlu0 %3778 }
 0x3c3   : > { %v7098_v40 = vpop.permute.xlu1 %7097  ;;  %v4153_v15 = vsel %vm4123_vm4, %v4120_v41, %v3779_v16 }
 0x3c4   : > { %v7131_v37 = vsel %vm7103_vm9, %v4217_v0, %v7098_v40  ;;  %v7833_v40 = vld [vmem:[#allocation4 + $0x18] sm:$0xf] }
 0x3c5   : > { %11933 = vmatmul.mubr.msk.bf16.gmra.mxu0 %vm7179_vm8, %v7131_v37 }
 0x3c6   : > { %v3859_v59 = vpop.permute.xlu0 %3858 }
 0x3c7   : > { %v3685_v62 = vpop.permute.xlu1 %3684  ;;  %v4186_v30 = vsel %vm4156_vm5, %v4153_v15, %v3859_v59 }
 0x3c8   : > { %v4122_v1 = vsel %vm4090_vm3, %v4089_v7, %v3685_v62  ;;  %v7826_v62 = vld [vmem:[#allocation4 + $0xc] sm:$0xf] }
 0x3ca   : > { %v3939_v60 = vpop.permute.xlu0 %3938 }
 0x3cb   : > { %v3781_v23 = vpop.permute.xlu1 %3780  ;;  %v4219_v6 = vsel %vm4189_vm6, %v4186_v30, %v3939_v60 }
 0x3cc   : > { %v4155_v50 = vsel %vm4123_vm4, %v4122_v1, %v3781_v23 }
 0x3ce   : > { %v7100_v35 = vpop.permute.xlu0 %7099 }
 0x3cf   : > { %v3861_v51 = vpop.permute.xlu1 %3860  ;;  %v7133_v32 = vsel %vm7103_vm9, %v4219_v6, %v7100_v35 }
 0x3d0   : > { %11936 = vmatprep.mubr.msk.bf16.mxu0 %vm7179_vm8, %v7133_v32  ;;  %v4188_v21 = vsel %vm4156_vm5, %v4155_v50, %v3861_v51 }
 0x3d3   : > { %v3941_v54 = vpop.permute.xlu1 %3940 }
 0x3d4   : > { %v4221_v9 = vsel %vm4189_vm6, %v4188_v21, %v3941_v54 }
 0x3d7   : > { %v7102_v2 = vpop.permute.xlu1 %7101 }
 0x3d8   : > { %v7135_v24 = vsel %vm7103_vm9, %v4221_v9, %v7102_v2 }
 0x3d9   : > { %11937 = vmatmul.mubr.msk.bf16.gmra.mxu0 %vm7179_vm8, %v7135_v24 }
 0x425   : > { %v11910_v44 = vpop.f32.mrf.mxu0 }
 0x426   : > { %v7259_v45 = vadd.f32 %v11910_v44, %v16164_v14 }
 0x427   : > { %v7250_v57 = vpop.f32.mrf.mxu0 }
 0x428   : > { %v7379_v20 = vmax.f32 %v7259_v45, 0.0  ;;  %v7251_v11 = vadd.f32 %v16164_v14, %v7250_v57 }
 0x429   : > { %v11911_v25 = vpop.f32.mrf.mxu0 }
 0x42a   : > { %v11828_v10 = vpack.c.bf16 %v7379_v20, %v7379_v20  ;;  %v7377_v46 = vmax.f32 %v7251_v11, 0.0  ;;  %v7262_v5 = vadd.f32 %v11911_v25, %v16164_v14 }
 0x42b   : > { %v7253_v8 = vpop.f32.mrf.mxu0 }
 0x42c   : > { %v7523_v53 = vshrl.u32 %v11828_v10, 16  ;;  %v11826_v52 = vpack.c.bf16 %v7377_v46, %v7377_v46  ;;  %v7380_v33 = vmax.f32 %v7262_v5, 0.0  ;;  %v7254_v47 = vadd.f32 %v16164_v14, %v7253_v8 }
 0x42d   : > { %v7526_v39 = vshll.u32 %v11828_v10, 16 }
 0x42e   : > { %v7525_v48 = vrot.slane %v7523_v53, 7  ;;  %v7506_v12 = vshrl.u32 %v11826_v52, 16  ;;  %v11829_v0 = vpack.c.bf16 %v7380_v33, %v7380_v33  ;;  %v7378_v37 = vmax.f32 %v7254_v47, 0.0 }
 0x42f   : > { %v7509_v38 = vshll.u32 %v11826_v52, 16 }
 0x430   : > { %v7528_v16 = vor.u32 %v7526_v39, %v7525_v48  ;;  %v7508_v55 = vrot.slane %v7506_v12, 7  ;;  %v7531_v63 = vshrl.u32 %v11829_v0, 16  ;;  %v11827_v59 = vpack.c.bf16 %v7378_v37, %v7378_v37 }
 0x431   : > { %v7534_v27 = vshll.u32 %v11829_v0, 16  ;;  %v7529_v28 = vrot.slane %v7525_v48, 4  ;;  %v7847_v0 = vld [vmem:[#allocation4 + $0x30] sm:$0xf] }
 0x432   : > { %v7834_v42 = vsel %vm12626_vm11, %v7528_v16, %v7833_v40  ;;  %v7511_v18 = vor.u32 %v7509_v38, %v7508_v55  ;;  %v7533_v56 = vrot.slane %v7531_v63, 7  ;;  %v7514_v23 = vshrl.u32 %v11827_v59, 16 }
 0x433   : > { %7835 = vst [vmem:[#allocation4 + $0x18] sm:$0xf] %v7834_v42  ;;  %v7517_v60 = vshll.u32 %v11827_v59, 16  ;;  %v7512_v35 = vrot.slane %v7508_v55, 4  ;;  %v7840_v42 = vld [vmem:[#allocation4 + $0x24] sm:$0xf] }
 0x434   : > { %v7827_v13 = vsel %vm12626_vm11, %v7511_v18, %v7826_v62  ;;  %v7536_v43 = vor.u32 %v7534_v27, %v7533_v56  ;;  %v7538_v49 = vrot.slane %v7533_v56, 4  ;;  %v7516_v36 = vrot.slane %v7514_v23, 7 }
 0x435   : > { %7828 = vst [vmem:[#allocation4 + $0xc] sm:$0xf] %v7827_v13  ;;  %v11914_v41 = vpop.f32.mrf.mxu0 }
 0x436   : > { %v7537_v30 = vsel %vm12632_vm12, %v7529_v28, %v7536_v43  ;;  %v7838_v3 = vsel %vm12639_vm13, %v7538_v49, %v7837_v31  ;;  %v7275_v6 = vadd.f32 %v11914_v41, %v16164_v14  ;;  %v7519_v4 = vor.u32 %v7517_v60, %v7516_v36  ;;  %v7851_v60 = vld [vmem:[#allocation4 + $0x38] sm:$0x1] }
 0x437   : > { %7836 = vst.msk [vmem:[#allocation4 + $0x1c] sm:$0xf] %vm273_vm0, %v7537_v30  ;;  %7839 = vst [vmem:[#allocation4 + $0x20] sm:$0x1] %v7838_v3  ;;  %v7521_v61 = vrot.slane %v7516_v36, 4  ;;  %v7266_v32 = vpop.f32.mrf.mxu0 }
 0x438   : > { %v7383_v29 = vmax.f32 %v7275_v6, 0.0  ;;  %v7267_v22 = vadd.f32 %v16164_v14, %v7266_v32  ;;  %v7520_v17 = vsel %vm12632_vm12, %v7512_v35, %v7519_v4 }
 0x439   : > { %v7831_v7 = vsel %vm12639_vm13, %v7521_v61, %v7830_v58  ;;  %v11915_v54 = vpop.f32.mrf.mxu0  ;;  %7829 = vst.msk [vmem:[#allocation4 + $0x10] sm:$0xf] %vm273_vm0, %v7520_v17 }
 0x43a   : > { %7832 = vst [vmem:[#allocation4 + $0x14] sm:$0x1] %v7831_v7  ;;  %v11832_v1 = vpack.c.bf16 %v7383_v29, %v7383_v29  ;;  %v7381_v50 = vmax.f32 %v7267_v22, 0.0  ;;  %v7278_v21 = vadd.f32 %v11915_v54, %v16164_v14  ;;  %v16187_v9 = vld [vmem:[#allocation4 + $0x18] sm:$0xf] }
 0x43b   : > { %v16189_v2 = vld [vmem:[#allocation4 + $0x18] sm:$0xf]  ;;  %v7269_v24 = vpop.f32.mrf.mxu0  ;;  %v9204_v44 = vshrl.u32 %v16187_v9, 16  ;;  %v9207_v45 = vshll.u32 %v16187_v9, 16 }
 0x43c   : > { %v8619_v57 = vshrl.u32 %v16189_v2, 16  ;;  %v7557_v20 = vshrl.u32 %v11832_v1, 16  ;;  %v11830_v11 = vpack.c.bf16 %v7381_v50, %v7381_v50  ;;  %v7384_v25 = vmax.f32 %v7278_v21, 0.0  ;;  %v8546_v10 = vld [vmem:[#allocation4 + $0xc] sm:$0xf] }
 0x43d   : > { %v8622_v46 = vshll.u32 %v16189_v2, 16  ;;  %v7560_v5 = vshll.u32 %v11832_v1, 16  ;;  %v7270_v8 = vadd.f32 %v16164_v14, %v7269_v24  ;;  %v8595_v53 = vshrl.u32 %v8546_v10, 16  ;;  %v7940_v33 = vld [vmem:[#allocation4 + $0xc] sm:$0xf] }
 0x43e   : > { %v8598_v52 = vshll.u32 %v8546_v10, 16  ;;  %v7559_v47 = vrot.slane %v7557_v20, 7  ;;  %v7540_v48 = vshrl.u32 %v11830_v11, 16  ;;  %v7543_v39 = vshll.u32 %v11830_v11, 16  ;;  %v7844_v21 = vld [vmem:[#allocation4 + $0x2c] sm:$0x1] }
 0x43f   : > { %v11833_v12 = vpack.c.bf16 %v7384_v25, %v7384_v25  ;;  %v7382_v40 = vmax.f32 %v7270_v8, 0.0  ;;  %v8597_v37 = vrot.slane %v8595_v53, 4  ;;  %v8011_v55 = vshrl.u32 %v7940_v33, 16 }
 0x440   : > { %v8600_v16 = vrot.slane %v8598_v52, 5  ;;  %v7562_v38 = vor.u32 %v7560_v5, %v7559_v47  ;;  %v7563_v63 = vrot.slane %v7559_v47, 4  ;;  %v7542_v62 = vrot.slane %v7540_v48, 7  ;;  %v16196_v27 = vld [vmem:[#allocation4 + $0x10] sm:$0xf] }
 0x441   : > { %v7565_v59 = vshrl.u32 %v11833_v12, 16  ;;  %v7568_v18 = vshll.u32 %v11833_v12, 16  ;;  %v11831_v56 = vpack.c.bf16 %v7382_v40, %v7382_v40  ;;  %v16198_v23 = vrot.slane %v8011_v55, 4  ;;  %v16202_v36 = vld [vmem:[#allocation4 + $0x14] sm:$0x1] }
 0x442   : > { %v8601_v31 = vor.u32 %v8600_v16, %v8597_v37  ;;  %v7848_v28 = vsel %vm12626_vm11, %v7562_v38, %v7847_v0  ;;  %v7545_v13 = vor.u32 %v7543_v39, %v7542_v62  ;;  %v7546_v43 = vrot.slane %v7542_v62, 4  ;;  %v16211_v54 = vld [vmem:[#allocation4 + $0x10] sm:$0xf]  ;;  %v16220_v47 = vld [vmem:[#allocation4 + $0x14] sm:$0x1] }
 0x443   : > { %v7567_v49 = vrot.slane %v7565_v59, 7  ;;  %7849 = vst [vmem:[#allocation4 + $0x30] sm:$0xf] %v7848_v28  ;;  %v7548_v41 = vshrl.u32 %v11831_v56, 16  ;;  %v7551_v30 = vshll.u32 %v11831_v56, 16  ;;  %v8608_v3 = vshrl.u32 %v16196_v27, 16 }
 0x444   : > { %v11705_v58 = vcombine.low %v8546_v10, %v16196_v27  ;;  %v7841_v6 = vsel %vm12626_vm11, %v7545_v13, %v7840_v42  ;;  %v8602_v61 = vrot.slane %v8601_v31, 4  ;;  %v8604_v22 = vshll.u32 %v16196_v27, 16 }
 0x445   : > { %v7570_v35 = vor.u32 %v7568_v18, %v7567_v49  ;;  %v7572_v4 = vrot.slane %v7567_v49, 4  ;;  %7842 = vst [vmem:[#allocation4 + $0x24] sm:$0xf] %v7841_v6  ;;  %v7550_v32 = vrot.slane %v7548_v41, 7  ;;  %v11918_v29 = vpop.f32.mrf.mxu0  ;;  %v8610_v17 = vrot.slane %v8608_v3, 4 }
 0x446   : > { %10051 = vrot.lane.b32.xlu0 %v11705_v58, %s12218_s29  ;;  %v8614_v7 = vshll.u32 %v16202_v36, 16  ;;  %v7291_v24 = vadd.f32 %v11918_v29, %v16164_v14  ;;  %v8014_v20 = vshll.u32 %v7940_v33, 16  ;;  %v8606_v5 = vrot.slane %v8604_v22, 5 }
 0x447   : > { %v7571_v1 = vsel %vm12632_vm12, %v7563_v63, %v7570_v35  ;;  %v7852_v50 = vsel %vm12639_vm13, %v7572_v4, %v7851_v60  ;;  %v7553_v11 = vor.u32 %v7551_v30, %v7550_v32  ;;  %v7555_v25 = vrot.slane %v7550_v32, 4  ;;  %v7282_v10 = vpop.f32.mrf.mxu0  ;;  %v7861_v35 = vld [vmem:[#allocation4 + $0x48] sm:$0xf] }
 0x448   : > { %7850 = vst.msk [vmem:[#allocation4 + $0x34] sm:$0xf] %vm273_vm0, %v7571_v1  ;;  %7853 = vst [vmem:[#allocation4 + $0x38] sm:$0x1] %v7852_v50  ;;  %v8616_v8 = vrot.slane %v8614_v7, 5  ;;  %v7387_v53 = vmax.f32 %v7291_v24, 0.0  ;;  %v7283_v52 = vadd.f32 %v16164_v14, %v7282_v10  ;;  %v8607_v40 = vsel %vm12619_vm10, %v8602_v61, %v8606_v5 }
 0x449   : > { %v8016_v48 = vrot.slane %v8014_v20, 5  ;;  %v8020_v39 = vshll.u32 %v16211_v54, 16  ;;  %v7554_v12 = vsel %vm12632_vm12, %v7546_v43, %v7553_v11  ;;  %v7845_v33 = vsel %vm12639_vm13, %v7555_v25, %v7844_v21  ;;  %v11919_v0 = vpop.f32.mrf.mxu0  ;;  %v8978_v50 = vld [vmem:[#allocation4 + $0xc] sm:$0xe]  ;;  %v7854_v21 = vld [vmem:[#allocation4 + $0x3c] sm:$0xf] }
 0x44a   : > { %v8611_v37 = vor.u32 %v8610_v17, %v8606_v5  ;;  %7843 = vst.msk [vmem:[#allocation4 + $0x28] sm:$0xf] %vm273_vm0, %v7554_v12  ;;  %7846 = vst [vmem:[#allocation4 + $0x2c] sm:$0x1] %v7845_v33  ;;  %v11836_v16 = vpack.c.bf16 %v7387_v53, %v7387_v53  ;;  %v7385_v55 = vmax.f32 %v7283_v52, 0.0  ;;  %v7294_v38 = vadd.f32 %v11919_v0, %v16164_v14 }
 0x44b   : > { %v8017_v63 = vor.u32 %v8016_v48, %v16198_v23  ;;  %v7285_v62 = vpop.f32.mrf.mxu0  ;;  %v8022_v42 = vrot.slane %v8020_v39, 5  ;;  %v8024_v18 = vshrl.u32 %v16211_v54, 16  ;;  %v8030_v56 = vshll.u32 %v16220_v47, 16  ;;  %v8371_v52 = vld [vmem:[#allocation4 + $0xc] sm:$0xe] }
 0x44c   : > { %v8612_v59 = vrot.slane %v8611_v37, 4  ;;  %v7591_v31 = vshrl.u32 %v11836_v16, 16  ;;  %v7594_v28 = vshll.u32 %v11836_v16, 16  ;;  %v11834_v13 = vpack.c.bf16 %v7385_v55, %v7385_v55  ;;  %v7865_v48 = vld [vmem:[#allocation4 + $0x50] sm:$0x1] }
 0x44d   : > { %v7388_v43 = vmax.f32 %v7294_v38, 0.0  ;;  %v7286_v49 = vadd.f32 %v16164_v14, %v7285_v62  ;;  %v8018_v41 = vrot.slane %v8017_v63, 4  ;;  %v8026_v30 = vrot.slane %v8024_v18, 4 }
 0x44e   : > { %v8617_v60 = vsel %vm12619_vm10, %v8612_v59, %v8616_v8  ;;  %v7593_v3 = vrot.slane %v7591_v31, 7  ;;  %v7574_v23 = vshrl.u32 %v11834_v13, 16  ;;  %v7577_v58 = vshll.u32 %v11834_v13, 16  ;;  %v7858_v31 = vld [vmem:[#allocation4 + $0x44] sm:$0x1] }
 0x44f   : > { %v11837_v6 = vpack.c.bf16 %v7388_v43, %v7388_v43  ;;  %v7386_v4 = vmax.f32 %v7286_v49, 0.0  ;;  %v11721_v61 = vcombine.low %v8607_v40, %v8617_v60  ;;  %v8023_v32 = vsel %vm12619_vm10, %v8018_v41, %v8022_v42  ;;  %v16255_v43 = vld [vmem:[#allocation4 + $0x1c] sm:$0xf] }
 0x450   : > { %v8027_v29 = vor.u32 %v8026_v30, %v8022_v42  ;;  %v7596_v22 = vor.u32 %v7594_v28, %v7593_v3  ;;  %v7597_v17 = vrot.slane %v7593_v3, 4  ;;  %v7576_v7 = vrot.slane %v7574_v23, 7  ;;  %v16266_v3 = vld [vmem:[#allocation4 + $0x1c] sm:$0xf] }
 0x451   : > { %v7599_v1 = vshrl.u32 %v11837_v6, 16  ;;  %v7602_v24 = vshll.u32 %v11837_v6, 16  ;;  %v11835_v20 = vpack.c.bf16 %v7386_v4, %v7386_v4  ;;  %10131 = vrot.lane.b32.xlu0 %v11721_v61, %s12219_s30  ;;  %v8032_v25 = vrot.slane %v8030_v56, 5 }
 0x452   : > { %v8028_v11 = vrot.slane %v8027_v29, 4  ;;  %v7862_v10 = vsel %vm12626_vm11, %v7596_v22, %v7861_v35  ;;  %v7579_v5 = vor.u32 %v7577_v58, %v7576_v7  ;;  %v7580_v8 = vrot.slane %v7576_v7, 4  ;;  %v16282_v29 = vld [vmem:[#allocation4 + $0x20] sm:$0x1] }
 0x453   : > { %v7601_v53 = vrot.slane %v7599_v1, 7  ;;  %7863 = vst [vmem:[#allocation4 + $0x48] sm:$0xf] %v7862_v10  ;;  %v7582_v39 = vshrl.u32 %v11835_v20, 16  ;;  %v7585_v12 = vshll.u32 %v11835_v20, 16  ;;  %v11625_v0 = vrot.slane %v8978_v50, 9 }
 0x454   : > { %v8033_v33 = vsel %vm12619_vm10, %v8028_v11, %v8032_v25  ;;  %v7855_v40 = vsel %vm12626_vm11, %v7579_v5, %v7854_v21  ;;  %v9044_v63 = vrot.slane %v16196_v27, 5  ;;  %v9047_v62 = vrot.slane %v16202_v36, 5 }
 0x455   : > { %v7604_v37 = vor.u32 %v7602_v24, %v7601_v53  ;;  %v7606_v16 = vrot.slane %v7601_v53, 4  ;;  %v11674_v55 = vcombine.low %v8023_v32, %v8033_v33  ;;  %7856 = vst [vmem:[#allocation4 + $0x3c] sm:$0xf] %v7855_v40  ;;  %v7584_v38 = vrot.slane %v7582_v39, 7  ;;  %v11922_v42 = vpop.f32.mrf.mxu0  ;;  %v16296_v53 = vld [vmem:[#allocation4 + $0x20] sm:$0x1] }
 0x456   : > { %v11610_v59 = vrot.slane %v8371_v52, 9  ;;  %v8443_v28 = vrot.slane %v16211_v54, 5  ;;  %v8446_v13 = vrot.slane %v16220_v47, 5  ;;  %v9045_v49 = vsel %vm12606_vm7, %v11625_v0, %v9044_v63 }
 0x457   : > { %v7605_v18 = vsel %vm12632_vm12, %v7597_v17, %v7604_v37  ;;  %v7866_v56 = vsel %vm12639_vm13, %v7606_v16, %v7865_v48  ;;  %9877 = vrot.lane.b32.xlu1 %v11674_v55, %s12217_s28  ;;  %v7587_v27 = vor.u32 %v7585_v12, %v7584_v38  ;;  %v7589_v36 = vrot.slane %v7584_v38, 4  ;;  %v7298_v4 = vpop.f32.mrf.mxu0 }
 0x458   : > { %7864 = vst.msk [vmem:[#allocation4 + $0x4c] sm:$0xf] %vm273_vm0, %v7605_v18  ;;  %7867 = vst [vmem:[#allocation4 + $0x50] sm:$0x1] %v7866_v56  ;;  %v9046_v60 = vrot.slane %v9044_v63, 4  ;;  %v8444_v41 = vsel %vm12606_vm7, %v11610_v59, %v8443_v28  ;;  %v8445_v30 = vrot.slane %v8443_v28, 4  ;;  %v11753_v61 = vcombine.low %v16187_v9, %v16255_v43 }
 0x459   : > { %v9206_v54 = vrot.slane %v9204_v44, 4  ;;  %v9209_v47 = vrot.slane %v9207_v45, 5  ;;  %v7588_v23 = vsel %vm12632_vm12, %v7580_v8, %v7587_v27  ;;  %v7859_v58 = vsel %vm12639_vm13, %v7589_v36, %v7858_v31  ;;  %v11923_v25 = vpop.f32.mrf.mxu0  ;;  %v9587_v59 = vld [vmem:[#allocation4 + $0x18] sm:$0xe] }
 0x45a   : > { %v9048_v6 = vsel %vm12606_vm7, %v9046_v60, %v9047_v62  ;;  %v9217_v35 = vshrl.u32 %v16255_v43, 16  ;;  %7857 = vst.msk [vmem:[#allocation4 + $0x40] sm:$0xf] %vm273_vm0, %v7588_v23  ;;  %7860 = vst [vmem:[#allocation4 + $0x44] sm:$0x1] %v7859_v58  ;;  %v8447_v45 = vsel %vm12606_vm7, %v8445_v30, %v8446_v13  ;;  %v8621_v32 = vrot.slane %v8619_v57, 4 }
 0x45b   : > { %v11737_v44 = vcombine.low %v9045_v49, %v9048_v6  ;;  %v11690_v22 = vcombine.low %v8444_v41, %v8447_v45  ;;  %v8624_v17 = vrot.slane %v8622_v46, 5  ;;  %v8632_v7 = vshrl.u32 %v16266_v3, 16  ;;  %v7301_v62 = vpop.f32.mrf.mxu0 }
 0x45c   : > { %v11706_v1 = vcombine.low %v16189_v2, %v16266_v3  ;;  %v7307_v50 = vadd.f32 %v11922_v42, %v16164_v14  ;;  %v7299_v9 = vadd.f32 %v16164_v14, %v7298_v4  ;;  %v9210_v21 = vor.u32 %v9209_v47, %v9206_v54  ;;  %v7875_v54 = vld [vmem:[#allocation4 + $0x60] sm:$0xf]  ;;  %v7868_v47 = vld [vmem:[#allocation4 + $0x54] sm:$0xf] }
 0x45d   : > { %10211 = vrot.lane.b32.xlu0 %v11737_v44, %s12220_s7  ;;  %v9213_v57 = vshll.u32 %v16255_v43, 16  ;;  %9957 = vrot.lane.b32.xlu1 %v11690_v22, %s12216_s27  ;;  %v9219_v24 = vrot.slane %v9217_v35, 4  ;;  %v9223_v20 = vshll.u32 %v16282_v29, 16  ;;  %v8625_v46 = vor.u32 %v8624_v17, %v8621_v32  ;;  %v8979_v32 = vld [vmem:[#allocation4 + $0x18] sm:$0xe] }
 0x45e   : > { %v8628_v11 = vshll.u32 %v16266_v3, 16  ;;  %v7391_v10 = vmax.f32 %v7307_v50, 0.0  ;;  %v7389_v2 = vmax.f32 %v7299_v9, 0.0  ;;  %v9211_v5 = vrot.slane %v9210_v21, 4  ;;  %v9588_v50 = vld [vmem:[#allocation4 + $0x24] sm:$0xe] }
 0x45f   : > { %v9215_v8 = vrot.slane %v9213_v57, 5  ;;  %v9225_v52 = vrot.slane %v9223_v20, 5  ;;  %v8626_v48 = vrot.slane %v8625_v46, 4  ;;  %v8634_v12 = vrot.slane %v8632_v7, 4 }
 0x460   : > { %v8630_v39 = vrot.slane %v8628_v11, 5  ;;  %v11840_v33 = vpack.c.bf16 %v7391_v10, %v7391_v10  ;;  %v11838_v0 = vpack.c.bf16 %v7389_v2, %v7389_v2  ;;  %v8638_v38 = vshll.u32 %v16296_v53, 16  ;;  %v7879_v10 = vld [vmem:[#allocation4 + $0x68] sm:$0x1] }
 0x461   : > { %10307 = vrot.lane.b32.xlu0 %v11753_v61, %s12221_s11  ;;  %v9216_v40 = vsel %vm12619_vm10, %v9211_v5, %v9215_v8  ;;  %v9220_v37 = vor.u32 %v9219_v24, %v9215_v8  ;;  %10053 = vrot.lane.b32.xlu1 %v11706_v1, %s12218_s29  ;;  %v7310_v63 = vadd.f32 %v11923_v25, %v16164_v14  ;;  %v11641_v30 = vrot.slane %v9587_v59, 9  ;;  %v16322_v24 = vld [vmem:[#allocation4 + $0x28] sm:$0xf] }
 0x462   : > { %v8631_v16 = vsel %vm12619_vm10, %v8626_v48, %v8630_v39  ;;  %v8635_v55 = vor.u32 %v8634_v12, %v8630_v39  ;;  %v7625_v42 = vshrl.u32 %v11840_v33, 16  ;;  %v7628_v18 = vshll.u32 %v11840_v33, 16  ;;  %v9188_v33 = vld [vmem:[#allocation4 + $0x2c] sm:$0x1] }
 0x463   : > { %v7608_v56 = vshrl.u32 %v11838_v0, 16  ;;  %v7611_v31 = vshll.u32 %v11838_v0, 16  ;;  %v9221_v28 = vrot.slane %v9220_v37, 4  ;;  %v8640_v27 = vrot.slane %v8638_v38, 5  ;;  %v8372_v38 = vld [vmem:[#allocation4 + $0x18] sm:$0xe] }
 0x464   : > { %v8636_v13 = vrot.slane %v8635_v55, 4  ;;  %v7392_v36 = vmax.f32 %v7310_v63, 0.0  ;;  %v7627_v49 = vrot.slane %v7625_v42, 7  ;;  %v7302_v41 = vadd.f32 %v16164_v14, %v7301_v62  ;;  %v9157_v55 = vld [vmem:[#allocation4 + $0x24] sm:$0xf] }
 0x465   : > { %v16306_v60 = vrot.slane %v7608_v56, 7  ;;  %v9226_v23 = vsel %vm12619_vm10, %v9221_v28, %v9225_v52  ;;  %v9653_v35 = vrot.slane %v16255_v43, 5  ;;  %v9656_v11 = vrot.slane %v16282_v29, 5  ;;  %v7872_v63 = vld [vmem:[#allocation4 + $0x5c] sm:$0x1]  ;;  %v11926_v42 = vpop.f32.mrf.mxu0 }
 0x466   : > { %v8641_v58 = vsel %vm12619_vm10, %v8636_v13, %v8640_v27  ;;  %v11841_v6 = vpack.c.bf16 %v7392_v36, %v7392_v36  ;;  %v7630_v4 = vor.u32 %v7628_v18, %v7627_v49  ;;  %v7631_v44 = vrot.slane %v7627_v49, 4  ;;  %v16343_v13 = vld [vmem:[#allocation4 + $0x1c] sm:$0xf] }
 0x467   : > { %v7613_v45 = vor.u32 %v7611_v31, %v16306_v60  ;;  %v7614_v61 = vrot.slane %v16306_v60, 4  ;;  %v11769_v22 = vcombine.low %v9216_v40, %v9226_v23  ;;  %v11722_v17 = vcombine.low %v8631_v16, %v8641_v58 }
 0x468   : > { %v7633_v7 = vshrl.u32 %v11841_v6, 16  ;;  %v7636_v1 = vshll.u32 %v11841_v6, 16  ;;  %v7876_v9 = vsel %vm12626_vm11, %v7630_v4, %v7875_v54  ;;  %v7390_v57 = vmax.f32 %v7302_v41, 0.0  ;;  %v16347_v41 = vld [vmem:[#allocation4 + $0x20] sm:$0x1] }
 0x469   : > { %v7869_v21 = vsel %vm12626_vm11, %v7613_v45, %v7868_v47  ;;  %v9654_v43 = vsel %vm12606_vm7, %v11641_v30, %v9653_v35  ;;  %7877 = vst [vmem:[#allocation4 + $0x60] sm:$0xf] %v7876_v9  ;;  %10387 = vrot.lane.b32.xlu0 %v11769_v22, %s12222_s12  ;;  %10133 = vrot.lane.b32.xlu1 %v11722_v17, %s12219_s30  ;;  %v9655_v46 = vrot.slane %v9653_v35, 4  ;;  %v11626_v25 = vrot.slane %v8979_v32, 9  ;;  %v7314_v45 = vpop.f32.mrf.mxu0 }
 0x46a   : > { %7870 = vst [vmem:[#allocation4 + $0x54] sm:$0xf] %v7869_v21  ;;  %v7635_v20 = vrot.slane %v7633_v7, 7  ;;  %v11839_v2 = vpack.c.bf16 %v7390_v57, %v7390_v57  ;;  %v9051_v5 = vrot.slane %v16266_v3, 5  ;;  %v9054_v8 = vrot.slane %v16296_v53, 5 }
 0x46b   : > { %v11642_v52 = vrot.slane %v9588_v50, 9  ;;  %v9657_v12 = vsel %vm12606_vm7, %v9655_v46, %v9656_v11  ;;  %v9660_v0 = vrot.slane %v16322_v24, 5  ;;  %v9663_v31 = vrot.slane %v9188_v33, 5 }
 0x46c   : > { %v7638_v48 = vor.u32 %v7636_v1, %v7635_v20  ;;  %v7640_v39 = vrot.slane %v7635_v20, 4  ;;  %v7616_v40 = vshrl.u32 %v11839_v2, 16  ;;  %v7619_v37 = vshll.u32 %v11839_v2, 16  ;;  %v7942_v1 = vld [vmem:[#allocation4 + $0x18] sm:$0xf] }
 0x46d   : > { %v11785_v16 = vcombine.low %v9654_v43, %v9657_v12  ;;  %v9052_v29 = vsel %vm12606_vm7, %v11626_v25, %v9051_v5  ;;  %v9053_v62 = vrot.slane %v9051_v5, 4  ;;  %v9661_v59 = vsel %vm12606_vm7, %v11642_v52, %v9660_v0 }
 0x46e   : > { %v7639_v3 = vsel %vm12632_vm12, %v7631_v44, %v7638_v48  ;;  %v7880_v53 = vsel %vm12639_vm13, %v7640_v39, %v7879_v10  ;;  %v7618_v18 = vrot.slane %v7616_v40, 7  ;;  %v9662_v56 = vrot.slane %v9660_v0, 4  ;;  %v16371_v48 = vld [vmem:[#allocation4 + $0x28] sm:$0xf] }
 0x46f   : > { %7878 = vst.msk [vmem:[#allocation4 + $0x64] sm:$0xf] %vm273_vm0, %v7639_v3  ;;  %7881 = vst [vmem:[#allocation4 + $0x68] sm:$0x1] %v7880_v53  ;;  %10467 = vrot.lane.b32.xlu0 %v11785_v16, %s12223_s13  ;;  %v11754_v28 = vcombine.low %v9157_v55, %v16322_v24  ;;  %v9055_v27 = vsel %vm12606_vm7, %v9053_v62, %v9054_v8  ;;  %v9228_v36 = vshrl.u32 %v9157_v55, 16  ;;  %v9231_v49 = vshll.u32 %v9157_v55, 16  ;;  %v11927_v53 = vpop.f32.mrf.mxu0 }
 0x470   : > { %v11611_v30 = vrot.slane %v8372_v38, 9  ;;  %v7621_v54 = vor.u32 %v7619_v37, %v7618_v18  ;;  %v7623_v47 = vrot.slane %v7618_v18, 4  ;;  %v11738_v23 = vcombine.low %v9052_v29, %v9055_v27  ;;  %v8550_v18 = vld [vmem:[#allocation4 + $0x24] sm:$0xf] }
 0x471   : > { %v9664_v58 = vsel %vm12606_vm7, %v9662_v56, %v9663_v31  ;;  %v9230_v35 = vrot.slane %v9228_v36, 4  ;;  %v9233_v4 = vrot.slane %v9231_v49, 5  ;;  %v8450_v44 = vrot.slane %v16343_v13, 5 }
 0x472   : > { %v11786_v6 = vcombine.low %v9661_v59, %v9664_v58  ;;  %v7622_v32 = vsel %vm12632_vm12, %v7614_v61, %v7621_v54  ;;  %v7873_v22 = vsel %vm12639_vm13, %v7623_v47, %v7872_v63  ;;  %10213 = vrot.lane.b32.xlu1 %v11738_v23, %s12220_s7  ;;  %v8453_v17 = vrot.slane %v16347_v41, 5  ;;  %v7882_v54 = vld [vmem:[#allocation4 + $0x6c] sm:$0xf] }
 0x473   : > { %v9237_v7 = vshll.u32 %v16322_v24, 16  ;;  %7871 = vst.msk [vmem:[#allocation4 + $0x58] sm:$0xf] %vm273_vm0, %v7622_v32  ;;  %7874 = vst [vmem:[#allocation4 + $0x5c] sm:$0x1] %v7873_v22  ;;  %v8451_v60 = vsel %vm12606_vm7, %v11611_v30, %v8450_v44  ;;  %v8452_v50 = vrot.slane %v8450_v44, 4  ;;  %v9234_v61 = vor.u32 %v9233_v4, %v9230_v35  ;;  %v7317_v35 = vpop.f32.mrf.mxu0 }
 0x474   : > { %10469 = vrot.lane.b32.xlu0 %v11786_v6, %s12223_s13  ;;  %v9241_v9 = vshrl.u32 %v16322_v24, 16  ;;  %v9247_v57 = vshll.u32 %v9188_v33, 16  ;;  %v7323_v43 = vadd.f32 %v11926_v42, %v16164_v14  ;;  %v7315_v20 = vadd.f32 %v16164_v14, %v7314_v45  ;;  %v7889_v30 = vld [vmem:[#allocation4 + $0x78] sm:$0xf] }
 0x475   : > { %v9239_v21 = vrot.slane %v9237_v7, 5  ;;  %v8454_v46 = vsel %vm12606_vm7, %v8452_v50, %v8453_v17  ;;  %v9235_v11 = vrot.slane %v9234_v61, 4  ;;  %v8035_v10 = vshrl.u32 %v7942_v1, 16 }
 0x476   : > { %v9243_v25 = vrot.slane %v9241_v9, 4  ;;  %10309 = vrot.lane.b32.xlu1 %v11754_v28, %s12221_s11  ;;  %v11691_v2 = vcombine.low %v8451_v60, %v8454_v46  ;;  %v9249_v5 = vrot.slane %v9247_v57, 5  ;;  %v7395_v8 = vmax.f32 %v7323_v43, 0.0  ;;  %v16395_v60 = vld [vmem:[#allocation4 + $0x2c] sm:$0x1] }
 0x477   : > { %v7393_v52 = vmax.f32 %v7315_v20, 0.0  ;;  %v9240_v24 = vsel %vm12619_vm10, %v9235_v11, %v9239_v21  ;;  %v8037_v12 = vrot.slane %v8035_v10, 4  ;;  %v8038_v33 = vshll.u32 %v7942_v1, 16  ;;  %v7944_v57 = vld [vmem:[#allocation4 + $0x24] sm:$0xf] }
 0x478   : > { %v9244_v39 = vor.u32 %v9243_v25, %v9239_v21  ;;  %9959 = vrot.lane.b32.xlu0 %v11691_v2, %s12216_s27  ;;  %v11844_v0 = vpack.c.bf16 %v7395_v8, %v7395_v8  ;;  %v8044_v37 = vshll.u32 %v16343_v13, 16  ;;  %v8048_v16 = vshrl.u32 %v16343_v13, 16  ;;  %v16406_v25 = vld [vmem:[#allocation4 + $0x28] sm:$0xf] }
 0x479   : > { %v11842_v40 = vpack.c.bf16 %v7393_v52, %v7393_v52  ;;  %v8040_v55 = vrot.slane %v8038_v33, 5  ;;  %v8054_v38 = vshll.u32 %v16347_v41, 16  ;;  %v8656_v3 = vshrl.u32 %v16371_v48, 16 }
 0x47a   : > { %v9245_v29 = vrot.slane %v9244_v39, 4  ;;  %v7659_v63 = vshrl.u32 %v11844_v0, 16  ;;  %v7662_v62 = vshll.u32 %v11844_v0, 16  ;;  %v8046_v28 = vrot.slane %v8044_v37, 5 }
 0x47b   : > { %v7642_v59 = vshrl.u32 %v11842_v40, 16  ;;  %v7645_v42 = vshll.u32 %v11842_v40, 16  ;;  %v8041_v31 = vor.u32 %v8040_v55, %v8037_v12  ;;  %v8050_v27 = vrot.slane %v8048_v16, 4 }
 0x47c   : > { %v9250_v56 = vsel %vm12619_vm10, %v9245_v29, %v9249_v5  ;;  %v16382_v13 = vrot.slane %v7659_v63, 7  ;;  %v8056_v41 = vrot.slane %v8054_v38, 5  ;;  %v11707_v58 = vcombine.low %v8550_v18, %v16371_v48  ;;  %v16411_v29 = vld [vmem:[#allocation4 + $0x2c] sm:$0x1] }
 0x47d   : > { %v11770_v36 = vcombine.low %v9240_v24, %v9250_v56  ;;  %v16384_v49 = vrot.slane %v7642_v59, 7  ;;  %v8042_v47 = vrot.slane %v8041_v31, 4  ;;  %v8051_v23 = vor.u32 %v8050_v27, %v8046_v28  ;;  %v8980_v59 = vld [vmem:[#allocation4 + $0x24] sm:$0xe]  ;;  %v7893_v27 = vld [vmem:[#allocation4 + $0x80] sm:$0x1] }
 0x47e   : > { %v8643_v6 = vshrl.u32 %v8550_v18, 16  ;;  %v7664_v4 = vor.u32 %v7662_v62, %v16382_v13  ;;  %v7665_v44 = vrot.slane %v16382_v13, 4  ;;  %10055 = vrot.lane.b32.xlu0 %v11707_v58, %s12218_s29  ;;  %v8646_v1 = vshll.u32 %v8550_v18, 16 }
 0x47f   : > { %10389 = vrot.lane.b32.xlu1 %v11770_v36, %s12222_s12  ;;  %v7647_v45 = vor.u32 %v7645_v42, %v16384_v49  ;;  %v7648_v32 = vrot.slane %v16384_v49, 4  ;;  %v8047_v22 = vsel %vm12619_vm10, %v8042_v47, %v8046_v28  ;;  %v8052_v17 = vrot.slane %v8051_v23, 4 }
 0x480   : > { %v8645_v7 = vrot.slane %v8643_v6, 4  ;;  %v7890_v50 = vsel %vm12626_vm11, %v7664_v4, %v7889_v30  ;;  %v7326_v9 = vadd.f32 %v11927_v53, %v16164_v14  ;;  %v7318_v21 = vadd.f32 %v16164_v14, %v7317_v35 }
 0x481   : > { %v7883_v61 = vsel %vm12626_vm11, %v7647_v45, %v7882_v54  ;;  %7891 = vst [vmem:[#allocation4 + $0x78] sm:$0xf] %v7890_v50  ;;  %v8057_v43 = vsel %vm12619_vm10, %v8052_v17, %v8056_v41  ;;  %v8648_v20 = vrot.slane %v8646_v1, 5  ;;  %v8652_v46 = vshll.u32 %v16371_v48, 16  ;;  %v7886_v54 = vld [vmem:[#allocation4 + $0x74] sm:$0x1] }
 0x482   : > { %7884 = vst [vmem:[#allocation4 + $0x6c] sm:$0xf] %v7883_v61  ;;  %v8658_v11 = vrot.slane %v8656_v3, 4  ;;  %v11675_v10 = vcombine.low %v8047_v22, %v8057_v43  ;;  %v7396_v2 = vmax.f32 %v7326_v9, 0.0  ;;  %v7394_v5 = vmax.f32 %v7318_v21, 0.0 }
 0x483   : > { %v8662_v8 = vshll.u32 %v16395_v60, 16  ;;  %v8649_v52 = vor.u32 %v8648_v20, %v8645_v7  ;;  %v8654_v24 = vrot.slane %v8652_v46, 5  ;;  %v8059_v14 = vshrl.u32 %v7944_v57, 16  ;;  %v8373_v61 = vld [vmem:[#allocation4 + $0x24] sm:$0xe]  ;;  %v11930_v46 = vpop.f32.mrf.mxu0 }
 0x484   : > { %v8062_v39 = vshll.u32 %v7944_v57, 16  ;;  %9879 = vrot.lane.b32.xlu1 %v11675_v10, %s12217_s28  ;;  %v11845_v12 = vpack.c.bf16 %v7396_v2, %v7396_v2  ;;  %v11843_v33 = vpack.c.bf16 %v7394_v5, %v7394_v5  ;;  %v8068_v40 = vshll.u32 %v16406_v25, 16  ;;  %v9159_v9 = vld [vmem:[#allocation4 + $0x30] sm:$0xf]  ;;  %v16434_v20 = vld [vmem:[#allocation4 + $0x34] sm:$0xf] }
 0x485   : > { %v8664_v0 = vrot.slane %v8662_v8, 5  ;;  %v8650_v37 = vrot.slane %v8649_v52, 4  ;;  %v8659_v16 = vor.u32 %v8658_v11, %v8654_v24  ;;  %v8061_v55 = vrot.slane %v8059_v14, 4  ;;  %v16444_v8 = vld [vmem:[#allocation4 + $0x30] sm:$0xf] }
 0x486   : > { %v8064_v38 = vrot.slane %v8062_v39, 5  ;;  %v7667_v3 = vshrl.u32 %v11845_v12, 16  ;;  %v7670_v53 = vshll.u32 %v11845_v12, 16  ;;  %v7650_v63 = vshrl.u32 %v11843_v33, 16  ;;  %v16449_v12 = vld [vmem:[#allocation4 + $0x34] sm:$0xf] }
 0x487   : > { %v7653_v62 = vshll.u32 %v11843_v33, 16  ;;  %v8655_v42 = vsel %vm12619_vm10, %v8650_v37, %v8654_v24  ;;  %v8660_v18 = vrot.slane %v8659_v16, 4  ;;  %v8070_v31 = vrot.slane %v8068_v40, 5 }
 0x488   : > { %v8065_v56 = vor.u32 %v8064_v38, %v8061_v55  ;;  %v7669_v28 = vrot.slane %v7667_v3, 7  ;;  %v7652_v36 = vrot.slane %v7650_v63, 7  ;;  %v8072_v41 = vshrl.u32 %v16406_v25, 16  ;;  %v7330_v55 = vpop.f32.mrf.mxu0 }
 0x489   : > { %v8078_v30 = vshll.u32 %v16411_v29, 16  ;;  %v8665_v47 = vsel %vm12619_vm10, %v8660_v18, %v8664_v0  ;;  %v11627_v58 = vrot.slane %v8980_v59, 9  ;;  %v9058_v6 = vrot.slane %v16371_v48, 5 }
 0x48a   : > { %v8066_v23 = vrot.slane %v8065_v56, 4  ;;  %v7672_v35 = vor.u32 %v7670_v53, %v7669_v28  ;;  %v7674_v4 = vrot.slane %v7669_v28, 4  ;;  %v7655_v45 = vor.u32 %v7653_v62, %v7652_v36  ;;  %v16462_v62 = vld [vmem:[#allocation4 + $0x38] sm:$0x1]  ;;  %v16469_v56 = vld [vmem:[%s17730_s3] ss:$0 sm:$0xff] }
 0x48b   : > { %v7657_v22 = vrot.slane %v7652_v36, 4  ;;  %v11723_v17 = vcombine.low %v8655_v42, %v8665_v47  ;;  %v8074_v1 = vrot.slane %v8072_v41, 4  ;;  %v8080_v50 = vrot.slane %v8078_v30, 5 }
 0x48c   : > { %v8071_v7 = vsel %vm12619_vm10, %v8066_v23, %v8070_v31  ;;  %v7673_v21 = vsel %vm12632_vm12, %v7665_v44, %v7672_v35  ;;  %v7894_v48 = vsel %vm12639_vm13, %v7674_v4, %v7893_v27  ;;  %v7656_v57 = vsel %vm12632_vm12, %v7648_v32, %v7655_v45  ;;  %v16478_v45 = vld [vmem:[#allocation4 + $0x38] sm:$0x1] }
 0x48d   : > { %v7887_v43 = vsel %vm12639_vm13, %v7657_v22, %v7886_v54  ;;  %7892 = vst.msk [vmem:[#allocation4 + $0x7c] sm:$0xf] %vm273_vm0, %v7673_v21  ;;  %7895 = vst [vmem:[#allocation4 + $0x80] sm:$0x1] %v7894_v48  ;;  %10135 = vrot.lane.b32.xlu0 %v11723_v17, %s12219_s30  ;;  %v8075_v13 = vor.u32 %v8074_v1, %v8070_v31  ;;  %v9059_v49 = vsel %vm12606_vm7, %v11627_v58, %v9058_v6  ;;  %v11931_v58 = vpop.f32.mrf.mxu0 }
 0x48e   : > { %7885 = vst.msk [vmem:[#allocation4 + $0x70] sm:$0xf] %vm273_vm0, %v7656_v57  ;;  %7888 = vst [vmem:[#allocation4 + $0x74] sm:$0x1] %v7887_v43  ;;  %v9060_v44 = vrot.slane %v9058_v6, 4  ;;  %v9061_v32 = vrot.slane %v16395_v60, 5  ;;  %v11755_v16 = vcombine.low %v9159_v9, %v16434_v20  ;;  %v11708_v18 = vcombine.low %v16444_v8, %v16449_v12 }
 0x48f   : > { %v11612_v11 = vrot.slane %v8373_v61, 9  ;;  %v8457_v10 = vrot.slane %v16406_v25, 5  ;;  %v8460_v2 = vrot.slane %v16411_v29, 5  ;;  %v9252_v5 = vshrl.u32 %v9159_v9, 16 }
 0x490   : > { %v8076_v52 = vrot.slane %v8075_v13, 4  ;;  %v9062_v24 = vsel %vm12606_vm7, %v9060_v44, %v9061_v32  ;;  %v9255_v14 = vshll.u32 %v9159_v9, 16  ;;  %v9265_v39 = vshrl.u32 %v16434_v20, 16  ;;  %v7333_v44 = vpop.f32.mrf.mxu0  ;;  %v9589_v32 = vld [vmem:[#allocation4 + $0x30] sm:$0xe] }
 0x491   : > { %v11739_v33 = vcombine.low %v9059_v49, %v9062_v24  ;;  %v8458_v60 = vsel %vm12606_vm7, %v11612_v11, %v8457_v10  ;;  %v8459_v0 = vrot.slane %v8457_v10, 4  ;;  %v9254_v25 = vrot.slane %v9252_v5, 4 }
 0x492   : > { %v8081_v40 = vsel %vm12619_vm10, %v8076_v52, %v8080_v50  ;;  %v9257_v37 = vrot.slane %v9255_v14, 5  ;;  %v8667_v29 = vshrl.u32 %v16444_v8, 16  ;;  %v8670_v53 = vshll.u32 %v16444_v8, 16  ;;  %v7903_v14 = vld [vmem:[#allocation4 + $0x90] sm:$0xf] }
 0x493   : > { %v11676_v38 = vcombine.low %v8071_v7, %v8081_v40  ;;  %10215 = vrot.lane.b32.xlu0 %v11739_v33, %s12220_s7  ;;  %v8461_v3 = vsel %vm12606_vm7, %v8459_v0, %v8460_v2  ;;  %v8680_v63 = vshrl.u32 %v16449_v12, 16  ;;  %v7339_v31 = vadd.f32 %v16469_v56, %v11930_v46 }
 0x494   : > { %v11692_v59 = vcombine.low %v8458_v60, %v8461_v3  ;;  %v8669_v42 = vrot.slane %v8667_v29, 4  ;;  %v8672_v28 = vrot.slane %v8670_v53, 5  ;;  %v7331_v27 = vadd.f32 %v16469_v56, %v7330_v55  ;;  %v8981_v55 = vld [vmem:[#allocation4 + $0x30] sm:$0xe] }
 0x495   : > { %9881 = vrot.lane.b32.xlu1 %v11676_v38, %s12217_s28  ;;  %v9258_v36 = vor.u32 %v9257_v37, %v9254_v25  ;;  %v9261_v41 = vshll.u32 %v16434_v20, 16  ;;  %v7399_v30 = vmax.f32 %v7339_v31, 0.0  ;;  %v9267_v54 = vrot.slane %v9265_v39, 4  ;;  %v7896_v37 = vld [vmem:[#allocation4 + $0x84] sm:$0xf] }
 0x496   : > { %v9271_v47 = vshll.u32 %v16462_v62, 16  ;;  %v8676_v23 = vshll.u32 %v16449_v12, 16  ;;  %v7397_v6 = vmax.f32 %v7331_v27, 0.0  ;;  %v8673_v22 = vor.u32 %v8672_v28, %v8669_v42 }
 0x497   : > { %10311 = vrot.lane.b32.xlu0 %v11755_v16, %s12221_s11  ;;  %v9259_v35 = vrot.slane %v9258_v36, 4  ;;  %v9263_v4 = vrot.slane %v9261_v41, 5  ;;  %v11848_v17 = vpack.c.bf16 %v7399_v30, %v7399_v30  ;;  %v8682_v50 = vrot.slane %v8680_v63, 4  ;;  %v9590_v30 = vld [vmem:[#allocation4 + $0x3c] sm:$0xe] }
 0x498   : > { %v9273_v7 = vrot.slane %v9271_v47, 5  ;;  %v8678_v1 = vrot.slane %v8676_v23, 5  ;;  %v11846_v61 = vpack.c.bf16 %v7397_v6, %v7397_v6  ;;  %v8674_v48 = vrot.slane %v8673_v22, 4  ;;  %v9190_v22 = vld [vmem:[#allocation4 + $0x44] sm:$0x1] }
 0x499   : > { %9961 = vrot.lane.b32.xlu1 %v11692_v59, %s12216_s27  ;;  %v9264_v9 = vsel %vm12619_vm10, %v9259_v35, %v9263_v4  ;;  %v9268_v21 = vor.u32 %v9267_v54, %v9263_v4  ;;  %v7693_v57 = vshrl.u32 %v11848_v17, 16  ;;  %v7696_v43 = vshll.u32 %v11848_v17, 16 }
 0x49a   : > { %v8683_v13 = vor.u32 %v8682_v50, %v8678_v1  ;;  %v8686_v49 = vshll.u32 %v16478_v45, 16  ;;  %v7676_v46 = vshrl.u32 %v11846_v61, 16  ;;  %v7679_v11 = vshll.u32 %v11846_v61, 16 }
 0x49b   : > { %v9269_v10 = vrot.slane %v9268_v21, 4  ;;  %v8679_v2 = vsel %vm12619_vm10, %v8674_v48, %v8678_v1  ;;  %v16486_v5 = vrot.slane %v7693_v57, 7  ;;  %v7342_v24 = vadd.f32 %v16469_v56, %v11931_v58  ;;  %v9161_v21 = vld [vmem:[#allocation4 + $0x3c] sm:$0xf]  ;;  %v11934_v48 = vpop.f32.mrf.mxu0  ;;  %v7907_v57 = vld [vmem:[#allocation4 + $0x98] sm:$0x1] }
 0x49c   : > { %v8684_v8 = vrot.slane %v8683_v13, 4  ;;  %v8688_v52 = vrot.slane %v8686_v49, 5  ;;  %v16490_v39 = vrot.slane %v7676_v46, 7  ;;  %v7334_v60 = vadd.f32 %v16469_v56, %v7333_v44 }
 0x49d   : > { %10057 = vrot.lane.b32.xlu1 %v11708_v18, %s12218_s29  ;;  %v9274_v33 = vsel %vm12619_vm10, %v9269_v10, %v9273_v7  ;;  %v11643_v0 = vrot.slane %v9589_v32, 9  ;;  %v7698_v25 = vor.u32 %v7696_v43, %v16486_v5  ;;  %v7699_v40 = vrot.slane %v16486_v5, 4  ;;  %v8374_v32 = vld [vmem:[#allocation4 + $0x30] sm:$0xe]  ;;  %v7900_v10 = vld [vmem:[#allocation4 + $0x8c] sm:$0x1] }
 0x49e   : > { %v11771_v16 = vcombine.low %v9264_v9, %v9274_v33  ;;  %v8689_v29 = vsel %vm12619_vm10, %v8684_v8, %v8688_v52  ;;  %v7681_v38 = vor.u32 %v7679_v11, %v16490_v39  ;;  %v7682_v3 = vrot.slane %v16490_v39, 4  ;;  %v16526_v8 = vld [vmem:[#allocation4 + $0x34] sm:$0xf] }
 0x49f   : > { %v11724_v53 = vcombine.low %v8679_v2, %v8689_v29  ;;  %v7400_v63 = vmax.f32 %v7342_v24, 0.0  ;;  %v7904_v59 = vsel %vm12626_vm11, %v7698_v25, %v7903_v14  ;;  %v7398_v42 = vmax.f32 %v7334_v60, 0.0  ;;  %v16529_v60 = vld [vmem:[#allocation4 + $0x38] sm:$0x1]  ;;  %v7346_v29 = vpop.f32.mrf.mxu0 }
 0x4a0   : > { %10391 = vrot.lane.b32.xlu0 %v11771_v16, %s12222_s12  ;;  %v9667_v18 = vrot.slane %v16434_v20, 5  ;;  %v9670_v31 = vrot.slane %v16462_v62, 5  ;;  %7905 = vst [vmem:[#allocation4 + $0x90] sm:$0xf] %v7904_v59  ;;  %v7897_v28 = vsel %vm12626_vm11, %v7681_v38, %v7896_v37  ;;  %v11628_v36 = vrot.slane %v8981_v55, 9 }
 0x4a1   : > { %10137 = vrot.lane.b32.xlu1 %v11724_v53, %s12219_s30  ;;  %v11849_v27 = vpack.c.bf16 %v7400_v63, %v7400_v63  ;;  %v9065_v41 = vrot.slane %v16449_v12, 5  ;;  %7898 = vst [vmem:[#allocation4 + $0x84] sm:$0xf] %v7897_v28  ;;  %v11847_v54 = vpack.c.bf16 %v7398_v42, %v7398_v42  ;;  %v9068_v20 = vrot.slane %v16478_v45, 5  ;;  %v16513_v62 = vld [vmem:[#allocation4 + $0x40] sm:$0xf] }
 0x4a2   : > { %v9668_v47 = vsel %vm12606_vm7, %v11643_v0, %v9667_v18  ;;  %v9669_v23 = vrot.slane %v9667_v18, 4  ;;  %v11644_v1 = vrot.slane %v9590_v30, 9  ;;  %v9674_v9 = vrot.slane %v16513_v62, 5 }
 0x4a3   : > { %v7701_v58 = vshrl.u32 %v11849_v27, 16  ;;  %v7704_v6 = vshll.u32 %v11849_v27, 16  ;;  %v9066_v35 = vsel %vm12606_vm7, %v11628_v36, %v9065_v41  ;;  %v9067_v4 = vrot.slane %v9065_v41, 4  ;;  %v7946_v27 = vld [vmem:[#allocation4 + $0x30] sm:$0xf] }
 0x4a4   : > { %v7684_v17 = vshrl.u32 %v11847_v54, 16  ;;  %v7687_v12 = vshll.u32 %v11847_v54, 16  ;;  %v9671_v7 = vsel %vm12606_vm7, %v9669_v23, %v9670_v31  ;;  %v9677_v49 = vrot.slane %v9190_v22, 5 }
 0x4a5   : > { %v7703_v50 = vrot.slane %v7701_v58, 7  ;;  %v11787_v61 = vcombine.low %v9668_v47, %v9671_v7  ;;  %v9069_v45 = vsel %vm12606_vm7, %v9067_v4, %v9068_v20  ;;  %v11756_v44 = vcombine.low %v9161_v21, %v16513_v62 }
 0x4a6   : > { %v7686_v43 = vrot.slane %v7684_v17, 7  ;;  %v11740_v13 = vcombine.low %v9066_v35, %v9069_v45  ;;  %v9675_v2 = vsel %vm12606_vm7, %v11644_v1, %v9674_v9  ;;  %v9676_v5 = vrot.slane %v9674_v9, 4 }
 0x4a7   : > { %v7706_v46 = vor.u32 %v7704_v6, %v7703_v50  ;;  %v7708_v11 = vrot.slane %v7703_v50, 4  ;;  %10471 = vrot.lane.b32.xlu0 %v11787_v61, %s12223_s13  ;;  %v9276_v14 = vshrl.u32 %v9161_v21, 16  ;;  %v9279_v33 = vshll.u32 %v9161_v21, 16 }
 0x4a8   : > { %v7689_v52 = vor.u32 %v7687_v12, %v7686_v43  ;;  %v7691_v24 = vrot.slane %v7686_v43, 4  ;;  %10217 = vrot.lane.b32.xlu1 %v11740_v13, %s12220_s7  ;;  %v9678_v37 = vsel %vm12606_vm7, %v9676_v5, %v9677_v49  ;;  %v11613_v16 = vrot.slane %v8374_v32, 9  ;;  %v11935_v43 = vpop.f32.mrf.mxu0 }
 0x4a9   : > { %v7707_v0 = vsel %vm12632_vm12, %v7699_v40, %v7706_v46  ;;  %v7908_v25 = vsel %vm12639_vm13, %v7708_v11, %v7907_v57  ;;  %v11788_v40 = vcombine.low %v9675_v2, %v9678_v37  ;;  %v9278_v53 = vrot.slane %v9276_v14, 4  ;;  %v16562_v46 = vld [vmem:[#allocation4 + $0x40] sm:$0xf]  ;;  %v7917_v2 = vld [vmem:[#allocation4 + $0xa8] sm:$0xf] }
 0x4aa   : > { %7906 = vst.msk [vmem:[#allocation4 + $0x94] sm:$0xf] %vm273_vm0, %v7707_v0  ;;  %7909 = vst [vmem:[#allocation4 + $0x98] sm:$0x1] %v7908_v25  ;;  %v7690_v55 = vsel %vm12632_vm12, %v7682_v3, %v7689_v52  ;;  %v7901_v38 = vsel %vm12639_vm13, %v7691_v24, %v7900_v10  ;;  %v9281_v63 = vrot.slane %v9279_v33, 5  ;;  %v8464_v59 = vrot.slane %v16526_v8, 5 }
 0x4ab   : > { %7899 = vst.msk [vmem:[#allocation4 + $0x88] sm:$0xf] %vm273_vm0, %v7690_v55  ;;  %7902 = vst [vmem:[#allocation4 + $0x8c] sm:$0x1] %v7901_v38  ;;  %v8467_v42 = vrot.slane %v16529_v60, 5  ;;  %v9285_v18 = vshll.u32 %v16513_v62, 16  ;;  %10473 = vrot.lane.b32.xlu0 %v11788_v40, %s12223_s13  ;;  %v7355_v31 = vadd.f32 %v16469_v56, %v11934_v48  ;;  %v7347_v28 = vadd.f32 %v16469_v56, %v7346_v29  ;;  %v7349_v55 = vpop.f32.mrf.mxu0 }
 0x4ac   : > { %10313 = vrot.lane.b32.xlu1 %v11756_v44, %s12221_s11  ;;  %v9289_v39 = vshrl.u32 %v16513_v62, 16  ;;  %v9295_v3 = vshll.u32 %v9190_v22, 16  ;;  %v8465_v36 = vsel %vm12606_vm7, %v11613_v16, %v8464_v59  ;;  %v8466_v41 = vrot.slane %v8464_v59, 4  ;;  %v7910_v14 = vld [vmem:[#allocation4 + $0x9c] sm:$0xf] }
 0x4ad   : > { %v9282_v30 = vor.u32 %v9281_v63, %v9278_v53  ;;  %v9287_v54 = vrot.slane %v9285_v18, 5  ;;  %v7403_v20 = vmax.f32 %v7355_v31, 0.0  ;;  %v7401_v58 = vmax.f32 %v7347_v28, 0.0  ;;  %v8554_v25 = vld [vmem:[#allocation4 + $0x3c] sm:$0xf] }
 0x4ae   : > { %v9291_v47 = vrot.slane %v9289_v39, 4  ;;  %v9297_v23 = vrot.slane %v9295_v3, 5  ;;  %v8468_v6 = vsel %vm12606_vm7, %v8466_v41, %v8467_v42  ;;  %v8083_v35 = vshrl.u32 %v7946_v27, 16  ;;  %v16579_v63 = vld [vmem:[#allocation4 + $0x44] sm:$0x1] }
 0x4af   : > { %v9283_v62 = vrot.slane %v9282_v30, 4  ;;  %v8086_v4 = vshll.u32 %v7946_v27, 16  ;;  %v11693_v22 = vcombine.low %v8465_v36, %v8468_v6  ;;  %v11852_v12 = vpack.c.bf16 %v7403_v20, %v7403_v20  ;;  %v7948_v36 = vld [vmem:[#allocation4 + $0x3c] sm:$0xf] }
 0x4b0   : > { %v9292_v17 = vor.u32 %v9291_v47, %v9287_v54  ;;  %v11850_v7 = vpack.c.bf16 %v7401_v58, %v7401_v58  ;;  %v8085_v50 = vrot.slane %v8083_v35, 4  ;;  %v8092_v45 = vshll.u32 %v16526_v8, 16 }
 0x4b1   : > { %v9288_v1 = vsel %vm12619_vm10, %v9283_v62, %v9287_v54  ;;  %v8088_v61 = vrot.slane %v8086_v4, 5  ;;  %9963 = vrot.lane.b32.xlu0 %v11693_v22, %s12216_s27  ;;  %v7727_v21 = vshrl.u32 %v11852_v12, 16  ;;  %v7730_v48 = vshll.u32 %v11852_v12, 16  ;;  %v16592_v62 = vld [vmem:[#allocation4 + $0x40] sm:$0xf] }
 0x4b2   : > { %v9293_v9 = vrot.slane %v9292_v17, 4  ;;  %v7710_v57 = vshrl.u32 %v11850_v7, 16  ;;  %v7713_v13 = vshll.u32 %v11850_v7, 16  ;;  %v8094_v44 = vrot.slane %v8092_v45, 5 }
 0x4b3   : > { %v8089_v49 = vor.u32 %v8088_v61, %v8085_v50  ;;  %v8096_v32 = vshrl.u32 %v16526_v8, 16  ;;  %v16566_v10 = vrot.slane %v7727_v21, 7  ;;  %v8102_v52 = vshll.u32 %v16529_v60, 16 }
 0x4b4   : > { %v9298_v11 = vsel %vm12619_vm10, %v9293_v9, %v9297_v23  ;;  %v16568_v5 = vrot.slane %v7710_v57, 7  ;;  %v8704_v29 = vshrl.u32 %v16562_v46, 16  ;;  %v11709_v53 = vcombine.low %v8554_v25, %v16562_v46 }
 0x4b5   : > { %v11772_v24 = vcombine.low %v9288_v1, %v9298_v11  ;;  %v8090_v33 = vrot.slane %v8089_v49, 4  ;;  %v8098_v0 = vrot.slane %v8096_v32, 4  ;;  %v7732_v37 = vor.u32 %v7730_v48, %v16566_v10  ;;  %v16598_v49 = vld [vmem:[#allocation4 + $0x44] sm:$0x1] }
 0x4b6   : > { %v7733_v8 = vrot.slane %v16566_v10, 4  ;;  %v7715_v16 = vor.u32 %v7713_v13, %v16568_v5  ;;  %v8104_v40 = vrot.slane %v8102_v52, 5  ;;  %v8691_v18 = vshrl.u32 %v8554_v25, 16  ;;  %10059 = vrot.lane.b32.xlu0 %v11709_v53, %s12218_s29 }
 0x4b7   : > { %10393 = vrot.lane.b32.xlu1 %v11772_v24, %s12222_s12  ;;  %v8095_v38 = vsel %vm12619_vm10, %v8090_v33, %v8094_v44  ;;  %v8099_v60 = vor.u32 %v8098_v0, %v8094_v44  ;;  %v7918_v59 = vsel %vm12626_vm11, %v7732_v37, %v7917_v2  ;;  %v8694_v39 = vshll.u32 %v8554_v25, 16  ;;  %v8982_v33 = vld [vmem:[#allocation4 + $0x3c] sm:$0xe]  ;;  %v7921_v0 = vld [vmem:[#allocation4 + $0xb0] sm:$0x1] }
 0x4b8   : > { %v7911_v42 = vsel %vm12626_vm11, %v7715_v16, %v7910_v14  ;;  %7919 = vst [vmem:[#allocation4 + $0xa8] sm:$0xf] %v7918_v59  ;;  %v7358_v31 = vadd.f32 %v16469_v56, %v11935_v43  ;;  %v7350_v28 = vadd.f32 %v16469_v56, %v7349_v55  ;;  %v8700_v27 = vshll.u32 %v16562_v46, 16  ;;  %v7914_v25 = vld [vmem:[#allocation4 + $0xa4] sm:$0x1] }
 0x4b9   : > { %7912 = vst [vmem:[#allocation4 + $0x9c] sm:$0xf] %v7911_v42  ;;  %v8100_v3 = vrot.slane %v8099_v60, 4  ;;  %v8693_v41 = vrot.slane %v8691_v18, 4  ;;  %v8696_v30 = vrot.slane %v8694_v39, 5  ;;  %v8706_v54 = vrot.slane %v8704_v29, 4 }
 0x4ba   : > { %v8710_v47 = vshll.u32 %v16579_v63, 16  ;;  %v7404_v20 = vmax.f32 %v7358_v31, 0.0  ;;  %v7402_v58 = vmax.f32 %v7350_v28, 0.0  ;;  %v8702_v6 = vrot.slane %v8700_v27, 5 }
 0x4bb   : > { %v8105_v23 = vsel %vm12619_vm10, %v8100_v3, %v8104_v40  ;;  %v7716_v35 = vrot.slane %v16568_v5, 4  ;;  %v8697_v22 = vor.u32 %v8696_v30, %v8693_v41  ;;  %v8107_v17 = vshrl.u32 %v7948_v36, 16  ;;  %v8375_v3 = vld [vmem:[#allocation4 + $0x3c] sm:$0xe] }
 0x4bc   : > { %v11677_v4 = vcombine.low %v8095_v38, %v8105_v23  ;;  %v11853_v12 = vpack.c.bf16 %v7404_v20, %v7404_v20  ;;  %v11851_v7 = vpack.c.bf16 %v7402_v58, %v7402_v58  ;;  %v8707_v1 = vor.u32 %v8706_v54, %v8702_v6  ;;  %v16621_v54 = vld [vmem:[#allocation4 + $0x4c] sm:$0xf] }
 0x4bd   : > { %v8110_v50 = vshll.u32 %v7948_v36, 16  ;;  %v8698_v61 = vrot.slane %v8697_v22, 4  ;;  %v8109_v45 = vrot.slane %v8107_v17, 4  ;;  %v8116_v9 = vshll.u32 %v16592_v62, 16  ;;  %v9163_v36 = vld [vmem:[#allocation4 + $0x48] sm:$0xf] }
 0x4be   : > { %9883 = vrot.lane.b32.xlu1 %v11677_v4, %s12217_s28  ;;  %v8120_v21 = vshrl.u32 %v16592_v62, 16  ;;  %v7735_v48 = vshrl.u32 %v11853_v12, 16  ;;  %v7738_v57 = vshll.u32 %v11853_v12, 16  ;;  %v7718_v43 = vshrl.u32 %v11851_v7, 16  ;;  %v16630_v12 = vld [vmem:[#allocation4 + $0x4c] sm:$0xf] }
 0x4bf   : > { %v8712_v13 = vrot.slane %v8710_v47, 5  ;;  %v7721_v44 = vshll.u32 %v11851_v7, 16  ;;  %v8708_v32 = vrot.slane %v8707_v1, 4  ;;  %v8112_v11 = vrot.slane %v8110_v50, 5 }
 0x4c0   : > { %v8118_v2 = vrot.slane %v8116_v9, 5  ;;  %v7737_v5 = vrot.slane %v7735_v48, 7  ;;  %v7720_v52 = vrot.slane %v7718_v43, 7  ;;  %v8703_v24 = vsel %vm12619_vm10, %v8698_v61, %v8702_v6  ;;  %v8556_v6 = vld [vmem:[#allocation4 + $0x48] sm:$0xf]  ;;  %v11938_v61 = vpop.f32.mrf.mxu0 }
 0x4c1   : > { %v8122_v14 = vrot.slane %v8120_v21, 4  ;;  %v8713_v37 = vsel %vm12619_vm10, %v8708_v32, %v8712_v13  ;;  %v8113_v16 = vor.u32 %v8112_v11, %v8109_v45  ;;  %v8126_v29 = vshll.u32 %v16598_v49, 16  ;;  %v16635_v45 = vpop.permute.xlu0 %9875 }
 0x4c2   : > { %v9072_v55 = vrot.slane %v16562_v46, 5  ;;  %v7740_v38 = vor.u32 %v7738_v57, %v7737_v5  ;;  %v7742_v60 = vrot.slane %v7737_v5, 4  ;;  %v7723_v40 = vor.u32 %v7721_v44, %v7720_v52  ;;  %v16639_v57 = vld [vmem:[#allocation4 + $0x50] sm:$0x1] }
 0x4c3   : > { %v7725_v53 = vrot.slane %v7720_v52, 4  ;;  %v11725_v59 = vcombine.low %v8703_v24, %v8713_v37  ;;  %v8114_v42 = vrot.slane %v8113_v16, 4  ;;  %v8123_v18 = vor.u32 %v8122_v14, %v8118_v2  ;;  %v16648_v52 = vld [vmem:[#allocation4 + $0x50] sm:$0x1] }
 0x4c4   : > { %v11629_v39 = vrot.slane %v8982_v33, 9  ;;  %v7741_v31 = vsel %vm12632_vm12, %v7733_v8, %v7740_v38  ;;  %v7922_v28 = vsel %vm12639_vm13, %v7742_v60, %v7921_v0  ;;  %v7724_v46 = vsel %vm12632_vm12, %v7716_v35, %v7723_v40 }
 0x4c5   : > { %v7915_v27 = vsel %vm12639_vm13, %v7725_v53, %v7914_v25  ;;  %7920 = vst.msk [vmem:[#allocation4 + $0xac] sm:$0xf] %vm273_vm0, %v7741_v31  ;;  %7923 = vst [vmem:[#allocation4 + $0xb0] sm:$0x1] %v7922_v28  ;;  %10139 = vrot.lane.b32.xlu0 %v11725_v59, %s12219_s30  ;;  %v8119_v10 = vsel %vm12619_vm10, %v8114_v42, %v8118_v2  ;;  %v8124_v8 = vrot.slane %v8123_v18, 4  ;;  %v8128_v41 = vrot.slane %v8126_v29, 5  ;;  %v7362_v25 = vpop.f32.mrf.mxu0  ;;  %v16656_v59 = vpop.permute.xlu0 %9955 }
 0x4c6   : > { %7913 = vst.msk [vmem:[#allocation4 + $0xa0] sm:$0xf] %vm273_vm0, %v7724_v46  ;;  %7916 = vst [vmem:[#allocation4 + $0xa4] sm:$0x1] %v7915_v27  ;;  %v9074_v30 = vrot.slane %v9072_v55, 4  ;;  %v9073_v47 = vsel %vm12606_vm7, %v11629_v39, %v9072_v55  ;;  %v9075_v23 = vrot.slane %v16579_v63, 5  ;;  %v11757_v11 = vcombine.low %v9163_v36, %v16621_v54 }
 0x4c7   : > { %v11614_v20 = vrot.slane %v8375_v3, 9  ;;  %v8471_v58 = vrot.slane %v16592_v62, 5  ;;  %v8129_v35 = vsel %vm12619_vm10, %v8124_v8, %v8128_v41  ;;  %v8474_v4 = vrot.slane %v16598_v49, 5  ;;  %v9591_v31 = vld [vmem:[#allocation4 + $0x48] sm:$0xe] }
 0x4c8   : > { %v9300_v22 = vshrl.u32 %v9163_v36, 16  ;;  %v9303_v17 = vshll.u32 %v9163_v36, 16  ;;  %v11678_v7 = vcombine.low %v8119_v10, %v8129_v35  ;;  %v9076_v1 = vsel %vm12606_vm7, %v9074_v30, %v9075_v23  ;;  %v8983_v10 = vld [vmem:[#allocation4 + $0x48] sm:$0xe]  ;;  %v11939_v23 = vpop.f32.mrf.mxu0 }
 0x4c9   : > { %v8473_v50 = vrot.slane %v8471_v58, 4  ;;  %v9313_v63 = vshrl.u32 %v16621_v54, 16  ;;  %v11741_v62 = vcombine.low %v9073_v47, %v9076_v1  ;;  %v8472_v9 = vsel %vm12606_vm7, %v11614_v20, %v8471_v58 }
 0x4ca   : > { %v9302_v21 = vrot.slane %v9300_v22, 4  ;;  %v9305_v48 = vrot.slane %v9303_v17, 5  ;;  %9885 = vrot.lane.b32.xlu1 %v11678_v7, %s12217_s28  ;;  %v8715_v13 = vshrl.u32 %v8556_v6, 16  ;;  %v8718_v49 = vshll.u32 %v8556_v6, 16 }
 0x4cb   : > { %v8475_v43 = vsel %vm12606_vm7, %v8473_v50, %v8474_v4  ;;  %v8728_v44 = vshrl.u32 %v16630_v12, 16  ;;  %10219 = vrot.lane.b32.xlu0 %v11741_v62, %s12220_s7  ;;  %v9309_v5 = vshll.u32 %v16621_v54, 16  ;;  %v9315_v33 = vrot.slane %v9313_v63, 4 }
 0x4cc   : > { %v11694_v32 = vcombine.low %v8472_v9, %v8475_v43  ;;  %v9306_v2 = vor.u32 %v9305_v48, %v9302_v21  ;;  %v8717_v24 = vrot.slane %v8715_v13, 4  ;;  %v8720_v14 = vrot.slane %v8718_v49, 5  ;;  %v7931_v49 = vld [vmem:[#allocation4 + $0xc0] sm:$0xf] }
 0x4cd   : > { %v9319_v0 = vshll.u32 %v16639_v57, 16  ;;  %v9311_v16 = vrot.slane %v9309_v5, 5  ;;  %v8724_v29 = vshll.u32 %v16630_v12, 16  ;;  %v8730_v55 = vrot.slane %v8728_v44, 4 }
 0x4ce   : > { %v9307_v37 = vrot.slane %v9306_v2, 4  ;;  %9965 = vrot.lane.b32.xlu1 %v11694_v32, %s12216_s27  ;;  %v11710_v38 = vcombine.low %v8556_v6, %v16630_v12  ;;  %v8721_v60 = vor.u32 %v8720_v14, %v8717_v24  ;;  %v8734_v40 = vshll.u32 %v16648_v52, 16  ;;  %v7924_v2 = vld [vmem:[#allocation4 + $0xb4] sm:$0xf] }
 0x4cf   : > { %v7371_v53 = vadd.f32 %v16469_v56, %v11938_v61  ;;  %10315 = vrot.lane.b32.xlu0 %v11757_v11, %s12221_s11  ;;  %v9316_v42 = vor.u32 %v9315_v33, %v9311_v16  ;;  %v9321_v18 = vrot.slane %v9319_v0, 5  ;;  %v8726_v39 = vrot.slane %v8724_v29, 5  ;;  %v16671_v61 = vpop.permute.xlu0 %10051  ;;  %v9592_v29 = vld [vmem:[#allocation4 + $0x54] sm:$0xe] }
 0x4d0   : > { %v7363_v3 = vadd.f32 %v16469_v56, %v7362_v25  ;;  %v9312_v28 = vsel %vm12619_vm10, %v9307_v37, %v9311_v16  ;;  %v8722_v46 = vrot.slane %v8721_v60, 4  ;;  %v8736_v27 = vrot.slane %v8734_v40, 5  ;;  %v9166_v37 = vld [vmem:[#allocation4 + $0x58] sm:$0xf]  ;;  %v16690_v16 = vld [vmem:[#allocation4 + $0x5c] sm:$0x1] }
 0x4d1   : > { %v7407_v36 = vmax.f32 %v7371_v53, 0.0  ;;  %v9317_v8 = vrot.slane %v9316_v42, 4  ;;  %v8731_v41 = vor.u32 %v8730_v55, %v8726_v39  ;;  %v9681_v47 = vrot.slane %v16621_v54, 5  ;;  %v9165_v53 = vld [vmem:[#allocation4 + $0x54] sm:$0xf] }
 0x4d2   : > { %v7405_v30 = vmax.f32 %v7363_v3, 0.0  ;;  %10061 = vrot.lane.b32.xlu1 %v11710_v38, %s12218_s29  ;;  %v8727_v20 = vsel %vm12619_vm10, %v8722_v46, %v8726_v39  ;;  %v11645_v6 = vrot.slane %v9591_v31, 9  ;;  %v9684_v35 = vrot.slane %v16639_v57, 5  ;;  %v7365_v57 = vpop.f32.mrf.mxu0  ;;  %v16702_v3 = vld [vmem:[#allocation4 + $0x4c] sm:$0xf] }
 0x4d3   : > { %v11856_v58 = vpack.c.bf16 %v7407_v36, %v7407_v36  ;;  %v9322_v4 = vsel %vm12619_vm10, %v9317_v8, %v9321_v18  ;;  %v8732_v22 = vrot.slane %v8731_v41, 4  ;;  %v11630_v7 = vrot.slane %v8983_v10, 9  ;;  %v16692_v55 = vpop.permute.xlu0 %10131  ;;  %v8376_v36 = vld [vmem:[#allocation4 + $0x48] sm:$0xe] }
 0x4d4   : > { %v11854_v17 = vpack.c.bf16 %v7405_v30, %v7405_v30  ;;  %v11773_v1 = vcombine.low %v9312_v28, %v9322_v4  ;;  %v9682_v54 = vsel %vm12606_vm7, %v11645_v6, %v9681_v47  ;;  %v9683_v63 = vrot.slane %v9681_v47, 4 }
 0x4d5   : > { %v7761_v50 = vshrl.u32 %v11856_v58, 16  ;;  %v8737_v62 = vsel %vm12619_vm10, %v8732_v22, %v8736_v27  ;;  %v7764_v9 = vshll.u32 %v11856_v58, 16  ;;  %v9079_v48 = vrot.slane %v16630_v12, 5  ;;  %v16711_v58 = vpop.permute.xlu1 %9877  ;;  %v16713_v22 = vld [vmem:[#allocation4 + $0x50] sm:$0x1] }
 0x4d6   : > { %v7744_v21 = vshrl.u32 %v11854_v17, 16  ;;  %10395 = vrot.lane.b32.xlu0 %v11773_v1, %s12222_s12  ;;  %v11726_v43 = vcombine.low %v8727_v20, %v8737_v62  ;;  %v7747_v44 = vshll.u32 %v11854_v17, 16  ;;  %v9685_v32 = vsel %vm12606_vm7, %v9683_v63, %v9684_v35 }
 0x4d7   : > { %v16677_v13 = vrot.slane %v7761_v50, 7  ;;  %v11789_v5 = vcombine.low %v9682_v54, %v9685_v32  ;;  %v9081_v24 = vrot.slane %v9079_v48, 4  ;;  %v9082_v14 = vrot.slane %v16648_v52, 5 }
 0x4d8   : > { %v16681_v11 = vrot.slane %v7744_v21, 7  ;;  %10141 = vrot.lane.b32.xlu1 %v11726_v43, %s12219_s30  ;;  %v9080_v33 = vsel %vm12606_vm7, %v11630_v7, %v9079_v48  ;;  %v7374_v0 = vadd.f32 %v16469_v56, %v11939_v23  ;;  %v7366_v25 = vadd.f32 %v16469_v56, %v7365_v57  ;;  %v16715_v7 = vpop.permute.xlu0 %10211  ;;  %v7928_v43 = vld [vmem:[#allocation4 + $0xbc] sm:$0x1] }
 0x4d9   : > { %v7766_v12 = vor.u32 %v7764_v9, %v16677_v13  ;;  %v7767_v38 = vrot.slane %v16677_v13, 4  ;;  %v9083_v40 = vsel %vm12606_vm7, %v9081_v24, %v9082_v14  ;;  %v11646_v28 = vrot.slane %v9592_v29, 9  ;;  %v7935_v9 = vld [vmem:[#allocation4 + $0xc8] sm:$0x1]  ;;  %v16726_v29 = vpop.permute.xlu1 %9957 }
 0x4da   : > { %v7749_v52 = vor.u32 %v7747_v44, %v16681_v11  ;;  %v7750_v60 = vrot.slane %v16681_v11, 4  ;;  %10475 = vrot.lane.b32.xlu0 %v11789_v5, %s12223_s13  ;;  %v11742_v56 = vcombine.low %v9080_v33, %v9083_v40  ;;  %v7408_v18 = vmax.f32 %v7374_v0, 0.0 }
 0x4db   : > { %v7932_v42 = vsel %vm12626_vm11, %v7766_v12, %v7931_v49  ;;  %v7406_v39 = vmax.f32 %v7366_v25, 0.0  ;;  %v9688_v46 = vrot.slane %v9166_v37, 5  ;;  %v9691_v27 = vrot.slane %v16690_v16, 5  ;;  %v7950_v25 = vld [vmem:[#allocation4 + $0x48] sm:$0xf] }
 0x4dc   : > { %7933 = vst [vmem:[#allocation4 + $0xc0] sm:$0xf] %v7932_v42  ;;  %v7925_v31 = vsel %vm12626_vm11, %v7749_v52, %v7924_v2  ;;  %10221 = vrot.lane.b32.xlu1 %v11742_v56, %s12220_s7  ;;  %v11857_v10 = vpack.c.bf16 %v7408_v18, %v7408_v18  ;;  %v9324_v41 = vshrl.u32 %v9165_v53, 16  ;;  %v9327_v30 = vshll.u32 %v9165_v53, 16  ;;  %v16736_v42 = vld [vmem:[#allocation4 + $0x58] sm:$0xf]  ;;  %v16738_v56 = vpop.permute.xlu0 %10307 }
 0x4dd   : > { %7926 = vst [vmem:[#allocation4 + $0xb4] sm:$0xf] %v7925_v31  ;;  %v11855_v8 = vpack.c.bf16 %v7406_v39, %v7406_v39  ;;  %v9689_v47 = vsel %vm12606_vm7, %v11646_v28, %v9688_v46  ;;  %v9690_v23 = vrot.slane %v9688_v46, 4  ;;  %v11758_v20 = vcombine.low %v9165_v53, %v9166_v37  ;;  %v8558_v46 = vld [vmem:[#allocation4 + $0x54] sm:$0xf] }
 0x4de   : > { %v8478_v34 = vrot.slane %v16702_v3, 5  ;;  %v7769_v6 = vshrl.u32 %v11857_v10, 16  ;;  %v7772_v35 = vshll.u32 %v11857_v10, 16  ;;  %v11615_v17 = vrot.slane %v8376_v36, 9 }
 0x4df   : > { %v7752_v4 = vshrl.u32 %v11855_v8, 16  ;;  %v7755_v1 = vshll.u32 %v11855_v8, 16  ;;  %v9692_v50 = vsel %vm12606_vm7, %v9690_v23, %v9691_v27  ;;  %v9326_v54 = vrot.slane %v9324_v41, 4 }
 0x4e0   : > { %v9329_v63 = vrot.slane %v9327_v30, 5  ;;  %v7771_v62 = vrot.slane %v7769_v6, 7  ;;  %v11790_v48 = vcombine.low %v9689_v47, %v9692_v50  ;;  %10317 = vrot.lane.b32.xlu1 %v11758_v20, %s12221_s11  ;;  %v8480_v57 = vrot.slane %v8478_v34, 4  ;;  %v7952_v6 = vld [vmem:[#allocation4 + $0x54] sm:$0xf] }
 0x4e1   : > { %v7754_v21 = vrot.slane %v7752_v4, 7  ;;  %v8481_v13 = vrot.slane %v16713_v22, 5  ;;  %v9333_v44 = vshll.u32 %v9166_v37, 16  ;;  %v9337_v32 = vshrl.u32 %v9166_v37, 16  ;;  %v16755_v50 = vld [vmem:[#allocation4 + $0x5c] sm:$0x1] }
 0x4e2   : > { %v9330_v49 = vor.u32 %v9329_v63, %v9326_v54  ;;  %v7774_v11 = vor.u32 %v7772_v35, %v7771_v62  ;;  %v7776_v2 = vrot.slane %v7771_v62, 4  ;;  %10477 = vrot.lane.b32.xlu0 %v11790_v48, %s12223_s13  ;;  %v8479_v14 = vsel %vm12606_vm7, %v11615_v17, %v8478_v34  ;;  %v16753_v35 = vpop.permute.xlu1 %10053  ;;  %v16757_v54 = vld [vmem:[#allocation4 + $0x58] sm:$0xf]  ;;  %v16759_v63 = vpop.permute.xlu0 %10387 }
 0x4e3   : > { %v7757_v5 = vor.u32 %v7755_v1, %v7754_v21  ;;  %v7759_v24 = vrot.slane %v7754_v21, 4  ;;  %v8482_v12 = vsel %vm12606_vm7, %v8480_v57, %v8481_v13  ;;  %v9335_v33 = vrot.slane %v9333_v44, 5 }
 0x4e4   : > { %v9339_v0 = vrot.slane %v9337_v32, 4  ;;  %v7775_v37 = vsel %vm12632_vm12, %v7767_v38, %v7774_v11  ;;  %v7936_v52 = vsel %vm12639_vm13, %v7776_v2, %v7935_v9  ;;  %v11695_v38 = vcombine.low %v8479_v14, %v8482_v12  ;;  %v16765_v11 = vld [vmem:[#allocation4 + $0x5c] sm:$0x1] }
 0x4e5   : > { %v7758_v40 = vsel %vm12632_vm12, %v7750_v60, %v7757_v5  ;;  %v7929_v53 = vsel %vm12639_vm13, %v7759_v24, %v7928_v43  ;;  %7934 = vst.msk [vmem:[#allocation4 + $0xc4] sm:$0xf] %vm273_vm0, %v7775_v37  ;;  %7937 = vst [vmem:[#allocation4 + $0xc8] sm:$0x1] %v7936_v52  ;;  %v9331_v18 = vrot.slane %v9330_v49, 4  ;;  %v9343_v31 = vshll.u32 %v16690_v16, 16 }
 0x4e6   : > { %7927 = vst.msk [vmem:[#allocation4 + $0xb8] sm:$0xf] %vm273_vm0, %v7758_v40  ;;  %7930 = vst [vmem:[#allocation4 + $0xbc] sm:$0x1] %v7929_v53  ;;  %v9340_v39 = vor.u32 %v9339_v0, %v9335_v33  ;;  %v8131_v15 = vshrl.u32 %v7950_v25, 16  ;;  %v8134_v60 = vshll.u32 %v7950_v25, 16  ;;  %9967 = vrot.lane.b32.xlu0 %v11695_v38, %s12216_s27  ;;  %v16772_v53 = vpop.permute.xlu1 %10133 }
 0x4e7   : > { %v8140_v51 = vshll.u32 %v16702_v3, 16  ;;  %v8144_v28 = vshrl.u32 %v16702_v3, 16  ;;  %v9345_v36 = vrot.slane %v9343_v31, 5  ;;  %v8150_v10 = vshll.u32 %v16713_v22, 16  ;;  %v8984_v40 = vld [vmem:[#allocation4 + $0x54] sm:$0xe] }
 0x4e8   : > { %v9341_v27 = vrot.slane %v9340_v39, 4  ;;  %v8752_v8 = vshrl.u32 %v16736_v42, 16  ;;  %v8133_v41 = vrot.slane %v8131_v15, 4  ;;  %v8136_v30 = vrot.slane %v8134_v60, 5  ;;  %v12181_v31 = vld [vmem:[#allocation4] sm:$0xf] }
 0x4e9   : > { %v8142_v47 = vrot.slane %v8140_v51, 5  ;;  %v8146_v23 = vrot.slane %v8144_v28, 4  ;;  %v9336_v16 = vsel %vm12619_vm10, %v9331_v18, %v9335_v33  ;;  %v11711_v3 = vcombine.low %v8558_v46, %v16736_v42  ;;  %v12182_v15 = vld [vmem:[#allocation4 + $0x4] sm:$0xf]  ;;  %v16776_v51 = vpop.permute.xlu0 %10467 }
 0x4ea   : > { %v9346_v20 = vsel %vm12619_vm10, %v9341_v27, %v9345_v36  ;;  %v8739_v34 = vshrl.u32 %v8558_v46, 16  ;;  %v8137_v22 = vor.u32 %v8136_v30, %v8133_v41  ;;  %v8742_v1 = vshll.u32 %v8558_v46, 16 }
 0x4eb   : > { %v11774_v4 = vcombine.low %v9336_v16, %v9346_v20  ;;  %v8147_v17 = vor.u32 %v8146_v23, %v8142_v47  ;;  %v8152_v62 = vrot.slane %v8150_v10, 5  ;;  %10063 = vrot.lane.b32.xlu0 %v11711_v3, %s12218_s29  ;;  %v8748_v21 = vshll.u32 %v16736_v42, 16 }
 0x4ec   : > { %v8741_v9 = vrot.slane %v8739_v34, 4  ;;  %v8754_v48 = vrot.slane %v8752_v8, 4  ;;  %v8138_v57 = vrot.slane %v8137_v22, 4  ;;  %v8744_v13 = vrot.slane %v8742_v1, 5  ;;  %v9167_v34 = vld [vmem:[#allocation4 + $0x60] sm:$0xf] }
 0x4ed   : > { %10397 = vrot.lane.b32.xlu1 %v11774_v4, %s12222_s12  ;;  %v8148_v43 = vrot.slane %v8147_v17, 4  ;;  %v8155_v49 = vshrl.u32 %v7952_v6, 16  ;;  %v8750_v44 = vrot.slane %v8748_v21, 5  ;;  %v8758_v32 = vshll.u32 %v16755_v50, 16  ;;  %v16793_v21 = vld [vmem:[#allocation4 + $0x64] sm:$0xf] }
 0x4ee   : > { %v8158_v2 = vshll.u32 %v7952_v6, 16  ;;  %v8164_v5 = vshll.u32 %v16757_v54, 16  ;;  %v8143_v24 = vsel %vm12619_vm10, %v8138_v57, %v8142_v47  ;;  %v8745_v12 = vor.u32 %v8744_v13, %v8741_v9  ;;  %v8377_v47 = vld [vmem:[#allocation4 + $0x54] sm:$0xe]  ;;  %v16800_v13 = vld [vmem:[#allocation4 + $0x60] sm:$0xf] }
 0x4ef   : > { %v8153_v14 = vsel %vm12619_vm10, %v8148_v43, %v8152_v62  ;;  %v8157_v33 = vrot.slane %v8155_v49, 4  ;;  %v8755_v25 = vor.u32 %v8754_v48, %v8750_v44  ;;  %v8168_v18 = vshrl.u32 %v16757_v54, 16  ;;  %v16802_v49 = vpop.permute.xlu0 %10469 }
 0x4f0   : > { %v11679_v0 = vcombine.low %v8143_v24, %v8153_v14  ;;  %v8160_v37 = vrot.slane %v8158_v2, 5  ;;  %v8166_v52 = vrot.slane %v8164_v5, 5  ;;  %v8746_v38 = vrot.slane %v8745_v12, 4  ;;  %v16808_v2 = vld [vmem:[#allocation4 + $0x64] sm:$0xf] }
 0x4f1   : > { %v8174_v39 = vshll.u32 %v16765_v11, 16  ;;  %v11657_v60 = vcombine.low %v12181_v31, %v12182_v15  ;;  %v8756_v28 = vrot.slane %v8755_v25, 4  ;;  %v8760_v46 = vrot.slane %v8758_v32, 5 }
 0x4f2   : > { %9887 = vrot.lane.b32.xlu1 %v11679_v0, %s12217_s28  ;;  %v8161_v27 = vor.u32 %v8160_v37, %v8157_v33  ;;  %v9086_v36 = vrot.slane %v16736_v42, 5  ;;  %v8751_v10 = vsel %vm12619_vm10, %v8746_v38, %v8750_v44  ;;  %v8170_v8 = vrot.slane %v8168_v18, 4 }
 0x4f3   : > { %v8176_v41 = vrot.slane %v8174_v39, 5  ;;  %v11631_v30 = vrot.slane %v8984_v40, 9  ;;  %v8761_v23 = vsel %vm12619_vm10, %v8756_v28, %v8760_v46  ;;  %v10501_v20 = vsel %vm3942_vm14, %v11657_v60, %v16635_v45  ;;  %v16795_v45 = vpop.permute.xlu1 %10213  ;;  %v8585_v39 = vld [vmem:[#allocation4 + $0x68] sm:$0x1] }
 0x4f4   : > { %v8162_v16 = vrot.slane %v8161_v27, 4  ;;  %v9088_v3 = vrot.slane %v9086_v36, 4  ;;  %v11727_v6 = vcombine.low %v8751_v10, %v8761_v23  ;;  %v8171_v4 = vor.u32 %v8170_v8, %v8166_v52 }
 0x4f5   : > { %v9087_v42 = vsel %vm12606_vm7, %v11631_v30, %v9086_v36  ;;  %v9089_v22 = vrot.slane %v16755_v50, 5  ;;  %v11616_v1 = vrot.slane %v8377_v47, 9  ;;  %v8485_v62 = vrot.slane %v16757_v54, 5  ;;  %v16827_v30 = vpop.permute.xlu0 %9959 }
 0x4f6   : > { %v8167_v17 = vsel %vm12619_vm10, %v8162_v16, %v8166_v52  ;;  %v8488_v9 = vrot.slane %v16765_v11, 5  ;;  %10143 = vrot.lane.b32.xlu0 %v11727_v6, %s12219_s30  ;;  %v8172_v48 = vrot.slane %v8171_v4, 4  ;;  %v9348_v43 = vshrl.u32 %v9167_v34, 16  ;;  %v9193_v52 = vld [vmem:[#allocation4 + $0x68] sm:$0x1] }
 0x4f7   : > { %v9090_v57 = vsel %vm12606_vm7, %v9088_v3, %v9089_v22  ;;  %v9351_v50 = vshll.u32 %v9167_v34, 16  ;;  %v8486_v54 = vsel %vm12606_vm7, %v11616_v1, %v8485_v62  ;;  %v8487_v32 = vrot.slane %v8485_v62, 4  ;;  %v16824_v46 = vpop.permute.xlu1 %10309  ;;  %v8985_v62 = vld [vmem:[#allocation4 + $0x60] sm:$0xe] }
 0x4f8   : > { %v11743_v44 = vcombine.low %v9087_v42, %v9090_v57  ;;  %v10548_v11 = vsel %vm3991_vm15, %v10501_v20, %v16656_v59  ;;  %v8177_v5 = vsel %vm12619_vm10, %v8172_v48, %v8176_v41  ;;  %v9350_v24 = vrot.slane %v9348_v43, 4  ;;  %v9593_v41 = vld [vmem:[#allocation4 + $0x60] sm:$0xe] }
 0x4f9   : > { %v9353_v14 = vrot.slane %v9351_v50, 5  ;;  %v9361_v12 = vshrl.u32 %v16793_v21, 16  ;;  %v11680_v33 = vcombine.low %v8167_v17, %v8177_v5  ;;  %v8489_v0 = vsel %vm12606_vm7, %v8487_v32, %v8488_v9  ;;  %v12183_v5 = vld [vmem:[#allocation4 + $0xc] sm:$0xf] }
 0x4fa   : > { %v8763_v25 = vshrl.u32 %v16800_v13, 16  ;;  %v8766_v37 = vshll.u32 %v16800_v13, 16  ;;  %10223 = vrot.lane.b32.xlu0 %v11743_v44, %s12220_s7  ;;  %v11696_v59 = vcombine.low %v8486_v54, %v8489_v0  ;;  %v11759_v40 = vcombine.low %v9167_v34, %v16793_v21  ;;  %v16847_v0 = vpop.permute.xlu0 %10055 }
 0x4fb   : > { %v8776_v38 = vshrl.u32 %v16808_v2, 16  ;;  %v11712_v18 = vcombine.low %v16800_v13, %v16808_v2  ;;  %9889 = vrot.lane.b32.xlu1 %v11680_v33, %s12217_s28  ;;  %v9354_v60 = vor.u32 %v9353_v14, %v9350_v24  ;;  %v9357_v28 = vshll.u32 %v16793_v21, 16  ;;  %v16841_v44 = vpop.permute.xlu1 %10389  ;;  %v12184_v24 = vld [vmem:[#allocation4 + $0x10] sm:$0xf]  ;;  %v9594_v33 = vld [vmem:[#allocation4 + $0x6c] sm:$0xe] }
 0x4fc   : > { %v8765_v31 = vrot.slane %v8763_v25, 4  ;;  %v8768_v15 = vrot.slane %v8766_v37, 5  ;;  %v9363_v27 = vrot.slane %v9361_v12, 4  ;;  %v9367_v36 = vshll.u32 %v9193_v52, 16  ;;  %v16845_v12 = vld [vmem:[#allocation4 + $0x70] sm:$0xf] }
 0x4fd   : > { %v8772_v10 = vshll.u32 %v16808_v2, 16  ;;  %v8778_v8 = vrot.slane %v8776_v38, 4  ;;  %v9355_v47 = vrot.slane %v9354_v60, 4  ;;  %v9359_v23 = vrot.slane %v9357_v28, 5 }
 0x4fe   : > { %v8769_v16 = vor.u32 %v8768_v15, %v8765_v31  ;;  %v8782_v20 = vshll.u32 %v8585_v39, 16  ;;  %10319 = vrot.lane.b32.xlu0 %v11759_v40, %s12221_s11  ;;  %v10580_v3 = vsel %vm4024_vm1, %v10548_v11, %v16671_v61  ;;  %v9369_v34 = vrot.slane %v9367_v36, 5  ;;  %v9169_v40 = vld [vmem:[#allocation4 + $0x6c] sm:$0xf]  ;;  %v7955_v36 = vld [vmem:[#allocation4 + $0x64] sm:$0xf] }
 0x4ff   : > { %v8774_v6 = vrot.slane %v8772_v10, 5  ;;  %v9695_v4 = vrot.slane %v16793_v21, 5  ;;  %9969 = vrot.lane.b32.xlu1 %v11696_v59, %s12216_s27  ;;  %v9360_v42 = vsel %vm12619_vm10, %v9355_v47, %v9359_v23  ;;  %v9364_v22 = vor.u32 %v9363_v27, %v9359_v23  ;;  %v16852_v59 = vld [vmem:[#allocation4 + $0x74] sm:$0x1]  ;;  %v8378_v23 = vld [vmem:[#allocation4 + $0x60] sm:$0xe] }
 0x500   : > { %v8770_v17 = vrot.slane %v8769_v16, 4  ;;  %v11647_v1 = vrot.slane %v9593_v41, 9  ;;  %v8784_v48 = vrot.slane %v8782_v20, 5  ;;  %v9698_v43 = vrot.slane %v9193_v52, 5 }
 0x501   : > { %v8779_v9 = vor.u32 %v8778_v8, %v8774_v6  ;;  %v9697_v57 = vrot.slane %v9695_v4, 4  ;;  %v9365_v50 = vrot.slane %v9364_v22, 4  ;;  %v9093_v13 = vrot.slane %v16808_v2, 5 }
 0x502   : > { %v8775_v61 = vsel %vm12619_vm10, %v8770_v17, %v8774_v6  ;;  %v9696_v21 = vsel %vm12606_vm7, %v11647_v1, %v9695_v4  ;;  %v11632_v11 = vrot.slane %v8985_v62, 9  ;;  %v11658_v14 = vcombine.low %v12183_v5, %v12184_v24  ;;  %v7978_v6 = vld [vmem:[#allocation4 + $0x68] sm:$0x1]  ;;  %v16871_v4 = vpop.permute.xlu1 %9879  ;;  %v16877_v17 = vpop.permute.xlu0 %10135 }
 0x503   : > { %v8780_v54 = vrot.slane %v8779_v9, 4  ;;  %v9699_v32 = vsel %vm12606_vm7, %v9697_v57, %v9698_v43  ;;  %10065 = vrot.lane.b32.xlu1 %v11712_v18, %s12218_s29  ;;  %v9370_v2 = vsel %vm12619_vm10, %v9365_v50, %v9369_v34  ;;  %v9095_v37 = vrot.slane %v9093_v13, 4  ;;  %v7954_v57 = vld [vmem:[#allocation4 + $0x60] sm:$0xf] }
 0x504   : > { %v11791_v25 = vcombine.low %v9696_v21, %v9699_v32  ;;  %v9096_v52 = vrot.slane %v8585_v39, 5  ;;  %v11775_v38 = vcombine.low %v9360_v42, %v9370_v2  ;;  %v9094_v15 = vsel %vm12606_vm7, %v11632_v11, %v9093_v13 }
 0x505   : > { %v8785_v31 = vsel %vm12619_vm10, %v8780_v54, %v8784_v48  ;;  %v10504_v60 = vsel %vm3942_vm14, %v11658_v14, %v16711_v58  ;;  %v11648_v27 = vrot.slane %v9594_v33, 9  ;;  %v9702_v39 = vrot.slane %v16845_v12, 5 }
 0x506   : > { %v11728_v18 = vcombine.low %v8775_v61, %v8785_v31  ;;  %v9097_v28 = vsel %vm12606_vm7, %v9095_v37, %v9096_v52  ;;  %10399 = vrot.lane.b32.xlu0 %v11775_v38, %s12222_s12  ;;  %v10612_v8 = vsel %vm4057_vm2, %v10580_v3, %v16692_v55  ;;  %v9705_v41 = vrot.slane %v16852_v59, 5  ;;  %v8562_v31 = vld [vmem:[#allocation4 + $0x6c] sm:$0xf] }
 0x507   : > { %v11744_v10 = vcombine.low %v9094_v15, %v9097_v28  ;;  %v9372_v47 = vshrl.u32 %v9169_v40, 16  ;;  %v9703_v58 = vsel %vm12606_vm7, %v11648_v27, %v9702_v39  ;;  %v9704_v16 = vrot.slane %v9702_v39, 4  ;;  %v16896_v37 = vpop.permute.xlu1 %9881  ;;  %v16899_v15 = vpop.permute.xlu0 %10215 }
 0x508   : > { %10145 = vrot.lane.b32.xlu1 %v11728_v18, %s12219_s30  ;;  %v11760_v20 = vcombine.low %v9169_v40, %v16845_v12  ;;  %v9375_v34 = vshll.u32 %v9169_v40, 16  ;;  %v10550_v55 = vsel %vm3991_vm15, %v10504_v60, %v16726_v29  ;;  %v10644_v3 = vsel %vm4090_vm3, %v10612_v8, %v16715_v7 }
 0x509   : > { %v9374_v42 = vrot.slane %v9372_v47, 4  ;;  %v8492_v22 = vrot.slane %v7955_v36, 5  ;;  %v9706_v1 = vsel %vm12606_vm7, %v9704_v16, %v9705_v41  ;;  %v11617_v9 = vrot.slane %v8378_v23, 9 }
 0x50a   : > { %v9377_v62 = vrot.slane %v9375_v34, 5  ;;  %v9381_v48 = vshll.u32 %v16845_v12, 16  ;;  %10479 = vrot.lane.b32.xlu0 %v11791_v25, %s12223_s13  ;;  %v11792_v43 = vcombine.low %v9703_v58, %v9706_v1  ;;  %v8495_v61 = vrot.slane %v7978_v6, 5  ;;  %v16894_v25 = vld [vmem:[#allocation4 + $0x70] sm:$0xf] }
 0x50b   : > { %v8494_v50 = vrot.slane %v8492_v22, 4  ;;  %v9385_v29 = vshrl.u32 %v16845_v12, 16  ;;  %v8493_v7 = vsel %vm12606_vm7, %v11617_v9, %v8492_v22  ;;  %v9391_v54 = vshll.u32 %v16852_v59, 16  ;;  %v16911_v34 = vld [vmem:[#allocation4 + $0x74] sm:$0x1] }
 0x50c   : > { %10225 = vrot.lane.b32.xlu1 %v11744_v10, %s12220_s7  ;;  %v9378_v21 = vor.u32 %v9377_v62, %v9374_v42  ;;  %v9383_v13 = vrot.slane %v9381_v48, 5  ;;  %v10582_v5 = vsel %vm4024_vm1, %v10550_v55, %v16753_v35  ;;  %v8179_v24 = vshrl.u32 %v7954_v57, 16  ;;  %v7957_v1 = vld [vmem:[#allocation4 + $0x70] sm:$0xf]  ;;  %v16913_v62 = vpop.permute.xlu1 %9961 }
 0x50d   : > { %v8496_v32 = vsel %vm12606_vm7, %v8494_v50, %v8495_v61  ;;  %v9387_v11 = vrot.slane %v9385_v29, 4  ;;  %v10676_v12 = vsel %vm4123_vm4, %v10644_v3, %v16738_v56  ;;  %v8182_v2 = vshll.u32 %v7954_v57, 16  ;;  %v16920_v50 = vpop.permute.xlu0 %10311  ;;  %v7979_v29 = vld [vmem:[#allocation4 + $0x74] sm:$0x1] }
 0x50e   : > { %v11697_v14 = vcombine.low %v8493_v7, %v8496_v32  ;;  %v9379_v33 = vrot.slane %v9378_v21, 4  ;;  %10481 = vrot.lane.b32.xlu0 %v11792_v43, %s12223_s13  ;;  %v8181_v59 = vrot.slane %v8179_v24, 4  ;;  %v8188_v40 = vshll.u32 %v7955_v36, 16 }
 0x50f   : > { %v9388_v52 = vor.u32 %v9387_v11, %v9383_v13  ;;  %v8192_v38 = vshrl.u32 %v7955_v36, 16  ;;  %v9393_v56 = vrot.slane %v9391_v54, 5  ;;  %v8184_v60 = vrot.slane %v8182_v2, 5  ;;  %v12084_v11 = vld [vmem:[%s17731_s4 + $0x10] ss:$0 sps:$4 sm:$0x33]  }
 0x510   : > { %10321 = vrot.lane.b32.xlu1 %v11760_v20, %s12221_s11  ;;  %v9384_v35 = vsel %vm12619_vm10, %v9379_v33, %v9383_v13  ;;  %v8198_v18 = vshll.u32 %v7978_v6, 16  ;;  %v8190_v27 = vrot.slane %v8188_v40, 5  ;;  %v8800_v10 = vshrl.u32 %v16894_v25, 16  ;;  %v7956_v6 = vld [vmem:[#allocation4 + $0x6c] sm:$0xf] }
 0x511   : > { %v9389_v28 = vrot.slane %v9388_v52, 4  ;;  %v8194_v39 = vrot.slane %v8192_v38, 4  ;;  %v8185_v8 = vor.u32 %v8184_v60, %v8181_v59  ;;  %v11713_v41 = vcombine.low %v8562_v31, %v16894_v25  ;;  %v8379_v40 = vld [vmem:[#allocation4 + $0x6c] sm:$0xe]  ;;  %v12085_v38 = vld [vmem:[%s17731_s4 + $0x8] sm:$0xff]   ;;  %v16938_v60 = vpop.permute.xlu1 %10057 }
 0x512   : > { %v8787_v36 = vshrl.u32 %v8562_v31, 16  ;;  %v8790_v47 = vshll.u32 %v8562_v31, 16  ;;  %9971 = vrot.lane.b32.xlu0 %v11697_v14, %s12216_s27  ;;  %v8200_v16 = vrot.slane %v8198_v18, 5  ;;  %v10614_v20 = vsel %vm4057_vm2, %v10582_v5, %v16772_v53 }
 0x513   : > { %v9394_v23 = vsel %vm12619_vm10, %v9389_v28, %v9393_v56  ;;  %v8195_v58 = vor.u32 %v8194_v39, %v8190_v27  ;;  %v8186_v55 = vrot.slane %v8185_v8, 4  ;;  %v16917_v48 = vsel %vm4156_vm5, %v10676_v12, %v16759_v63  ;;  %v16942_v8 = vpop.permute.xlu0 %10391 }
 0x514   : > { %v11776_v42 = vcombine.low %v9384_v35, %v9394_v23  ;;  %v8789_v3 = vrot.slane %v8787_v36, 4  ;;  %v8792_v22 = vrot.slane %v8790_v47, 5  ;;  %v8796_v57 = vshll.u32 %v16894_v25, 16 }
 0x515   : > { %v8196_v9 = vrot.slane %v8195_v58, 4  ;;  %v8802_v43 = vrot.slane %v8800_v10, 4  ;;  %v8806_v61 = vshll.u32 %v16911_v34, 16  ;;  %v8203_v7 = vshrl.u32 %v7956_v6, 16  ;;  %v8986_v10 = vld [vmem:[#allocation4 + $0x6c] sm:$0xe] }
 0x516   : > { %10401 = vrot.lane.b32.xlu1 %v11776_v42, %s12222_s12  ;;  %v8793_v53 = vor.u32 %v8792_v22, %v8789_v3  ;;  %v8206_v21 = vshll.u32 %v7956_v6, 16  ;;  %v8191_v13 = vsel %vm12619_vm10, %v8186_v55, %v8190_v27  ;;  %10067 = vrot.lane.b32.xlu0 %v11713_v41, %s12218_s29  ;;  %v8798_v54 = vrot.slane %v8796_v57, 5  ;;  %v16947_v55 = vld [vmem:[#allocation4 + $0x78] sm:$0xf] }
 0x517   : > { %v8201_v63 = vsel %vm12619_vm10, %v8196_v9, %v8200_v16  ;;  %v8212_v32 = vshll.u32 %v7957_v1, 16  ;;  %v8205_v14 = vrot.slane %v8203_v7, 4  ;;  %v8216_v52 = vshrl.u32 %v7957_v1, 16 }
 0x518   : > { %v11681_v5 = vcombine.low %v8191_v13, %v8201_v63  ;;  %v8794_v24 = vrot.slane %v8793_v53, 4  ;;  %v8208_v33 = vrot.slane %v8206_v21, 5  ;;  %v8803_v12 = vor.u32 %v8802_v43, %v8798_v54  ;;  %v16957_v53 = vld [vmem:[#allocation4 + $0x7c] sm:$0xf]  ;;  %v9171_v13 = vld [vmem:[#allocation4 + $0x78] sm:$0xf]  ;;  %v16968_v63 = vpop.permute.xlu1 %10137 }
 0x519   : > { %v8214_v2 = vrot.slane %v8212_v32, 5  ;;  %v8222_v59 = vshll.u32 %v7979_v29, 16  ;;  %v8808_v35 = vrot.slane %v8806_v61, 5  ;;  %vm10830_vm0 = vcmask 1041408  }
 0x51a   : > { %9891 = vrot.lane.b32.xlu1 %v11681_v5, %s12217_s28  ;;  %v8799_v31 = vsel %vm12619_vm10, %v8794_v24, %v8798_v54  ;;  %v8209_v56 = vor.u32 %v8208_v33, %v8205_v14  ;;  %v8804_v18 = vrot.slane %v8803_v12, 4  ;;  %v8218_v28 = vrot.slane %v8216_v52, 4  ;;  %11979 = vmatprep.subr.msk.bf16.mxu1 %vm10830_vm0, %v12084_v11 }
 0x51b   : > { %v10832_v27 = vsel %vm10830_vm0, %v12084_v11, 0  ;;  %v10646_v39 = vsel %vm4090_vm3, %v10614_v20, %v16795_v45  ;;  %v8224_v36 = vrot.slane %v8222_v59, 5  ;;  %v11618_v47 = vrot.slane %v8379_v40, 9  ;;  %v12088_v45 = vld [vmem:[%s17731_s4] sm:$0xff]   ;;  %v16983_v40 = vld [vmem:[#allocation4 + $0x80] sm:$0x1] }
 0x51c   : > { %v8210_v41 = vrot.slane %v8209_v56, 4  ;;  %11941 = vmatpush3.bf16.msra.mxu1 %v10832_v27  ;;  %v8499_v23 = vrot.slane %v7957_v1, 5  ;;  %v8809_v58 = vsel %vm12619_vm10, %v8804_v18, %v8808_v35  ;;  %v8219_v16 = vor.u32 %v8218_v28, %v8214_v2  ;;  %v16992_v56 = vld [vmem:[#allocation4 + $0x80] sm:$0x1] }
 0x51d   : > { %v8502_v6 = vrot.slane %v7979_v29, 5  ;;  %v9100_v42 = vrot.slane %v16894_v25, 5  ;;  %11942 = vmatprep.subr.bf16.mxu1 %v12085_v38  ;;  %v11729_v20 = vcombine.low %v8799_v31, %v8809_v58  ;;  %v11633_v1 = vrot.slane %v8986_v10, 9 }
 0x51e   : > { %v8215_v3 = vsel %vm12619_vm10, %v8210_v41, %v8214_v2  ;;  %v8501_v22 = vrot.slane %v8499_v23, 4  ;;  %v8220_v9 = vrot.slane %v8219_v16, 4  ;;  %v8500_v57 = vsel %vm12606_vm7, %v11618_v47, %v8499_v23  ;;  %v16996_v23 = vpop.permute.xlu1 %10217 }
 0x51f   : > { %v9102_v43 = vrot.slane %v9100_v42, 4  ;;  %v9103_v25 = vrot.slane %v16911_v34, 5  ;;  %10147 = vrot.lane.b32.xlu0 %v11729_v20, %s12219_s30  ;;  %v9101_v29 = vsel %vm12606_vm7, %v11633_v1, %v9100_v42  ;;  %v10740_v7 = vsel %vm4189_vm6, %v16917_v48, %v16776_v51  ;;  %v16978_v51 = vld [vmem:[#allocation4 + $0x7c] sm:$0xf]  ;;  %v16980_v48 = vpop.permute.xlu0 %10471  ;;  %v12186_v1 = vld [vmem:[#allocation4 + $0x18] sm:$0xf] }
 0x520   : > { %v8503_v61 = vsel %vm12606_vm7, %v8501_v22, %v8502_v6  ;;  %11943 = vmatpush3.bf16.msra.mxu1 %v12085_v38  ;;  %v8811_v21 = vshrl.u32 %v16947_v55, 16  ;;  %v8225_v34 = vsel %vm12619_vm10, %v8220_v9, %v8224_v36  ;;  %11946 = vmatprep.mubr.msk.bf16.mxu1 %vm7103_vm9, %v10740_v7  ;;  %v10678_v32 = vsel %vm4123_vm4, %v10646_v39, %v16824_v46  ;;  %v12185_v22 = vld [vmem:[#allocation4 + $0x1c] sm:$0xf] }
 0x521   : > { %v9104_v54 = vsel %vm12606_vm7, %v9102_v43, %v9103_v25  ;;  %v8814_v11 = vshll.u32 %v16947_v55, 16  ;;  %11944 = vmatprep.subr.bf16.mxu1 %v12088_v45  ;;  %v11682_v5 = vcombine.low %v8215_v3, %v8225_v34  ;;  %v8824_v33 = vshrl.u32 %v16957_v53, 16 }
 0x522   : > { %v11745_v24 = vcombine.low %v9101_v29, %v9104_v54  ;;  %v8813_v14 = vrot.slane %v8811_v21, 4  ;;  %v11698_v12 = vcombine.low %v8500_v57, %v8503_v61  ;;  %v9396_v52 = vshrl.u32 %v9171_v13, 16  ;;  %v8987_v57 = vld [vmem:[#allocation4 + $0x78] sm:$0xe] }
 0x523   : > { %v8816_v2 = vrot.slane %v8814_v11, 5  ;;  %v9399_v59 = vshll.u32 %v9171_v13, 16  ;;  %9893 = vrot.lane.b32.xlu1 %v11682_v5, %s12217_s28  ;;  %v9409_v46 = vshrl.u32 %v16978_v51, 16  ;;  %v11761_v38 = vcombine.low %v9171_v13, %v16978_v51  ;;  %v17001_v42 = vpop.permute.xlu0 %10473  ;;  %v9595_v29 = vld [vmem:[#allocation4 + $0x78] sm:$0xe] }
 0x524   : > { %10227 = vrot.lane.b32.xlu0 %v11745_v24, %s12220_s7  ;;  %v10710_v31 = vsel %vm4156_vm5, %v10678_v32, %v16841_v44  ;;  %v8820_v35 = vshll.u32 %v16957_v53, 16  ;;  %v9398_v18 = vrot.slane %v9396_v52, 4  ;;  %11945 = vmatpush3.bf16.msra.mxu1 %v12088_v45  ;;  %v8826_v39 = vrot.slane %v8824_v33, 4  ;;  %v17025_v33 = vpop.permute.xlu1 %10313 }
 0x525   : > { %v9401_v28 = vrot.slane %v9399_v59, 5  ;;  %v8817_v27 = vor.u32 %v8816_v2, %v8813_v14  ;;  %v8830_v41 = vshll.u32 %v16983_v40, 16  ;;  %v9405_v36 = vshll.u32 %v16978_v51, 16  ;;  %v9173_v59 = vld [vmem:[#allocation4 + $0x84] sm:$0xf] }
 0x526   : > { %v8822_v10 = vrot.slane %v8820_v35, 5  ;;  %v9411_v47 = vrot.slane %v9409_v46, 4  ;;  %v9415_v44 = vshll.u32 %v16992_v56, 16  ;;  %v10742_v6 = vsel %vm4189_vm6, %v10710_v31, %v16802_v49  ;;  %v12188_v31 = vld [vmem:[#allocation4 + $0x28] sm:$0xf] }
 0x527   : > { %v8818_v58 = vrot.slane %v8817_v27, 4  ;;  %v9402_v16 = vor.u32 %v9401_v28, %v9398_v18  ;;  %9973 = vrot.lane.b32.xlu1 %v11698_v12, %s12216_s27  ;;  %v11714_v45 = vcombine.low %v16947_v55, %v16957_v53  ;;  %v9407_v3 = vrot.slane %v9405_v36, 5  ;;  %11947 = vmatmul.mubr.msk.bf16.vlgmr.msra.gmra.mxu1 %vm7103_vm9, %v10742_v6  ;;  %v9596_v28 = vld [vmem:[#allocation4 + $0x84] sm:$0xe] }
 0x528   : > { %10323 = vrot.lane.b32.xlu0 %v11761_v38, %s12221_s11  ;;  %v8827_v20 = vor.u32 %v8826_v39, %v8822_v10  ;;  %v11659_v9 = vcombine.low %v12186_v1, %v12185_v22  ;;  %v8832_v25 = vrot.slane %v8830_v41, 5  ;;  %v9417_v61 = vrot.slane %v9415_v44, 5  ;;  %v12187_v38 = vld [vmem:[#allocation4 + $0x24] sm:$0xf]  ;;  %v9196_v41 = vld [vmem:[#allocation4 + $0x8c] sm:$0x1] }
 0x529   : > { %v8823_v43 = vsel %vm12619_vm10, %v8818_v58, %v8822_v10  ;;  %v9403_v49 = vrot.slane %v9402_v16, 4  ;;  %v9412_v21 = vor.u32 %v9411_v47, %v9407_v3  ;;  %v9107_v13 = vrot.slane %v16957_v53, 5  ;;  %v17023_v53 = vld [vmem:[#allocation4 + $0x88] sm:$0xf]  ;;  %v7959_v1 = vld [vmem:[#allocation4 + $0x7c] sm:$0xf] }
 0x52a   : > { %v8828_v7 = vrot.slane %v8827_v20, 4  ;;  %v10507_v55 = vsel %vm3942_vm14, %v11659_v9, %v16871_v4  ;;  %v11634_v32 = vrot.slane %v8987_v57, 9  ;;  %v9110_v11 = vrot.slane %v16983_v40, 5  ;;  %v17030_v40 = vpop.permute.xlu0 %9963  ;;  %v8380_v9 = vld [vmem:[#allocation4 + $0x78] sm:$0xe]  ;;  %v17050_v57 = vpop.permute.xlu1 %10393 }
 0x52b   : > { %v9408_v34 = vsel %vm12619_vm10, %v9403_v49, %v9407_v3  ;;  %v10552_v54 = vsel %vm3991_vm15, %v10507_v55, %v16827_v30  ;;  %10069 = vrot.lane.b32.xlu1 %v11714_v45, %s12218_s29  ;;  %v9413_v24 = vrot.slane %v9412_v21, 4  ;;  %v11649_v14 = vrot.slane %v9595_v29, 9 }
 0x52c   : > { %v8833_v5 = vsel %vm12619_vm10, %v8828_v7, %v8832_v25  ;;  %v10584_v4 = vsel %vm4024_vm1, %v10552_v54, %v16847_v0  ;;  %v9108_v30 = vsel %vm12606_vm7, %v11634_v32, %v9107_v13  ;;  %v9109_v2 = vrot.slane %v9107_v13, 4 }
 0x52d   : > { %v11730_v12 = vcombine.low %v8823_v43, %v8833_v5  ;;  %v9709_v52 = vrot.slane %v16978_v51, 5  ;;  %v9418_v46 = vsel %vm12619_vm10, %v9413_v24, %v9417_v61  ;;  %v9712_v0 = vrot.slane %v16992_v56, 5  ;;  %v7980_v61 = vld [vmem:[#allocation4 + $0x80] sm:$0x1] }
 0x52e   : > { %v11660_v35 = vcombine.low %v12187_v38, %v12188_v31  ;;  %v10616_v18 = vsel %vm4057_vm2, %v10584_v4, %v16877_v17  ;;  %v11777_v27 = vcombine.low %v9408_v34, %v9418_v46  ;;  %v9111_v39 = vsel %vm12606_vm7, %v9109_v2, %v9110_v11  ;;  %v17056_v29 = vpop.permute.xlu0 %10059  ;;  %v7958_v11 = vld [vmem:[#allocation4 + $0x78] sm:$0xf] }
 0x52f   : > { %v9711_v51 = vrot.slane %v9709_v52, 4  ;;  %v9433_v10 = vshrl.u32 %v17023_v53, 16  ;;  %10149 = vrot.lane.b32.xlu1 %v11730_v12, %s12219_s30  ;;  %v11746_v36 = vcombine.low %v9108_v30, %v9111_v39  ;;  %v9710_v56 = vsel %vm12606_vm7, %v11649_v14, %v9709_v52 }
 0x530   : > { %v10510_v47 = vsel %vm3942_vm14, %v11660_v35, %v16896_v37  ;;  %v9420_v58 = vshrl.u32 %v9173_v59, 16  ;;  %10403 = vrot.lane.b32.xlu0 %v11777_v27, %s12222_s12  ;;  %v9423_v16 = vshll.u32 %v9173_v59, 16  ;;  %v11650_v44 = vrot.slane %v9596_v28, 9  ;;  %v17070_v38 = vpop.permute.xlu1 %9883 }
 0x531   : > { %v9713_v17 = vsel %vm12606_vm7, %v9711_v51, %v9712_v0  ;;  %v9716_v6 = vrot.slane %v17023_v53, 5  ;;  %v11762_v20 = vcombine.low %v9173_v59, %v17023_v53  ;;  %v9719_v22 = vrot.slane %v9196_v41, 5  ;;  %v8566_v0 = vld [vmem:[#allocation4 + $0x84] sm:$0xf] }
 0x532   : > { %v11793_v45 = vcombine.low %v9710_v56, %v9713_v17  ;;  %v9422_v3 = vrot.slane %v9420_v58, 4  ;;  %v9425_v37 = vrot.slane %v9423_v16, 5  ;;  %v10554_v49 = vsel %vm3991_vm15, %v10510_v47, %v16913_v62 }
 0x533   : > { %v9717_v43 = vsel %vm12606_vm7, %v11650_v44, %v9716_v6  ;;  %v9718_v25 = vrot.slane %v9716_v6, 4  ;;  %10229 = vrot.lane.b32.xlu1 %v11746_v36, %s12220_s7  ;;  %v10648_v7 = vsel %vm4090_vm3, %v10616_v18, %v16899_v15  ;;  %v9429_v21 = vshll.u32 %v17023_v53, 16  ;;  %v7960_v6 = vld [vmem:[#allocation4 + $0x84] sm:$0xf] }
 0x534   : > { %v9435_v55 = vrot.slane %v9433_v10, 4  ;;  %v9439_v13 = vshll.u32 %v9196_v41, 16  ;;  %10483 = vrot.lane.b32.xlu0 %v11793_v45, %s12223_s13  ;;  %v9426_v54 = vor.u32 %v9425_v37, %v9422_v3  ;;  %v11619_v32 = vrot.slane %v8380_v9, 9  ;;  %v17081_v41 = vld [vmem:[#allocation4 + $0x88] sm:$0xf] }
 0x535   : > { %v9720_v34 = vsel %vm12606_vm7, %v9718_v25, %v9719_v22  ;;  %v8506_v62 = vrot.slane %v7959_v1, 5  ;;  %v9431_v24 = vrot.slane %v9429_v21, 5  ;;  %v8509_v14 = vrot.slane %v7980_v61, 5  ;;  %v17085_v45 = vld [vmem:[#allocation4 + $0x88] sm:$0xf] }
 0x536   : > { %v11794_v5 = vcombine.low %v9717_v43, %v9720_v34  ;;  %v9441_v4 = vrot.slane %v9439_v13, 5  ;;  %v9427_v12 = vrot.slane %v9426_v54, 4  ;;  %v10586_v30 = vsel %vm4024_vm1, %v10554_v49, %v16938_v60  ;;  %v17089_v9 = vld [vmem:[#allocation4 + $0x8c] sm:$0x1] }
 0x537   : > { %v8507_v15 = vsel %vm12606_vm7, %v11619_v32, %v8506_v62  ;;  %v8508_v53 = vrot.slane %v8506_v62, 4  ;;  %10325 = vrot.lane.b32.xlu1 %v11762_v20, %s12221_s11  ;;  %v9436_v2 = vor.u32 %v9435_v55, %v9431_v24  ;;  %v8227_v52 = vshrl.u32 %v7958_v11, 16  ;;  %v17077_v60 = vpop.permute.xlu0 %10139 }
 0x538   : > { %v8230_v59 = vshll.u32 %v7958_v11, 16  ;;  %v8236_v46 = vshll.u32 %v7959_v1, 16  ;;  %10485 = vrot.lane.b32.xlu0 %v11794_v5, %s12223_s13  ;;  %v10680_v35 = vsel %vm4123_vm4, %v10648_v7, %v16920_v50  ;;  %v8240_v18 = vshrl.u32 %v7959_v1, 16  ;;  %v8588_v11 = vld [vmem:[#allocation4 + $0x8c] sm:$0x1] }
 0x539   : > { %v8510_v31 = vsel %vm12606_vm7, %v8508_v53, %v8509_v14  ;;  %v8246_v28 = vshll.u32 %v7980_v61, 16  ;;  %v9432_v27 = vsel %vm12619_vm10, %v9427_v12, %v9431_v24  ;;  %v9437_v39 = vrot.slane %v9436_v2, 4  ;;  %v8381_v2 = vld [vmem:[#allocation4 + $0x84] sm:$0xe] }
 0x53a   : > { %v8229_v51 = vrot.slane %v8227_v52, 4  ;;  %v8232_v10 = vrot.slane %v8230_v59, 5  ;;  %v11699_v36 = vcombine.low %v8507_v15, %v8510_v31  ;;  %v8238_v56 = vrot.slane %v8236_v46, 5 }
 0x53b   : > { %v8242_v47 = vrot.slane %v8240_v18, 4  ;;  %v8835_v58 = vshrl.u32 %v8566_v0, 16  ;;  %v9442_v17 = vsel %vm12619_vm10, %v9437_v39, %v9441_v4  ;;  %v8248_v16 = vrot.slane %v8246_v28, 5  ;;  %v8988_v39 = vld [vmem:[#allocation4 + $0x84] sm:$0xe] }
 0x53c   : > { %v8233_v50 = vor.u32 %v8232_v10, %v8229_v51  ;;  %v8838_v44 = vshll.u32 %v8566_v0, 16  ;;  %v11778_v20 = vcombine.low %v9432_v27, %v9442_v17  ;;  %9975 = vrot.lane.b32.xlu0 %v11699_v36, %s12216_s27  ;;  %v8848_v1 = vshrl.u32 %v17081_v41, 16  ;;  %v17094_v61 = vpop.permute.xlu1 %9885 }
 0x53d   : > { %v8243_v3 = vor.u32 %v8242_v47, %v8238_v56  ;;  %v8837_v22 = vrot.slane %v8835_v58, 4  ;;  %v11715_v25 = vcombine.low %v8566_v0, %v17081_v41  ;;  %v10618_v49 = vsel %vm4057_vm2, %v10586_v30, %v16968_v63  ;;  %v17098_v34 = vpop.permute.xlu0 %10219 }
 0x53e   : > { %v8234_v37 = vrot.slane %v8233_v50, 4  ;;  %v8840_v43 = vrot.slane %v8838_v44, 5  ;;  %10405 = vrot.lane.b32.xlu1 %v11778_v20, %s12222_s12  ;;  %v8251_v21 = vshrl.u32 %v7960_v6, 16  ;;  %v8254_v55 = vshll.u32 %v7960_v6, 16  ;;  %v17127_v6 = vld [vmem:[#allocation4 + $0x90] sm:$0xf] }
 0x53f   : > { %v8244_v7 = vrot.slane %v8243_v3, 4  ;;  %v8260_v13 = vshll.u32 %v17085_v45, 16  ;;  %v8264_v32 = vshrl.u32 %v17085_v45, 16  ;;  %v8270_v62 = vshll.u32 %v17089_v9, 16 }
 0x540   : > { %v8239_v54 = vsel %vm12619_vm10, %v8234_v37, %v8238_v56  ;;  %v8841_v63 = vor.u32 %v8840_v43, %v8837_v22  ;;  %10071 = vrot.lane.b32.xlu0 %v11715_v25, %s12218_s29  ;;  %v8253_v24 = vrot.slane %v8251_v21, 4  ;;  %v8256_v4 = vrot.slane %v8254_v55, 5  ;;  %v17137_v25 = vld [vmem:[#allocation4 + $0x90] sm:$0xf] }
 0x541   : > { %v8249_v5 = vsel %vm12619_vm10, %v8244_v7, %v8248_v16  ;;  %v8262_v14 = vrot.slane %v8260_v13, 5  ;;  %v10712_v15 = vsel %vm4156_vm5, %v10680_v35, %v16942_v8  ;;  %v8266_v53 = vrot.slane %v8264_v32, 4  ;;  %v17115_v8 = vpop.permute.xlu1 %9965  ;;  %v17119_v56 = vpop.permute.xlu0 %10315  ;;  %v17144_v13 = vld [vmem:[#allocation4 + $0x94] sm:$0xf] }
 0x542   : > { %v11683_v12 = vcombine.low %v8239_v54, %v8249_v5  ;;  %v8842_v30 = vrot.slane %v8841_v63, 4  ;;  %v8257_v52 = vor.u32 %v8256_v4, %v8253_v24  ;;  %v8844_v59 = vshll.u32 %v17081_v41, 16 }
 0x543   : > { %v8850_v46 = vrot.slane %v8848_v1, 4  ;;  %v8854_v0 = vshll.u32 %v8588_v11, 16  ;;  %v8267_v31 = vor.u32 %v8266_v53, %v8262_v14  ;;  %v8272_v18 = vrot.slane %v8270_v62, 5 }
 0x544   : > { %9895 = vrot.lane.b32.xlu1 %v11683_v12, %s12217_s28  ;;  %v10650_v28 = vsel %vm4090_vm3, %v10618_v49, %v16996_v23  ;;  %v10744_v27 = vsel %vm4189_vm6, %v10712_v15, %v16980_v48  ;;  %v8258_v35 = vrot.slane %v8257_v52, 4  ;;  %v8846_v51 = vrot.slane %v8844_v59, 5  ;;  %v17159_v15 = vld [vmem:[#allocation4 + $0x98] sm:$0x1] }
 0x545   : > { %v11620_v10 = vrot.slane %v8381_v2, 9  ;;  %v8513_v36 = vrot.slane %v17085_v45, 5  ;;  %11950 = vmatprep.mubr.msk.bf16.mxu1 %vm7103_vm9, %v10744_v27  ;;  %v8268_v47 = vrot.slane %v8267_v31, 4  ;;  %v8856_v58 = vrot.slane %v8854_v0, 5  ;;  %v17129_v45 = vld [vmem:[#allocation4 + $0x94] sm:$0xf]  ;;  %v17146_v54 = vpop.permute.xlu1 %10061 }
 0x546   : > { %v8516_v17 = vrot.slane %v17089_v9, 5  ;;  %v9114_v23 = vrot.slane %v17081_v41, 5  ;;  %v8263_v48 = vsel %vm12619_vm10, %v8258_v35, %v8262_v14  ;;  %v8847_v50 = vsel %vm12619_vm10, %v8842_v30, %v8846_v51  ;;  %v17164_v59 = vld [vmem:[#allocation4 + $0x98] sm:$0x1] }
 0x547   : > { %v8851_v16 = vor.u32 %v8850_v46, %v8846_v51  ;;  %v11635_v44 = vrot.slane %v8988_v39, 9  ;;  %v8273_v20 = vsel %vm12619_vm10, %v8268_v47, %v8272_v18  ;;  %v8514_v3 = vsel %vm12606_vm7, %v11620_v10, %v8513_v36 }
 0x548   : > { %v8515_v22 = vrot.slane %v8513_v36, 4  ;;  %v9116_v41 = vrot.slane %v9114_v23, 4  ;;  %v11684_v1 = vcombine.low %v8263_v48, %v8273_v20  ;;  %v9117_v43 = vrot.slane %v8588_v11, 5  ;;  %v17155_v5 = vpop.permute.xlu0 %10395  ;;  %v8989_v48 = vld [vmem:[#allocation4 + $0x90] sm:$0xe] }
 0x549   : > { %v8852_v9 = vrot.slane %v8851_v16, 4  ;;  %v9115_v37 = vsel %vm12606_vm7, %v11635_v44, %v9114_v23  ;;  %v8859_v7 = vshrl.u32 %v17127_v6, 16  ;;  %v8862_v21 = vshll.u32 %v17127_v6, 16  ;;  %v12189_v20 = vld [vmem:[#allocation4 + $0x34] sm:$0xf] }
 0x54a   : > { %v8517_v49 = vsel %vm12606_vm7, %v8515_v22, %v8516_v17  ;;  %v8872_v55 = vshrl.u32 %v17129_v45, 16  ;;  %9897 = vrot.lane.b32.xlu1 %v11684_v1, %s12217_s28  ;;  %v9118_v11 = vsel %vm12606_vm7, %v9116_v41, %v9117_v43  ;;  %v10682_v63 = vsel %vm4123_vm4, %v10650_v28, %v17025_v33  ;;  %v17174_v47 = vpop.permute.xlu1 %10141  ;;  %v9597_v41 = vld [vmem:[#allocation4 + $0x90] sm:$0xe] }
 0x54b   : > { %v8857_v32 = vsel %vm12619_vm10, %v8852_v9, %v8856_v58  ;;  %v11700_v62 = vcombine.low %v8514_v3, %v8517_v49  ;;  %v8861_v4 = vrot.slane %v8859_v7, 4  ;;  %v8864_v14 = vrot.slane %v8862_v21, 5  ;;  %v12190_v3 = vld [vmem:[#allocation4 + $0x30] sm:$0xf] }
 0x54c   : > { %v11731_v24 = vcombine.low %v8847_v50, %v8857_v32  ;;  %v11716_v12 = vcombine.low %v17127_v6, %v17129_v45  ;;  %v11747_v53 = vcombine.low %v9115_v37, %v9118_v11  ;;  %v9444_v30 = vshrl.u32 %v17137_v25, 16  ;;  %v17180_v50 = vpop.permute.xlu0 %10475 }
 0x54d   : > { %v9447_v2 = vshll.u32 %v17137_v25, 16  ;;  %v9457_v52 = vshrl.u32 %v17144_v13, 16  ;;  %v10714_v33 = vsel %vm4156_vm5, %v10682_v63, %v17050_v57  ;;  %v8865_v46 = vor.u32 %v8864_v14, %v8861_v4 }
 0x54e   : > { %10151 = vrot.lane.b32.xlu0 %v11731_v24, %s12219_s30  ;;  %v8868_v0 = vshll.u32 %v17129_v45, 16  ;;  %v8874_v31 = vrot.slane %v8872_v55, 4  ;;  %9977 = vrot.lane.b32.xlu1 %v11700_v62, %s12216_s27  ;;  %v9446_v18 = vrot.slane %v9444_v30, 4  ;;  %v8878_v27 = vshll.u32 %v17159_v15, 16  ;;  %v9178_v24 = vld [vmem:[#allocation4 + $0xa0] sm:$0xf]  ;;  %v17201_v4 = vpop.permute.xlu1 %10221 }
 0x54f   : > { %v9449_v28 = vrot.slane %v9447_v2, 5  ;;  %v9453_v39 = vshll.u32 %v17144_v13, 16  ;;  %v8866_v35 = vrot.slane %v8865_v46, 4  ;;  %v9459_v10 = vrot.slane %v9457_v52, 4  ;;  %v9177_v2 = vld [vmem:[#allocation4 + $0x9c] sm:$0xf] }
 0x550   : > { %v8870_v51 = vrot.slane %v8868_v0, 5  ;;  %v9463_v36 = vshll.u32 %v17164_v59, 16  ;;  %v11763_v57 = vcombine.low %v17137_v25, %v17144_v13  ;;  %v10746_v23 = vsel %vm4189_vm6, %v10714_v33, %v17001_v42 }
 0x551   : > { %v9450_v58 = vor.u32 %v9449_v28, %v9446_v18  ;;  %v9455_v17 = vrot.slane %v9453_v39, 5  ;;  %v8880_v6 = vrot.slane %v8878_v27, 5  ;;  %11951 = vmatmul.mubr.msk.bf16.gmra.mxu1 %vm7103_vm9, %v10746_v23  ;;  %v11661_v22 = vcombine.low %v12190_v3, %v12189_v20  ;;  %v9198_v39 = vld [vmem:[#allocation4 + $0xa4] sm:$0x1]  ;;  %v7963_v23 = vld [vmem:[#allocation4 + $0x94] sm:$0xf] }
 0x552   : > { %10231 = vrot.lane.b32.xlu0 %v11747_v53, %s12220_s7  ;;  %v8871_v16 = vsel %vm12619_vm10, %v8866_v35, %v8870_v51  ;;  %v8875_v44 = vor.u32 %v8874_v31, %v8870_v51  ;;  %10073 = vrot.lane.b32.xlu1 %v11716_v12, %s12218_s29  ;;  %v9465_v9 = vrot.slane %v9463_v36, 5  ;;  %v9121_v37 = vrot.slane %v17129_v45, 5  ;;  %v12192_v53 = vld [vmem:[#allocation4 + $0x40] sm:$0xf]  ;;  %v9598_v31 = vld [vmem:[#allocation4 + $0x9c] sm:$0xe]  ;;  %v17224_v3 = vpop.permute.xlu1 %10317 }
 0x553   : > { %v9451_v1 = vrot.slane %v9450_v58, 4  ;;  %v9460_v42 = vor.u32 %v9459_v10, %v9455_v17  ;;  %v10513_v25 = vsel %vm3942_vm14, %v11661_v22, %v17070_v38  ;;  %v11636_v49 = vrot.slane %v8989_v48, 9  ;;  %v7982_v48 = vld [vmem:[#allocation4 + $0x98] sm:$0x1]  ;;  %v8382_v20 = vld [vmem:[#allocation4 + $0x90] sm:$0xe] }
 0x554   : > { %v8876_v43 = vrot.slane %v8875_v44, 4  ;;  %v9124_v7 = vrot.slane %v17159_v15, 5  ;;  %v10556_v32 = vsel %vm3991_vm15, %v10513_v25, %v17030_v40  ;;  %v11651_v62 = vrot.slane %v9597_v41, 9  ;;  %v12191_v15 = vld [vmem:[#allocation4 + $0x3c] sm:$0xf]  ;;  %v17207_v52 = vpop.permute.xlu0 %10477 }
 0x555   : > { %v9456_v21 = vsel %vm12619_vm10, %v9451_v1, %v9455_v17  ;;  %v9461_v55 = vrot.slane %v9460_v42, 4  ;;  %v9122_v11 = vsel %vm12606_vm7, %v11636_v49, %v9121_v37  ;;  %v9123_v38 = vrot.slane %v9121_v37, 4  ;;  %v7962_v25 = vld [vmem:[#allocation4 + $0x90] sm:$0xf] }
 0x556   : > { %10327 = vrot.lane.b32.xlu0 %v11763_v57, %s12221_s11  ;;  %v8881_v45 = vsel %vm12619_vm10, %v8876_v43, %v8880_v6  ;;  %v9723_v63 = vrot.slane %v17144_v13, 5  ;;  %v10588_v40 = vsel %vm4024_vm1, %v10556_v32, %v17056_v29  ;;  %v11662_v30 = vcombine.low %v12191_v15, %v12192_v53  ;;  %v8570_v53 = vld [vmem:[#allocation4 + $0x9c] sm:$0xf] }
 0x557   : > { %v11732_v14 = vcombine.low %v8871_v16, %v8881_v45  ;;  %v9466_v12 = vsel %vm12619_vm10, %v9461_v55, %v9465_v9  ;;  %v9125_v13 = vsel %vm12606_vm7, %v9123_v38, %v9124_v7  ;;  %v9726_v0 = vrot.slane %v17164_v59, 5 }
 0x558   : > { %v11779_v33 = vcombine.low %v9456_v21, %v9466_v12  ;;  %v9725_v46 = vrot.slane %v9723_v63, 4  ;;  %v11748_v18 = vcombine.low %v9122_v11, %v9125_v13  ;;  %v9724_v29 = vsel %vm12606_vm7, %v11651_v62, %v9723_v63  ;;  %v17229_v42 = vpop.permute.xlu0 %9967 }
 0x559   : > { %10153 = vrot.lane.b32.xlu1 %v11732_v14, %s12219_s30  ;;  %v10516_v28 = vsel %vm3942_vm14, %v11662_v30, %v17094_v61  ;;  %v9481_v27 = vshrl.u32 %v9178_v24, 16  ;;  %v10620_v59 = vsel %vm4057_vm2, %v10588_v40, %v17077_v60  ;;  %v9468_v51 = vshrl.u32 %v9177_v2, 16 }
 0x55a   : > { %10407 = vrot.lane.b32.xlu0 %v11779_v33, %s12222_s12  ;;  %v9727_v35 = vsel %vm12606_vm7, %v9725_v46, %v9726_v0  ;;  %v9471_v10 = vshll.u32 %v9177_v2, 16  ;;  %v11764_v57 = vcombine.low %v9177_v2, %v9178_v24  ;;  %v11652_v58 = vrot.slane %v9598_v31, 9 }
 0x55b   : > { %v11795_v36 = vcombine.low %v9724_v29, %v9727_v35  ;;  %v9730_v17 = vrot.slane %v9178_v24, 5  ;;  %v9470_v16 = vrot.slane %v9468_v51, 4  ;;  %v9733_v44 = vrot.slane %v9198_v39, 5 }
 0x55c   : > { %v9473_v61 = vrot.slane %v9471_v10, 5  ;;  %v10558_v6 = vsel %vm3991_vm15, %v10516_v28, %v17115_v8  ;;  %v10652_v22 = vsel %vm4090_vm3, %v10620_v59, %v17098_v34  ;;  %v9477_v41 = vshll.u32 %v9178_v24, 16  ;;  %v17250_v28 = vld [vmem:[#allocation4 + $0xa0] sm:$0xf]  ;;  %v17256_v59 = vld [vmem:[#allocation4 + $0x9c] sm:$0xf] }
 0x55d   : > { %10233 = vrot.lane.b32.xlu1 %v11748_v18, %s12220_s7  ;;  %v9732_v60 = vrot.slane %v9730_v17, 4  ;;  %v9483_v1 = vrot.slane %v9481_v27, 4  ;;  %v9731_v9 = vsel %vm12606_vm7, %v11652_v58, %v9730_v17  ;;  %v9487_v8 = vshll.u32 %v9198_v39, 16  ;;  %v17248_v46 = vpop.permute.xlu0 %10063  ;;  %v17259_v58 = vld [vmem:[#allocation4 + $0xa0] sm:$0xf] }
 0x55e   : > { %10487 = vrot.lane.b32.xlu0 %v11795_v36, %s12223_s13  ;;  %v9474_v37 = vor.u32 %v9473_v61, %v9470_v16  ;;  %v8520_v43 = vrot.slane %v7963_v23, 5  ;;  %v9479_v7 = vrot.slane %v9477_v41, 5  ;;  %v11621_v21 = vrot.slane %v8382_v20, 9  ;;  %v17261_v17 = vld [vmem:[#allocation4 + $0xa4] sm:$0x1] }
 0x55f   : > { %v9734_v49 = vsel %vm12606_vm7, %v9732_v60, %v9733_v44  ;;  %v8523_v55 = vrot.slane %v7982_v48, 5  ;;  %v9489_v62 = vrot.slane %v9487_v8, 5  ;;  %v10590_v45 = vsel %vm4024_vm1, %v10558_v6, %v17146_v54  ;;  %v17244_v30 = vpop.permute.xlu1 %10397 }
 0x560   : > { %v11796_v34 = vcombine.low %v9731_v9, %v9734_v49  ;;  %v9475_v32 = vrot.slane %v9474_v37, 4  ;;  %v9484_v11 = vor.u32 %v9483_v1, %v9479_v7  ;;  %v8521_v38 = vsel %vm12606_vm7, %v11621_v21, %v8520_v43  ;;  %v8590_v49 = vld [vmem:[#allocation4 + $0xa4] sm:$0x1] }
 0x561   : > { %10329 = vrot.lane.b32.xlu1 %v11764_v57, %s12221_s11  ;;  %v8522_v63 = vrot.slane %v8520_v43, 4  ;;  %v8275_v24 = vshrl.u32 %v7962_v25, 16  ;;  %v10684_v14 = vsel %vm4123_vm4, %v10652_v22, %v17119_v56  ;;  %v8278_v12 = vshll.u32 %v7962_v25, 16 }
 0x562   : > { %10489 = vrot.lane.b32.xlu0 %v11796_v34, %s12223_s13  ;;  %v8284_v40 = vshll.u32 %v7963_v23, 16  ;;  %v8288_v15 = vshrl.u32 %v7963_v23, 16  ;;  %v9485_v54 = vrot.slane %v9484_v11, 4  ;;  %v8294_v13 = vshll.u32 %v7982_v48, 16 }
 0x563   : > { %v8524_v2 = vsel %vm12606_vm7, %v8522_v63, %v8523_v55  ;;  %v8277_v33 = vrot.slane %v8275_v24, 4  ;;  %v8280_v31 = vrot.slane %v8278_v12, 5  ;;  %v9480_v56 = vsel %vm12619_vm10, %v9475_v32, %v9479_v7  ;;  %v8383_v63 = vld [vmem:[#allocation4 + $0x9c] sm:$0xe] }
 0x564   : > { %v11701_v0 = vcombine.low %v8521_v38, %v8524_v2  ;;  %v8286_v18 = vrot.slane %v8284_v40, 5  ;;  %v8290_v29 = vrot.slane %v8288_v15, 4  ;;  %v9490_v27 = vsel %vm12619_vm10, %v9485_v54, %v9489_v62  ;;  %v17269_v22 = vpop.permute.xlu1 %9887 }
 0x565   : > { %v8883_v39 = vshrl.u32 %v8570_v53, 16  ;;  %v8886_v35 = vshll.u32 %v8570_v53, 16  ;;  %v11780_v51 = vcombine.low %v9480_v56, %v9490_v27  ;;  %v8281_v10 = vor.u32 %v8280_v31, %v8277_v33  ;;  %v8990_v33 = vld [vmem:[#allocation4 + $0x9c] sm:$0xe] }
 0x566   : > { %9979 = vrot.lane.b32.xlu0 %v11701_v0, %s12216_s27  ;;  %v8291_v36 = vor.u32 %v8290_v29, %v8286_v18  ;;  %v8296_v57 = vrot.slane %v8294_v13, 5  ;;  %v8896_v16 = vshrl.u32 %v17250_v28, 16  ;;  %v11717_v61 = vcombine.low %v8570_v53, %v17250_v28 }
 0x567   : > { %v8885_v23 = vrot.slane %v8883_v39, 4  ;;  %v8888_v48 = vrot.slane %v8886_v35, 5  ;;  %10409 = vrot.lane.b32.xlu1 %v11780_v51, %s12222_s12  ;;  %v8282_v44 = vrot.slane %v8281_v10, 4  ;;  %v10622_v20 = vsel %vm4057_vm2, %v10590_v45, %v17174_v47 }
 0x568   : > { %v8292_v6 = vrot.slane %v8291_v36, 4  ;;  %v8299_v60 = vshrl.u32 %v17256_v59, 16  ;;  %v8302_v41 = vshll.u32 %v17256_v59, 16  ;;  %v8308_v1 = vshll.u32 %v17259_v58, 16  ;;  %v17275_v8 = vpop.permute.xlu0 %10143  ;;  %v8572_v36 = vld [vmem:[#allocation4 + $0xa8] sm:$0xf] }
 0x569   : > { %v8312_v9 = vshrl.u32 %v17259_v58, 16  ;;  %v8318_v37 = vshll.u32 %v17261_v17, 16  ;;  %v8287_v43 = vsel %vm12619_vm10, %v8282_v44, %v8286_v18  ;;  %v8889_v7 = vor.u32 %v8888_v48, %v8885_v23 }
 0x56a   : > { %v8297_v47 = vsel %vm12619_vm10, %v8292_v6, %v8296_v57  ;;  %10075 = vrot.lane.b32.xlu0 %v11717_v61, %s12218_s29  ;;  %v8301_v25 = vrot.slane %v8299_v60, 4  ;;  %v8304_v55 = vrot.slane %v8302_v41, 5  ;;  %v8310_v34 = vrot.slane %v8308_v1, 5  ;;  %v17304_v57 = vld [vmem:[#allocation4 + $0xac] sm:$0xf] }
 0x56b   : > { %v11685_v21 = vcombine.low %v8287_v43, %v8297_v47  ;;  %v8314_v32 = vrot.slane %v8312_v9, 4  ;;  %v10716_v62 = vsel %vm4156_vm5, %v10684_v14, %v17155_v5  ;;  %v8890_v45 = vrot.slane %v8889_v7, 4  ;;  %v17310_v61 = vld [vmem:[#allocation4 + $0xa8] sm:$0xf]  ;;  %v17322_v47 = vld [vmem:[#allocation4 + $0xac] sm:$0xf] }
 0x56c   : > { %v8892_v11 = vshll.u32 %v17250_v28, 16  ;;  %v8898_v38 = vrot.slane %v8896_v16, 4  ;;  %v8305_v24 = vor.u32 %v8304_v55, %v8301_v25  ;;  %v8320_v40 = vrot.slane %v8318_v37, 5  ;;  %v17286_v53 = vpop.permute.xlu0 %10223  ;;  %v17329_v55 = vld [vmem:[#allocation4 + $0xb0] sm:$0x1] }
 0x56d   : > { %9899 = vrot.lane.b32.xlu1 %v11685_v21, %s12217_s28  ;;  %v8315_v12 = vor.u32 %v8314_v32, %v8310_v34  ;;  %v8902_v15 = vshll.u32 %v8590_v49, 16  ;;  %v10654_v2 = vsel %vm4090_vm3, %v10622_v20, %v17201_v4  ;;  %v10748_v5 = vsel %vm4189_vm6, %v10716_v62, %v17180_v50  ;;  %v17293_v13 = vpop.permute.xlu1 %9889 }
 0x56e   : > { %v8894_v54 = vrot.slane %v8892_v11, 5  ;;  %v8527_v14 = vrot.slane %v17259_v58, 5  ;;  %v8306_v0 = vrot.slane %v8305_v24, 4  ;;  %v11622_v29 = vrot.slane %v8383_v63, 9  ;;  %11954 = vmatprep.mubr.msk.bf16.mxu1 %vm7103_vm9, %v10748_v5  ;;  %v17333_v11 = vld [vmem:[#allocation4 + $0xb0] sm:$0x1] }
 0x56f   : > { %v8316_v31 = vrot.slane %v8315_v12, 4  ;;  %v8904_v18 = vrot.slane %v8902_v15, 5  ;;  %v8530_v4 = vrot.slane %v17261_v17, 5  ;;  %v11637_v51 = vrot.slane %v8990_v33, 9 }
 0x570   : > { %v8895_v56 = vsel %vm12619_vm10, %v8890_v45, %v8894_v54  ;;  %v8899_v27 = vor.u32 %v8898_v38, %v8894_v54  ;;  %v8529_v39 = vrot.slane %v8527_v14, 4  ;;  %v8311_v50 = vsel %vm12619_vm10, %v8306_v0, %v8310_v34  ;;  %v17316_v41 = vpop.permute.xlu0 %10319 }
 0x571   : > { %v8321_v35 = vsel %vm12619_vm10, %v8316_v31, %v8320_v40  ;;  %v9128_v10 = vrot.slane %v17250_v28, 5  ;;  %v8528_v16 = vsel %vm12606_vm7, %v11622_v29, %v8527_v14  ;;  %v17312_v44 = vpop.permute.xlu1 %9969  ;;  %v9131_v60 = vrot.slane %v8590_v49, 5 }
 0x572   : > { %v11686_v23 = vcombine.low %v8311_v50, %v8321_v35  ;;  %v8900_v48 = vrot.slane %v8899_v27, 4  ;;  %v8531_v17 = vsel %vm12606_vm7, %v8529_v39, %v8530_v4  ;;  %v8907_v9 = vshrl.u32 %v8572_v36, 16  ;;  %v8991_v27 = vld [vmem:[#allocation4 + $0xa8] sm:$0xe] }
 0x573   : > { %v11702_v6 = vcombine.low %v8528_v16, %v8531_v17  ;;  %v9129_v20 = vsel %vm12606_vm7, %v11637_v51, %v9128_v10  ;;  %v9130_v28 = vrot.slane %v9128_v10, 4  ;;  %v8910_v37 = vshll.u32 %v8572_v36, 16  ;;  %v12193_v51 = vld [vmem:[#allocation4 + $0x4c] sm:$0xf]  ;;  %v12194_v10 = vld [vmem:[#allocation4 + $0x48] sm:$0xf] }
 0x574   : > { %9901 = vrot.lane.b32.xlu1 %v11686_v23, %s12217_s28  ;;  %v8905_v1 = vsel %vm12619_vm10, %v8900_v48, %v8904_v18  ;;  %v8920_v43 = vshrl.u32 %v17304_v57, 16  ;;  %v10686_v49 = vsel %vm4123_vm4, %v10654_v2, %v17224_v3  ;;  %v9492_v21 = vshrl.u32 %v17310_v61, 16  ;;  %v9599_v17 = vld [vmem:[#allocation4 + $0xa8] sm:$0xe] }
 0x575   : > { %v11733_v25 = vcombine.low %v8895_v56, %v8905_v1  ;;  %v9132_v7 = vsel %vm12606_vm7, %v9130_v28, %v9131_v60  ;;  %v8909_v34 = vrot.slane %v8907_v9, 4  ;;  %v8912_v32 = vrot.slane %v8910_v37, 5  ;;  %v17335_v38 = vpop.permute.xlu1 %10065 }
 0x576   : > { %v11718_v62 = vcombine.low %v8572_v36, %v17304_v57  ;;  %v9495_v45 = vshll.u32 %v17310_v61, 16  ;;  %v11749_v63 = vcombine.low %v9129_v20, %v9132_v7  ;;  %v9494_v24 = vrot.slane %v9492_v21, 4 }
 0x577   : > { %10155 = vrot.lane.b32.xlu0 %v11733_v25, %s12219_s30  ;;  %v9505_v3 = vshrl.u32 %v17322_v47, 16  ;;  %v10718_v12 = vsel %vm4156_vm5, %v10686_v49, %v17244_v30  ;;  %v8913_v15 = vor.u32 %v8912_v32, %v8909_v34  ;;  %v8916_v54 = vshll.u32 %v17304_v57, 16  ;;  %v9181_v32 = vld [vmem:[#allocation4 + $0xb4] sm:$0xf] }
 0x578   : > { %9981 = vrot.lane.b32.xlu1 %v11702_v6, %s12216_s27  ;;  %v9497_v40 = vrot.slane %v9495_v45, 5  ;;  %v8922_v2 = vrot.slane %v8920_v43, 4  ;;  %v8926_v5 = vshll.u32 %v17329_v55, 16  ;;  %v9501_v14 = vshll.u32 %v17322_v47, 16  ;;  %v17346_v31 = vpop.permute.xlu0 %10399 }
 0x579   : > { %v9507_v33 = vrot.slane %v9505_v3, 4  ;;  %v9511_v0 = vshll.u32 %v17333_v11, 16  ;;  %v8914_v18 = vrot.slane %v8913_v15, 4  ;;  %v8918_v29 = vrot.slane %v8916_v54, 5  ;;  %v12196_v3 = vld [vmem:[#allocation4 + $0x58] sm:$0xf] }
 0x57a   : > { %v9498_v56 = vor.u32 %v9497_v40, %v9494_v24  ;;  %v10750_v30 = vsel %vm4189_vm6, %v10718_v12, %v17207_v52  ;;  %v17350_v39 = vpop.permute.xlu1 %10145  ;;  %v11765_v4 = vcombine.low %v17310_v61, %v17322_v47  ;;  %v8928_v50 = vrot.slane %v8926_v5, 5  ;;  %v12195_v24 = vld [vmem:[#allocation4 + $0x54] sm:$0xf]  ;;  %v9200_v5 = vld [vmem:[#allocation4 + $0xbc] sm:$0x1] }
 0x57b   : > { %10235 = vrot.lane.b32.xlu0 %v11749_v63, %s12220_s7  ;;  %v9503_v35 = vrot.slane %v9501_v14, 5  ;;  %11955 = vmatmul.mubr.msk.bf16.gmra.mxu1 %vm7103_vm9, %v10750_v30  ;;  %v11663_v36 = vcombine.low %v12194_v10, %v12193_v51  ;;  %v8919_v52 = vsel %vm12619_vm10, %v8914_v18, %v8918_v29  ;;  %v8923_v23 = vor.u32 %v8922_v2, %v8918_v29  ;;  %v9600_v40 = vld [vmem:[#allocation4 + $0xb4] sm:$0xe]  ;;  %v17398_v10 = vld [vmem:[#allocation4 + $0xac] sm:$0xf] }
 0x57c   : > { %10077 = vrot.lane.b32.xlu1 %v11718_v62, %s12218_s29  ;;  %v9499_v48 = vrot.slane %v9498_v56, 4  ;;  %v9513_v16 = vrot.slane %v9511_v0, 5  ;;  %v11638_v20 = vrot.slane %v8991_v27, 9  ;;  %v9135_v28 = vrot.slane %v17304_v57, 5  ;;  %v17362_v60 = vpop.permute.xlu0 %10479  ;;  %v9182_v62 = vld [vmem:[#allocation4 + $0xb8] sm:$0xf] }
 0x57d   : > { %v9508_v6 = vor.u32 %v9507_v33, %v9503_v35  ;;  %v10519_v61 = vsel %vm3942_vm14, %v11663_v36, %v17269_v22  ;;  %v8924_v1 = vrot.slane %v8923_v23, 4  ;;  %v9138_v43 = vrot.slane %v17329_v55, 5  ;;  %v8384_v36 = vld [vmem:[#allocation4 + $0xa8] sm:$0xe] }
 0x57e   : > { %v9504_v9 = vsel %vm12619_vm10, %v9499_v48, %v9503_v35  ;;  %v10560_v37 = vsel %vm3991_vm15, %v10519_v61, %v17229_v42  ;;  %v17369_v25 = vpop.permute.xlu1 %10225  ;;  %v9137_v57 = vrot.slane %v9135_v28, 4  ;;  %v11653_v49 = vrot.slane %v9599_v17, 9 }
 0x57f   : > { %10331 = vrot.lane.b32.xlu0 %v11765_v4, %s12221_s11  ;;  %v9509_v7 = vrot.slane %v9508_v6, 4  ;;  %v10592_v22 = vsel %vm4024_vm1, %v10560_v37, %v17248_v46  ;;  %v8929_v21 = vsel %vm12619_vm10, %v8924_v1, %v8928_v50  ;;  %v9136_v34 = vsel %vm12606_vm7, %v11638_v20, %v9135_v28 }
 0x580   : > { %v9737_v42 = vrot.slane %v17322_v47, 5  ;;  %v9740_v55 = vrot.slane %v17333_v11, 5  ;;  %v11734_v45 = vcombine.low %v8919_v52, %v8929_v21  ;;  %v9139_v46 = vsel %vm12606_vm7, %v9137_v57, %v9138_v43  ;;  %v17384_v15 = vpop.permute.xlu0 %10481  ;;  %v17413_v43 = vld [vmem:[#allocation4 + $0xa8] sm:$0xf] }
 0x581   : > { %v9514_v63 = vsel %vm12619_vm10, %v9509_v7, %v9513_v16  ;;  %v11664_v12 = vcombine.low %v12195_v24, %v12196_v3  ;;  %v11750_v2 = vcombine.low %v9136_v34, %v9139_v46  ;;  %v10624_v11 = vsel %vm4057_vm2, %v10592_v22, %v17275_v8  ;;  %v7984_v16 = vld [vmem:[#allocation4 + $0xb0] sm:$0x1]  ;;  %v8574_v46 = vld [vmem:[#allocation4 + $0xb4] sm:$0xf] }
 0x582   : > { %v11781_v54 = vcombine.low %v9504_v9, %v9514_v63  ;;  %v9739_v47 = vrot.slane %v9737_v42, 4  ;;  %10157 = vrot.lane.b32.xlu1 %v11734_v45, %s12219_s30  ;;  %v9738_v14 = vsel %vm12606_vm7, %v11653_v49, %v9737_v42  ;;  %v9529_v0 = vshrl.u32 %v9182_v62, 16  ;;  %v17396_v8 = vpop.permute.xlu1 %10321 }
 0x583   : > { %v10522_v33 = vsel %vm3942_vm14, %v11664_v12, %v17293_v13  ;;  %v9516_v18 = vshrl.u32 %v9181_v32, 16  ;;  %v9519_v56 = vshll.u32 %v9181_v32, 16  ;;  %v11654_v30 = vrot.slane %v9600_v40, 9 }
 0x584   : > { %10411 = vrot.lane.b32.xlu0 %v11781_v54, %s12222_s12  ;;  %v9741_v29 = vsel %vm12606_vm7, %v9739_v47, %v9740_v55  ;;  %v9744_v27 = vrot.slane %v9182_v62, 5  ;;  %v11766_v50 = vcombine.low %v9181_v32, %v9182_v62  ;;  %v9747_v51 = vrot.slane %v9200_v5, 5  ;;  %v17404_v17 = vpop.permute.xlu0 %9971 }
 0x585   : > { %v11797_v4 = vcombine.low %v9738_v14, %v9741_v29  ;;  %v9518_v35 = vrot.slane %v9516_v18, 4  ;;  %v9521_v13 = vrot.slane %v9519_v56, 5  ;;  %v10562_v48 = vsel %vm3991_vm15, %v10522_v33, %v17312_v44 }
 0x586   : > { %v9745_v52 = vsel %vm12606_vm7, %v11654_v30, %v9744_v27  ;;  %v9746_v23 = vrot.slane %v9744_v27, 4  ;;  %10237 = vrot.lane.b32.xlu1 %v11750_v2, %s12220_s7  ;;  %v10656_v6 = vsel %vm4090_vm3, %v10624_v11, %v17286_v53  ;;  %v9525_v61 = vshll.u32 %v9182_v62, 16  ;;  %v17439_v27 = vld [vmem:[#allocation4 + $0xb4] sm:$0xf] }
 0x587   : > { %v9531_v20 = vrot.slane %v9529_v0, 4  ;;  %v9535_v28 = vshll.u32 %v9200_v5, 16  ;;  %v9522_v9 = vor.u32 %v9521_v13, %v9518_v35  ;;  %v11623_v37 = vrot.slane %v8384_v36, 9  ;;  %v17435_v5 = vld [vmem:[#allocation4 + $0xb8] sm:$0xf] }
 0x588   : > { %10491 = vrot.lane.b32.xlu0 %v11797_v4, %s12223_s13  ;;  %v9748_v1 = vsel %vm12606_vm7, %v9746_v23, %v9747_v51  ;;  %v8534_v44 = vrot.slane %v17398_v10, 5  ;;  %v9527_v22 = vrot.slane %v9525_v61, 5  ;;  %v8537_v49 = vrot.slane %v7984_v16, 5  ;;  %v17419_v55 = vpop.permute.xlu1 %10401  ;;  %v17431_v40 = vpop.permute.xlu0 %10067  ;;  %v17441_v4 = vld [vmem:[#allocation4 + $0xb8] sm:$0xf] }
 0x589   : > { %v11798_v7 = vcombine.low %v9745_v52, %v9748_v1  ;;  %v9537_v57 = vrot.slane %v9535_v28, 5  ;;  %v9523_v21 = vrot.slane %v9522_v9, 4  ;;  %v10594_v42 = vsel %vm4024_vm1, %v10562_v48, %v17335_v38  ;;  %v17445_v13 = vld [vmem:[#allocation4 + $0xbc] sm:$0x1] }
 0x58a   : > { %v8535_v53 = vsel %vm12606_vm7, %v11623_v37, %v8534_v44  ;;  %v8536_v34 = vrot.slane %v8534_v44, 4  ;;  %10333 = vrot.lane.b32.xlu1 %v11766_v50, %s12221_s11  ;;  %v9532_v32 = vor.u32 %v9531_v20, %v9527_v22  ;;  %v8323_v62 = vshrl.u32 %v17413_v43, 16 }
 0x58b   : > { %v8326_v45 = vshll.u32 %v17413_v43, 16  ;;  %v8332_v63 = vshll.u32 %v17398_v10, 16  ;;  %v10688_v38 = vsel %vm4123_vm4, %v10656_v6, %v17316_v41  ;;  %v8336_v3 = vshrl.u32 %v17398_v10, 16 }
 0x58c   : > { %10493 = vrot.lane.b32.xlu0 %v11798_v7, %s12223_s13  ;;  %v8538_v24 = vsel %vm12606_vm7, %v8536_v34, %v8537_v49  ;;  %v8342_v12 = vshll.u32 %v7984_v16, 16  ;;  %v9528_v54 = vsel %vm12619_vm10, %v9523_v21, %v9527_v22  ;;  %v9533_v2 = vrot.slane %v9532_v32, 4  ;;  %v17447_v52 = vpop.permute.xlu1 %9891  ;;  %v8592_v22 = vld [vmem:[#allocation4 + $0xbc] sm:$0x1] }
 0x58d   : > { %v8325_v47 = vrot.slane %v8323_v62, 4  ;;  %v8328_v11 = vrot.slane %v8326_v45, 5  ;;  %v11703_v14 = vcombine.low %v8535_v53, %v8538_v24  ;;  %v8334_v33 = vrot.slane %v8332_v63, 5  ;;  %v8385_v45 = vld [vmem:[#allocation4 + $0xb4] sm:$0xe] }
 0x58e   : > { %v8338_v0 = vrot.slane %v8336_v3, 4  ;;  %v8931_v18 = vshrl.u32 %v8574_v46, 16  ;;  %v9538_v41 = vsel %vm12619_vm10, %v9533_v2, %v9537_v57  ;;  %v8344_v56 = vrot.slane %v8342_v12, 5 }
 0x58f   : > { %v8329_v29 = vor.u32 %v8328_v11, %v8325_v47  ;;  %v8934_v30 = vshll.u32 %v8574_v46, 16  ;;  %v11782_v50 = vcombine.low %v9528_v54, %v9538_v41  ;;  %v8944_v36 = vshrl.u32 %v17435_v5, 16 }
 0x590   : > { %9983 = vrot.lane.b32.xlu0 %v11703_v14, %s12216_s27  ;;  %v8339_v35 = vor.u32 %v8338_v0, %v8334_v33  ;;  %v8933_v51 = vrot.slane %v8931_v18, 4  ;;  %v11719_v16 = vcombine.low %v8574_v46, %v17435_v5  ;;  %v10626_v6 = vsel %vm4057_vm2, %v10594_v42, %v17350_v39 }
 0x591   : > { %v8330_v23 = vrot.slane %v8329_v29, 4  ;;  %v8936_v48 = vrot.slane %v8934_v30, 5  ;;  %10413 = vrot.lane.b32.xlu1 %v11782_v50, %s12222_s12  ;;  %v8347_v20 = vshrl.u32 %v17439_v27, 16  ;;  %v8350_v28 = vshll.u32 %v17439_v27, 16  ;;  %v17456_v9 = vpop.permute.xlu0 %10147 }
 0x592   : > { %v8340_v61 = vrot.slane %v8339_v35, 4  ;;  %v8356_v1 = vshll.u32 %v17441_v4, 16  ;;  %v8360_v44 = vshrl.u32 %v17441_v4, 16  ;;  %v8366_v7 = vshll.u32 %v17445_v13, 16 }
 0x593   : > { %v8335_v37 = vsel %vm12619_vm10, %v8330_v23, %v8334_v33  ;;  %v8937_v39 = vor.u32 %v8936_v48, %v8933_v51  ;;  %v8349_v49 = vrot.slane %v8347_v20, 4  ;;  %v8352_v21 = vrot.slane %v8350_v28, 5  ;;  %v17485_v51 = vld [vmem:[#allocation4 + $0xc0] sm:$0xf] }
 0x594   : > { %v8345_v57 = vsel %vm12619_vm10, %v8340_v61, %v8344_v56  ;;  %10079 = vrot.lane.b32.xlu0 %v11719_v16, %s12218_s29  ;;  %v8358_v53 = vrot.slane %v8356_v1, 5  ;;  %v10720_v42 = vsel %vm4156_vm5, %v10688_v38, %v17346_v31  ;;  %v8362_v32 = vrot.slane %v8360_v44, 4  ;;  %v8992_v38 = vld [vmem:[#allocation4 + $0xb4] sm:$0xe]  ;;  %v17497_v1 = vld [vmem:[#allocation4 + $0xc0] sm:$0xf] }
 0x595   : > { %v11687_v34 = vcombine.low %v8335_v37, %v8345_v57  ;;  %v8938_v62 = vrot.slane %v8937_v39, 4  ;;  %v8353_v63 = vor.u32 %v8352_v21, %v8349_v49  ;;  %v8940_v46 = vshll.u32 %v17435_v5, 16  ;;  %v17468_v12 = vpop.permute.xlu1 %9893  ;;  %v17504_v57 = vld [vmem:[#allocation4 + $0xc4] sm:$0xf] }
 0x596   : > { %v8946_v24 = vrot.slane %v8944_v36, 4  ;;  %v8950_v3 = vshll.u32 %v8592_v22, 16  ;;  %v8363_v54 = vor.u32 %v8362_v32, %v8358_v53  ;;  %v8368_v2 = vrot.slane %v8366_v7, 5  ;;  %v17475_v11 = vpop.permute.xlu0 %10227  ;;  %v17487_v36 = vld [vmem:[#allocation4 + $0xc4] sm:$0xf] }
 0x597   : > { %9903 = vrot.lane.b32.xlu1 %v11687_v34, %s12217_s28  ;;  %v10658_v47 = vsel %vm4090_vm3, %v10626_v6, %v17369_v25  ;;  %v10752_v31 = vsel %vm4189_vm6, %v10720_v42, %v17362_v60  ;;  %v8354_v14 = vrot.slane %v8353_v63, 4  ;;  %v8942_v33 = vrot.slane %v8940_v46, 5  ;;  %v17519_v46 = vld [vmem:[#allocation4 + $0xc8] sm:$0x1] }
 0x598   : > { %v11624_v0 = vrot.slane %v8385_v45, 9  ;;  %v8541_v18 = vrot.slane %v17441_v4, 5  ;;  %11958 = vmatprep.mubr.msk.bf16.mxu1 %vm7103_vm9, %v10752_v31  ;;  %v8364_v41 = vrot.slane %v8363_v54, 4  ;;  %v8952_v29 = vrot.slane %v8950_v3, 5  ;;  %v17524_v31 = vld [vmem:[#allocation4 + $0xc8] sm:$0x1] }
 0x599   : > { %v8544_v56 = vrot.slane %v17445_v13, 5  ;;  %v9142_v30 = vrot.slane %v17435_v5, 5  ;;  %v8359_v25 = vsel %vm12619_vm10, %v8354_v14, %v8358_v53  ;;  %v8943_v60 = vsel %vm12619_vm10, %v8938_v62, %v8942_v33  ;;  %v17489_v23 = vpop.permute.xlu1 %9973 }
 0x59a   : > { %v8947_v50 = vor.u32 %v8946_v24, %v8942_v33  ;;  %v11639_v35 = vrot.slane %v8992_v38, 9  ;;  %v8369_v48 = vsel %vm12619_vm10, %v8364_v41, %v8368_v2  ;;  %v8542_v5 = vsel %vm12606_vm7, %v11624_v0, %v8541_v18  ;;  %v17506_v49 = vpop.permute.xlu0 %10323 }
 0x59b   : > { %v8543_v13 = vrot.slane %v8541_v18, 4  ;;  %v9144_v16 = vrot.slane %v9142_v30, 4  ;;  %v11688_v6 = vcombine.low %v8359_v25, %v8369_v48  ;;  %v9145_v28 = vrot.slane %v8592_v22, 5 }
 0x59c   : > { %v8948_v61 = vrot.slane %v8947_v50, 4  ;;  %v9143_v20 = vsel %vm12606_vm7, %v11639_v35, %v9142_v30  ;;  %v8955_v44 = vshrl.u32 %v17485_v51, 16  ;;  %v8958_v7 = vshll.u32 %v17485_v51, 16 }
 0x59d   : > { %v8545_v37 = vsel %vm12606_vm7, %v8543_v13, %v8544_v56  ;;  %v8968_v39 = vshrl.u32 %v17487_v36, 16  ;;  %9905 = vrot.lane.b32.xlu1 %v11688_v6, %s12217_s28  ;;  %v9146_v53 = vsel %vm12606_vm7, %v9144_v16, %v9145_v28  ;;  %v10690_v34 = vsel %vm4123_vm4, %v10658_v47, %v17396_v8  ;;  %v17515_v42 = vpop.permute.xlu1 %10069 }
 0x59e   : > { %v8953_v22 = vsel %vm12619_vm10, %v8948_v61, %v8952_v29  ;;  %v11704_v21 = vcombine.low %v8542_v5, %v8545_v37  ;;  %v8957_v62 = vrot.slane %v8955_v44, 4  ;;  %v8960_v45 = vrot.slane %v8958_v7, 5  ;;  %v8993_v5 = vld [vmem:[#allocation4 + $0xc0] sm:$0xe]  ;;  %v12197_v61 = vld [vmem:[#allocation4 + $0x64] sm:$0xf] }
 0x59f   : > { %v11735_v32 = vcombine.low %v8943_v60, %v8953_v22  ;;  %v11720_v63 = vcombine.low %v17485_v51, %v17487_v36  ;;  %v11751_v24 = vcombine.low %v9143_v20, %v9146_v53  ;;  %v9540_v3 = vshrl.u32 %v17497_v1, 16  ;;  %v12198_v20 = vld [vmem:[#allocation4 + $0x60] sm:$0xf] }
 0x5a0   : > { %v9543_v54 = vshll.u32 %v17497_v1, 16  ;;  %v9553_v2 = vshrl.u32 %v17504_v57, 16  ;;  %v10722_v8 = vsel %vm4156_vm5, %v10690_v34, %v17419_v55  ;;  %v8961_v47 = vor.u32 %v8960_v45, %v8957_v62  ;;  %v9601_v37 = vld [vmem:[#allocation4 + $0xc0] sm:$0xe] }
 0x5a1   : > { %10159 = vrot.lane.b32.xlu0 %v11735_v32, %s12219_s30  ;;  %v8964_v38 = vshll.u32 %v17487_v36, 16  ;;  %v8970_v14 = vrot.slane %v8968_v39, 4  ;;  %9985 = vrot.lane.b32.xlu1 %v11704_v21, %s12216_s27  ;;  %v9542_v33 = vrot.slane %v9540_v3, 4  ;;  %v8974_v18 = vshll.u32 %v17519_v46, 16  ;;  %v17533_v29 = vpop.permute.xlu1 %10149 }
 0x5a2   : > { %v9545_v0 = vrot.slane %v9543_v54, 5  ;;  %v9549_v41 = vshll.u32 %v17504_v57, 16  ;;  %v8962_v56 = vrot.slane %v8961_v47, 4  ;;  %v9555_v25 = vrot.slane %v9553_v2, 4  ;;  %v17536_v55 = vpop.permute.xlu0 %10403  ;;  %v9185_v54 = vld [vmem:[#allocation4 + $0xcc] sm:$0xf] }
 0x5a3   : > { %v8966_v30 = vrot.slane %v8964_v38, 5  ;;  %v9559_v60 = vshll.u32 %v17524_v31, 16  ;;  %v11767_v50 = vcombine.low %v17497_v1, %v17504_v57  ;;  %v10754_v48 = vsel %vm4189_vm6, %v10722_v8, %v17384_v15  ;;  %v12199_v47 = vld [vmem:[#allocation4 + $0x6c] sm:$0xf]  ;;  %v12200_v38 = vld [vmem:[#allocation4 + $0x70] sm:$0xf] }
 0x5a4   : > { %v9546_v35 = vor.u32 %v9545_v0, %v9542_v33  ;;  %v9551_v51 = vrot.slane %v9549_v41, 5  ;;  %v8976_v6 = vrot.slane %v8974_v18, 5  ;;  %11959 = vmatmul.mubr.msk.bf16.gmra.mxu1 %vm7103_vm9, %v10754_v48  ;;  %v11665_v28 = vcombine.low %v12198_v20, %v12197_v61  ;;  %v9186_v33 = vld [vmem:[#allocation4 + $0xd0] sm:$0xf] }
 0x5a5   : > { %10239 = vrot.lane.b32.xlu0 %v11751_v24, %s12220_s7  ;;  %v8967_v13 = vsel %vm12619_vm10, %v8962_v56, %v8966_v30  ;;  %v8971_v16 = vor.u32 %v8970_v14, %v8966_v30  ;;  %10081 = vrot.lane.b32.xlu1 %v11720_v63, %s12218_s29  ;;  %v9561_v7 = vrot.slane %v9559_v60, 5  ;;  %v9149_v15 = vrot.slane %v17487_v36, 5  ;;  %v17548_v39 = vpop.permute.xlu1 %10229  ;;  %s11825_s29 = sshll.u32 %s18052_s22, 4 }
 0x5a6   : > { %v9547_v1 = vrot.slane %v9546_v35, 4  ;;  %v9556_v44 = vor.u32 %v9555_v25, %v9551_v51  ;;  %v10525_v21 = vsel %vm3942_vm14, %v11665_v28, %v17447_v52  ;;  %v11640_v53 = vrot.slane %v8993_v5, 9  ;;  %v10484_v24 = vpop.permute.xlu0 %10483 }
 0x5a7   : > { %v8972_v22 = vrot.slane %v8971_v16, 4  ;;  %v9152_v34 = vrot.slane %v17519_v46, 5  ;;  %v10564_v45 = vsel %vm3991_vm15, %v10525_v21, %v17404_v17  ;;  %v11655_v63 = vrot.slane %v9601_v37, 9 }
 0x5a8   : > { %v9552_v32 = vsel %vm12619_vm10, %v9547_v1, %v9551_v51  ;;  %v9557_v62 = vrot.slane %v9556_v44, 4  ;;  %v9150_v52 = vsel %vm12606_vm7, %v11640_v53, %v9149_v15  ;;  %v9151_v3 = vrot.slane %v9149_v15, 4 }
 0x5a9   : > { %10335 = vrot.lane.b32.xlu0 %v11767_v50, %s12221_s11  ;;  %v8977_v36 = vsel %vm12619_vm10, %v8972_v22, %v8976_v6  ;;  %v9751_v46 = vrot.slane %v17504_v57, 5  ;;  %v10596_v17 = vsel %vm4024_vm1, %v10564_v45, %v17431_v40  ;;  %v11666_v14 = vcombine.low %v12199_v47, %v12200_v38  ;;  %v10326_v57 = vpop.permute.xlu1 %10325  ;;  %v9202_v50 = vld [vmem:[#allocation4 + $0xd4] sm:$0x1]  ;;  %v9602_v6 = vld [vmem:[#allocation4 + $0xcc] sm:$0xe] }
 0x5aa   : > { %v11736_v2 = vcombine.low %v8967_v13, %v8977_v36  ;;  %v9562_v8 = vsel %vm12619_vm10, %v9557_v62, %v9561_v7  ;;  %v9153_v18 = vsel %vm12606_vm7, %v9151_v3, %v9152_v34  ;;  %v9754_v56 = vrot.slane %v17524_v31, 5  ;;  %v10486_v61 = vpop.permute.xlu0 %10485 }
 0x5ab   : > { %v11783_v0 = vcombine.low %v9552_v32, %v9562_v8  ;;  %v9753_v41 = vrot.slane %v9751_v46, 4  ;;  %v11752_v30 = vcombine.low %v9150_v52, %v9153_v18  ;;  %v9752_v25 = vsel %vm12606_vm7, %v11655_v63, %v9751_v46  ;;  %v12201_v18 = vld [vmem:[#allocation4 + $0x7c] sm:$0xf] }
 0x5ac   : > { %10161 = vrot.lane.b32.xlu1 %v11736_v2, %s12219_s30  ;;  %v10528_v40 = vsel %vm3942_vm14, %v11666_v14, %v17468_v12  ;;  %v9564_v60 = vshrl.u32 %v9185_v54, 16  ;;  %v10628_v31 = vsel %vm4057_vm2, %v10596_v17, %v17456_v9  ;;  %v9567_v51 = vshll.u32 %v9185_v54, 16 }
 0x5ad   : > { %10415 = vrot.lane.b32.xlu0 %v11783_v0, %s12222_s12  ;;  %v9755_v35 = vsel %vm12606_vm7, %v9753_v41, %v9754_v56  ;;  %v9577_v48 = vshrl.u32 %v9186_v33, 16  ;;  %v10566_v16 = vsel %vm3991_vm15, %v10528_v40, %v17489_v23  ;;  %v10660_v12 = vsel %vm4090_vm3, %v10628_v31, %v17475_v11  ;;  %v12202_v41 = vld [vmem:[#allocation4 + $0x78] sm:$0xf] }
 0x5ae   : > { %v11799_v5 = vcombine.low %v9752_v25, %v9755_v35  ;;  %v9566_v13 = vrot.slane %v9564_v60, 4  ;;  %v9569_v20 = vrot.slane %v9567_v51, 5  ;;  %v9573_v28 = vshll.u32 %v9186_v33, 16  ;;  %v9976_v3 = vpop.permute.xlu0 %9975 }
 0x5af   : > { %v9579_v37 = vrot.slane %v9577_v48, 4  ;;  %v9583_v1 = vshll.u32 %v9202_v50, 16  ;;  %v11768_v44 = vcombine.low %v9185_v54, %v9186_v33  ;;  %v10598_v9 = vsel %vm4024_vm1, %v10566_v16, %v17515_v42 }
 0x5b0   : > { %10241 = vrot.lane.b32.xlu1 %v11752_v30, %s12220_s7  ;;  %v10692_v7 = vsel %vm4123_vm4, %v10660_v12, %v17506_v49  ;;  %v9758_v15 = vrot.slane %v9186_v33, 5  ;;  %v9570_v23 = vor.u32 %v9569_v20, %v9566_v13  ;;  %v9575_v11 = vrot.slane %v9573_v28, 5  ;;  %v10406_v53 = vpop.permute.xlu1 %10405  ;;  %v12204_v20 = vld [vmem:[#allocation4 + $0x88] sm:$0xf] }
 0x5b1   : > { %10495 = vrot.lane.b32.xlu0 %v11799_v5, %s12223_s13  ;;  %v9585_v22 = vrot.slane %v9583_v1, 5  ;;  %v11656_v21 = vrot.slane %v9602_v6, 9  ;;  %v9761_v32 = vrot.slane %v9202_v50, 5  ;;  %v10630_v62 = vsel %vm4057_vm2, %v10598_v9, %v17533_v29 }
 0x5b2   : > { %v9760_v34 = vrot.slane %v9758_v15, 4  ;;  %v10724_v45 = vsel %vm4156_vm5, %v10692_v7, %v17536_v55  ;;  %v9571_v42 = vrot.slane %v9570_v23, 4  ;;  %v9580_v63 = vor.u32 %v9579_v37, %v9575_v11  ;;  %v10072_v33 = vpop.permute.xlu0 %10071 }
 0x5b3   : > { %v10662_v49 = vsel %vm4090_vm3, %v10630_v62, %v17548_v39  ;;  %v10756_v36 = vsel %vm4189_vm6, %v10724_v45, %v10484_v24  ;;  %v9759_v54 = vsel %vm12606_vm7, %v11656_v21, %v9758_v15  ;;  %v11671_v17 = vcombine.low %v17413_v43, %v17398_v10 }
 0x5b4   : > { %10337 = vrot.lane.b32.xlu1 %v11768_v44, %s12221_s11  ;;  %11962 = vmatprep.mubr.msk.bf16.mxu1 %vm7103_vm9, %v10756_v36  ;;  %v10694_v52 = vsel %vm4123_vm4, %v10662_v49, %v10326_v57  ;;  %v9576_v29 = vsel %vm12619_vm10, %v9571_v42, %v9575_v11  ;;  %v9581_v46 = vrot.slane %v9580_v63, 4  ;;  %v9762_v2 = vsel %vm12606_vm7, %v9760_v34, %v9761_v32  ;;  %v17638_v36 = vld [vmem:[%s17732_s5] ss:$0 sm:$0xff]  ;;  %s17712_s11 = scalar_lea.vmem %s17733_s6, %s11825_s29 }
 0x5b5   : > { %v10726_v55 = vsel %vm4156_vm5, %v10694_v52, %v10406_v53  ;;  %v11672_v47 = vcombine.low %v17439_v27, %v17441_v4  ;;  %v11800_v14 = vcombine.low %v9759_v54, %v9762_v2  ;;  %v11667_v56 = vcombine.low %v12202_v41, %v12201_v18 }
 0x5b6   : > { %v10758_v39 = vsel %vm4189_vm6, %v10726_v55, %v10486_v61  ;;  %v9586_v24 = vsel %vm12619_vm10, %v9581_v46, %v9585_v22  ;;  %v9896_v8 = vpop.permute.xlu1 %9895  ;;  %v12203_v61 = vld [vmem:[#allocation4 + $0x84] sm:$0xf] }
 0x5b7   : > { %11963 = vmatmul.mubr.msk.bf16.gmra.mxu1 %vm7103_vm9, %v10758_v39  ;;  %v11784_v38 = vcombine.low %v9576_v29, %v9586_v24  ;;  %v10531_v57 = vsel %vm3942_vm14, %v11667_v56, %v9896_v8  ;;  %v11668_v28 = vcombine.low %v12203_v61, %v12204_v20  ;;  %v12206_v29 = vld [vmem:[#allocation4 + $0x90] sm:$0xf] }
 0x5b8   : > { %v10568_v40 = vsel %vm3991_vm15, %v10531_v57, %v9976_v3  ;;  %v12205_v3 = vld [vmem:[#allocation4 + $0x94] sm:$0xf] }
 0x5b9   : > { %10417 = vrot.lane.b32.xlu1 %v11784_v38, %s12222_s12  ;;  %v10600_v50 = vsel %vm4024_vm1, %v10568_v40, %v10072_v33  ;;  %v11669_v46 = vcombine.low %v12206_v29, %v12205_v3 }
 0x5bc   : > { %v9898_v0 = vpop.permute.xlu1 %9897 }
 0x5bd   : > { %10497 = vrot.lane.b32.xlu1 %v11800_v14, %s12223_s13  ;;  %v10534_v1 = vsel %vm3942_vm14, %v11668_v28, %v9898_v0 }
 0x5c0   : > { %v10152_v26 = vpop.permute.xlu0 %10151  ;;  %v9978_v19 = vpop.permute.xlu1 %9977 }
 0x5c1   : > { %v10632_v51 = vsel %vm4057_vm2, %v10600_v50, %v10152_v26  ;;  %v10570_v44 = vsel %vm3991_vm15, %v10534_v1, %v9978_v19 }
 0x5c4   : > { %v10232_v30 = vpop.permute.xlu0 %10231  ;;  %v10074_v25 = vpop.permute.xlu1 %10073 }
 0x5c5   : > { %v10664_v48 = vsel %vm4090_vm3, %v10632_v51, %v10232_v30  ;;  %v10602_v9 = vsel %vm4024_vm1, %v10570_v44, %v10074_v25 }
 0x5c8   : > { %v10328_v60 = vpop.permute.xlu0 %10327 }
 0x5c9   : > { %v10696_v5 = vsel %vm4123_vm4, %v10664_v48, %v10328_v60 }
 0x5cb   : > { %v10154_v35 = vpop.permute.xlu1 %10153 }
 0x5cc   : > { %v10408_v31 = vpop.permute.xlu0 %10407  ;;  %v10634_v15 = vsel %vm4057_vm2, %v10602_v9, %v10154_v35 }
 0x5cd   : > { %v10728_v16 = vsel %vm4156_vm5, %v10696_v5, %v10408_v31  ;;  %v11670_v5 = vcombine.low %v17256_v59, %v17259_v58 }
 0x5cf   : > { %v10234_v13 = vpop.permute.xlu1 %10233 }
 0x5d0   : > { %v10488_v12 = vpop.permute.xlu0 %10487  ;;  %v10666_v23 = vsel %vm4090_vm3, %v10634_v15, %v10234_v13 }
 0x5d1   : > { %v10760_v6 = vsel %vm4189_vm6, %v10728_v16, %v10488_v12 }
 0x5d2   : > { %11966 = vmatprep.mubr.msk.bf16.mxu1 %vm7103_vm9, %v10760_v6 }
 0x5d3   : > { %v10330_v37 = vpop.permute.xlu1 %10329 }
 0x5d4   : > { %v10490_v7 = vpop.permute.xlu0 %10489  ;;  %v10698_v11 = vsel %vm4123_vm4, %v10666_v23, %v10330_v37 }
 0x5d8   : > { %v9980_v34 = vpop.permute.xlu0 %9979 }
 0x5d9   : > { %v10410_v22 = vpop.permute.xlu1 %10409 }
 0x5da   : > { %v10730_v21 = vsel %vm4156_vm5, %v10698_v11, %v10410_v22 }
 0x5db   : > { %v10762_v53 = vsel %vm4189_vm6, %v10730_v21, %v10490_v7 }
 0x5dc   : > { %11967 = vmatmul.mubr.msk.bf16.gmra.mxu1 %vm7103_vm9, %v10762_v53  ;;  %v10076_v62 = vpop.permute.xlu0 %10075 }
 0x5df   : > { %v9900_v32 = vpop.permute.xlu1 %9899 }
 0x5e0   : > { %v10537_v24 = vsel %vm3942_vm14, %v11669_v46, %v9900_v32 }
 0x5e1   : > { %v10572_v33 = vsel %vm3991_vm15, %v10537_v24, %v9980_v34 }
 0x5e2   : > { %v10604_v18 = vsel %vm4024_vm1, %v10572_v33, %v10076_v62 }
 0x5e6   : > { %v9902_v45 = vpop.permute.xlu1 %9901 }
 0x5e7   : > { %v11948_v63 = vpop.f32.mrf.mxu1  ;;  %v10540_v16 = vsel %vm3942_vm14, %v11670_v5, %v9902_v45 }
 0x5e8   : > { %v10877_v26 = vadd.f32 %v11948_v63, %v17638_v36 }
 0x5e9   : > { %v10156_v42 = vpop.permute.xlu0 %10155  ;;  %v10868_v52 = vpop.f32.mrf.mxu1 }
 0x5ea   : > { %v9982_v49 = vpop.permute.xlu1 %9981  ;;  %v10869_v55 = vadd.f32 %v17638_v36, %v10868_v52  ;;  %v10997_v57 = vmax.f32 %v10877_v26, 0.0  ;;  %v10636_v25 = vsel %vm4057_vm2, %v10604_v18, %v10156_v42 }
 0x5eb   : > { %v11949_v39 = vpop.f32.mrf.mxu1  ;;  %v10574_v12 = vsel %vm3991_vm15, %v10540_v16, %v9982_v49 }
 0x5ec   : > { %v10995_v2 = vmax.f32 %v10869_v55, 0.0  ;;  %v10880_v30 = vadd.f32 %v11949_v39, %v17638_v36 }
 0x5ed   : > { %v10236_v54 = vpop.permute.xlu0 %10235  ;;  %v10871_v38 = vpop.f32.mrf.mxu1 }
 0x5ee   : > { %v10078_v8 = vpop.permute.xlu1 %10077  ;;  %v10872_v14 = vadd.f32 %v17638_v36, %v10871_v38  ;;  %11027 = vxpose.xlu0.b32.start [1/16] (narrow) %v10995_v2, 8  ;;  %v10668_v40 = vsel %vm4090_vm3, %v10636_v25, %v10236_v54  ;;  %v10998_v51 = vmax.f32 %v10880_v30, 0.0 }
 0x5ef   : > { %v10606_v6 = vsel %vm4024_vm1, %v10574_v12, %v10078_v8 }
 0x5f0   : > { %v10996_v19 = vmax.f32 %v10872_v14, 0.0 }
 0x5f1   : > { %v10332_v0 = vpop.permute.xlu0 %10331 }
 0x5f2   : > { %11028 = vxpose.xlu0.b32.cont [2/16] (narrow) %v10996_v19, 8  ;;  %v10700_v60 = vsel %vm4123_vm4, %v10668_v40, %v10332_v0 }
 0x5f4   : > { %v10158_v41 = vpop.permute.xlu1 %10157 }
 0x5f5   : > { %v10638_v20 = vsel %vm4057_vm2, %v10606_v6, %v10158_v41 }
 0x5f6   : > { %v10412_v56 = vpop.permute.xlu0 %10411  ;;  %11029 = vxpose.xlu0.b32.cont [3/16] (narrow) %v10997_v57, 8 }
 0x5f7   : > { %v10732_v35 = vsel %vm4156_vm5, %v10700_v60, %v10412_v56 }
 0x5f8   : > { %v10238_v50 = vpop.permute.xlu1 %10237 }
 0x5f9   : > { %v10670_v28 = vsel %vm4090_vm3, %v10638_v20, %v10238_v50 }
 0x5fa   : > { %v10492_v31 = vpop.permute.xlu0 %10491  ;;  %11030 = vxpose.xlu0.b32.cont [4/16] (narrow) %v10998_v51, 8 }
 0x5fb   : > { %v10764_v48 = vsel %vm4189_vm6, %v10732_v35, %v10492_v31 }
 0x5fc   : > { %11970 = vmatprep.mubr.msk.bf16.mxu1 %vm7103_vm9, %v10764_v48  ;;  %v10334_v13 = vpop.permute.xlu1 %10333 }
 0x5fd   : > { %v10702_v37 = vsel %vm4123_vm4, %v10670_v28, %v10334_v13 }
 0x5fe   : > { %v10494_v61 = vpop.permute.xlu0 %10493 }
 0x602   : > { %v9984_v59 = vpop.permute.xlu0 %9983 }
 0x603   : > { %v10414_v1 = vpop.permute.xlu1 %10413 }
 0x604   : > { %v10734_v44 = vsel %vm4156_vm5, %v10702_v37, %v10414_v1 }
 0x605   : > { %v10766_v9 = vsel %vm4189_vm6, %v10734_v44, %v10494_v61 }
 0x606   : > { %11971 = vmatmul.mubr.msk.bf16.gmra.mxu1 %vm7103_vm9, %v10766_v9  ;;  %v10080_v7 = vpop.permute.xlu0 %10079 }
 0x609   : > { %v9904_v58 = vpop.permute.xlu1 %9903 }
 0x60a   : > { %v10543_v32 = vsel %vm3942_vm14, %v11671_v17, %v9904_v58 }
 0x60b   : > { %v10576_v52 = vsel %vm3991_vm15, %v10543_v32, %v9984_v59 }
 0x60c   : > { %v10608_v55 = vsel %vm4024_vm1, %v10576_v52, %v10080_v7 }
 0x60f   : > { %v9906_v15 = vpop.permute.xlu1 %9905 }
 0x610   : > { %v10546_v19 = vsel %vm3942_vm14, %v11672_v47, %v9906_v15 }
 0x611   : > { %v11952_v23 = vpop.f32.mrf.mxu1 }
 0x612   : > { %v10893_v29 = vadd.f32 %v11952_v23, %v17638_v36 }
 0x613   : > { %v10160_v11 = vpop.permute.xlu0 %10159  ;;  %v9986_v22 = vpop.permute.xlu1 %9985 }
 0x614   : > { %v10884_v21 = vpop.f32.mrf.mxu1  ;;  %v11001_v43 = vmax.f32 %v10893_v29, 0.0  ;;  %v10640_v39 = vsel %vm4057_vm2, %v10608_v55, %v10160_v11  ;;  %v10578_v18 = vsel %vm3991_vm15, %v10546_v19, %v9986_v22 }
 0x615   : > { %v10885_v53 = vadd.f32 %v17638_v36, %v10884_v21 }
 0x616   : > { %v11953_v34 = vpop.f32.mrf.mxu1 }
 0x617   : > { %v10240_v62 = vpop.permute.xlu0 %10239  ;;  %v10999_v45 = vmax.f32 %v10885_v53, 0.0  ;;  %v10082_v42 = vpop.permute.xlu1 %10081  ;;  %v10896_v17 = vadd.f32 %v11953_v34, %v17638_v36 }
 0x618   : > { %v10887_v63 = vpop.f32.mrf.mxu1  ;;  %v10672_v24 = vsel %vm4090_vm3, %v10640_v39, %v10240_v62  ;;  %v10610_v41 = vsel %vm4024_vm1, %v10578_v18, %v10082_v42 }
 0x619   : > { %v10888_v49 = vadd.f32 %v17638_v36, %v10887_v63  ;;  %11031 = vxpose.xlu0.b32.cont [5/16] (narrow) %v10999_v45, 8  ;;  %v11002_v33 = vmax.f32 %v10896_v17, 0.0 }
 0x61b   : > { %v10336_v3 = vpop.permute.xlu0 %10335  ;;  %v11000_v46 = vmax.f32 %v10888_v49, 0.0 }
 0x61c   : > { %v10704_v2 = vsel %vm4123_vm4, %v10672_v24, %v10336_v3 }
 0x61d   : > { %11032 = vxpose.xlu0.b32.cont [6/16] (narrow) %v11000_v46, 8 }
 0x61e   : > { %v10162_v54 = vpop.permute.xlu1 %10161 }
 0x61f   : > { %v10416_v10 = vpop.permute.xlu0 %10415  ;;  %v10642_v57 = vsel %vm4057_vm2, %v10610_v41, %v10162_v54 }
 0x620   : > { %v10736_v38 = vsel %vm4156_vm5, %v10704_v2, %v10416_v10 }
 0x621   : > { %11033 = vxpose.xlu0.b32.cont [7/16] (narrow) %v11001_v43, 8 }
 0x622   : > { %v10242_v8 = vpop.permute.xlu1 %10241 }
 0x623   : > { %v10496_v14 = vpop.permute.xlu0 %10495  ;;  %v10674_v30 = vsel %vm4090_vm3, %v10642_v57, %v10242_v8 }
 0x624   : > { %v10768_v0 = vsel %vm4189_vm6, %v10736_v38, %v10496_v14 }
 0x625   : > { %11974 = vmatprep.mubr.msk.bf16.mxu1 %vm7103_vm9, %v10768_v0  ;;  %11034 = vxpose.xlu0.b32.cont [8/16] (narrow) %v11002_v33, 8 }
 0x626   : > { %v10338_v26 = vpop.permute.xlu1 %10337 }
 0x627   : > { %v10706_v25 = vsel %vm4123_vm4, %v10674_v30, %v10338_v26 }
 0x62b   : > { %v10418_v56 = vpop.permute.xlu1 %10417 }
 0x62c   : > { %v10738_v40 = vsel %vm4156_vm5, %v10706_v25, %v10418_v56 }
 0x62f   : > { %v10498_v60 = vpop.permute.xlu1 %10497 }
 0x630   : > { %v10770_v50 = vsel %vm4189_vm6, %v10738_v40, %v10498_v60 }
 0x631   : > { %11975 = vmatmul.mubr.msk.bf16.gmra.mxu1 %vm7103_vm9, %v10770_v50 }
 0x63b   : > { %v11956_v27 = vpop.f32.mrf.mxu1 }
 0x63c   : > { %v10909_v5 = vadd.f32 %v11956_v27, %v17638_v36 }
 0x63d   : > { %v10900_v4 = vpop.f32.mrf.mxu1 }
 0x63e   : > { %v10901_v47 = vadd.f32 %v17638_v36, %v10900_v4  ;;  %v11005_v16 = vmax.f32 %v10909_v5, 0.0 }
 0x63f   : > { %v11957_v35 = vpop.f32.mrf.mxu1 }
 0x640   : > { %v11003_v31 = vmax.f32 %v10901_v47, 0.0  ;;  %v10912_v12 = vadd.f32 %v11957_v35, %v17638_v36 }
 0x641   : > { %v10903_v51 = vpop.f32.mrf.mxu1 }
 0x642   : > { %v10904_v48 = vadd.f32 %v17638_v36, %v10903_v51  ;;  %11035 = vxpose.xlu0.b32.cont [9/16] (narrow) %v11003_v31, 8  ;;  %v11006_v6 = vmax.f32 %v10912_v12, 0.0 }
 0x644   : > { %v11004_v13 = vmax.f32 %v10904_v48, 0.0 }
 0x646   : > { %11036 = vxpose.xlu0.b32.cont [10/16] (narrow) %v11004_v13, 8 }
 0x64a   : > { %11037 = vxpose.xlu0.b32.cont [11/16] (narrow) %v11005_v16, 8 }
 0x64e   : > { %11038 = vxpose.xlu0.b32.cont [12/16] (narrow) %v11006_v6, 8 }
 0x664   : > { %v11960_v61 = vpop.f32.mrf.mxu1 }
 0x665   : > { %v10925_v59 = vadd.f32 %v11960_v61, %v17638_v36 }
 0x666   : > { %v10916_v20 = vpop.f32.mrf.mxu1 }
 0x667   : > { %v10917_v28 = vadd.f32 %v17638_v36, %v10916_v20  ;;  %v11009_v7 = vmax.f32 %v10925_v59, 0.0 }
 0x668   : > { %v11961_v37 = vpop.f32.mrf.mxu1 }
 0x669   : > { %v11007_v1 = vmax.f32 %v10917_v28, 0.0  ;;  %v10928_v15 = vadd.f32 %v11961_v37, %v17638_v36 }
 0x66a   : > { %v10919_v44 = vpop.f32.mrf.mxu1 }
 0x66b   : > { %v10920_v9 = vadd.f32 %v17638_v36, %v10919_v44  ;;  %11039 = vxpose.xlu0.b32.cont [13/16] (narrow) %v11007_v1, 8  ;;  %v11010_v23 = vmax.f32 %v10928_v15, 0.0 }
 0x66d   : > { %v11008_v58 = vmax.f32 %v10920_v9, 0.0 }
 0x66f   : > { %11040 = vxpose.xlu0.b32.cont [14/16] (narrow) %v11008_v58, 8 }
 0x673   : > { %11041 = vxpose.xlu0.b32.cont [15/16] (narrow) %v11009_v7, 8 }
 0x677   : > { %v11964_v11 = vpop.f32.mrf.mxu1  ;;  %11042 = vxpose.xlu0.b32.end [16/16] (narrow) %v11010_v23, 8 }
 0x678   : > { %v10941_v45 = vadd.f32 %v11964_v11, %v17638_v36 }
 0x679   : > { %v10932_v22 = vpop.f32.mrf.mxu1 }
 0x67a   : > { %v10933_v21 = vadd.f32 %v17638_v36, %v10932_v22  ;;  %v11013_v63 = vmax.f32 %v10941_v45, 0.0 }
 0x67b   : > { %v11965_v53 = vpop.f32.mrf.mxu1 }
 0x67c   : > { %v11011_v34 = vmax.f32 %v10933_v21, 0.0  ;;  %v10944_v49 = vadd.f32 %v11965_v53, %v17638_v36 }
 0x67d   : > { %v10935_v32 = vpop.f32.mrf.mxu1 }
 0x67e   : > { %v10936_v62 = vadd.f32 %v17638_v36, %v10935_v32  ;;  %11059 = vxpose.xlu1.b32.start [1/16] (narrow) %v11011_v34, 8  ;;  %v11014_v52 = vmax.f32 %v10944_v49, 0.0 }
 0x680   : > { %v11012_v42 = vmax.f32 %v10936_v62, 0.0 }
 0x682   : > { %11060 = vxpose.xlu1.b32.cont [2/16] (narrow) %v11012_v42, 8 }
 0x686   : > { %11061 = vxpose.xlu1.b32.cont [3/16] (narrow) %v11013_v63, 8 }
 0x68a   : > { %11062 = vxpose.xlu1.b32.cont [4/16] (narrow) %v11014_v52, 8 }
 0x69c   : > { %v11968_v3 = vpop.f32.mrf.mxu1 }
 0x69d   : > { %v10957_v17 = vadd.f32 %v11968_v3, %v17638_v36 }
 0x69e   : > { %v10948_v29 = vpop.f32.mrf.mxu1 }
 0x69f   : > { %v10949_v46 = vadd.f32 %v17638_v36, %v10948_v29  ;;  %v11017_v24 = vmax.f32 %v10957_v17, 0.0 }
 0x6a0   : > { %v11969_v55 = vpop.f32.mrf.mxu1 }
 0x6a1   : > { %v11015_v54 = vmax.f32 %v10949_v46, 0.0  ;;  %v10960_v2 = vadd.f32 %v11969_v55, %v17638_v36 }
 0x6a2   : > { %v10951_v10 = vpop.f32.mrf.mxu1 }
 0x6a3   : > { %v10952_v43 = vadd.f32 %v17638_v36, %v10951_v10  ;;  %11063 = vxpose.xlu1.b32.cont [5/16] (narrow) %v11015_v54, 8  ;;  %v11018_v8 = vmax.f32 %v10960_v2, 0.0 }
 0x6a5   : > { %v11016_v39 = vmax.f32 %v10952_v43, 0.0 }
 0x6a7   : > { %11064 = vxpose.xlu1.b32.cont [6/16] (narrow) %v11016_v39, 8 }
 0x6ab   : > { %11065 = vxpose.xlu1.b32.cont [7/16] (narrow) %v11017_v24, 8 }
 0x6af   : > { %11066 = vxpose.xlu1.b32.cont [8/16] (narrow) %v11018_v8, 8 }
 0x6b7   : > { %v11043_v38 = vpop.trf.xlu0 }
 0x6b8   : > { %11091 = vst [vmem:[%s17712_s11] sm:$0xff] %v11043_v38 }
 0x6c6   : > { %v11972_v14 = vpop.f32.mrf.mxu1 }
 0x6c7   : > { %v10973_v56 = vadd.f32 %v11972_v14, %v17638_v36 }
 0x6c8   : > { %v10964_v33 = vpop.f32.mrf.mxu1 }
 0x6c9   : > { %v10965_v0 = vadd.f32 %v17638_v36, %v10964_v33  ;;  %v11021_v30 = vmax.f32 %v10973_v56, 0.0 }
 0x6ca   : > { %v11973_v26 = vpop.f32.mrf.mxu1 }
 0x6cb   : > { %v11019_v19 = vmax.f32 %v10965_v0, 0.0  ;;  %v10976_v25 = vadd.f32 %v11973_v26, %v17638_v36 }
 0x6cc   : > { %v10967_v18 = vpop.f32.mrf.mxu1 }
 0x6cd   : > { %v10968_v41 = vadd.f32 %v17638_v36, %v10967_v18  ;;  %11067 = vxpose.xlu1.b32.cont [9/16] (narrow) %v11019_v19, 8  ;;  %v11022_v40 = vmax.f32 %v10976_v25, 0.0 }
 0x6cf   : > { %v11020_v57 = vmax.f32 %v10968_v41, 0.0 }
 0x6d1   : > { %11068 = vxpose.xlu1.b32.cont [10/16] (narrow) %v11020_v57, 8 }
 0x6d5   : > { %11069 = vxpose.xlu1.b32.cont [11/16] (narrow) %v11021_v30, 8 }
 0x6d9   : > { %11070 = vxpose.xlu1.b32.cont [12/16] (narrow) %v11022_v40, 8 }
 0x6f1   : > { %v11976_v60 = vpop.f32.mrf.mxu1 }
 0x6f2   : > { %v10989_v51 = vadd.f32 %v11976_v60, %v17638_v36 }
 0x6f3   : > { %v10980_v50 = vpop.f32.mrf.mxu1 }
 0x6f4   : > { %v10981_v27 = vadd.f32 %v17638_v36, %v10980_v50  ;;  %v11025_v5 = vmax.f32 %v10989_v51, 0.0 }
 0x6f5   : > { %v11977_v4 = vpop.f32.mrf.mxu1 }
 0x6f6   : > { %v11023_v47 = vmax.f32 %v10981_v27, 0.0  ;;  %v10992_v13 = vadd.f32 %v11977_v4, %v17638_v36 }
 0x6f7   : > { %v10983_v35 = vpop.f32.mrf.mxu1 }
 0x6f8   : > { %v10984_v31 = vadd.f32 %v17638_v36, %v10983_v35  ;;  %11071 = vxpose.xlu1.b32.cont [13/16] (narrow) %v11023_v47, 8  ;;  %v11026_v16 = vmax.f32 %v10992_v13, 0.0 }
 0x6fa   : > { %v11024_v48 = vmax.f32 %v10984_v31, 0.0 }
 0x6fc   : > { %11072 = vxpose.xlu1.b32.cont [14/16] (narrow) %v11024_v48, 8 }
 0x700   : > { %11073 = vxpose.xlu1.b32.cont [15/16] (narrow) %v11025_v5, 8 }
 0x704   : > { %11074 = vxpose.xlu1.b32.end [16/16] (narrow) %v11026_v16, 8 }
 0x744   : > { %v11075_v12 = vpop.trf.xlu1 }
 0x745   : > { %11092 = vst [vmem:[%s17712_s11 + $0x8] sm:$0xff] %v11075_v12 }
 0x746 PF: > { %s16_s21 = sadd.s32 1, %s12213_s21  }
 0x747   : > { %p13_p4 = scmp.ge.s32.totalorder %s16_s21, 4  }
 0x749   :  { %15 = sbr.rel (!%p13_p4) target bundleno = 1 (0x1), region = 83 }

</bundles_post_ra>
